<compile_context>
chip_gen: v6e
topology: v6e:2x2x1
jax: 0.10.0
libtpu: 0.0.40
codegen_flags: <defaults>
</compile_context>

<pallas_src>
import functools

import jax
import jax.numpy as jnp
from jax.experimental import pallas as pl
from jax.experimental.pallas import tpu as pltpu


def _round_up(x, m):
    return ((x + m - 1) // m) * m


def _latent_critic_kernel(w1_pad, hpad, mm_dtype, ew_dtype,
                          state_ref, probs_ref,
                          wcat_ref, exp_ref, red_ref, w2_ref,
                          q_ref):
    f32 = jnp.float32
    s = state_ref[...]                    # (row_tile, S_pad)  mm_dtype; col S == 1.0 on valid rows
    p = probs_ref[...]                    # (row_tile, na_pad) mm_dtype

    # One wide matmul for all four state-side first layers.  All biases (and the
    # two constant-1 lanes used for downstream bias folding) ride in wcat's
    # "ones" row, so there is no broadcast bias add on the wide z.
    z = jnp.dot(s, wcat_ref[...], preferred_element_type=f32).astype(ew_dtype)

    off_b1 = w1_pad
    off_hf = w1_pad + hpad
    w1seg = z[:, :w1_pad]                 # hyper_w_1(state), flat (pad cols = 0)
    b1seg = z[:, off_b1:off_hf]           # hyper_b_1(state)  (+1.0 at col `hid`)
    hfhg = z[:, off_hf:]                  # first layers of both "final" heads (+1.0 at hf col `hid`)

    # bmm(probs[b,1,NA], w1[b,NA,hid]) via resident one-hot expand/reduce matmuls
    # (kept on the MXU: a reshape+sum alternative would push stride-`hid` lane
    # reductions onto the XLU/VALU, the slots that actually saturate).
    p_exp = jnp.dot(p, exp_ref[...], preferred_element_type=f32).astype(ew_dtype)
    mix = (p_exp * w1seg).astype(mm_dtype)          # cast to MXU dtype before any spill
    h = jnp.maximum(
        jnp.dot(mix, red_ref[...], preferred_element_type=f32).astype(ew_dtype)
        + b1seg, 0.0)

    # Fused second layers of hyper_w_final / hyper_b_final (block-diagonal w2;
    # b_f2 / b_g2 are folded into the w2 row driven by the constant-1 hf lane):
    #   fin[:, :hid] = w_final, fin[:, hid] = b_final, other columns 0.
    hfhg_r = jnp.maximum(hfhg, 0.0).astype(mm_dtype)
    fin = jnp.dot(hfhg_r, w2_ref[...], preferred_element_type=f32).astype(ew_dtype)

    # h[:, hid] == 1.0 on valid rows (constant baked into wcat's ones row), so a
    # single rowwise dot gives q = sum_j h*w_final + b_final with no slicing.
    # Padded rows (no ones column) produce exactly 0.
    q = jnp.sum((h * fin).astype(f32), axis=-1)     # (row_tile,)
    q_ref[...] = q[None, :]                         # lane-dense (1, row_tile) store


def prepare_latent_critic(params, *, state_dim, n_agents, n_actions, hid,
                          matmul_dtype=jnp.bfloat16):
    """Build the fused / padded constant MXU operands once per parameter set.

    Hoisting this out of the per-call wrapper avoids re-running ~1 MB of
    scatter / iota / pad ops (and their HBM writes) on every forward call.
    bf16 operands are the default on all TPU generations; accumulation in the
    kernel is always f32.
    """
    f32 = jnp.float32
    S = state_dim
    na = n_agents * n_actions

    S_pad = _round_up(S + 1, 128)        # +1: "ones" column drives the folded biases
    na_pad = _round_up(na, 128)
    w1_pad = _round_up(na * hid, 128)    # padded width of the flat w1 segment
    hpad = _round_up(hid + 1, 128)       # padded width of b1 / h / fin segments
    hfpad = _round_up(hid + 1, 128)      # hf segment (+1 lane that drives b2 folding)
    hgpad = _round_up(hid, 128)          # hg segment
    ntot = w1_pad + hpad + hfpad + hgpad
    off_b1 = w1_pad
    off_hf = off_b1 + hpad
    off_hg = off_hf + hfpad

    # --- fused first-layer weight: [state | 1] -> [w1 | b1 | hf | hg] -----------
    wcat = jnp.zeros((S_pad, ntot), f32)
    wcat = wcat.at[:S, :na * hid].set(params["w_w1"].astype(f32))
    wcat = wcat.at[:S, off_b1:off_b1 + hid].set(params["w_b1"].astype(f32))
    wcat = wcat.at[:S, off_hf:off_hf + hid].set(params["w_f1"].astype(f32))
    wcat = wcat.at[:S, off_hg:off_hg + hid].set(params["w_g1"].astype(f32))
    # bias row, multiplied by the ones column of the streamed state tile:
    wcat = wcat.at[S, :na * hid].set(params["b_w1"][0].astype(f32))
    wcat = wcat.at[S, off_b1:off_b1 + hid].set(params["b_b1"][0].astype(f32))
    wcat = wcat.at[S, off_b1 + hid].set(1.0)     # -> h[:, hid] == 1.0 (folds b_final in)
    wcat = wcat.at[S, off_hf:off_hf + hid].set(params["b_f1"][0].astype(f32))
    wcat = wcat.at[S, off_hf + hid].set(1.0)     # -> drives the b_f2 / b_g2 row of w2
    wcat = wcat.at[S, off_hg:off_hg + hid].set(params["b_g1"][0].astype(f32))

    # --- constant expand / reduce one-hot matrices (exact 0/1, lossless in bf16) -
    a_i = jnp.arange(na_pad)[:, None]
    k_i = jnp.arange(w1_pad)[None, :]
    expand = ((k_i // hid == a_i) & (a_i < na) & (k_i < na * hid)).astype(f32)
    kk = jnp.arange(w1_pad)[:, None]
    jj = jnp.arange(hpad)[None, :]
    reduce_ = ((kk % hid == jj) & (kk < na * hid) & (jj < hid)).astype(f32)

    # --- fused block-diagonal second layers of the two final heads ---------------
    w2 = jnp.zeros((hfpad + hgpad, hpad), f32)
    w2 = w2.at[:hid, :hid].set(params["w_f2"].astype(f32))                    # w_final
    w2 = w2.at[hid, :hid].set(params["b_f2"][0].astype(f32))                  # folded b_f2
    w2 = w2.at[hid, hid].set(params["b_g2"][0, 0].astype(f32))                # folded b_g2
    w2 = w2.at[hfpad:hfpad + hid, hid].set(params["w_g2"][:, 0].astype(f32))  # b_final

    md = matmul_dtype
    return {
        "wcat": wcat.astype(md), "expand": expand.astype(md),
        "reduce": reduce_.astype(md), "w2": w2.astype(md),
        "S": S, "na": na, "hid": hid,
        "S_pad": S_pad, "na_pad": na_pad, "w1_pad": w1_pad, "hpad": hpad,
        "matmul_dtype": md,
    }


def latent_critic_forward(state, policy, consts, *, row_tile=512,
                          elementwise_dtype=jnp.float32):
    """Forward pass; `consts` comes from prepare_latent_critic(params, ...).

    elementwise_dtype=jnp.bfloat16 is recommended on v6e / v7x (bf16 VALU halves
    vreg pressure and spill traffic of the wide intermediates); keep jnp.float32
    on v5e (no bf16 VALU).  Accumulation is always f32.
    """
    bs, T, S_in = state.shape
    assert S_in == consts["S"]
    na = consts["na"]
    assert policy.shape[2] * policy.shape[3] == na
    B = bs * T

    md = consts["matmul_dtype"]
    S = consts["S"]
    S_pad, na_pad = consts["S_pad"], consts["na_pad"]
    w1_pad, hpad = consts["w1_pad"], consts["hpad"]

    assert row_tile % 128 == 0, "row_tile must be a multiple of 128"
    num_tiles = pl.cdiv(B, row_tile)
    # v7x has two TensorCores: if the batch is big enough, shrink the tile so the
    # ("parallel",) grid has >= 2 row tiles to shard across them.
    while (num_tiles < 2 and row_tile > 256 and row_tile % 256 == 0
           and B > row_tile // 2):
        row_tile //= 2
        num_tiles = pl.cdiv(B, row_tile)
    B_pad = num_tiles * row_tile

    # Streamed inputs: flatten, cast to the MXU dtype, zero-pad rows/lanes, and
    # set the "ones" column on valid rows only (padded rows then compute q == 0).
    # TODO(synk): on HBM-bound setups (esp. v5e) stream state/probs at natural
    # feature width (full-dim last block dim) instead of 128-lane padding.
    state2 = jnp.zeros((B_pad, S_pad), md)
    state2 = state2.at[:B, :S].set(state.reshape(B, S).astype(md))
    state2 = state2.at[:B, S].set(jnp.ones((B,), md))
    probs2 = jnp.zeros((B_pad, na_pad), md)
    probs2 = probs2.at[:B, :na].set(policy.reshape(B, na).astype(md))

    def resident(arr):
        nd = arr.ndim
        # Constant block index -> fetched once, kept resident in VMEM.
        # (pl.Buffered(1) would reclaim the second buffer; default kept for safety.)
        return pl.BlockSpec(arr.shape, lambda i, n=nd: (0,) * n)

    wcat, expand, reduce_, w2 = (consts["wcat"], consts["expand"],
                                 consts["reduce"], consts["w2"])

    in_specs = [
        pl.BlockSpec((row_tile, S_pad), lambda i: (i, 0)),    # state tile
        pl.BlockSpec((row_tile, na_pad), lambda i: (i, 0)),   # probs tile
        resident(wcat), resident(expand), resident(reduce_), resident(w2),
    ]
    out_spec = pl.BlockSpec((1, row_tile), lambda i: (0, i))  # lane-dense output

    kernel = functools.partial(_latent_critic_kernel, w1_pad, hpad, md,
                               elementwise_dtype)

    q = pl.pallas_call(
        kernel,
        out_shape=jax.ShapeDtypeStruct((1, B_pad), jnp.float32),
        grid_spec=pltpu.PrefetchScalarGridSpec(
            num_scalar_prefetch=0,
            grid=(num_tiles,),
            in_specs=in_specs,
            out_specs=out_spec,
        ),
        compiler_params=pltpu.CompilerParams(
            dimension_semantics=("parallel",)),
    )(state2, probs2, wcat, expand, reduce_, w2)

    return q[0, :B].reshape(bs, T, 1)


def latent_critic_reference(state, policy, params, *, hid):
    """Pure-JAX mirror of the PyTorch forward (t=None path)."""
    bs, T, S = state.shape
    na = policy.shape[2] * policy.shape[3]
    s = state.reshape(-1, S)
    p = policy.reshape(-1, 1, na)
    w1 = (s @ params["w_w1"] + params["b_w1"]).reshape(-1, na, hid)
    b1 = (s @ params["w_b1"] + params["b_b1"]).reshape(-1, 1, hid)
    h = jax.nn.relu(jnp.einsum("bij,bjk->bik", p, w1) + b1)
    w_final = (jax.nn.relu(s @ params["w_f1"] + params["b_f1"]) @ params["w_f2"]
               + params["b_f2"]).reshape(-1, hid, 1)
    b_final = (jax.nn.relu(s @ params["w_g1"] + params["b_g1"]) @ params["w_g2"]
               + params["b_g2"]).reshape(-1, 1, 1)
    q = jnp.einsum("bij,bjk->bik", h, w_final) + b_final
    return q.reshape(bs, -1, 1)


def init_params(key, state_dim, n_agents, n_actions, hid):
    """Deterministic synthetic init (shapes match the PyTorch module's __init__)."""
    na = n_agents * n_actions
    embed = hid * na
    keys = jax.random.split(key, 12)

    def lin(kw, kb, fan_in, fan_out):
        scale = 1.0 / jnp.sqrt(jnp.float32(fan_in))
        w = jax.random.uniform(kw, (fan_in, fan_out), jnp.float32, -scale, scale)
        b = jax.random.uniform(kb, (1, fan_out), jnp.float32, -scale, scale)
        return w, b

    p = {}
    p["w_w1"], p["b_w1"] = lin(keys[0], keys[1], state_dim, embed)   # hyper_w_1
    p["w_b1"], p["b_b1"] = lin(keys[2], keys[3], state_dim, hid)     # hyper_b_1
    p["w_f1"], p["b_f1"] = lin(keys[4], keys[5], state_dim, hid)     # hyper_w_final[0]
    p["w_f2"], p["b_f2"] = lin(keys[6], keys[7], hid, hid)           # hyper_w_final[2]
    p["w_g1"], p["b_g1"] = lin(keys[8], keys[9], state_dim, hid)     # hyper_b_final[0]
    p["w_g2"], p["b_g2"] = lin(keys[10], keys[11], hid, 1)           # hyper_b_final[2]
    return p


if __name__ == "__main__":
    # TODO(synk): the module's optional `t` time-slice argument is handled by
    # slicing state/policy in the wrapper before calling the kernel; only the
    # t=None path is exercised here.
    bs, T = 2, 8
    n_agents, n_actions = 3, 5
    state_dim = 32
    hid = 32  # args.mixing_embed_dim

    key = jax.random.PRNGKey(0)
    k_state, k_policy, k_params = jax.random.split(key, 3)

    state = jax.random.normal(k_state, (bs, T, state_dim), jnp.float32)
    logits = jax.random.normal(k_policy, (bs, T, n_agents, n_actions), jnp.float32)
    policy = jax.nn.softmax(logits, axis=-1)  # per-agent action probabilities

    params = init_params(k_params, state_dim, n_agents, n_actions, hid)
    q_ref = latent_critic_reference(state, policy, params, hid=hid)

    # f32 MXU-operand path: tight check against the pure-JAX reference.
    consts32 = prepare_latent_critic(params, state_dim=state_dim,
                                     n_agents=n_agents, n_actions=n_actions,
                                     hid=hid, matmul_dtype=jnp.float32)
    q32 = jax.block_until_ready(latent_critic_forward(state, policy, consts32))
    assert q32.shape == (bs, T, 1)
    assert jnp.allclose(q32, q_ref, atol=1e-3, rtol=1e-3), "f32 mismatch vs. reference"

    # Default bf16 MXU-operand path (recommended on all generations); f32 elementwise.
    consts16 = prepare_latent_critic(params, state_dim=state_dim,
                                     n_agents=n_agents, n_actions=n_actions,
                                     hid=hid)  # matmul_dtype defaults to bf16
    q16 = jax.block_until_ready(latent_critic_forward(state, policy, consts16))
    scale = float(jnp.max(jnp.abs(q_ref)))
    err = float(jnp.max(jnp.abs(q16 - q_ref)))
    assert err <= 0.1 * scale + 0.1, f"bf16 path error too large: {err} (scale {scale})"

    # bf16 elementwise path (v6e / v7x: bf16 VALU halves vreg + spill traffic).
    q16e = jax.block_until_ready(
        latent_critic_forward(state, policy, consts16,
                              elementwise_dtype=jnp.bfloat16))
    err_e = float(jnp.max(jnp.abs(q16e - q_ref)))
    assert err_e <= 0.15 * scale + 0.15, f"bf16-elementwise error too large: {err_e}"

    print("KERNEL_OK")
</pallas_src>

<mosaic_0001>
module attributes {stable_mosaic.version = 11 : i64} {
  func.func @_latent_critic_kernel(%arg0: i32, %arg1: memref<512x128xf32, #tpu.memory_space<vmem>>, %arg2: memref<512x128xf32, #tpu.memory_space<vmem>>, %arg3: memref<128x896xf32, #tpu.memory_space<vmem>>, %arg4: memref<128x512xf32, #tpu.memory_space<vmem>>, %arg5: memref<512x128xf32, #tpu.memory_space<vmem>>, %arg6: memref<256x128xf32, #tpu.memory_space<vmem>>, %arg7: memref<1x512xf32, #tpu.memory_space<vmem>>) attributes {dimension_semantics = [#tpu.dimension_semantics<parallel>], iteration_bounds = array<i64: 1>, scalar_prefetch = 0 : i64, scratch_operands = 0 : i64, tpu.core_type = #tpu.core_type<tc>, window_params = [{transform_indices = @transform_0, window_bounds = array<i64: 512, 128>}, {transform_indices = @transform_1, window_bounds = array<i64: 512, 128>}, {pipeline_mode = #tpu.pipeline_mode<synchronous>, transform_indices = @transform_2, window_bounds = array<i64: 128, 896>}, {pipeline_mode = #tpu.pipeline_mode<synchronous>, transform_indices = @transform_3, window_bounds = array<i64: 128, 512>}, {pipeline_mode = #tpu.pipeline_mode<synchronous>, transform_indices = @transform_4, window_bounds = array<i64: 512, 128>}, {pipeline_mode = #tpu.pipeline_mode<synchronous>, transform_indices = @transform_5, window_bounds = array<i64: 256, 128>}, {transform_indices = @transform_6, window_bounds = array<i64: 1, 512>}]} {
    %c0 = arith.constant 0 : index
    %c0_0 = arith.constant 0 : index
    %0 = vector.load %arg1[%c0, %c0_0] : memref<512x128xf32, #tpu.memory_space<vmem>>, vector<512x128xf32>
    %c0_1 = arith.constant 0 : index
    %c0_2 = arith.constant 0 : index
    %1 = vector.load %arg2[%c0_1, %c0_2] : memref<512x128xf32, #tpu.memory_space<vmem>>, vector<512x128xf32>
    %c0_3 = arith.constant 0 : index
    %c0_4 = arith.constant 0 : index
    %2 = vector.load %arg3[%c0_3, %c0_4] : memref<128x896xf32, #tpu.memory_space<vmem>>, vector<128x896xf32>
    %cst = arith.constant dense<0.000000e+00> : vector<512x896xf32>
    %3 = tpu.matmul %0, %2, %cst {dimension_numbers = #tpu.dot_dimension_numbers<[1], [0], [0], [1], [0, 0, 1, 1], [], []>} : vector<512x128xf32>, vector<128x896xf32>, vector<512x896xf32> -> vector<512x896xf32>
    %4 = vector.extract_strided_slice %3 {offsets = [0, 0], sizes = [512, 512], strides = [1, 1]} : vector<512x896xf32> to vector<512x512xf32>
    %5 = vector.extract_strided_slice %3 {offsets = [0, 512], sizes = [512, 128], strides = [1, 1]} : vector<512x896xf32> to vector<512x128xf32>
    %6 = vector.extract_strided_slice %3 {offsets = [0, 640], sizes = [512, 256], strides = [1, 1]} : vector<512x896xf32> to vector<512x256xf32>
    %c0_5 = arith.constant 0 : index
    %c0_6 = arith.constant 0 : index
    %7 = vector.load %arg4[%c0_5, %c0_6] : memref<128x512xf32, #tpu.memory_space<vmem>>, vector<128x512xf32>
    %cst_7 = arith.constant dense<0.000000e+00> : vector<512x512xf32>
    %8 = tpu.matmul %1, %7, %cst_7 {dimension_numbers = #tpu.dot_dimension_numbers<[1], [0], [0], [1], [0, 0, 1, 1], [], []>} : vector<512x128xf32>, vector<128x512xf32>, vector<512x512xf32> -> vector<512x512xf32>
    %9 = arith.mulf %8, %4 : vector<512x512xf32>
    %c0_8 = arith.constant 0 : index
    %c0_9 = arith.constant 0 : index
    %10 = vector.load %arg5[%c0_8, %c0_9] : memref<512x128xf32, #tpu.memory_space<vmem>>, vector<512x128xf32>
    %cst_10 = arith.constant dense<0.000000e+00> : vector<512x128xf32>
    %11 = tpu.matmul %9, %10, %cst_10 {dimension_numbers = #tpu.dot_dimension_numbers<[1], [0], [0], [1], [0, 0, 1, 1], [], []>} : vector<512x512xf32>, vector<512x128xf32>, vector<512x128xf32> -> vector<512x128xf32>
    %12 = arith.addf %11, %5 : vector<512x128xf32>
    %cst_11 = arith.constant 0.000000e+00 : f32
    %13 = vector.broadcast %cst_11 : f32 to vector<512x128xf32>
    %14 = arith.maximumf %12, %13 : vector<512x128xf32>
    %cst_12 = arith.constant 0.000000e+00 : f32
    %15 = vector.broadcast %cst_12 : f32 to vector<512x256xf32>
    %16 = arith.maximumf %6, %15 : vector<512x256xf32>
    %c0_13 = arith.constant 0 : index
    %c0_14 = arith.constant 0 : index
    %17 = vector.load %arg6[%c0_13, %c0_14] : memref<256x128xf32, #tpu.memory_space<vmem>>, vector<256x128xf32>
    %cst_15 = arith.constant dense<0.000000e+00> : vector<512x128xf32>
    %18 = tpu.matmul %16, %17, %cst_15 {dimension_numbers = #tpu.dot_dimension_numbers<[1], [0], [0], [1], [0, 0, 1, 1], [], []>} : vector<512x256xf32>, vector<256x128xf32>, vector<512x128xf32> -> vector<512x128xf32>
    %19 = arith.mulf %14, %18 : vector<512x128xf32>
    %cst_16 = arith.constant dense<0.000000e+00> : vector<512xf32>
    %20 = vector.multi_reduction <add>, %19, %cst_16 [1] : vector<512x128xf32> to vector<512xf32>
    %21 = vector.shape_cast %20 : vector<512xf32> to vector<1x512xf32>
    %c0_17 = arith.constant 0 : index
    %c0_18 = arith.constant 0 : index
    %22 = vector.load %arg7[%c0_17, %c0_18] : memref<1x512xf32, #tpu.memory_space<vmem>>, vector<1x512xf32>
    tpu.vector_store %arg7[%c0_17, %c0_18], %21 {strides = array<i32>} : memref<1x512xf32, #tpu.memory_space<vmem>>, vector<1x512xf32>,
    return
  }
  func.func @transform_0(%arg0: i32) -> (i32, i32) {
    %c0_i32 = arith.constant 0 : i32
    %c0_i32_0 = arith.constant 0 : i32
    return %arg0, %c0_i32 : i32, i32
  }
  func.func @transform_1(%arg0: i32) -> (i32, i32) {
    %c0_i32 = arith.constant 0 : i32
    %c0_i32_0 = arith.constant 0 : i32
    return %arg0, %c0_i32 : i32, i32
  }
  func.func @transform_2(%arg0: i32) -> (i32, i32) {
    %c0_i32 = arith.constant 0 : i32
    %c0_i32_0 = arith.constant 0 : i32
    %c0_i32_1 = arith.constant 0 : i32
    return %c0_i32, %c0_i32_0 : i32, i32
  }
  func.func @transform_3(%arg0: i32) -> (i32, i32) {
    %c0_i32 = arith.constant 0 : i32
    %c0_i32_0 = arith.constant 0 : i32
    %c0_i32_1 = arith.constant 0 : i32
    return %c0_i32, %c0_i32_0 : i32, i32
  }
  func.func @transform_4(%arg0: i32) -> (i32, i32) {
    %c0_i32 = arith.constant 0 : i32
    %c0_i32_0 = arith.constant 0 : i32
    %c0_i32_1 = arith.constant 0 : i32
    return %c0_i32, %c0_i32_0 : i32, i32
  }
  func.func @transform_5(%arg0: i32) -> (i32, i32) {
    %c0_i32 = arith.constant 0 : i32
    %c0_i32_0 = arith.constant 0 : i32
    %c0_i32_1 = arith.constant 0 : i32
    return %c0_i32, %c0_i32_0 : i32, i32
  }
  func.func @transform_6(%arg0: i32) -> (i32, i32) {
    %c0_i32 = arith.constant 0 : i32
    %c0_i32_0 = arith.constant 0 : i32
    return %c0_i32, %arg0 : i32, i32
  }
}

</mosaic_0001>

<bundles_post_ra>
// kernel: tpu_custom_call.1
= control target key start
LH: loop header
LB: loop body
LE: loop exit
PB: predicated region body
PF: predicated region fallthrough
CT: control target
= control target key end

     0   :  { %11 = vsyncpa [#allocation3], 0  ;;  %s16541_s0 = inlined_call_operand.hbm [shape: f32[512,128], index: 0, kind: input, shape index: {}]   ;;  %s16542_s1 = inlined_call_operand.hbm [shape: f32[512,128], index: 1, kind: input, shape index: {}]   ;;  %s16543_s2 = inlined_call_operand.hbm [shape: f32[128,896], index: 2, kind: input, shape index: {}]   ;;  %s16544_s3 = inlined_call_operand.hbm [shape: f32[128,512], index: 3, kind: input, shape index: {}]   ;;  %s16545_s4 = inlined_call_operand.hbm [shape: f32[512,128], index: 4, kind: input, shape index: {}]   ;;  %s16546_s5 = inlined_call_operand.hbm [shape: f32[256,128], index: 5, kind: input, shape index: {}]   ;;  %s16547_s6 = inlined_call_operand.hbm [shape: f32[1,512], index: 6, kind: output, shape index: {}]  }
   0x1   :  { %12 = vsyncpa [#allocation6], 0 }
   0x2   :  { %13 = vsyncpa [#allocation9], 0 }
   0x3   :  { %14 = vsyncpa [#allocation12], 0 }
   0x4   :  { %15 = vsyncpa [#allocation4], 0  ;;  %s11303_s21 = smov [#allocation5]   ;;  %s11304_s23 = smov [#allocation8]  }
   0x5   :  { %s33_s22 = sshll.u32 %s11303_s21, 4  ;;  %s57_s24 = sshll.u32 %s11304_s23, 4  ;;  %s34_s22 = int_to_ptr.vmem [resolvable:$true] %s33_s22  ;;  %s58_s24 = int_to_ptr.vmem [resolvable:$true] %s57_s24 }
   0x6   :  { %s11161_s25 = scalar_lea.vmem %s34_s22, 8192  ;;  %p11166_p1 = scmp.lt.s32.totalorder %s34_s22, %s34_s22 }
   0x7   :  { %p11162_p0 = scmp.ne.s32.totalorder %s34_s22, %s11161_s25  ;;  %p11167_p2 = scmp.lt.s32.totalorder %s11161_s25, %s11161_s25 }
   0x9   :  { %p11168_p3 = por %p11167_p2, %p11166_p1 }
   0xb   :  { %p11169_p4 = pnand %p11168_p3, %p11162_p0 }
   0xd   :  { %11172 = shalt.err (!%p11169_p4)
}
   0xe   :  { %s11305_s26 = smov 128   ;;  %s11306_s27 = smov 8  }
   0xf   :  { %39 = dma.hbm_to_vmem [thread:$0]  %s16542_s1, 8192, %s34_s22, [#allocation6], %s11305_s26, %s11305_s26, %s11306_s27  }
  0x10   :  { %s11181_s30 = scalar_lea.vmem %s58_s24, 8192  ;;  %p11186_p6 = scmp.lt.s32.totalorder %s58_s24, %s58_s24 }
  0x11   :  { %p11182_p5 = scmp.ne.s32.totalorder %s58_s24, %s11181_s30  ;;  %p11187_p7 = scmp.lt.s32.totalorder %s11181_s30, %s11181_s30 }
  0x13   :  { %p11188_p8 = por %p11187_p7, %p11186_p6 }
  0x15   :  { %p11189_p9 = pnand %p11188_p8, %p11182_p5 }
  0x17   :  { %11192 = shalt.err (!%p11189_p9)
}
  0x18   :  { %s11307_s7 = smov 512   ;;  %s11308_s8 = smov 32  }
  0x19   :  { %63 = dma.hbm_to_vmem [thread:$0]  %s16544_s3, 8192, %s58_s24, [#allocation9], %s11307_s7, %s11307_s7, %s11308_s8  }
  0x1a   :  { %s11309_s11 = smov [#allocation2]   ;;  %s11310_s13 = smov [#allocation7]  }
  0x1b   :  { %s21_s12 = sshll.u32 %s11309_s11, 4  ;;  %s45_s14 = sshll.u32 %s11310_s13, 4  ;;  %s22_s12 = int_to_ptr.vmem [resolvable:$true] %s21_s12  ;;  %s46_s14 = int_to_ptr.vmem [resolvable:$true] %s45_s14 }
  0x1c   :  { %s11201_s1 = scalar_lea.vmem %s22_s12, 8192  ;;  %p11206_p11 = scmp.lt.s32.totalorder %s22_s12, %s22_s12 }
  0x1d   :  { %p11202_p10 = scmp.ne.s32.totalorder %s22_s12, %s11201_s1  ;;  %p11207_p12 = scmp.lt.s32.totalorder %s11201_s1, %s11201_s1 }
  0x1f   :  { %p11208_p13 = por %p11207_p12, %p11206_p11 }
  0x21   :  { %p11209_p0 = pnand %p11208_p13, %p11202_p10 }
  0x23   :  { %11212 = shalt.err (!%p11209_p0)
}
  0x24   :  { %27 = dma.hbm_to_vmem [thread:$0]  %s16541_s0, 8192, %s22_s12, [#allocation3], %s11305_s26, %s11305_s26, %s11306_s27  }
  0x25   :  { %s11221_s3 = scalar_lea.vmem %s46_s14, 14336  ;;  %p11226_p2 = scmp.lt.s32.totalorder %s46_s14, %s46_s14 }
  0x26   :  { %p11222_p1 = scmp.ne.s32.totalorder %s46_s14, %s11221_s3  ;;  %p11227_p3 = scmp.lt.s32.totalorder %s11221_s3, %s11221_s3 }
  0x28   :  { %p11228_p4 = por %p11227_p3, %p11226_p2 }
  0x2a   :  { %p11229_p5 = pnand %p11228_p4, %p11222_p1 }
  0x2c   :  { %11232 = shalt.err (!%p11229_p5)
}
  0x2d   :  { %s11311_s17 = smov 896   ;;  %s11312_s18 = smov 56  }
  0x2e   :  { %51 = dma.hbm_to_vmem [thread:$0]  %s16543_s2, 14336, %s46_s14, [#allocation6], %s11311_s17, %s11311_s17, %s11312_s18  }
  0x2f   :  { %s11313_s21 = smov [#allocation10]   ;;  %s11314_s23 = smov [#allocation11]  }
  0x30   :  { %s69_s22 = sshll.u32 %s11313_s21, 4  ;;  %s81_s24 = sshll.u32 %s11314_s23, 4  ;;  %s70_s22 = int_to_ptr.vmem [resolvable:$true] %s69_s22  ;;  %s82_s24 = int_to_ptr.vmem [resolvable:$true] %s81_s24 }
  0x31   :  { %s11241_s0 = scalar_lea.vmem %s70_s22, 8192  ;;  %p11246_p7 = scmp.lt.s32.totalorder %s70_s22, %s70_s22 }
  0x32   :  { %p11242_p6 = scmp.ne.s32.totalorder %s70_s22, %s11241_s0  ;;  %p11247_p8 = scmp.lt.s32.totalorder %s11241_s0, %s11241_s0 }
  0x34   :  { %p11248_p9 = por %p11247_p8, %p11246_p7 }
  0x36   :  { %p11249_p10 = pnand %p11248_p9, %p11242_p6 }
  0x38   :  { %11252 = shalt.err (!%p11249_p10)
}
  0x39   :  { %75 = dma.hbm_to_vmem [thread:$0]  %s16545_s4, 8192, %s70_s22, [#allocation9], %s11305_s26, %s11305_s26, %s11306_s27  }
  0x3a   :  { %s11261_s2 = scalar_lea.vmem %s82_s24, 4096  ;;  %p11266_p12 = scmp.lt.s32.totalorder %s82_s24, %s82_s24 }
  0x3b   :  { %p11262_p11 = scmp.ne.s32.totalorder %s82_s24, %s11261_s2  ;;  %p11267_p13 = scmp.lt.s32.totalorder %s11261_s2, %s11261_s2 }
  0x3d   :  { %p11268_p0 = por %p11267_p13, %p11266_p12 }
  0x3f   :  { %p11269_p1 = pnand %p11268_p0, %p11262_p11 }
  0x41   :  { %11272 = shalt.err (!%p11269_p1)
}
  0x42   :  { %87 = dma.hbm_to_vmem [thread:$0]  %s16546_s5, 4096, %s82_s24, [#allocation12], %s11305_s26, %s11305_s26, %s11306_s27  }
  0x43   :  { %11293 = dma.done.wait [#allocation3], 8192  }
  0x44   :  { %11294 = vsyncadd [#allocation3], 4294959104 }
  0x45   :  { %11295 = dma.done.wait [#allocation6], 22528  }
  0x46   :  { %11296 = vsyncadd [#allocation6], 4294944768 }
  0x47   :  { %11297 = dma.done.wait [#allocation9], 16384  }
  0x48   :  { %11298 = vsyncadd [#allocation9], 4294950912 }
  0x49   :  { %11299 = dma.done.wait [#allocation12], 4096  }
  0x4a   :  { %11300 = vsyncadd [#allocation12], 4294963200  ;;  %v11315_v0 = vmov 0.0   ;;  %v340_v1 = vld [vmem:[#allocation7 + $0x350] sm:$0xff]  ;;  %v11386_v2 = vld [vmem:[#allocation7 + $0x360] sm:$0xff]  ;;  %vm10382_vm0 = vcmask 130112  }
  0x4b   :  { %410 = vmatprep.mubr.f32.mxu0 %v11315_v0  ;;  %955 = vmatprep.mubr.f32.mxu1 %v11315_v0  ;;  %v339_v3 = vld [vmem:[#allocation7 + $0x348] sm:$0xff]  ;;  %v11389_v4 = vld [vmem:[#allocation7 + $0x358] sm:$0xff]  ;;  %v332_v7 = vld [vmem:[#allocation7 + $0x310] sm:$0xff]  ;;  %vm10389_vm1 = vcmask 195712   ;;  %vm10396_vm2 = vcmask 261312   ;;  %vm10403_vm3 = vcmask 326912  }
  0x4c   :  { %346 = vmatprep.subr.mxu0 %v340_v1  ;;  %10975 = vmatprep.subr.mxu1 %v11386_v2  ;;  %v333_v5 = vld [vmem:[#allocation7 + $0x318] sm:$0xff]  ;;  %v11391_v6 = vld [vmem:[#allocation7 + $0x328] sm:$0xff]  ;;  %v11394_v8 = vld [vmem:[#allocation7 + $0x320] sm:$0xff]  ;;  %vm10410_vm4 = vcmask 392512   ;;  %vm10417_vm5 = vcmask 458112   ;;  %vm10424_vm6 = vcmask 523712  }
  0x4d   :  { %347 = vmatpush1.msra.mxu0 %v339_v3  ;;  %10991 = vmatpush1.msra.mxu1 %v11389_v4  ;;  %v326_v9 = vld [vmem:[#allocation7 + $0x2e0] sm:$0xff]  ;;  %v11397_v10 = vld [vmem:[#allocation7 + $0x2f0] sm:$0xff]  ;;  %v325_v11 = vld [vmem:[#allocation7 + $0x2d8] sm:$0xff]  ;;  %vm10431_vm7 = vcmask 589312   ;;  %vm10438_vm8 = vcmask 654912   ;;  %vm10445_vm9 = vcmask 720512  }
  0x4e   :  { %348 = vmatprep.subr.mxu0 %v333_v5  ;;  %10976 = vmatprep.subr.mxu1 %v11391_v6  ;;  %v11399_v12 = vld [vmem:[#allocation7 + $0x2e8] sm:$0xff]  ;;  %v11402_v14 = vld [vmem:[#allocation7 + $0x2b8] sm:$0xff]  ;;  %v318_v15 = vld [vmem:[#allocation7 + $0x2a0] sm:$0xff]  ;;  %vm10452_vm10 = vcmask 786112   ;;  %vm10459_vm11 = vcmask 851712   ;;  %vm10466_vm12 = vcmask 917312  }
  0x4f   :  { %349 = vmatpush1.msra.mxu0 %v332_v7  ;;  %10992 = vmatpush1.msra.mxu1 %v11394_v8  ;;  %v319_v13 = vld [vmem:[#allocation7 + $0x2a8] sm:$0xff]  ;;  %v11405_v16 = vld [vmem:[#allocation7 + $0x2b0] sm:$0xff]  ;;  %v11408_v18 = vld [vmem:[#allocation7 + $0x280] sm:$0xff]  ;;  %vm10473_vm13 = vcmask 982912   ;;  %vm10480_vm14 = vcmask 1048512   ;;  %s11318_s4 = smov [#allocation13]  }
  0x50   :  { %350 = vmatprep.subr.mxu0 %v326_v9  ;;  %10977 = vmatprep.subr.mxu1 %v11397_v10  ;;  %v312_v17 = vld [vmem:[#allocation7 + $0x270] sm:$0xff]  ;;  %v311_v19 = vld [vmem:[#allocation7 + $0x268] sm:$0xff]  ;;  %v11411_v20 = vld [vmem:[#allocation7 + $0x278] sm:$0xff]  ;;  %s10755_s5 = sshll.u32 %s11318_s4, 4  ;;  %s10756_s5 = int_to_ptr.vmem [resolvable:$true] %s10755_s5 }
  0x51   :  { %351 = vmatpush1.msra.mxu0 %v325_v11  ;;  %10993 = vmatpush1.msra.mxu1 %v11399_v12  ;;  %v305_v21 = vld [vmem:[#allocation7 + $0x238] sm:$0xff]  ;;  %v11414_v22 = vld [vmem:[#allocation7 + $0x248] sm:$0xff]  ;;  %v304_v23 = vld [vmem:[#allocation7 + $0x230] sm:$0xff]  ;;  %s11273_s26 = scalar_lea.vmem %s10756_s5, 64  ;;  %p11278_p3 = scmp.lt.s32.totalorder %s10756_s5, %s10756_s5 }
  0x52   :  { %352 = vmatprep.subr.mxu0 %v319_v13  ;;  %10978 = vmatprep.subr.mxu1 %v11402_v14  ;;  %v11417_v24 = vld [vmem:[#allocation7 + $0x240] sm:$0xff]  ;;  %v11420_v26 = vld [vmem:[#allocation7 + $0x210] sm:$0xff]  ;;  %v297_v27 = vld [vmem:[#allocation7 + $0x1f8] sm:$0xff]  ;;  %p11274_p2 = scmp.ne.s32.totalorder %s10756_s5, %s11273_s26  ;;  %p11279_p4 = scmp.lt.s32.totalorder %s11273_s26, %s11273_s26 }
  0x53   :  { %353 = vmatpush1.msra.mxu0 %v318_v15  ;;  %10994 = vmatpush1.msra.mxu1 %v11405_v16  ;;  %v298_v25 = vld [vmem:[#allocation7 + $0x200] sm:$0xff]  ;;  %v11423_v28 = vld [vmem:[#allocation7 + $0x208] sm:$0xff]  ;;  %v11426_v30 = vld [vmem:[#allocation7 + $0x1d8] sm:$0xff] }
  0x54   :  { %354 = vmatprep.subr.mxu0 %v312_v17  ;;  %10979 = vmatprep.subr.mxu1 %v11408_v18  ;;  %v291_v29 = vld [vmem:[#allocation7 + $0x1c8] sm:$0xff]  ;;  %v290_v31 = vld [vmem:[#allocation7 + $0x1c0] sm:$0xff]  ;;  %v11429_v32 = vld [vmem:[#allocation7 + $0x1d0] sm:$0xff]  ;;  %p11280_p5 = por %p11279_p4, %p11278_p3 }
  0x55   :  { %355 = vmatpush1.msra.mxu0 %v311_v19  ;;  %10995 = vmatpush1.msra.mxu1 %v11411_v20  ;;  %v284_v33 = vld [vmem:[#allocation7 + $0x190] sm:$0xff]  ;;  %v11432_v34 = vld [vmem:[#allocation7 + $0x1a0] sm:$0xff]  ;;  %v283_v35 = vld [vmem:[#allocation7 + $0x188] sm:$0xff] }
  0x56   :  { %356 = vmatprep.subr.mxu0 %v305_v21  ;;  %10980 = vmatprep.subr.mxu1 %v11414_v22  ;;  %v11435_v36 = vld [vmem:[#allocation7 + $0x198] sm:$0xff]  ;;  %v11438_v38 = vld [vmem:[#allocation7 + $0x168] sm:$0xff]  ;;  %v276_v39 = vld [vmem:[#allocation7 + $0x150] sm:$0xff]  ;;  %p11281_p6 = pnand %p11280_p5, %p11274_p2 }
  0x57   :  { %357 = vmatpush1.msra.mxu0 %v304_v23  ;;  %10996 = vmatpush1.msra.mxu1 %v11417_v24  ;;  %v277_v37 = vld [vmem:[#allocation7 + $0x158] sm:$0xff]  ;;  %v11441_v40 = vld [vmem:[#allocation7 + $0x160] sm:$0xff]  ;;  %v11444_v42 = vld [vmem:[#allocation7 + $0x130] sm:$0xff] }
  0x58   :  { %358 = vmatprep.subr.mxu0 %v298_v25  ;;  %10981 = vmatprep.subr.mxu1 %v11420_v26  ;;  %v270_v41 = vld [vmem:[#allocation7 + $0x120] sm:$0xff]  ;;  %v269_v43 = vld [vmem:[#allocation7 + $0x118] sm:$0xff]  ;;  %v11447_v44 = vld [vmem:[#allocation7 + $0x128] sm:$0xff] }
  0x59   :  { %359 = vmatpush1.msra.mxu0 %v297_v27  ;;  %10997 = vmatpush1.msra.mxu1 %v11423_v28  ;;  %v263_v45 = vld [vmem:[#allocation7 + $0xe8] sm:$0xff]  ;;  %v11450_v46 = vld [vmem:[#allocation7 + $0xf8] sm:$0xff]  ;;  %v262_v47 = vld [vmem:[#allocation7 + $0xe0] sm:$0xff] }
  0x5a   :  { %360 = vmatprep.subr.mxu0 %v291_v29  ;;  %10982 = vmatprep.subr.mxu1 %v11426_v30  ;;  %v11453_v48 = vld [vmem:[#allocation7 + $0xf0] sm:$0xff]  ;;  %v11456_v50 = vld [vmem:[#allocation7 + $0xc0] sm:$0xff]  ;;  %v255_v51 = vld [vmem:[#allocation7 + $0xa8] sm:$0xff] }
  0x5b   :  { %361 = vmatpush1.msra.mxu0 %v290_v31  ;;  %10998 = vmatpush1.msra.mxu1 %v11429_v32  ;;  %v256_v49 = vld [vmem:[#allocation7 + $0xb0] sm:$0xff]  ;;  %v11459_v52 = vld [vmem:[#allocation7 + $0xb8] sm:$0xff]  ;;  %v11462_v54 = vld [vmem:[#allocation7 + $0x88] sm:$0xff] }
  0x5c   :  { %362 = vmatprep.subr.mxu0 %v284_v33  ;;  %10983 = vmatprep.subr.mxu1 %v11432_v34  ;;  %v249_v53 = vld [vmem:[#allocation7 + $0x78] sm:$0xff]  ;;  %v248_v55 = vld [vmem:[#allocation7 + $0x70] sm:$0xff]  ;;  %v11465_v56 = vld [vmem:[#allocation7 + $0x80] sm:$0xff] }
  0x5d   :  { %363 = vmatpush1.msra.mxu0 %v283_v35  ;;  %10999 = vmatpush1.msra.mxu1 %v11435_v36  ;;  %v242_v57 = vld [vmem:[#allocation7 + $0x40] sm:$0xff]  ;;  %v11468_v58 = vld [vmem:[#allocation7 + $0x50] sm:$0xff]  ;;  %v241_v59 = vld [vmem:[#allocation7 + $0x38] sm:$0xff] }
  0x5e   :  { %364 = vmatprep.subr.mxu0 %v277_v37  ;;  %10984 = vmatprep.subr.mxu1 %v11438_v38  ;;  %v11471_v60 = vld [vmem:[#allocation7 + $0x48] sm:$0xff]  ;;  %v11474_v62 = vld [vmem:[#allocation7 + $0x18] sm:$0xff]  ;;  %v234_v63 = vld [vmem:[#allocation7] sm:$0xff] }
  0x5f   :  { %365 = vmatpush1.msra.mxu0 %v276_v39  ;;  %11000 = vmatpush1.msra.mxu1 %v11441_v40  ;;  %v235_v61 = vld [vmem:[#allocation7 + $0x8] sm:$0xff]  ;;  %v11477_v1 = vld [vmem:[#allocation7 + $0x10] sm:$0xff]  ;;  %v11480_v3 = vld [vmem:[#allocation2] sm:$0xff] }
  0x60   :  { %366 = vmatprep.subr.mxu0 %v270_v41  ;;  %10985 = vmatprep.subr.mxu1 %v11444_v42  ;;  %v11483_v5 = vld [vmem:[#allocation2 + $0x80] sm:$0xff]  ;;  %v345_v7 = vld [vmem:[#allocation7 + $0x378] sm:$0xff]  ;;  %v11490_v9 = vld [vmem:[#allocation2 + $0x8] sm:$0xff] }
  0x61   :  { %367 = vmatpush1.msra.mxu0 %v269_v43  ;;  %11001 = vmatpush1.msra.mxu1 %v11447_v44  ;;  %v11494_v11 = vld [vmem:[#allocation2 + $0x88] sm:$0xff]  ;;  %v338_v13 = vld [vmem:[#allocation7 + $0x340] sm:$0xff]  ;;  %v11503_v15 = vld [vmem:[#allocation2 + $0x90] sm:$0xff] }
  0x62   :  { %368 = vmatprep.subr.mxu0 %v263_v45  ;;  %10986 = vmatprep.subr.mxu1 %v11450_v46  ;;  %v11509_v17 = vld [vmem:[#allocation2 + $0x18] sm:$0xff]  ;;  %v11518_v21 = vld [vmem:[#allocation2 + $0x20] sm:$0xff]  ;;  %v11528_v25 = vld [vmem:[#allocation2 + $0x28] sm:$0xff] }
  0x63   :  { %369 = vmatpush1.msra.mxu0 %v262_v47  ;;  %11002 = vmatpush1.msra.mxu1 %v11453_v48  ;;  %v11512_v19 = vld [vmem:[#allocation2 + $0x98] sm:$0xff]  ;;  %v11521_v23 = vld [vmem:[#allocation2 + $0xa0] sm:$0xff]  ;;  %v11531_v27 = vld [vmem:[#allocation2 + $0xa8] sm:$0xff] }
  0x64   :  { %370 = vmatprep.subr.mxu0 %v256_v49  ;;  %10987 = vmatprep.subr.mxu1 %v11456_v50  ;;  %v11541_v29 = vld [vmem:[#allocation2 + $0xb0] sm:$0xff]  ;;  %v11551_v31 = vld [vmem:[#allocation2 + $0xb8] sm:$0xff]  ;;  %v11561_v33 = vld [vmem:[#allocation2 + $0xc0] sm:$0xff] }
  0x65   :  { %371 = vmatpush1.msra.mxu0 %v255_v51  ;;  %11003 = vmatpush1.msra.mxu1 %v11459_v52  ;;  %v275_v35 = vld [vmem:[#allocation7 + $0x148] sm:$0xff]  ;;  %v11580_v39 = vld [vmem:[#allocation2 + $0xd0] sm:$0xff]  ;;  %v11586_v41 = vld [vmem:[#allocation2 + $0x58] sm:$0xff] }
  0x66   :  { %372 = vmatprep.subr.mxu0 %v249_v53  ;;  %10988 = vmatprep.subr.mxu1 %v11462_v54  ;;  %v11571_v37 = vld [vmem:[#allocation2 + $0xc8] sm:$0xff]  ;;  %v11589_v43 = vld [vmem:[#allocation2 + $0xd8] sm:$0xff]  ;;  %v11596_v45 = vld [vmem:[#allocation2 + $0x60] sm:$0xff] }
  0x67   :  { %373 = vmatpush1.msra.mxu0 %v248_v55  ;;  %11004 = vmatpush1.msra.mxu1 %v11465_v56  ;;  %v11599_v47 = vld [vmem:[#allocation2 + $0xe0] sm:$0xff]  ;;  %v11609_v49 = vld [vmem:[#allocation2 + $0xe8] sm:$0xff]  ;;  %v11629_v51 = vld [vmem:[#allocation2 + $0xf8] sm:$0xff] }
  0x68   :  { %374 = vmatprep.subr.mxu0 %v242_v57  ;;  %10989 = vmatprep.subr.mxu1 %v11468_v58  ;;  %v11653_v53 = vld [vmem:[#allocation2 + $0x110] sm:$0xff]  ;;  %v11666_v55 = vld [vmem:[#allocation2 + $0x120] sm:$0xff] }
  0x69   :  { %375 = vmatpush1.msra.mxu0 %v241_v59  ;;  %11005 = vmatpush1.msra.mxu1 %v11471_v60  ;;  %v11678_v57 = vld [vmem:[#allocation2 + $0x130] sm:$0xff]  ;;  %v11690_v59 = vld [vmem:[#allocation2 + $0x140] sm:$0xff] }
  0x6a   :  { %376 = vmatprep.subr.mxu0 %v235_v61  ;;  %10990 = vmatprep.subr.mxu1 %v11474_v62  ;;  %16618 = vst [vmem:[#allocation19_spill] sm:$0xff] %v11690_v59  ;;  %v11702_v61 = vld [vmem:[#allocation2 + $0x150] sm:$0xff] }
  0x6b   :  { %377 = vmatpush1.msra.mxu0 %v234_v63  ;;  %11006 = vmatpush1.msra.mxu1 %v11477_v1  ;;  %16620 = vst [vmem:[#allocation21_spill] sm:$0xff] %v11702_v61  ;;  %v11714_v63 = vld [vmem:[#allocation2 + $0x160] sm:$0xff] }
  0x6c   :  { %411 = vmatmul.mubr.f32.vlgmr.msra.gmra.mxu0 %v11480_v3  ;;  %795 = vmatprep.subr.mxu0 %v11386_v2  ;;  %v11500_v2 = vld [vmem:[#allocation2 + $0x10] sm:$0xff]  ;;  %16622 = vst [vmem:[#allocation23_spill] sm:$0xff] %v11714_v63 }
  0x6d   :  { %956 = vmatmul.mubr.f32.vlgmr.msra.gmra.mxu1 %v11483_v5  ;;  %796 = vmatpush1.msra.mxu0 %v11389_v4  ;;  %v331_v4 = vld [vmem:[#allocation7 + $0x308] sm:$0xff] }
  0x6e   :  { %416 = vmatprep.mubr.f32.mxu0 %v11315_v0  ;;  %961 = vmatprep.mubr.f32.mxu1 %v11315_v0 }
  0x6f   :  { %10847 = vmatprep.subr.mxu1 %v345_v7  ;;  %797 = vmatprep.subr.mxu0 %v11391_v6  ;;  %v324_v6 = vld [vmem:[#allocation7 + $0x2d0] sm:$0xff] }
  0x70   :  { %417 = vmatmul.mubr.f32.gmra.mxu0 %v11490_v9  ;;  %10848 = vmatpush3.msra.mxu1 %v345_v7  ;;  %v11726_v7 = vld [vmem:[#allocation2 + $0x170] sm:$0xff] }
  0x71   :  { %962 = vmatmul.mubr.f32.gmra.mxu1 %v11494_v11  ;;  %422 = vmatprep.mubr.f32.mxu0 %v11315_v0  ;;  %16624 = vst [vmem:[#allocation25_spill] sm:$0xff] %v11726_v7 }
  0x72   :  { %967 = vmatprep.mubr.f32.mxu1 %v11315_v0  ;;  %10849 = vmatprep.subr.mxu1 %v338_v13 }
  0x73   :  { %798 = vmatpush1.msra.mxu0 %v11394_v8  ;;  %10850 = vmatpush3.msra.mxu1 %v338_v13  ;;  %v317_v8 = vld [vmem:[#allocation7 + $0x298] sm:$0xff] }
  0x74   :  { %423 = vmatmul.mubr.f32.gmra.mxu0 %v11500_v2  ;;  %10851 = vmatprep.subr.mxu1 %v331_v4  ;;  %v11732_v13 = vld [vmem:[#allocation2 + $0x178] sm:$0xff] }
  0x75   :  { %968 = vmatmul.mubr.f32.gmra.mxu1 %v11503_v15  ;;  %428 = vmatprep.mubr.f32.mxu0 %v11315_v0  ;;  %16625 = vst [vmem:[#allocation26_spill] sm:$0xff] %v11732_v13 }
  0x76   :  { %973 = vmatprep.mubr.f32.mxu1 %v11315_v0  ;;  %10852 = vmatpush3.msra.mxu1 %v331_v4  ;;  %v11738_v4 = vld [vmem:[#allocation2 + $0x180] sm:$0xff] }
  0x77   :  { %799 = vmatprep.subr.mxu0 %v11397_v10  ;;  %10853 = vmatprep.subr.mxu1 %v324_v6  ;;  %v310_v10 = vld [vmem:[#allocation7 + $0x260] sm:$0xff]  ;;  %16626 = vst [vmem:[#allocation27_spill] sm:$0xff] %v11738_v4 }
  0x78   :  { %429 = vmatmul.mubr.f32.gmra.mxu0 %v11509_v17  ;;  %10854 = vmatpush3.msra.mxu1 %v324_v6  ;;  %v344_v6 = vld [vmem:[#allocation7 + $0x370] sm:$0xff] }
  0x79   :  { %974 = vmatmul.mubr.f32.gmra.mxu1 %v11512_v19  ;;  %434 = vmatprep.mubr.f32.mxu0 %v11315_v0 }
  0x7a   :  { %979 = vmatprep.mubr.f32.mxu1 %v11315_v0  ;;  %800 = vmatpush1.msra.mxu0 %v11399_v12  ;;  %v303_v12 = vld [vmem:[#allocation7 + $0x228] sm:$0xff] }
  0x7b   :  { %801 = vmatprep.subr.mxu0 %v11402_v14  ;;  %10855 = vmatprep.subr.mxu1 %v317_v8  ;;  %v11538_v14 = vld [vmem:[#allocation2 + $0x30] sm:$0xff] }
  0x7c   :  { %435 = vmatmul.mubr.f32.gmra.mxu0 %v11518_v21  ;;  %10856 = vmatpush3.msra.mxu1 %v317_v8  ;;  %v11744_v8 = vld [vmem:[#allocation2 + $0x188] sm:$0xff] }
  0x7d   :  { %980 = vmatmul.mubr.f32.gmra.mxu1 %v11521_v23  ;;  %440 = vmatprep.mubr.f32.mxu0 %v11315_v0 }
  0x7e   :  { %985 = vmatprep.mubr.f32.mxu1 %v11315_v0  ;;  %802 = vmatpush1.msra.mxu0 %v11405_v16  ;;  %v296_v16 = vld [vmem:[#allocation7 + $0x1f0] sm:$0xff] }
  0x7f   :  { %803 = vmatprep.subr.mxu0 %v11408_v18  ;;  %10857 = vmatprep.subr.mxu1 %v310_v10  ;;  %v11548_v18 = vld [vmem:[#allocation2 + $0x38] sm:$0xff] }
  0x80   :  { %441 = vmatmul.mubr.f32.gmra.mxu0 %v11528_v25  ;;  %10858 = vmatpush3.msra.mxu1 %v310_v10  ;;  %v11750_v10 = vld [vmem:[#allocation2 + $0x190] sm:$0xff] }
  0x81   :  { %986 = vmatmul.mubr.f32.gmra.mxu1 %v11531_v27  ;;  %446 = vmatprep.mubr.f32.mxu0 %v11315_v0 }
  0x82   :  { %991 = vmatprep.mubr.f32.mxu1 %v11315_v0  ;;  %804 = vmatpush1.msra.mxu0 %v11411_v20  ;;  %v289_v20 = vld [vmem:[#allocation7 + $0x1b8] sm:$0xff] }
  0x83   :  { %10859 = vmatprep.subr.mxu1 %v303_v12  ;;  %805 = vmatprep.subr.mxu0 %v11414_v22  ;;  %v11558_v22 = vld [vmem:[#allocation2 + $0x40] sm:$0xff] }
  0x84   :  { %447 = vmatmul.mubr.f32.gmra.mxu0 %v11538_v14  ;;  %10860 = vmatpush3.msra.mxu1 %v303_v12  ;;  %v11756_v12 = vld [vmem:[#allocation2 + $0x198] sm:$0xff] }
  0x85   :  { %992 = vmatmul.mubr.f32.gmra.mxu1 %v11541_v29  ;;  %452 = vmatprep.mubr.f32.mxu0 %v11315_v0 }
  0x86   :  { %997 = vmatprep.mubr.f32.mxu1 %v11315_v0  ;;  %806 = vmatpush1.msra.mxu0 %v11417_v24  ;;  %v282_v24 = vld [vmem:[#allocation7 + $0x180] sm:$0xff] }
  0x87   :  { %10861 = vmatprep.subr.mxu1 %v296_v16  ;;  %807 = vmatprep.subr.mxu0 %v11420_v26  ;;  %v11568_v26 = vld [vmem:[#allocation2 + $0x48] sm:$0xff] }
  0x88   :  { %453 = vmatmul.mubr.f32.gmra.mxu0 %v11548_v18  ;;  %10862 = vmatpush3.msra.mxu1 %v296_v16  ;;  %v11762_v16 = vld [vmem:[#allocation2 + $0x1a0] sm:$0xff] }
  0x89   :  { %998 = vmatmul.mubr.f32.gmra.mxu1 %v11551_v31  ;;  %458 = vmatprep.mubr.f32.mxu0 %v11315_v0 }
  0x8a   :  { %1003 = vmatprep.mubr.f32.mxu1 %v11315_v0  ;;  %808 = vmatpush1.msra.mxu0 %v11423_v28  ;;  %v268_v28 = vld [vmem:[#allocation7 + $0x110] sm:$0xff] }
  0x8b   :  { %10863 = vmatprep.subr.mxu1 %v289_v20  ;;  %809 = vmatprep.subr.mxu0 %v11426_v30  ;;  %v11577_v30 = vld [vmem:[#allocation2 + $0x50] sm:$0xff] }
  0x8c   :  { %459 = vmatmul.mubr.f32.gmra.mxu0 %v11558_v22  ;;  %10864 = vmatpush3.msra.mxu1 %v289_v20  ;;  %v11768_v20 = vld [vmem:[#allocation2 + $0x1a8] sm:$0xff] }
  0x8d   :  { %1004 = vmatmul.mubr.f32.gmra.mxu1 %v11561_v33  ;;  %464 = vmatprep.mubr.f32.mxu0 %v11315_v0 }
  0x8e   :  { %1009 = vmatprep.mubr.f32.mxu1 %v11315_v0  ;;  %10865 = vmatprep.subr.mxu1 %v282_v24 }
  0x8f   :  { %810 = vmatpush1.msra.mxu0 %v11429_v32  ;;  %10866 = vmatpush3.msra.mxu1 %v282_v24  ;;  %v261_v32 = vld [vmem:[#allocation7 + $0xd8] sm:$0xff]  ;;  %v11774_v24 = vld [vmem:[#allocation2 + $0x1b0] sm:$0xff] }
  0x90   :  { %465 = vmatmul.mubr.f32.gmra.mxu0 %v11568_v26  ;;  %10867 = vmatprep.subr.mxu1 %v275_v35 }
  0x91   :  { %1010 = vmatmul.mubr.f32.gmra.mxu1 %v11571_v37  ;;  %470 = vmatprep.mubr.f32.mxu0 %v11315_v0 }
  0x92   :  { %1015 = vmatprep.mubr.f32.mxu1 %v11315_v0  ;;  %10868 = vmatpush3.msra.mxu1 %v275_v35  ;;  %v11780_v35 = vld [vmem:[#allocation2 + $0x1b8] sm:$0xff] }
  0x93   :  { %811 = vmatprep.subr.mxu0 %v11432_v34  ;;  %10869 = vmatprep.subr.mxu1 %v268_v28  ;;  %v254_v34 = vld [vmem:[#allocation7 + $0xa0] sm:$0xff] }
  0x94   :  { %471 = vmatmul.mubr.f32.gmra.mxu0 %v11577_v30  ;;  %10870 = vmatpush3.msra.mxu1 %v268_v28  ;;  %v11786_v28 = vld [vmem:[#allocation2 + $0x1c0] sm:$0xff] }
  0x95   :  { %1016 = vmatmul.mubr.f32.gmra.mxu1 %v11580_v39  ;;  %476 = vmatprep.mubr.f32.mxu0 %v11315_v0 }
  0x96   :  { %1021 = vmatprep.mubr.f32.mxu1 %v11315_v0  ;;  %812 = vmatpush1.msra.mxu0 %v11435_v36  ;;  %v247_v36 = vld [vmem:[#allocation7 + $0x68] sm:$0xff] }
  0x97   :  { %813 = vmatprep.subr.mxu0 %v11438_v38  ;;  %10871 = vmatprep.subr.mxu1 %v261_v32  ;;  %v11606_v38 = vld [vmem:[#allocation2 + $0x68] sm:$0xff] }
  0x98   :  { %477 = vmatmul.mubr.f32.gmra.mxu0 %v11586_v41  ;;  %10872 = vmatpush3.msra.mxu1 %v261_v32  ;;  %v11792_v32 = vld [vmem:[#allocation2 + $0x1c8] sm:$0xff] }
  0x99   :  { %1022 = vmatmul.mubr.f32.gmra.mxu1 %v11589_v43  ;;  %482 = vmatprep.mubr.f32.mxu0 %v11315_v0 }
  0x9a   :  { %1027 = vmatprep.mubr.f32.mxu1 %v11315_v0  ;;  %814 = vmatpush1.msra.mxu0 %v11441_v40  ;;  %v11616_v40 = vld [vmem:[#allocation2 + $0x70] sm:$0xff] }
  0x9b   :  { %815 = vmatprep.subr.mxu0 %v11444_v42  ;;  %10873 = vmatprep.subr.mxu1 %v254_v34  ;;  %v11619_v42 = vld [vmem:[#allocation2 + $0xf0] sm:$0xff] }
  0x9c   :  { %483 = vmatmul.mubr.f32.gmra.mxu0 %v11596_v45  ;;  %10874 = vmatpush3.msra.mxu1 %v254_v34  ;;  %v11798_v34 = vld [vmem:[#allocation2 + $0x1d0] sm:$0xff] }
  0x9d   :  { %1028 = vmatmul.mubr.f32.gmra.mxu1 %v11599_v47  ;;  %488 = vmatprep.mubr.f32.mxu0 %v11315_v0 }
  0x9e   :  { %1033 = vmatprep.mubr.f32.mxu1 %v11315_v0  ;;  %816 = vmatpush1.msra.mxu0 %v11447_v44  ;;  %v11626_v44 = vld [vmem:[#allocation2 + $0x78] sm:$0xff] }
  0x9f   :  { %10875 = vmatprep.subr.mxu1 %v247_v36  ;;  %817 = vmatprep.subr.mxu0 %v11450_v46  ;;  %v240_v46 = vld [vmem:[#allocation7 + $0x30] sm:$0xff] }
  0xa0   :  { %489 = vmatmul.mubr.f32.gmra.mxu0 %v11606_v38  ;;  %10876 = vmatpush3.msra.mxu1 %v247_v36  ;;  %v11804_v36 = vld [vmem:[#allocation2 + $0x1d8] sm:$0xff] }
  0xa1   :  { %1034 = vmatmul.mubr.f32.gmra.mxu1 %v11609_v49  ;;  %494 = vmatprep.mubr.f32.mxu0 %v11315_v0 }
  0xa2   :  { %1039 = vmatprep.mubr.f32.mxu1 %v11315_v0  ;;  %818 = vmatpush1.msra.mxu0 %v11453_v48  ;;  %v11637_v48 = vld [vmem:[#allocation2 + $0x100] sm:$0xff] }
  0xa3   :  { %819 = vmatprep.subr.mxu0 %v11456_v50  ;;  %10877 = vmatprep.subr.mxu1 %v240_v46  ;;  %v11645_v50 = vld [vmem:[#allocation2 + $0x108] sm:$0xff] }
  0xa4   :  { %495 = vmatmul.mubr.f32.gmra.mxu0 %v11616_v40  ;;  %10878 = vmatpush3.msra.mxu1 %v240_v46  ;;  %v11810_v46 = vld [vmem:[#allocation2 + $0x1e0] sm:$0xff] }
  0xa5   :  { %1040 = vmatmul.mubr.f32.gmra.mxu1 %v11619_v42  ;;  %500 = vmatprep.mubr.f32.mxu0 %v11315_v0 }
  0xa6   :  { %1045 = vmatprep.mubr.f32.mxu1 %v11315_v0  ;;  %820 = vmatpush1.msra.mxu0 %v11459_v52  ;;  %v2139_v52 = vld [vmem:[#allocation8 + $0x1e8] sm:$0xff] }
  0xa7   :  { %821 = vmatprep.subr.mxu0 %v11462_v54  ;;  %2142 = vmatprep.subr.mxu1 %v2139_v52  ;;  %v11660_v54 = vld [vmem:[#allocation2 + $0x118] sm:$0xff]  ;;  %v11816_v52 = vld [vmem:[#allocation2 + $0x1e8] sm:$0xff] }
  0xa8   :  { %501 = vmatmul.mubr.f32.gmra.mxu0 %v11626_v44 }
  0xa9   :  { %1046 = vmatmul.mubr.f32.gmra.mxu1 %v11629_v51  ;;  %506 = vmatprep.mubr.f32.mxu0 %v11315_v0 }
  0xaa   :  { %1051 = vmatprep.mubr.f32.mxu1 %v11315_v0  ;;  %822 = vmatpush1.msra.mxu0 %v11465_v56  ;;  %v11672_v56 = vld [vmem:[#allocation2 + $0x128] sm:$0xff] }
  0xab   :  { %823 = vmatprep.subr.mxu0 %v11468_v58  ;;  %v11684_v58 = vld [vmem:[#allocation2 + $0x138] sm:$0xff] }
  0xac   :  { %507 = vmatmul.mubr.f32.gmra.mxu0 %v11483_v5 }
  0xad   :  { %1052 = vmatmul.mubr.f32.gmra.mxu1 %v11637_v48  ;;  %512 = vmatprep.mubr.f32.mxu0 %v11315_v0 }
  0xae   :  { %1057 = vmatprep.mubr.f32.mxu1 %v11315_v0  ;;  %824 = vmatpush1.msra.mxu0 %v11471_v60  ;;  %v11696_v60 = vld [vmem:[#allocation2 + $0x148] sm:$0xff] }
  0xaf   :  { %825 = vmatprep.subr.mxu0 %v11474_v62  ;;  %16619 = vst [vmem:[#allocation20_spill] sm:$0xff] %v11696_v60  ;;  %v11708_v62 = vld [vmem:[#allocation2 + $0x158] sm:$0xff] }
  0xb0   :  { %513 = vmatmul.mubr.f32.gmra.mxu0 %v11494_v11  ;;  %16621 = vst [vmem:[#allocation22_spill] sm:$0xff] %v11708_v62 }
  0xb1   :  { %1058 = vmatmul.mubr.f32.gmra.mxu1 %v11645_v50  ;;  %518 = vmatprep.mubr.f32.mxu0 %v11315_v0 }
  0xb2   :  { %1063 = vmatprep.mubr.f32.mxu1 %v11315_v0  ;;  %826 = vmatpush1.msra.mxu0 %v11477_v1  ;;  %v11720_v1 = vld [vmem:[#allocation2 + $0x168] sm:$0xff] }
  0xb3   :  { %16623 = vst [vmem:[#allocation24_spill] sm:$0xff] %v11720_v1  ;;  %1244 = vmatprep.subr.mxu0 %v344_v6  ;;  %v11822_v6 = vld [vmem:[#allocation2 + $0x1f0] sm:$0xff] }
  0xb4   :  { %519 = vmatmul.mubr.f32.gmra.mxu0 %v11503_v15 }
  0xb5   :  { %1064 = vmatmul.mubr.f32.gmra.mxu1 %v11653_v53  ;;  %524 = vmatprep.mubr.f32.mxu0 %v11315_v0 }
  0xb6   :  { %1069 = vmatprep.mubr.f32.mxu1 %v11315_v0 }
  0xb8   :  { %525 = vmatmul.mubr.f32.gmra.mxu0 %v11512_v19 }
  0xb9   :  { %1070 = vmatmul.mubr.f32.gmra.mxu1 %v11660_v54  ;;  %530 = vmatprep.mubr.f32.mxu0 %v11315_v0 }
  0xba   :  { %1075 = vmatprep.mubr.f32.mxu1 %v11315_v0 }
  0xbc   :  { %531 = vmatmul.mubr.f32.gmra.mxu0 %v11521_v23 }
  0xbd   :  { %1076 = vmatmul.mubr.f32.gmra.mxu1 %v11666_v55  ;;  %536 = vmatprep.mubr.f32.mxu0 %v11315_v0 }
  0xbe   :  { %1081 = vmatprep.mubr.f32.mxu1 %v11315_v0 }
  0xc0   :  { %537 = vmatmul.mubr.f32.gmra.mxu0 %v11531_v27 }
  0xc1   :  { %1082 = vmatmul.mubr.f32.gmra.mxu1 %v11672_v56  ;;  %542 = vmatprep.mubr.f32.mxu0 %v11315_v0 }
  0xc2   :  { %1087 = vmatprep.mubr.f32.mxu1 %v11315_v0 }
  0xc4   :  { %543 = vmatmul.mubr.f32.gmra.mxu0 %v11541_v29 }
  0xc5   :  { %1088 = vmatmul.mubr.f32.gmra.mxu1 %v11678_v57  ;;  %548 = vmatprep.mubr.f32.mxu0 %v11315_v0 }
  0xc6   :  { %1093 = vmatprep.mubr.f32.mxu1 %v11315_v0 }
  0xc8   :  { %549 = vmatmul.mubr.f32.gmra.mxu0 %v11551_v31 }
  0xc9   :  { %1094 = vmatmul.mubr.f32.gmra.mxu1 %v11684_v58  ;;  %554 = vmatprep.mubr.f32.mxu0 %v11315_v0 }
  0xca   :  { %1099 = vmatprep.mubr.f32.mxu1 %v11315_v0 }
  0xcc   :  { %555 = vmatmul.mubr.f32.gmra.mxu0 %v11561_v33 }
  0xcd   :  { %1100 = vmatmul.mubr.f32.gmra.mxu1 %v11690_v59  ;;  %560 = vmatprep.mubr.f32.mxu0 %v11315_v0 }
  0xce   :  { %1105 = vmatprep.mubr.f32.mxu1 %v11315_v0 }
  0xd0   :  { %561 = vmatmul.mubr.f32.gmra.mxu0 %v11571_v37 }
  0xd1   :  { %1106 = vmatmul.mubr.f32.gmra.mxu1 %v11696_v60  ;;  %566 = vmatprep.mubr.f32.mxu0 %v11315_v0 }
  0xd2   :  { %1111 = vmatprep.mubr.f32.mxu1 %v11315_v0 }
  0xd4   :  { %567 = vmatmul.mubr.f32.gmra.mxu0 %v11580_v39 }
  0xd5   :  { %1112 = vmatmul.mubr.f32.gmra.mxu1 %v11702_v61  ;;  %572 = vmatprep.mubr.f32.mxu0 %v11315_v0 }
  0xd6   :  { %1117 = vmatprep.mubr.f32.mxu1 %v11315_v0 }
  0xd8   :  { %573 = vmatmul.mubr.f32.gmra.mxu0 %v11589_v43 }
  0xd9   :  { %1118 = vmatmul.mubr.f32.gmra.mxu1 %v11708_v62  ;;  %578 = vmatprep.mubr.f32.mxu0 %v11315_v0 }
  0xda   :  { %1123 = vmatprep.mubr.f32.mxu1 %v11315_v0 }
  0xdc   :  { %579 = vmatmul.mubr.f32.gmra.mxu0 %v11599_v47 }
  0xdd   :  { %1124 = vmatmul.mubr.f32.gmra.mxu1 %v11714_v63  ;;  %584 = vmatprep.mubr.f32.mxu0 %v11315_v0 }
  0xde   :  { %1129 = vmatprep.mubr.f32.mxu1 %v11315_v0 }
  0xe0   :  { %585 = vmatmul.mubr.f32.gmra.mxu0 %v11609_v49 }
  0xe1   :  { %1130 = vmatmul.mubr.f32.gmra.mxu1 %v11720_v1  ;;  %590 = vmatprep.mubr.f32.mxu0 %v11315_v0 }
  0xe2   :  { %1135 = vmatprep.mubr.f32.mxu1 %v11315_v0 }
  0xe4   :  { %591 = vmatmul.mubr.f32.gmra.mxu0 %v11619_v42 }
  0xe5   :  { %1136 = vmatmul.mubr.f32.gmra.mxu1 %v11726_v7  ;;  %596 = vmatprep.mubr.f32.mxu0 %v11315_v0 }
  0xe6   :  { %1141 = vmatprep.mubr.f32.mxu1 %v11315_v0 }
  0xe8   :  { %597 = vmatmul.mubr.f32.gmra.mxu0 %v11629_v51 }
  0xe9   :  { %1142 = vmatmul.mubr.f32.gmra.mxu1 %v11732_v13  ;;  %602 = vmatprep.mubr.f32.mxu0 %v11315_v0 }
  0xea   :  { %1147 = vmatprep.mubr.f32.mxu1 %v11315_v0 }
  0xec   :  { %603 = vmatmul.mubr.f32.gmra.mxu0 %v11637_v48 }
  0xed   :  { %1148 = vmatmul.mubr.f32.gmra.mxu1 %v11738_v4  ;;  %608 = vmatprep.mubr.f32.mxu0 %v11315_v0 }
  0xee   :  { %1153 = vmatprep.mubr.f32.mxu1 %v11315_v0 }
  0xf0   :  { %609 = vmatmul.mubr.f32.gmra.mxu0 %v11645_v50 }
  0xf1   :  { %1154 = vmatmul.mubr.f32.gmra.mxu1 %v11744_v8  ;;  %614 = vmatprep.mubr.f32.mxu0 %v11315_v0 }
  0xf2   :  { %1159 = vmatprep.mubr.f32.mxu1 %v11315_v0 }
  0xf4   :  { %615 = vmatmul.mubr.f32.gmra.mxu0 %v11653_v53 }
  0xf5   :  { %1160 = vmatmul.mubr.f32.gmra.mxu1 %v11750_v10  ;;  %620 = vmatprep.mubr.f32.mxu0 %v11315_v0 }
  0xf6   :  { %1165 = vmatprep.mubr.f32.mxu1 %v11315_v0 }
  0xf8   :  { %621 = vmatmul.mubr.f32.gmra.mxu0 %v11660_v54 }
  0xf9   :  { %1166 = vmatmul.mubr.f32.gmra.mxu1 %v11756_v12  ;;  %626 = vmatprep.mubr.f32.mxu0 %v11315_v0 }
  0xfa   :  { %1171 = vmatprep.mubr.f32.mxu1 %v11315_v0 }
  0xfc   :  { %627 = vmatmul.mubr.f32.gmra.mxu0 %v11666_v55 }
  0xfd   :  { %1172 = vmatmul.mubr.f32.gmra.mxu1 %v11762_v16  ;;  %632 = vmatprep.mubr.f32.mxu0 %v11315_v0 }
  0xfe   :  { %1177 = vmatprep.mubr.f32.mxu1 %v11315_v0 }
 0x100   :  { %633 = vmatmul.mubr.f32.gmra.mxu0 %v11672_v56 }
 0x101   :  { %1178 = vmatmul.mubr.f32.gmra.mxu1 %v11768_v20  ;;  %638 = vmatprep.mubr.f32.mxu0 %v11315_v0 }
 0x102   :  { %1183 = vmatprep.mubr.f32.mxu1 %v11315_v0 }
 0x104   :  { %639 = vmatmul.mubr.f32.gmra.mxu0 %v11678_v57 }
 0x105   :  { %1184 = vmatmul.mubr.f32.gmra.mxu1 %v11774_v24  ;;  %644 = vmatprep.mubr.f32.mxu0 %v11315_v0 }
 0x106   :  { %1189 = vmatprep.mubr.f32.mxu1 %v11315_v0 }
 0x108   :  { %645 = vmatmul.mubr.f32.gmra.mxu0 %v11684_v58 }
 0x109   :  { %1190 = vmatmul.mubr.f32.gmra.mxu1 %v11780_v35  ;;  %650 = vmatprep.mubr.f32.mxu0 %v11315_v0 }
 0x10a   :  { %1195 = vmatprep.mubr.f32.mxu1 %v11315_v0 }
 0x10c   :  { %651 = vmatmul.mubr.f32.gmra.mxu0 %v11690_v59 }
 0x10d   :  { %1196 = vmatmul.mubr.f32.gmra.mxu1 %v11786_v28  ;;  %656 = vmatprep.mubr.f32.mxu0 %v11315_v0 }
 0x10e   :  { %1201 = vmatprep.mubr.f32.mxu1 %v11315_v0 }
 0x110   :  { %657 = vmatmul.mubr.f32.gmra.mxu0 %v11696_v60  ;;  %v2134_v60 = vld [vmem:[#allocation8 + $0x1c0] sm:$0xff] }
 0x111   :  { %1202 = vmatmul.mubr.f32.gmra.mxu1 %v11792_v32  ;;  %662 = vmatprep.mubr.f32.mxu0 %v11315_v0 }
 0x112   :  { %1207 = vmatprep.mubr.f32.mxu1 %v11315_v0 }
 0x114   :  { %663 = vmatmul.mubr.f32.gmra.mxu0 %v11702_v61 }
 0x115   :  { %1208 = vmatmul.mubr.f32.gmra.mxu1 %v11798_v34  ;;  %668 = vmatprep.mubr.f32.mxu0 %v11315_v0 }
 0x116   :  { %1213 = vmatprep.mubr.f32.mxu1 %v11315_v0 }
 0x118   :  { %669 = vmatmul.mubr.f32.gmra.mxu0 %v11708_v62 }
 0x119   :  { %1214 = vmatmul.mubr.f32.gmra.mxu1 %v11804_v36  ;;  %674 = vmatprep.mubr.f32.mxu0 %v11315_v0 }
 0x11a   :  { %1219 = vmatprep.mubr.f32.mxu1 %v11315_v0 }
 0x11c   :  { %675 = vmatmul.mubr.f32.gmra.mxu0 %v11714_v63  ;;  %v11828_v63 = vld [vmem:[#allocation2 + $0x1f8] sm:$0xff] }
 0x11d   :  { %1220 = vmatmul.mubr.f32.gmra.mxu1 %v11810_v46  ;;  %680 = vmatprep.mubr.f32.mxu0 %v11315_v0 }
 0x11e   :  { %1225 = vmatprep.mubr.f32.mxu1 %v11315_v0 }
 0x120   :  { %681 = vmatmul.mubr.f32.gmra.mxu0 %v11720_v1  ;;  %v2138_v1 = vld [vmem:[#allocation8 + $0x1e0] sm:$0xff] }
 0x121   :  { %1226 = vmatmul.mubr.f32.gmra.mxu1 %v11816_v52  ;;  %686 = vmatprep.mubr.f32.mxu0 %v11315_v0 }
 0x122   :  { %1231 = vmatprep.mubr.f32.mxu1 %v11315_v0 }
 0x124   :  { %687 = vmatmul.mubr.f32.gmra.mxu0 %v11726_v7  ;;  %v2135_v7 = vld [vmem:[#allocation8 + $0x1c8] sm:$0xff] }
 0x125   :  { %1232 = vmatmul.mubr.f32.gmra.mxu1 %v11822_v6  ;;  %692 = vmatprep.mubr.f32.mxu0 %v11315_v0 }
 0x126   :  { %1237 = vmatprep.mubr.f32.mxu1 %v11315_v0 }
 0x128   :  { %693 = vmatmul.mubr.f32.gmra.mxu0 %v11732_v13 }
 0x129   :  { %1238 = vmatmul.mubr.f32.gmra.mxu1 %v11828_v63  ;;  %698 = vmatprep.mubr.f32.mxu0 %v11315_v0 }
 0x12a   :  { %10879 = vmatprep.mubr.f32.mxu1 %v11480_v3  ;;  %v2131_v3 = vld [vmem:[#allocation8 + $0x1a8] sm:$0xff] }
 0x12c   :  { %v11834_v62 = vpop.f32.mrf.mxu0  ;;  %699 = vmatmul.mubr.f32.gmra.mxu0 %v11738_v4 }
 0x12d   :  { %16627 = vst [vmem:[#allocation28_spill] sm:$0xff] %v11834_v62  ;;  %v11837_v61 = vpop.f32.mrf.mxu1  ;;  %10880 = vmatmul.mubr.f32.vlgmr.msra.gmra.mxu1 %v11490_v9  ;;  %704 = vmatprep.mubr.f32.mxu0 %v11315_v0  ;;  %v2127_v9 = vld [vmem:[#allocation8 + $0x188] sm:$0xff] }
 0x12e   :  { %16628 = vst [vmem:[#allocation29_spill] sm:$0xff] %v11837_v61  ;;  %v11841_v13 = vpop.f32.mrf.mxu0  ;;  %10882 = vmatprep.mubr.f32.mxu1 %v11500_v2  ;;  %2143 = vmatpush1.msra.mxu1 %v2138_v1  ;;  %v2130_v61 = vld [vmem:[#allocation8 + $0x1a0] sm:$0xff] }
 0x12f   :  { %16629 = vst [vmem:[#allocation30_spill] sm:$0xff] %v11841_v13  ;;  %v11844_v59 = vpop.f32.mrf.mxu1  ;;  %2144 = vmatprep.subr.mxu1 %v2135_v7  ;;  %v2126_v1 = vld [vmem:[#allocation8 + $0x180] sm:$0xff] }
 0x130   :  { %16630 = vst [vmem:[#allocation31_spill] sm:$0xff] %v11844_v59  ;;  %v11846_v62 = vpop.f32.mrf.mxu0  ;;  %705 = vmatmul.mubr.f32.gmra.mxu0 %v11744_v8  ;;  %2145 = vmatpush1.msra.mxu1 %v2134_v60  ;;  %v2123_v60 = vld [vmem:[#allocation8 + $0x168] sm:$0xff] }
 0x131   :  { %v11849_v4 = vpop.f32.mrf.mxu1  ;;  %10883 = vmatmul.mubr.f32.gmra.mxu1 %v11509_v17  ;;  %710 = vmatprep.mubr.f32.mxu0 %v11315_v0  ;;  %v2122_v17 = vld [vmem:[#allocation8 + $0x160] sm:$0xff] }
 0x132   :  { %16631 = vst [vmem:[#allocation32_spill] sm:$0xff] %v11849_v4  ;;  %v11853_v13 = vpop.f32.mrf.mxu0  ;;  %10885 = vmatprep.mubr.f32.mxu1 %v11518_v21  ;;  %2146 = vmatprep.subr.mxu1 %v2131_v3 }
 0x133   :  { %v11856_v2 = vpop.f32.mrf.mxu1  ;;  %2147 = vmatpush1.msra.mxu1 %v2130_v61  ;;  %v2119_v61 = vld [vmem:[#allocation8 + $0x148] sm:$0xff] }
 0x134   :  { %16632 = vst [vmem:[#allocation33_spill] sm:$0xff] %v11856_v2  ;;  %v11858_v7 = vpop.f32.mrf.mxu0  ;;  %711 = vmatmul.mubr.f32.gmra.mxu0 %v11750_v10  ;;  %2148 = vmatprep.subr.mxu1 %v2127_v9  ;;  %v2118_v9 = vld [vmem:[#allocation8 + $0x140] sm:$0xff] }
 0x135   :  { %v11861_v4 = vpop.f32.mrf.mxu1  ;;  %10886 = vmatmul.mubr.f32.gmra.mxu1 %v11528_v25  ;;  %716 = vmatprep.mubr.f32.mxu0 %v11315_v0  ;;  %v2115_v25 = vld [vmem:[#allocation8 + $0x128] sm:$0xff] }
 0x136   :  { %16633 = vst [vmem:[#allocation34_spill] sm:$0xff] %v11861_v4  ;;  %v11865_v59 = vpop.f32.mrf.mxu0  ;;  %10888 = vmatprep.mubr.f32.mxu1 %v11538_v14  ;;  %2149 = vmatpush1.msra.mxu1 %v2126_v1  ;;  %v2114_v1 = vld [vmem:[#allocation8 + $0x120] sm:$0xff] }
 0x137   :  { %v11868_v21 = vpop.f32.mrf.mxu1  ;;  %2150 = vmatprep.subr.mxu1 %v2123_v60 }
 0x138   :  { %16634 = vst [vmem:[#allocation35_spill] sm:$0xff] %v11868_v21  ;;  %v11870_v3 = vpop.f32.mrf.mxu0  ;;  %717 = vmatmul.mubr.f32.gmra.mxu0 %v11756_v12  ;;  %2151 = vmatpush1.msra.mxu1 %v2122_v17  ;;  %v2111_v17 = vld [vmem:[#allocation8 + $0x108] sm:$0xff] }
 0x139   :  { %v11873_v4 = vpop.f32.mrf.mxu1  ;;  %10889 = vmatmul.mubr.f32.gmra.mxu1 %v11548_v18  ;;  %722 = vmatprep.mubr.f32.mxu0 %v11315_v0  ;;  %v2110_v18 = vld [vmem:[#allocation8 + $0x100] sm:$0xff] }
 0x13a   :  { %16635 = vst [vmem:[#allocation36_spill] sm:$0xff] %v11873_v4  ;;  %v11877_v2 = vpop.f32.mrf.mxu0  ;;  %10891 = vmatprep.mubr.f32.mxu1 %v11558_v22  ;;  %2152 = vmatprep.subr.mxu1 %v2119_v61  ;;  %v2107_v61 = vld [vmem:[#allocation8 + $0xe8] sm:$0xff] }
 0x13b   :  { %v11880_v14 = vpop.f32.mrf.mxu1  ;;  %2153 = vmatpush1.msra.mxu1 %v2118_v9 }
 0x13c   :  { %16636 = vst [vmem:[#allocation37_spill] sm:$0xff] %v11880_v14  ;;  %v11882_v60 = vpop.f32.mrf.mxu0  ;;  %723 = vmatmul.mubr.f32.gmra.mxu0 %v11762_v16  ;;  %2154 = vmatprep.subr.mxu1 %v2115_v25  ;;  %v2106_v25 = vld [vmem:[#allocation8 + $0xe0] sm:$0xff] }
 0x13d   :  { %v11885_v4 = vpop.f32.mrf.mxu1  ;;  %10892 = vmatmul.mubr.f32.gmra.mxu1 %v11568_v26  ;;  %728 = vmatprep.mubr.f32.mxu0 %v11315_v0  ;;  %v2103_v26 = vld [vmem:[#allocation8 + $0xc8] sm:$0xff] }
 0x13e   :  { %16637 = vst [vmem:[#allocation38_spill] sm:$0xff] %v11885_v4  ;;  %v11889_v21 = vpop.f32.mrf.mxu0  ;;  %10894 = vmatprep.mubr.f32.mxu1 %v11577_v30  ;;  %2155 = vmatpush1.msra.mxu1 %v2114_v1  ;;  %v2102_v1 = vld [vmem:[#allocation8 + $0xc0] sm:$0xff] }
 0x13f   :  { %v11892_v22 = vpop.f32.mrf.mxu1  ;;  %2156 = vmatprep.subr.mxu1 %v2111_v17 }
 0x140   :  { %16638 = vst [vmem:[#allocation39_spill] sm:$0xff] %v11892_v22  ;;  %v11894_v9 = vpop.f32.mrf.mxu0  ;;  %729 = vmatmul.mubr.f32.gmra.mxu0 %v11768_v20  ;;  %2157 = vmatpush1.msra.mxu1 %v2110_v18  ;;  %v2099_v18 = vld [vmem:[#allocation8 + $0xa8] sm:$0xff] }
 0x141   :  { %v11897_v4 = vpop.f32.mrf.mxu1  ;;  %10895 = vmatmul.mubr.f32.gmra.mxu1 %v11586_v41  ;;  %734 = vmatprep.mubr.f32.mxu0 %v11315_v0  ;;  %v2098_v41 = vld [vmem:[#allocation8 + $0xa0] sm:$0xff] }
 0x142   :  { %16639 = vst [vmem:[#allocation40_spill] sm:$0xff] %v11897_v4  ;;  %v11901_v14 = vpop.f32.mrf.mxu0  ;;  %10897 = vmatprep.mubr.f32.mxu1 %v11596_v45  ;;  %2158 = vmatprep.subr.mxu1 %v2107_v61  ;;  %v2095_v61 = vld [vmem:[#allocation8 + $0x88] sm:$0xff] }
 0x143   :  { %v11904_v30 = vpop.f32.mrf.mxu1  ;;  %2159 = vmatpush1.msra.mxu1 %v2106_v25 }
 0x144   :  { %16640 = vst [vmem:[#allocation41_spill] sm:$0xff] %v11904_v30  ;;  %v11906_v17 = vpop.f32.mrf.mxu0  ;;  %735 = vmatmul.mubr.f32.gmra.mxu0 %v11774_v24  ;;  %2160 = vmatprep.subr.mxu1 %v2103_v26  ;;  %v2094_v26 = vld [vmem:[#allocation8 + $0x80] sm:$0xff] }
 0x145   :  { %v11909_v4 = vpop.f32.mrf.mxu1  ;;  %10898 = vmatmul.mubr.f32.gmra.mxu1 %v11606_v38  ;;  %740 = vmatprep.mubr.f32.mxu0 %v11315_v0  ;;  %v2091_v38 = vld [vmem:[#allocation8 + $0x68] sm:$0xff] }
 0x146   :  { %16641 = vst [vmem:[#allocation42_spill] sm:$0xff] %v11909_v4  ;;  %v11913_v22 = vpop.f32.mrf.mxu0  ;;  %10900 = vmatprep.mubr.f32.mxu1 %v11616_v40  ;;  %2161 = vmatpush1.msra.mxu1 %v2102_v1  ;;  %v2090_v1 = vld [vmem:[#allocation8 + $0x60] sm:$0xff] }
 0x147   :  { %v11916_v45 = vpop.f32.mrf.mxu1  ;;  %2162 = vmatprep.subr.mxu1 %v2099_v18 }
 0x148   :  { %16642 = vst [vmem:[#allocation43_spill] sm:$0xff] %v11916_v45  ;;  %v11918_v25 = vpop.f32.mrf.mxu0  ;;  %741 = vmatmul.mubr.f32.gmra.mxu0 %v11780_v35  ;;  %2163 = vmatpush1.msra.mxu1 %v2098_v41  ;;  %v2087_v41 = vld [vmem:[#allocation8 + $0x48] sm:$0xff] }
 0x149   :  { %v11921_v4 = vpop.f32.mrf.mxu1  ;;  %10901 = vmatmul.mubr.f32.gmra.mxu1 %v11626_v44  ;;  %746 = vmatprep.mubr.f32.mxu0 %v11315_v0  ;;  %v2086_v44 = vld [vmem:[#allocation8 + $0x40] sm:$0xff] }
 0x14a   :  { %16643 = vst [vmem:[#allocation44_spill] sm:$0xff] %v11921_v4  ;;  %v11925_v30 = vpop.f32.mrf.mxu0  ;;  %10903 = vmatprep.mubr.f32.mxu1 %v11483_v5  ;;  %2164 = vmatprep.subr.mxu1 %v2095_v61  ;;  %v2083_v61 = vld [vmem:[#allocation8 + $0x28] sm:$0xff] }
 0x14b   :  { %v11928_v40 = vpop.f32.mrf.mxu1  ;;  %2165 = vmatpush1.msra.mxu1 %v2094_v26 }
 0x14c   :  { %16644 = vst [vmem:[#allocation45_spill] sm:$0xff] %v11928_v40  ;;  %v11930_v18 = vpop.f32.mrf.mxu0  ;;  %747 = vmatmul.mubr.f32.gmra.mxu0 %v11786_v28  ;;  %2166 = vmatprep.subr.mxu1 %v2091_v38  ;;  %v2082_v38 = vld [vmem:[#allocation8 + $0x20] sm:$0xff] }
 0x14d   :  { %v11933_v4 = vpop.f32.mrf.mxu1  ;;  %10904 = vmatmul.mubr.f32.gmra.mxu1 %v11494_v11  ;;  %752 = vmatprep.mubr.f32.mxu0 %v11315_v0  ;;  %v2079_v11 = vld [vmem:[#allocation8 + $0x8] sm:$0xff] }
 0x14e   :  { %16645 = vst [vmem:[#allocation46_spill] sm:$0xff] %v11933_v4  ;;  %v11937_v45 = vpop.f32.mrf.mxu0  ;;  %10906 = vmatprep.mubr.f32.mxu1 %v11503_v15  ;;  %2167 = vmatpush1.msra.mxu1 %v2090_v1  ;;  %v2078_v1 = vld [vmem:[#allocation8] sm:$0xff] }
 0x14f   :  { %v11940_v5 = vpop.f32.mrf.mxu1  ;;  %2168 = vmatprep.subr.mxu1 %v2087_v41 }
 0x150   :  { %16646 = vst [vmem:[#allocation47_spill] sm:$0xff] %v11940_v5  ;;  %v11942_v26 = vpop.f32.mrf.mxu0  ;;  %753 = vmatmul.mubr.f32.gmra.mxu0 %v11792_v32  ;;  %2169 = vmatpush1.msra.mxu1 %v2086_v44 }
 0x151   :  { %v11945_v4 = vpop.f32.mrf.mxu1  ;;  %10907 = vmatmul.mubr.f32.gmra.mxu1 %v11512_v19  ;;  %758 = vmatprep.mubr.f32.mxu0 %v11315_v0 }
 0x152   :  { %16647 = vst [vmem:[#allocation48_spill] sm:$0xff] %v11945_v4  ;;  %v11949_v40 = vpop.f32.mrf.mxu0  ;;  %10909 = vmatprep.mubr.f32.mxu1 %v11521_v23  ;;  %2170 = vmatprep.subr.mxu1 %v2083_v61 }
 0x153   :  { %v11952_v15 = vpop.f32.mrf.mxu1  ;;  %2171 = vmatpush1.msra.mxu1 %v2082_v38 }
 0x154   :  { %16648 = vst [vmem:[#allocation49_spill] sm:$0xff] %v11952_v15  ;;  %v11954_v41 = vpop.f32.mrf.mxu0  ;;  %759 = vmatmul.mubr.f32.gmra.mxu0 %v11798_v34  ;;  %2172 = vmatprep.subr.mxu1 %v2079_v11  ;;  %v12043_v15 = vld [vmem:[#allocation2 + $0x8] sm:$0xff] }
 0x155   :  { %v11957_v44 = vpop.f32.mrf.mxu1  ;;  %10910 = vmatmul.mubr.f32.gmra.mxu1 %v11531_v27  ;;  %764 = vmatprep.mubr.f32.mxu0 %v11315_v0 }
 0x156   :  { %16649 = vst [vmem:[#allocation50_spill] sm:$0xff] %v11957_v44  ;;  %v11961_v19 = vpop.f32.mrf.mxu0  ;;  %10912 = vmatprep.mubr.f32.mxu1 %v11541_v29  ;;  %2173 = vmatpush1.msra.mxu1 %v2078_v1 }
 0x157   :  { %v11964_v23 = vpop.f32.mrf.mxu1  ;;  %3360 = vmatprep.subr.mxu1 %v11315_v0 }
 0x158   :  { %16650 = vst [vmem:[#allocation51_spill] sm:$0xff] %v11964_v23  ;;  %v11967_v61 = vpop.f32.mrf.mxu0  ;;  %765 = vmatmul.mubr.f32.gmra.mxu0 %v11804_v36  ;;  %v337_v23 = vld [vmem:[#allocation7 + $0x338] sm:$0xff] }
 0x159   :  { %v11970_v38 = vpop.f32.mrf.mxu1  ;;  %10913 = vmatmul.mubr.f32.gmra.mxu1 %v11551_v31  ;;  %770 = vmatprep.mubr.f32.mxu0 %v11315_v0 }
 0x15a   :  { %16651 = vst [vmem:[#allocation52_spill] sm:$0xff] %v11970_v38  ;;  %v11974_v27 = vpop.f32.mrf.mxu0  ;;  %10915 = vmatprep.mubr.f32.mxu1 %v11561_v33 }
 0x15b   :  { %v11977_v29 = vpop.f32.mrf.mxu1 }
 0x15c   :  { %16652 = vst [vmem:[#allocation53_spill] sm:$0xff] %v11977_v29  ;;  %v11979_v11 = vpop.f32.mrf.mxu0  ;;  %771 = vmatmul.mubr.f32.gmra.mxu0 %v11810_v46 }
 0x15d   :  { %v11982_v1 = vpop.f32.mrf.mxu1  ;;  %10916 = vmatmul.mubr.f32.gmra.mxu1 %v11571_v37  ;;  %776 = vmatprep.mubr.f32.mxu0 %v11315_v0 }
 0x15e   :  { %16653 = vst [vmem:[#allocation54_spill] sm:$0xff] %v11982_v1  ;;  %v11986_v38 = vpop.f32.mrf.mxu0  ;;  %10918 = vmatprep.mubr.f32.mxu1 %v11580_v39 }
 0x15f   :  { %v11989_v31 = vpop.f32.mrf.mxu1 }
 0x160   :  { %16654 = vst [vmem:[#allocation55_spill] sm:$0xff] %v11989_v31  ;;  %v11991_v44 = vpop.f32.mrf.mxu0  ;;  %777 = vmatmul.mubr.f32.gmra.mxu0 %v11816_v52 }
 0x161   :  { %16655 = vst [vmem:[#allocation56_spill] sm:$0xff] %v11991_v44  ;;  %v11994_v33 = vpop.f32.mrf.mxu1  ;;  %10919 = vmatmul.mubr.f32.gmra.mxu1 %v11589_v43  ;;  %782 = vmatprep.mubr.f32.mxu0 %v11315_v0 }
 0x162   :  { %16656 = vst [vmem:[#allocation57_spill] sm:$0xff] %v11994_v33  ;;  %v11998_v1 = vpop.f32.mrf.mxu0  ;;  %10921 = vmatprep.mubr.f32.mxu1 %v11599_v47 }
 0x163   :  { %v12001_v37 = vpop.f32.mrf.mxu1 }
 0x164   :  { %16657 = vst [vmem:[#allocation58_spill] sm:$0xff] %v12001_v37  ;;  %v12003_v29 = vpop.f32.mrf.mxu0  ;;  %783 = vmatmul.mubr.f32.gmra.mxu0 %v11822_v6 }
 0x165   :  { %16658 = vst [vmem:[#allocation59_spill] sm:$0xff] %v12003_v29  ;;  %v12006_v39 = vpop.f32.mrf.mxu1  ;;  %10922 = vmatmul.mubr.f32.gmra.mxu1 %v11609_v49  ;;  %788 = vmatprep.mubr.f32.mxu0 %v11315_v0  ;;  %v343_v49 = vld [vmem:[#allocation7 + $0x368] sm:$0xff] }
 0x166   :  { %16659 = vst [vmem:[#allocation60_spill] sm:$0xff] %v12006_v39  ;;  %v12010_v33 = vpop.f32.mrf.mxu0  ;;  %10924 = vmatprep.mubr.f32.mxu1 %v11619_v42 }
 0x167   :  { %16660 = vst [vmem:[#allocation61_spill] sm:$0xff] %v12010_v33  ;;  %v12013_v43 = vpop.f32.mrf.mxu1 }
 0x168   :  { %16661 = vst [vmem:[#allocation62_spill] sm:$0xff] %v12013_v43  ;;  %v12015_v31 = vpop.f32.mrf.mxu0  ;;  %789 = vmatmul.mubr.f32.gmra.mxu0 %v11828_v63  ;;  %v12029_v43 = vld [vmem:[#allocation2] sm:$0xff] }
 0x169   :  { %16662 = vst [vmem:[#allocation63_spill] sm:$0xff] %v12015_v31  ;;  %v12018_v47 = vpop.f32.mrf.mxu1  ;;  %10925 = vmatmul.mubr.f32.gmra.mxu1 %v11629_v51  ;;  %859 = vmatprep.mubr.f32.mxu0 %v11315_v0 }
 0x16a   :  { %16663 = vst [vmem:[#allocation64_spill] sm:$0xff] %v12018_v47  ;;  %v12022_v39 = vpop.f32.mrf.mxu0  ;;  %10927 = vmatprep.mubr.f32.mxu1 %v11637_v48  ;;  %v336_v48 = vld [vmem:[#allocation7 + $0x330] sm:$0xff] }
 0x16b   :  { %16664 = vst [vmem:[#allocation65_spill] sm:$0xff] %v12022_v39  ;;  %v12025_v37 = vpop.f32.mrf.mxu1  ;;  %v11087_v39 = vld [vmem:[#allocation2 + $0x1f0] sm:$0xff] }
 0x16c   :  { %16665 = vst [vmem:[#allocation66_spill] sm:$0xff] %v12025_v37  ;;  %v12027_v42 = vpop.f32.mrf.mxu0  ;;  %860 = vmatmul.mubr.f32.vlgmr.msra.gmra.mxu0 %v12029_v43 }
 0x16d   :  { %16666 = vst [vmem:[#allocation67_spill] sm:$0xff] %v12027_v42  ;;  %v12032_v4 = vpop.f32.mrf.mxu1  ;;  %10928 = vmatmul.mubr.f32.gmra.mxu1 %v11645_v50  ;;  %1245 = vmatpush1.msra.mxu0 %v343_v49 }
 0x16e   :  { %16667 = vst [vmem:[#allocation68_spill] sm:$0xff] %v12032_v4  ;;  %v12035_v51 = vpop.f32.mrf.mxu0  ;;  %865 = vmatprep.mubr.f32.mxu0 %v11315_v0  ;;  %10930 = vmatprep.mubr.f32.mxu1 %v11653_v53  ;;  %v330_v4 = vld [vmem:[#allocation7 + $0x300] sm:$0xff]  ;;  %v329_v53 = vld [vmem:[#allocation7 + $0x2f8] sm:$0xff] }
 0x16f   :  { %16668 = vst [vmem:[#allocation69_spill] sm:$0xff] %v12035_v51  ;;  %v12039_v47 = vpop.f32.mrf.mxu1  ;;  %1246 = vmatprep.subr.mxu0 %v337_v23 }
 0x170   :  { %16669 = vst [vmem:[#allocation70_spill] sm:$0xff] %v12039_v47  ;;  %v12041_v37 = vpop.f32.mrf.mxu0  ;;  %866 = vmatmul.mubr.f32.gmra.mxu0 %v12043_v15  ;;  %v12057_v47 = vld [vmem:[#allocation2 + $0x10] sm:$0xff] }
 0x171   :  { %16670 = vst [vmem:[#allocation71_spill] sm:$0xff] %v12041_v37  ;;  %v12046_v5 = vpop.f32.mrf.mxu1  ;;  %10931 = vmatmul.mubr.f32.gmra.mxu1 %v11660_v54  ;;  %1247 = vmatpush1.msra.mxu0 %v336_v48 }
 0x172   :  { %16671 = vst [vmem:[#allocation72_spill] sm:$0xff] %v12046_v5  ;;  %v12049_v50 = vpop.f32.mrf.mxu0  ;;  %871 = vmatprep.mubr.f32.mxu0 %v11315_v0  ;;  %10933 = vmatprep.mubr.f32.mxu1 %v11666_v55  ;;  %v323_v5 = vld [vmem:[#allocation7 + $0x2c8] sm:$0xff]  ;;  %v322_v55 = vld [vmem:[#allocation7 + $0x2c0] sm:$0xff] }
 0x173   :  { %16672 = vst [vmem:[#allocation73_spill] sm:$0xff] %v12049_v50  ;;  %v12053_v23 = vpop.f32.mrf.mxu1  ;;  %1248 = vmatprep.subr.mxu0 %v330_v4 }
 0x174   :  { %16673 = vst [vmem:[#allocation74_spill] sm:$0xff] %v12053_v23  ;;  %v12055_v49 = vpop.f32.mrf.mxu0  ;;  %872 = vmatmul.mubr.f32.gmra.mxu0 %v12057_v47  ;;  %v12071_v23 = vld [vmem:[#allocation2 + $0x18] sm:$0xff] }
 0x175   :  { %16674 = vst [vmem:[#allocation75_spill] sm:$0xff] %v12055_v49  ;;  %v12060_v37 = vpop.f32.mrf.mxu1  ;;  %10934 = vmatmul.mubr.f32.gmra.mxu1 %v11672_v56  ;;  %1249 = vmatpush1.msra.mxu0 %v329_v53  ;;  %v315_v53 = vld [vmem:[#allocation7 + $0x288] sm:$0xff] }
 0x176   :  { %16675 = vst [vmem:[#allocation76_spill] sm:$0xff] %v12060_v37  ;;  %v12063_v54 = vpop.f32.mrf.mxu0  ;;  %877 = vmatprep.mubr.f32.mxu0 %v11315_v0  ;;  %10936 = vmatprep.mubr.f32.mxu1 %v11678_v57  ;;  %v316_v37 = vld [vmem:[#allocation7 + $0x290] sm:$0xff]  ;;  %v16681_v57 = vld [vmem:[#allocation19_spill] sm:$0xff] }
 0x177   :  { %16676 = vst [vmem:[#allocation77_spill] sm:$0xff] %v12063_v54  ;;  %v12067_v4 = vpop.f32.mrf.mxu1  ;;  %1250 = vmatprep.subr.mxu0 %v323_v5 }
 0x178   :  { %16677 = vst [vmem:[#allocation78_spill] sm:$0xff] %v12067_v4  ;;  %v12069_v48 = vpop.f32.mrf.mxu0  ;;  %878 = vmatmul.mubr.f32.gmra.mxu0 %v12071_v23 }
 0x179   :  { %16678 = vst [vmem:[#allocation79_spill] sm:$0xff] %v12069_v48  ;;  %v12074_v49 = vpop.f32.mrf.mxu1  ;;  %10937 = vmatmul.mubr.f32.gmra.mxu1 %v11684_v58  ;;  %1251 = vmatpush1.msra.mxu0 %v322_v55  ;;  %v12085_v48 = vld [vmem:[#allocation2 + $0x20] sm:$0xff]  ;;  %v16685_v58 = vld [vmem:[#allocation20_spill] sm:$0xff] }
 0x17a   :  { %16679 = vst [vmem:[#allocation80_spill] sm:$0xff] %v12074_v49  ;;  %v12077_v56 = vpop.f32.mrf.mxu0  ;;  %883 = vmatprep.mubr.f32.mxu0 %v11315_v0  ;;  %10939 = vmatprep.mubr.f32.mxu1 %v16681_v57  ;;  %v309_v49 = vld [vmem:[#allocation7 + $0x258] sm:$0xff] }
 0x17b   :  { %16680 = vst [vmem:[#allocation81_spill] sm:$0xff] %v12077_v56  ;;  %v12081_v5 = vpop.f32.mrf.mxu1  ;;  %1252 = vmatprep.subr.mxu0 %v316_v37  ;;  %v16687_v57 = vld [vmem:[#allocation21_spill] sm:$0xff]  ;;  %v12099_v56 = vld [vmem:[#allocation2 + $0x28] sm:$0xff] }
 0x17c   :  { %16682 = vst [vmem:[#allocation19_spill] sm:$0xff] %v12081_v5  ;;  %v12083_v4 = vpop.f32.mrf.mxu0  ;;  %884 = vmatmul.mubr.f32.gmra.mxu0 %v12085_v48  ;;  %v308_v5 = vld [vmem:[#allocation7 + $0x250] sm:$0xff] }
 0x17d   :  { %16683 = vst [vmem:[#allocation82_spill] sm:$0xff] %v12083_v4  ;;  %v12088_v54 = vpop.f32.mrf.mxu1  ;;  %10940 = vmatmul.mubr.f32.gmra.mxu1 %v16685_v58  ;;  %1253 = vmatpush1.msra.mxu0 %v315_v53  ;;  %v16691_v53 = vld [vmem:[#allocation22_spill] sm:$0xff] }
 0x17e   :  { %16684 = vst [vmem:[#allocation83_spill] sm:$0xff] %v12088_v54  ;;  %v12091_v55 = vpop.f32.mrf.mxu0  ;;  %889 = vmatprep.mubr.f32.mxu0 %v11315_v0  ;;  %10942 = vmatprep.mubr.f32.mxu1 %v16687_v57  ;;  %v302_v54 = vld [vmem:[#allocation7 + $0x220] sm:$0xff] }
 0x17f   :  { %16686 = vst [vmem:[#allocation20_spill] sm:$0xff] %v12091_v55  ;;  %v12095_v37 = vpop.f32.mrf.mxu1  ;;  %1254 = vmatprep.subr.mxu0 %v309_v49  ;;  %v16693_v57 = vld [vmem:[#allocation23_spill] sm:$0xff]  ;;  %v12113_v55 = vld [vmem:[#allocation2 + $0x30] sm:$0xff] }
 0x180   :  { %16688 = vst [vmem:[#allocation21_spill] sm:$0xff] %v12095_v37  ;;  %v12097_v4 = vpop.f32.mrf.mxu0  ;;  %890 = vmatmul.mubr.f32.gmra.mxu0 %v12099_v56  ;;  %v301_v37 = vld [vmem:[#allocation7 + $0x218] sm:$0xff] }
 0x181   :  { %16689 = vst [vmem:[#allocation84_spill] sm:$0xff] %v12097_v4  ;;  %v12102_v50 = vpop.f32.mrf.mxu1  ;;  %10943 = vmatmul.mubr.f32.gmra.mxu1 %v16691_v53  ;;  %1255 = vmatpush1.msra.mxu0 %v308_v5  ;;  %v16697_v5 = vld [vmem:[#allocation24_spill] sm:$0xff] }
 0x182   :  { %16690 = vst [vmem:[#allocation85_spill] sm:$0xff] %v12102_v50  ;;  %v12105_v58 = vpop.f32.mrf.mxu0  ;;  %895 = vmatprep.mubr.f32.mxu0 %v11315_v0  ;;  %10945 = vmatprep.mubr.f32.mxu1 %v16693_v57  ;;  %v295_v50 = vld [vmem:[#allocation7 + $0x1e8] sm:$0xff]  ;;  %v16699_v57 = vld [vmem:[#allocation25_spill] sm:$0xff] }
 0x183   :  { %16692 = vst [vmem:[#allocation22_spill] sm:$0xff] %v12105_v58  ;;  %v12109_v49 = vpop.f32.mrf.mxu1  ;;  %1256 = vmatprep.subr.mxu0 %v302_v54  ;;  %v12127_v58 = vld [vmem:[#allocation2 + $0x38] sm:$0xff] }
 0x184   :  { %16694 = vst [vmem:[#allocation23_spill] sm:$0xff] %v12109_v49  ;;  %v12111_v4 = vpop.f32.mrf.mxu0  ;;  %896 = vmatmul.mubr.f32.gmra.mxu0 %v12113_v55  ;;  %v294_v49 = vld [vmem:[#allocation7 + $0x1e0] sm:$0xff] }
 0x185   :  { %16695 = vst [vmem:[#allocation86_spill] sm:$0xff] %v12111_v4  ;;  %v12116_v42 = vpop.f32.mrf.mxu1  ;;  %10946 = vmatmul.mubr.f32.gmra.mxu1 %v16697_v5  ;;  %1257 = vmatpush1.msra.mxu0 %v301_v37  ;;  %v16703_v37 = vld [vmem:[#allocation26_spill] sm:$0xff] }
 0x186   :  { %16696 = vst [vmem:[#allocation87_spill] sm:$0xff] %v12116_v42  ;;  %v12119_v53 = vpop.f32.mrf.mxu0  ;;  %901 = vmatprep.mubr.f32.mxu0 %v11315_v0  ;;  %10948 = vmatprep.mubr.f32.mxu1 %v16699_v57  ;;  %v288_v42 = vld [vmem:[#allocation7 + $0x1b0] sm:$0xff]  ;;  %v16705_v57 = vld [vmem:[#allocation27_spill] sm:$0xff] }
 0x187   :  { %16698 = vst [vmem:[#allocation24_spill] sm:$0xff] %v12119_v53  ;;  %v12123_v54 = vpop.f32.mrf.mxu1  ;;  %1258 = vmatprep.subr.mxu0 %v295_v50  ;;  %v12141_v53 = vld [vmem:[#allocation2 + $0x40] sm:$0xff] }
 0x188   :  { %16700 = vst [vmem:[#allocation25_spill] sm:$0xff] %v12123_v54  ;;  %v12125_v4 = vpop.f32.mrf.mxu0  ;;  %902 = vmatmul.mubr.f32.gmra.mxu0 %v12127_v58  ;;  %v287_v54 = vld [vmem:[#allocation7 + $0x1a8] sm:$0xff] }
 0x189   :  { %16701 = vst [vmem:[#allocation88_spill] sm:$0xff] %v12125_v4  ;;  %v12130_v51 = vpop.f32.mrf.mxu1  ;;  %10949 = vmatmul.mubr.f32.gmra.mxu1 %v16703_v37  ;;  %1259 = vmatpush1.msra.mxu0 %v294_v49  ;;  %v280_v37 = vld [vmem:[#allocation7 + $0x170] sm:$0xff] }
 0x18a   :  { %16702 = vst [vmem:[#allocation89_spill] sm:$0xff] %v12130_v51  ;;  %v12133_v5 = vpop.f32.mrf.mxu0  ;;  %907 = vmatprep.mubr.f32.mxu0 %v11315_v0  ;;  %10951 = vmatprep.mubr.f32.mxu1 %v16705_v57  ;;  %v281_v51 = vld [vmem:[#allocation7 + $0x178] sm:$0xff] }
 0x18b   :  { %16704 = vst [vmem:[#allocation26_spill] sm:$0xff] %v12133_v5  ;;  %v12137_v50 = vpop.f32.mrf.mxu1  ;;  %1260 = vmatprep.subr.mxu0 %v288_v42 }
 0x18c   :  { %16706 = vst [vmem:[#allocation27_spill] sm:$0xff] %v12137_v50  ;;  %v12139_v4 = vpop.f32.mrf.mxu0  ;;  %908 = vmatmul.mubr.f32.gmra.mxu0 %v12141_v53  ;;  %v12155_v50 = vld [vmem:[#allocation2 + $0x48] sm:$0xff] }
 0x18d   :  { %16707 = vst [vmem:[#allocation90_spill] sm:$0xff] %v12139_v4  ;;  %v12144_v31 = vpop.f32.mrf.mxu1  ;;  %10952 = vmatmul.mubr.f32.gmra.mxu1 %v11744_v8  ;;  %1261 = vmatpush1.msra.mxu0 %v287_v54 }
 0x18e   :  { %16708 = vst [vmem:[#allocation91_spill] sm:$0xff] %v12144_v31  ;;  %v12147_v49 = vpop.f32.mrf.mxu0  ;;  %913 = vmatprep.mubr.f32.mxu0 %v11315_v0  ;;  %10954 = vmatprep.mubr.f32.mxu1 %v11750_v10  ;;  %v274_v31 = vld [vmem:[#allocation7 + $0x140] sm:$0xff]  ;;  %v273_v10 = vld [vmem:[#allocation7 + $0x138] sm:$0xff] }
 0x18f   :  { %16709 = vst [vmem:[#allocation92_spill] sm:$0xff] %v12147_v49  ;;  %v12151_v42 = vpop.f32.mrf.mxu1  ;;  %1262 = vmatprep.subr.mxu0 %v281_v51  ;;  %v11086_v49 = vld [vmem:[#allocation2 + $0x1e8] sm:$0xff] }
 0x190   :  { %16710 = vst [vmem:[#allocation93_spill] sm:$0xff] %v12151_v42  ;;  %v12153_v57 = vpop.f32.mrf.mxu0  ;;  %914 = vmatmul.mubr.f32.gmra.mxu0 %v12155_v50  ;;  %v12169_v42 = vld [vmem:[#allocation2 + $0x50] sm:$0xff] }
 0x191   :  { %16711 = vst [vmem:[#allocation94_spill] sm:$0xff] %v12153_v57  ;;  %v12158_v4 = vpop.f32.mrf.mxu1  ;;  %10955 = vmatmul.mubr.f32.gmra.mxu1 %v11756_v12  ;;  %1263 = vmatpush1.msra.mxu0 %v280_v37 }
 0x192   :  { %16712 = vst [vmem:[#allocation95_spill] sm:$0xff] %v12158_v4  ;;  %v12161_v8 = vpop.f32.mrf.mxu0  ;;  %919 = vmatprep.mubr.f32.mxu0 %v11315_v0  ;;  %10957 = vmatprep.mubr.f32.mxu1 %v11762_v16  ;;  %v267_v4 = vld [vmem:[#allocation7 + $0x108] sm:$0xff]  ;;  %v266_v16 = vld [vmem:[#allocation7 + $0x100] sm:$0xff] }
 0x193   :  { %16713 = vst [vmem:[#allocation96_spill] sm:$0xff] %v12161_v8  ;;  %v12165_v51 = vpop.f32.mrf.mxu1  ;;  %1264 = vmatprep.subr.mxu0 %v274_v31 }
 0x194   :  { %16714 = vst [vmem:[#allocation97_spill] sm:$0xff] %v12165_v51  ;;  %v12167_v54 = vpop.f32.mrf.mxu0  ;;  %920 = vmatmul.mubr.f32.gmra.mxu0 %v12169_v42  ;;  %v12183_v51 = vld [vmem:[#allocation2 + $0x58] sm:$0xff] }
 0x195   :  { %16715 = vst [vmem:[#allocation98_spill] sm:$0xff] %v12167_v54  ;;  %v12172_v57 = vpop.f32.mrf.mxu1  ;;  %10958 = vmatmul.mubr.f32.gmra.mxu1 %v11768_v20  ;;  %1265 = vmatpush1.msra.mxu0 %v273_v10 }
 0x196   :  { %16716 = vst [vmem:[#allocation99_spill] sm:$0xff] %v12172_v57  ;;  %v12175_v12 = vpop.f32.mrf.mxu0  ;;  %925 = vmatprep.mubr.f32.mxu0 %v11315_v0  ;;  %10960 = vmatprep.mubr.f32.mxu1 %v11774_v24  ;;  %v260_v57 = vld [vmem:[#allocation7 + $0xd0] sm:$0xff]  ;;  %v259_v24 = vld [vmem:[#allocation7 + $0xc8] sm:$0xff] }
 0x197   :  { %16717 = vst [vmem:[#allocation100_spill] sm:$0xff] %v12175_v12  ;;  %v12179_v31 = vpop.f32.mrf.mxu1  ;;  %1266 = vmatprep.subr.mxu0 %v267_v4  ;;  %v11085_v12 = vld [vmem:[#allocation2 + $0x1e0] sm:$0xff] }
 0x198   :  { %16718 = vst [vmem:[#allocation101_spill] sm:$0xff] %v12179_v31  ;;  %v12181_v37 = vpop.f32.mrf.mxu0  ;;  %926 = vmatmul.mubr.f32.gmra.mxu0 %v12183_v51  ;;  %v12197_v31 = vld [vmem:[#allocation2 + $0x60] sm:$0xff] }
 0x199   :  { %16719 = vst [vmem:[#allocation102_spill] sm:$0xff] %v12181_v37  ;;  %v12186_v54 = vpop.f32.mrf.mxu1  ;;  %10961 = vmatmul.mubr.f32.gmra.mxu1 %v11780_v35  ;;  %1267 = vmatpush1.msra.mxu0 %v266_v16 }
 0x19a   :  { %16720 = vst [vmem:[#allocation103_spill] sm:$0xff] %v12186_v54  ;;  %v12189_v20 = vpop.f32.mrf.mxu0  ;;  %931 = vmatprep.mubr.f32.mxu0 %v11315_v0  ;;  %10963 = vmatprep.mubr.f32.mxu1 %v11786_v28  ;;  %v253_v54 = vld [vmem:[#allocation7 + $0x98] sm:$0xff]  ;;  %v252_v28 = vld [vmem:[#allocation7 + $0x90] sm:$0xff] }
 0x19b   :  { %16721 = vst [vmem:[#allocation104_spill] sm:$0xff] %v12189_v20  ;;  %v12193_v4 = vpop.f32.mrf.mxu1  ;;  %1268 = vmatprep.subr.mxu0 %v260_v57 }
 0x19c   :  { %16722 = vst [vmem:[#allocation105_spill] sm:$0xff] %v12193_v4  ;;  %v12195_v10 = vpop.f32.mrf.mxu0  ;;  %932 = vmatmul.mubr.f32.gmra.mxu0 %v12197_v31  ;;  %v12211_v4 = vld [vmem:[#allocation2 + $0x68] sm:$0xff] }
 0x19d   :  { %16723 = vst [vmem:[#allocation106_spill] sm:$0xff] %v12195_v10  ;;  %v12200_v37 = vpop.f32.mrf.mxu1  ;;  %10964 = vmatmul.mubr.f32.gmra.mxu1 %v11792_v32  ;;  %1269 = vmatpush1.msra.mxu0 %v259_v24 }
 0x19e   :  { %16724 = vst [vmem:[#allocation107_spill] sm:$0xff] %v12200_v37  ;;  %v12203_v35 = vpop.f32.mrf.mxu0  ;;  %937 = vmatprep.mubr.f32.mxu0 %v11315_v0  ;;  %10966 = vmatprep.mubr.f32.mxu1 %v11798_v34  ;;  %v246_v37 = vld [vmem:[#allocation7 + $0x60] sm:$0xff]  ;;  %v245_v34 = vld [vmem:[#allocation7 + $0x58] sm:$0xff] }
 0x19f   :  { %16725 = vst [vmem:[#allocation108_spill] sm:$0xff] %v12203_v35  ;;  %v12207_v57 = vpop.f32.mrf.mxu1  ;;  %1270 = vmatprep.subr.mxu0 %v253_v54  ;;  %v11084_v35 = vld [vmem:[#allocation2 + $0x1d8] sm:$0xff] }
 0x1a0   :  { %16726 = vst [vmem:[#allocation109_spill] sm:$0xff] %v12207_v57  ;;  %v12209_v16 = vpop.f32.mrf.mxu0  ;;  %938 = vmatmul.mubr.f32.gmra.mxu0 %v12211_v4  ;;  %v12225_v57 = vld [vmem:[#allocation2 + $0x70] sm:$0xff] }
 0x1a1   :  { %16727 = vst [vmem:[#allocation110_spill] sm:$0xff] %v12209_v16  ;;  %v12214_v10 = vpop.f32.mrf.mxu1  ;;  %10967 = vmatmul.mubr.f32.gmra.mxu1 %v11804_v36  ;;  %1271 = vmatpush1.msra.mxu0 %v252_v28 }
 0x1a2   :  { %16728 = vst [vmem:[#allocation111_spill] sm:$0xff] %v12214_v10  ;;  %v12217_v32 = vpop.f32.mrf.mxu0  ;;  %943 = vmatprep.mubr.f32.mxu0 %v11315_v0  ;;  %10969 = vmatprep.mubr.f32.mxu1 %v11810_v46  ;;  %v239_v10 = vld [vmem:[#allocation7 + $0x28] sm:$0xff]  ;;  %v238_v46 = vld [vmem:[#allocation7 + $0x20] sm:$0xff] }
 0x1a3   :  { %16729 = vst [vmem:[#allocation112_spill] sm:$0xff] %v12217_v32  ;;  %v12221_v54 = vpop.f32.mrf.mxu1  ;;  %1272 = vmatprep.subr.mxu0 %v246_v37 }
 0x1a4   :  { %16730 = vst [vmem:[#allocation113_spill] sm:$0xff] %v12221_v54  ;;  %v12223_v24 = vpop.f32.mrf.mxu0  ;;  %944 = vmatmul.mubr.f32.gmra.mxu0 %v12225_v57  ;;  %v12239_v54 = vld [vmem:[#allocation2 + $0x78] sm:$0xff] }
 0x1a5   :  { %16731 = vst [vmem:[#allocation114_spill] sm:$0xff] %v12223_v24  ;;  %v12228_v16 = vpop.f32.mrf.mxu1  ;;  %10970 = vmatmul.mubr.f32.gmra.mxu1 %v11816_v52  ;;  %1273 = vmatpush1.msra.mxu0 %v245_v34 }
 0x1a6   :  { %16732 = vst [vmem:[#allocation115_spill] sm:$0xff] %v12228_v16  ;;  %v12231_v36 = vpop.f32.mrf.mxu0  ;;  %949 = vmatprep.mubr.f32.mxu0 %v11315_v0  ;;  %10972 = vmatprep.mubr.f32.mxu1 %v11822_v6  ;;  %v2141_v16 = vld [vmem:[#allocation8 + $0x1f8] sm:$0xff]  ;;  %v170_v6 = vld [vmem:[#allocation5] sm:$0xff] }
 0x1a7   :  { %16733 = vst [vmem:[#allocation116_spill] sm:$0xff] %v12231_v36  ;;  %v12235_v37 = vpop.f32.mrf.mxu1  ;;  %1274 = vmatprep.subr.mxu0 %v239_v10  ;;  %v2140_v10 = vld [vmem:[#allocation8 + $0x1f0] sm:$0xff] }
 0x1a8   :  { %16734 = vst [vmem:[#allocation117_spill] sm:$0xff] %v12235_v37  ;;  %v12237_v28 = vpop.f32.mrf.mxu0  ;;  %950 = vmatmul.mubr.f32.gmra.mxu0 %v12239_v54 }
 0x1a9   :  { %16735 = vst [vmem:[#allocation118_spill] sm:$0xff] %v12237_v28  ;;  %v12242_v24 = vpop.f32.mrf.mxu1  ;;  %10973 = vmatmul.mubr.f32.gmra.mxu1 %v11828_v63  ;;  %1275 = vmatpush1.msra.mxu0 %v238_v46  ;;  %v3311_v28 = vld [vmem:[#allocation10 + $0x78] sm:$0xff]  ;;  %v171_v46 = vld [vmem:[#allocation5 + $0x8] sm:$0xff] }
 0x1aa   :  { %16736 = vst [vmem:[#allocation119_spill] sm:$0xff] %v12242_v24  ;;  %v12245_v52 = vpop.f32.mrf.mxu0  ;;  %1308 = vmatprep.mubr.f32.mxu0 %v11315_v0  ;;  %2206 = vmatprep.mubr.f32.mxu1 %v11315_v0  ;;  %v2137_v24 = vld [vmem:[#allocation8 + $0x1d8] sm:$0xff] }
 0x1ab   :  { %16737 = vst [vmem:[#allocation120_spill] sm:$0xff] %v12245_v52  ;;  %v12249_v34 = vpop.f32.mrf.mxu1  ;;  %2591 = vmatprep.subr.mxu0 %v2141_v16  ;;  %v3310_v16 = vld [vmem:[#allocation10 + $0x70] sm:$0xff] }
 0x1ac   :  { %16738 = vst [vmem:[#allocation121_spill] sm:$0xff] %v12249_v34  ;;  %v12251_v37 = vpop.f32.mrf.mxu0  ;;  %1309 = vmatmul.mubr.f32.vlgmr.msra.gmra.mxu0 %v12029_v43  ;;  %v2136_v43 = vld [vmem:[#allocation8 + $0x1d0] sm:$0xff] }
 0x1ad   :  { %16739 = vst [vmem:[#allocation122_spill] sm:$0xff] %v12251_v37  ;;  %v12254_v36 = vpop.f32.mrf.mxu1  ;;  %2207 = vmatmul.mubr.f32.vlgmr.msra.gmra.mxu1 %v170_v6  ;;  %2592 = vmatpush1.msra.mxu0 %v2140_v10  ;;  %v3309_v10 = vld [vmem:[#allocation10 + $0x68] sm:$0xff] }
 0x1ae   :  { %16740 = vst [vmem:[#allocation123_spill] sm:$0xff] %v12254_v36  ;;  %v12256_v63 = vpop.f32.mrf.mxu0  ;;  %1314 = vmatprep.mubr.f32.mxu0 %v11315_v0  ;;  %2212 = vmatprep.mubr.f32.mxu1 %v11315_v0 }
 0x1af   :  { %16741 = vst [vmem:[#allocation124_spill] sm:$0xff] %v12256_v63  ;;  %v12260_v52 = vpop.f32.mrf.mxu1  ;;  %3361 = vmatpush1.msra.mxu1 %v3311_v28  ;;  %2593 = vmatprep.subr.mxu0 %v2137_v24  ;;  %v172_v28 = vld [vmem:[#allocation5 + $0x10] sm:$0xff] }
 0x1b0   :  { %16742 = vst [vmem:[#allocation125_spill] sm:$0xff] %v12260_v52  ;;  %v12262_v34 = vpop.f32.mrf.mxu0  ;;  %1315 = vmatmul.mubr.f32.gmra.mxu0 %v12043_v15  ;;  %3362 = vmatprep.subr.mxu1 %v11315_v0  ;;  %v11083_v63 = vld [vmem:[#allocation2 + $0x1d0] sm:$0xff] }
 0x1b1   :  { %16743 = vst [vmem:[#allocation126_spill] sm:$0xff] %v12262_v34  ;;  %v12266_v6 = vpop.f32.mrf.mxu1  ;;  %2213 = vmatmul.mubr.f32.gmra.mxu1 %v171_v46  ;;  %1320 = vmatprep.mubr.f32.mxu0 %v11315_v0  ;;  %v3308_v46 = vld [vmem:[#allocation10 + $0x60] sm:$0xff] }
 0x1b2   :  { %16744 = vst [vmem:[#allocation127_spill] sm:$0xff] %v12266_v6  ;;  %v12269_v36 = vpop.f32.mrf.mxu0  ;;  %2218 = vmatprep.mubr.f32.mxu1 %v11315_v0  ;;  %3363 = vmatpush1.msra.mxu1 %v3310_v16  ;;  %v2133_v6 = vld [vmem:[#allocation8 + $0x1b8] sm:$0xff] }
 0x1b3   :  { %16745 = vst [vmem:[#allocation128_spill] sm:$0xff] %v12269_v36  ;;  %v12272_v24 = vpop.f32.mrf.mxu1  ;;  %2594 = vmatpush1.msra.mxu0 %v2136_v43  ;;  %3364 = vmatprep.subr.mxu1 %v11315_v0  ;;  %v173_v16 = vld [vmem:[#allocation5 + $0x18] sm:$0xff]  ;;  %v11082_v36 = vld [vmem:[#allocation2 + $0x1c8] sm:$0xff] }
 0x1b4   :  { %16746 = vst [vmem:[#allocation129_spill] sm:$0xff] %v12272_v24  ;;  %v12275_v15 = vpop.f32.mrf.mxu0  ;;  %1321 = vmatmul.mubr.f32.gmra.mxu0 %v12057_v47  ;;  %3365 = vmatpush1.msra.mxu1 %v3309_v10  ;;  %v2132_v47 = vld [vmem:[#allocation8 + $0x1b0] sm:$0xff] }
 0x1b5   :  { %16747 = vst [vmem:[#allocation130_spill] sm:$0xff] %v12275_v15  ;;  %v12278_v52 = vpop.f32.mrf.mxu1  ;;  %2219 = vmatmul.mubr.f32.gmra.mxu1 %v172_v28  ;;  %1326 = vmatprep.mubr.f32.mxu0 %v11315_v0  ;;  %v3307_v28 = vld [vmem:[#allocation10 + $0x58] sm:$0xff] }
 0x1b6   :  { %16748 = vst [vmem:[#allocation131_spill] sm:$0xff] %v12278_v52  ;;  %v12281_v34 = vpop.f32.mrf.mxu0  ;;  %2224 = vmatprep.mubr.f32.mxu1 %v11315_v0  ;;  %3366 = vmatprep.subr.mxu1 %v11315_v0  ;;  %v2129_v52 = vld [vmem:[#allocation8 + $0x198] sm:$0xff] }
 0x1b7   :  { %16749 = vst [vmem:[#allocation132_spill] sm:$0xff] %v12281_v34  ;;  %v12285_v43 = vpop.f32.mrf.mxu1  ;;  %3367 = vmatpush1.msra.mxu1 %v3308_v46  ;;  %2595 = vmatprep.subr.mxu0 %v2133_v6  ;;  %v174_v46 = vld [vmem:[#allocation5 + $0x20] sm:$0xff] }
 0x1b8   :  { %16750 = vst [vmem:[#allocation133_spill] sm:$0xff] %v12285_v43  ;;  %v12287_v10 = vpop.f32.mrf.mxu0  ;;  %1327 = vmatmul.mubr.f32.gmra.mxu0 %v12071_v23  ;;  %3368 = vmatprep.subr.mxu1 %v11315_v0  ;;  %v3306_v43 = vld [vmem:[#allocation10 + $0x50] sm:$0xff] }
 0x1b9   :  { %16751 = vst [vmem:[#allocation134_spill] sm:$0xff] %v12287_v10  ;;  %v12291_v24 = vpop.f32.mrf.mxu1  ;;  %2225 = vmatmul.mubr.f32.gmra.mxu1 %v173_v16  ;;  %1332 = vmatprep.mubr.f32.mxu0 %v11315_v0  ;;  %v2128_v16 = vld [vmem:[#allocation8 + $0x190] sm:$0xff]  ;;  %v3305_v10 = vld [vmem:[#allocation10 + $0x48] sm:$0xff] }
 0x1ba   :  { %16752 = vst [vmem:[#allocation135_spill] sm:$0xff] %v12291_v24  ;;  %v12294_v15 = vpop.f32.mrf.mxu0  ;;  %2230 = vmatprep.mubr.f32.mxu1 %v11315_v0  ;;  %2596 = vmatpush1.msra.mxu0 %v2132_v47  ;;  %v175_v47 = vld [vmem:[#allocation5 + $0x28] sm:$0xff] }
 0x1bb   :  { %16753 = vst [vmem:[#allocation136_spill] sm:$0xff] %v12294_v15  ;;  %v12297_v6 = vpop.f32.mrf.mxu1  ;;  %3369 = vmatpush1.msra.mxu1 %v3307_v28  ;;  %2597 = vmatprep.subr.mxu0 %v2129_v52  ;;  %v3304_v28 = vld [vmem:[#allocation10 + $0x40] sm:$0xff] }
 0x1bc   :  { %16754 = vst [vmem:[#allocation137_spill] sm:$0xff] %v12297_v6  ;;  %v12299_v23 = vpop.f32.mrf.mxu0  ;;  %1333 = vmatmul.mubr.f32.gmra.mxu0 %v12085_v48  ;;  %3370 = vmatprep.subr.mxu1 %v11315_v0 }
 0x1bd   :  { %16755 = vst [vmem:[#allocation138_spill] sm:$0xff] %v12299_v23  ;;  %v12303_v24 = vpop.f32.mrf.mxu1  ;;  %2231 = vmatmul.mubr.f32.gmra.mxu1 %v174_v46  ;;  %1338 = vmatprep.mubr.f32.mxu0 %v11315_v0  ;;  %v2125_v46 = vld [vmem:[#allocation8 + $0x178] sm:$0xff] }
 0x1be   :  { %16756 = vst [vmem:[#allocation139_spill] sm:$0xff] %v12303_v24  ;;  %v12306_v15 = vpop.f32.mrf.mxu0  ;;  %2236 = vmatprep.mubr.f32.mxu1 %v11315_v0  ;;  %3371 = vmatpush1.msra.mxu1 %v3306_v43  ;;  %v176_v43 = vld [vmem:[#allocation5 + $0x30] sm:$0xff] }
 0x1bf   :  { %16757 = vst [vmem:[#allocation140_spill] sm:$0xff] %v12306_v15  ;;  %v12309_v52 = vpop.f32.mrf.mxu1  ;;  %2598 = vmatpush1.msra.mxu0 %v2128_v16  ;;  %3372 = vmatprep.subr.mxu1 %v11315_v0  ;;  %v11081_v15 = vld [vmem:[#allocation2 + $0x1c0] sm:$0xff] }
 0x1c0   :  { %16758 = vst [vmem:[#allocation141_spill] sm:$0xff] %v12309_v52  ;;  %v12312_v48 = vpop.f32.mrf.mxu0  ;;  %1339 = vmatmul.mubr.f32.gmra.mxu0 %v12099_v56  ;;  %3373 = vmatpush1.msra.mxu1 %v3305_v10  ;;  %v2124_v56 = vld [vmem:[#allocation8 + $0x170] sm:$0xff] }
 0x1c1   :  { %16759 = vst [vmem:[#allocation142_spill] sm:$0xff] %v12312_v48  ;;  %v12315_v24 = vpop.f32.mrf.mxu1  ;;  %2237 = vmatmul.mubr.f32.gmra.mxu1 %v175_v47  ;;  %1344 = vmatprep.mubr.f32.mxu0 %v11315_v0  ;;  %v3303_v47 = vld [vmem:[#allocation10 + $0x38] sm:$0xff] }
 0x1c2   :  { %16760 = vst [vmem:[#allocation143_spill] sm:$0xff] %v12315_v24  ;;  %v12318_v6 = vpop.f32.mrf.mxu0  ;;  %2242 = vmatprep.mubr.f32.mxu1 %v11315_v0  ;;  %3374 = vmatprep.subr.mxu1 %v11315_v0  ;;  %v2121_v24 = vld [vmem:[#allocation8 + $0x158] sm:$0xff] }
 0x1c3   :  { %16761 = vst [vmem:[#allocation144_spill] sm:$0xff] %v12318_v6  ;;  %v12322_v16 = vpop.f32.mrf.mxu1  ;;  %3375 = vmatpush1.msra.mxu1 %v3304_v28  ;;  %2599 = vmatprep.subr.mxu0 %v2125_v46  ;;  %v177_v28 = vld [vmem:[#allocation5 + $0x38] sm:$0xff] }
 0x1c4   :  { %16762 = vst [vmem:[#allocation145_spill] sm:$0xff] %v12322_v16  ;;  %v12324_v10 = vpop.f32.mrf.mxu0  ;;  %1345 = vmatmul.mubr.f32.gmra.mxu0 %v12113_v55  ;;  %3376 = vmatprep.subr.mxu1 %v11315_v0  ;;  %v3302_v16 = vld [vmem:[#allocation10 + $0x30] sm:$0xff]  ;;  %v11080_v6 = vld [vmem:[#allocation2 + $0x1b8] sm:$0xff] }
 0x1c5   :  { %16763 = vst [vmem:[#allocation146_spill] sm:$0xff] %v12324_v10  ;;  %v12328_v52 = vpop.f32.mrf.mxu1  ;;  %2243 = vmatmul.mubr.f32.gmra.mxu1 %v176_v43  ;;  %1350 = vmatprep.mubr.f32.mxu0 %v11315_v0  ;;  %v2120_v43 = vld [vmem:[#allocation8 + $0x150] sm:$0xff]  ;;  %v3301_v10 = vld [vmem:[#allocation10 + $0x28] sm:$0xff] }
 0x1c6   :  { %16764 = vst [vmem:[#allocation147_spill] sm:$0xff] %v12328_v52  ;;  %v12331_v48 = vpop.f32.mrf.mxu0  ;;  %2248 = vmatprep.mubr.f32.mxu1 %v11315_v0  ;;  %2600 = vmatpush1.msra.mxu0 %v2124_v56  ;;  %v178_v56 = vld [vmem:[#allocation5 + $0x40] sm:$0xff] }
 0x1c7   :  { %16765 = vst [vmem:[#allocation148_spill] sm:$0xff] %v12331_v48  ;;  %v12334_v46 = vpop.f32.mrf.mxu1  ;;  %3377 = vmatpush1.msra.mxu1 %v3303_v47  ;;  %2601 = vmatprep.subr.mxu0 %v2121_v24  ;;  %v3300_v47 = vld [vmem:[#allocation10 + $0x20] sm:$0xff] }
 0x1c8   :  { %16766 = vst [vmem:[#allocation149_spill] sm:$0xff] %v12334_v46  ;;  %v12336_v55 = vpop.f32.mrf.mxu0  ;;  %1351 = vmatmul.mubr.f32.gmra.mxu0 %v12127_v58  ;;  %3378 = vmatprep.subr.mxu1 %v11315_v0 }
 0x1c9   :  { %16767 = vst [vmem:[#allocation150_spill] sm:$0xff] %v12336_v55  ;;  %v12340_v52 = vpop.f32.mrf.mxu1  ;;  %2249 = vmatmul.mubr.f32.gmra.mxu1 %v177_v28  ;;  %1356 = vmatprep.mubr.f32.mxu0 %v11315_v0  ;;  %v2117_v28 = vld [vmem:[#allocation8 + $0x138] sm:$0xff]  ;;  %v11079_v55 = vld [vmem:[#allocation2 + $0x1b0] sm:$0xff] }
 0x1ca   :  { %16768 = vst [vmem:[#allocation151_spill] sm:$0xff] %v12340_v52  ;;  %v12343_v48 = vpop.f32.mrf.mxu0  ;;  %2254 = vmatprep.mubr.f32.mxu1 %v11315_v0  ;;  %3379 = vmatpush1.msra.mxu1 %v3302_v16  ;;  %v179_v16 = vld [vmem:[#allocation5 + $0x48] sm:$0xff] }
 0x1cb   :  { %16769 = vst [vmem:[#allocation152_spill] sm:$0xff] %v12343_v48  ;;  %v12346_v24 = vpop.f32.mrf.mxu1  ;;  %2602 = vmatpush1.msra.mxu0 %v2120_v43  ;;  %3380 = vmatprep.subr.mxu1 %v11315_v0 }
 0x1cc   :  { %16770 = vst [vmem:[#allocation153_spill] sm:$0xff] %v12346_v24  ;;  %v12349_v58 = vpop.f32.mrf.mxu0  ;;  %1357 = vmatmul.mubr.f32.gmra.mxu0 %v12141_v53  ;;  %3381 = vmatpush1.msra.mxu1 %v3301_v10  ;;  %v2116_v53 = vld [vmem:[#allocation8 + $0x130] sm:$0xff] }
 0x1cd   :  { %16771 = vst [vmem:[#allocation154_spill] sm:$0xff] %v12349_v58  ;;  %v12352_v52 = vpop.f32.mrf.mxu1  ;;  %2255 = vmatmul.mubr.f32.gmra.mxu1 %v178_v56  ;;  %1362 = vmatprep.mubr.f32.mxu0 %v11315_v0  ;;  %v3299_v56 = vld [vmem:[#allocation10 + $0x18] sm:$0xff] }
 0x1ce   :  { %16772 = vst [vmem:[#allocation155_spill] sm:$0xff] %v12352_v52  ;;  %v12355_v46 = vpop.f32.mrf.mxu0  ;;  %2260 = vmatprep.mubr.f32.mxu1 %v11315_v0  ;;  %3382 = vmatprep.subr.mxu1 %v11315_v0  ;;  %v2113_v52 = vld [vmem:[#allocation8 + $0x118] sm:$0xff] }
 0x1cf   :  { %16773 = vst [vmem:[#allocation156_spill] sm:$0xff] %v12355_v46  ;;  %v12359_v43 = vpop.f32.mrf.mxu1  ;;  %3383 = vmatpush1.msra.mxu1 %v3300_v47  ;;  %2603 = vmatprep.subr.mxu0 %v2117_v28  ;;  %v180_v47 = vld [vmem:[#allocation5 + $0x50] sm:$0xff] }
 0x1d0   :  { %16774 = vst [vmem:[#allocation157_spill] sm:$0xff] %v12359_v43  ;;  %v12361_v10 = vpop.f32.mrf.mxu0  ;;  %1363 = vmatmul.mubr.f32.gmra.mxu0 %v12155_v50  ;;  %3384 = vmatprep.subr.mxu1 %v11315_v0  ;;  %v3298_v43 = vld [vmem:[#allocation10 + $0x10] sm:$0xff] }
 0x1d1   :  { %16775 = vst [vmem:[#allocation158_spill] sm:$0xff] %v12361_v10  ;;  %v12365_v24 = vpop.f32.mrf.mxu1  ;;  %2261 = vmatmul.mubr.f32.gmra.mxu1 %v179_v16  ;;  %1368 = vmatprep.mubr.f32.mxu0 %v11315_v0  ;;  %v2112_v16 = vld [vmem:[#allocation8 + $0x110] sm:$0xff]  ;;  %v3297_v10 = vld [vmem:[#allocation10 + $0x8] sm:$0xff] }
 0x1d2   :  { %16776 = vst [vmem:[#allocation159_spill] sm:$0xff] %v12365_v24  ;;  %v12368_v58 = vpop.f32.mrf.mxu0  ;;  %2266 = vmatprep.mubr.f32.mxu1 %v11315_v0  ;;  %2604 = vmatpush1.msra.mxu0 %v2116_v53  ;;  %v181_v53 = vld [vmem:[#allocation5 + $0x58] sm:$0xff] }
 0x1d3   :  { %16777 = vst [vmem:[#allocation160_spill] sm:$0xff] %v12368_v58  ;;  %v12371_v28 = vpop.f32.mrf.mxu1  ;;  %3385 = vmatpush1.msra.mxu1 %v3299_v56  ;;  %2605 = vmatprep.subr.mxu0 %v2113_v52  ;;  %v3296_v56 = vld [vmem:[#allocation10] sm:$0xff] }
 0x1d4   :  { %16778 = vst [vmem:[#allocation161_spill] sm:$0xff] %v12371_v28  ;;  %v12373_v50 = vpop.f32.mrf.mxu0  ;;  %1369 = vmatmul.mubr.f32.gmra.mxu0 %v12169_v42  ;;  %3386 = vmatprep.subr.mxu1 %v11315_v0 }
 0x1d5   :  { %16779 = vst [vmem:[#allocation162_spill] sm:$0xff] %v12373_v50  ;;  %v12377_v24 = vpop.f32.mrf.mxu1  ;;  %2267 = vmatmul.mubr.f32.gmra.mxu1 %v180_v47  ;;  %1374 = vmatprep.mubr.f32.mxu0 %v11315_v0  ;;  %v2109_v47 = vld [vmem:[#allocation8 + $0xf8] sm:$0xff] }
 0x1d6   :  { %16780 = vst [vmem:[#allocation163_spill] sm:$0xff] %v12377_v24  ;;  %v12380_v58 = vpop.f32.mrf.mxu0  ;;  %2272 = vmatprep.mubr.f32.mxu1 %v11315_v0  ;;  %3387 = vmatpush1.msra.mxu1 %v3298_v43  ;;  %v182_v43 = vld [vmem:[#allocation5 + $0x60] sm:$0xff] }
 0x1d7   :  { %16781 = vst [vmem:[#allocation164_spill] sm:$0xff] %v12380_v58  ;;  %v12383_v52 = vpop.f32.mrf.mxu1  ;;  %2606 = vmatpush1.msra.mxu0 %v2112_v16  ;;  %3388 = vmatprep.subr.mxu1 %v11315_v0  ;;  %v11078_v58 = vld [vmem:[#allocation2 + $0x1a8] sm:$0xff] }
 0x1d8   :  { %16782 = vst [vmem:[#allocation165_spill] sm:$0xff] %v12383_v52  ;;  %v12386_v42 = vpop.f32.mrf.mxu0  ;;  %1375 = vmatmul.mubr.f32.gmra.mxu0 %v12183_v51  ;;  %3389 = vmatpush1.msra.mxu1 %v3297_v10  ;;  %v2108_v51 = vld [vmem:[#allocation8 + $0xf0] sm:$0xff] }
 0x1d9   :  { %16783 = vst [vmem:[#allocation166_spill] sm:$0xff] %v12386_v42  ;;  %v12389_v24 = vpop.f32.mrf.mxu1  ;;  %2273 = vmatmul.mubr.f32.gmra.mxu1 %v181_v53  ;;  %1380 = vmatprep.mubr.f32.mxu0 %v11315_v0  ;;  %v3327_v53 = vld [vmem:[#allocation10 + $0xf8] sm:$0xff] }
 0x1da   :  { %16784 = vst [vmem:[#allocation167_spill] sm:$0xff] %v12389_v24  ;;  %v12392_v28 = vpop.f32.mrf.mxu0  ;;  %2278 = vmatprep.mubr.f32.mxu1 %v11315_v0  ;;  %3390 = vmatprep.subr.mxu1 %v11315_v0  ;;  %v2105_v24 = vld [vmem:[#allocation8 + $0xd8] sm:$0xff] }
 0x1db   :  { %16785 = vst [vmem:[#allocation168_spill] sm:$0xff] %v12392_v28  ;;  %v12396_v16 = vpop.f32.mrf.mxu1  ;;  %3391 = vmatpush1.msra.mxu1 %v3296_v56  ;;  %2607 = vmatprep.subr.mxu0 %v2109_v47  ;;  %v183_v56 = vld [vmem:[#allocation5 + $0x68] sm:$0xff]  ;;  %v11077_v28 = vld [vmem:[#allocation2 + $0x1a0] sm:$0xff] }
 0x1dc   :  { %16786 = vst [vmem:[#allocation169_spill] sm:$0xff] %v12396_v16  ;;  %v12398_v10 = vpop.f32.mrf.mxu0  ;;  %1381 = vmatmul.mubr.f32.gmra.mxu0 %v12197_v31  ;;  %3392 = vmatprep.subr.mxu1 %v11315_v0  ;;  %v3326_v16 = vld [vmem:[#allocation10 + $0xf0] sm:$0xff] }
 0x1dd   :  { %16787 = vst [vmem:[#allocation170_spill] sm:$0xff] %v12398_v10  ;;  %v12402_v52 = vpop.f32.mrf.mxu1  ;;  %2279 = vmatmul.mubr.f32.gmra.mxu1 %v182_v43  ;;  %1386 = vmatprep.mubr.f32.mxu0 %v11315_v0  ;;  %v2104_v43 = vld [vmem:[#allocation8 + $0xd0] sm:$0xff]  ;;  %v3325_v10 = vld [vmem:[#allocation10 + $0xe8] sm:$0xff] }
 0x1de   :  { %16788 = vst [vmem:[#allocation171_spill] sm:$0xff] %v12402_v52  ;;  %v12405_v42 = vpop.f32.mrf.mxu0  ;;  %2284 = vmatprep.mubr.f32.mxu1 %v11315_v0  ;;  %2608 = vmatpush1.msra.mxu0 %v2108_v51  ;;  %v184_v51 = vld [vmem:[#allocation5 + $0x70] sm:$0xff] }
 0x1df   :  { %16789 = vst [vmem:[#allocation172_spill] sm:$0xff] %v12405_v42  ;;  %v12408_v47 = vpop.f32.mrf.mxu1  ;;  %3393 = vmatpush2.msra.mxu1 %v3327_v53  ;;  %2609 = vmatprep.subr.mxu0 %v2105_v24  ;;  %v3324_v53 = vld [vmem:[#allocation10 + $0xe0] sm:$0xff] }
 0x1e0   :  { %16790 = vst [vmem:[#allocation173_spill] sm:$0xff] %v12408_v47  ;;  %v12410_v31 = vpop.f32.mrf.mxu0  ;;  %1387 = vmatmul.mubr.f32.gmra.mxu0 %v12211_v4  ;;  %3394 = vmatprep.subr.mxu1 %v11315_v0 }
 0x1e1   :  { %16791 = vst [vmem:[#allocation174_spill] sm:$0xff] %v12410_v31  ;;  %v12414_v52 = vpop.f32.mrf.mxu1  ;;  %2285 = vmatmul.mubr.f32.gmra.mxu1 %v183_v56  ;;  %1392 = vmatprep.mubr.f32.mxu0 %v11315_v0  ;;  %v2101_v56 = vld [vmem:[#allocation8 + $0xb8] sm:$0xff] }
 0x1e2   :  { %16792 = vst [vmem:[#allocation175_spill] sm:$0xff] %v12414_v52  ;;  %v12417_v42 = vpop.f32.mrf.mxu0  ;;  %2290 = vmatprep.mubr.f32.mxu1 %v11315_v0  ;;  %3395 = vmatpush2.msra.mxu1 %v3326_v16  ;;  %v185_v16 = vld [vmem:[#allocation5 + $0x78] sm:$0xff] }
 0x1e3   :  { %16793 = vst [vmem:[#allocation176_spill] sm:$0xff] %v12417_v42  ;;  %v12420_v24 = vpop.f32.mrf.mxu1  ;;  %2610 = vmatpush1.msra.mxu0 %v2104_v43  ;;  %3396 = vmatprep.subr.mxu1 %v11315_v0  ;;  %v11076_v31 = vld [vmem:[#allocation2 + $0x198] sm:$0xff] }
 0x1e4   :  { %16794 = vst [vmem:[#allocation177_spill] sm:$0xff] %v12420_v24  ;;  %v12423_v4 = vpop.f32.mrf.mxu0  ;;  %1393 = vmatmul.mubr.f32.gmra.mxu0 %v12225_v57  ;;  %3397 = vmatpush2.msra.mxu1 %v3325_v10  ;;  %v2100_v57 = vld [vmem:[#allocation8 + $0xb0] sm:$0xff] }
 0x1e5   :  { %16795 = vst [vmem:[#allocation178_spill] sm:$0xff] %v12423_v4  ;;  %v12426_v52 = vpop.f32.mrf.mxu1  ;;  %2291 = vmatmul.mubr.f32.gmra.mxu1 %v184_v51  ;;  %1398 = vmatprep.mubr.f32.mxu0 %v11315_v0  ;;  %v3323_v51 = vld [vmem:[#allocation10 + $0xd8] sm:$0xff] }
 0x1e6   :  { %16796 = vst [vmem:[#allocation179_spill] sm:$0xff] %v12426_v52  ;;  %v12429_v47 = vpop.f32.mrf.mxu0  ;;  %2296 = vmatprep.mubr.f32.mxu1 %v11315_v0  ;;  %3398 = vmatprep.subr.mxu1 %v11315_v0  ;;  %v2097_v52 = vld [vmem:[#allocation8 + $0x98] sm:$0xff] }
 0x1e7   :  { %16797 = vst [vmem:[#allocation180_spill] sm:$0xff] %v12429_v47  ;;  %v12433_v43 = vpop.f32.mrf.mxu1  ;;  %3399 = vmatpush2.msra.mxu1 %v3324_v53  ;;  %2611 = vmatprep.subr.mxu0 %v2101_v56  ;;  %v186_v53 = vld [vmem:[#allocation5 + $0x80] sm:$0xff] }
 0x1e8   :  { %16798 = vst [vmem:[#allocation181_spill] sm:$0xff] %v12433_v43  ;;  %v12435_v10 = vpop.f32.mrf.mxu0  ;;  %1399 = vmatmul.mubr.f32.gmra.mxu0 %v12239_v54  ;;  %3400 = vmatprep.subr.mxu1 %v11315_v0  ;;  %v3322_v43 = vld [vmem:[#allocation10 + $0xd0] sm:$0xff] }
 0x1e9   :  { %16799 = vst [vmem:[#allocation182_spill] sm:$0xff] %v12435_v10  ;;  %v12439_v24 = vpop.f32.mrf.mxu1  ;;  %2297 = vmatmul.mubr.f32.gmra.mxu1 %v185_v16  ;;  %1404 = vmatprep.mubr.f32.mxu0 %v11315_v0  ;;  %v11041_v10 = vld [vmem:[#allocation2 + $0x80] sm:$0xff]  ;;  %v2096_v16 = vld [vmem:[#allocation8 + $0x90] sm:$0xff] }
 0x1ea   :  { %16800 = vst [vmem:[#allocation183_spill] sm:$0xff] %v12439_v24  ;;  %v12442_v4 = vpop.f32.mrf.mxu0  ;;  %2302 = vmatprep.mubr.f32.mxu1 %v11315_v0  ;;  %2612 = vmatpush1.msra.mxu0 %v2100_v57  ;;  %v187_v57 = vld [vmem:[#allocation5 + $0x88] sm:$0xff] }
 0x1eb   :  { %16801 = vst [vmem:[#allocation184_spill] sm:$0xff] %v12442_v4  ;;  %v12445_v56 = vpop.f32.mrf.mxu1  ;;  %3401 = vmatpush2.msra.mxu1 %v3323_v51  ;;  %2613 = vmatprep.subr.mxu0 %v2097_v52  ;;  %v3321_v4 = vld [vmem:[#allocation10 + $0xc8] sm:$0xff] }
 0x1ec   :  { %16802 = vst [vmem:[#allocation185_spill] sm:$0xff] %v12445_v56  ;;  %v12447_v54 = vpop.f32.mrf.mxu0  ;;  %1405 = vmatmul.mubr.f32.gmra.mxu0 %v11041_v10  ;;  %3402 = vmatprep.subr.mxu1 %v11315_v0  ;;  %v11042_v51 = vld [vmem:[#allocation2 + $0x88] sm:$0xff]  ;;  %v2093_v56 = vld [vmem:[#allocation8 + $0x78] sm:$0xff] }
 0x1ed   :  { %16803 = vst [vmem:[#allocation186_spill] sm:$0xff] %v12447_v54  ;;  %v12450_v24 = vpop.f32.mrf.mxu1  ;;  %2303 = vmatmul.mubr.f32.gmra.mxu1 %v186_v53  ;;  %1410 = vmatprep.mubr.f32.mxu0 %v11315_v0  ;;  %v3320_v53 = vld [vmem:[#allocation10 + $0xc0] sm:$0xff] }
 0x1ee   :  { %16804 = vst [vmem:[#allocation187_spill] sm:$0xff] %v12450_v24  ;;  %v12453_v47 = vpop.f32.mrf.mxu0  ;;  %2308 = vmatprep.mubr.f32.mxu1 %v11315_v0  ;;  %3403 = vmatpush2.msra.mxu1 %v3322_v43  ;;  %v188_v43 = vld [vmem:[#allocation5 + $0x90] sm:$0xff] }
 0x1ef   :  { %16805 = vst [vmem:[#allocation188_spill] sm:$0xff] %v12453_v47  ;;  %v12456_v52 = vpop.f32.mrf.mxu1  ;;  %2614 = vmatpush1.msra.mxu0 %v2096_v16  ;;  %3404 = vmatprep.subr.mxu1 %v11315_v0 }
 0x1f0   :  { %16806 = vst [vmem:[#allocation189_spill] sm:$0xff] %v12456_v52  ;;  %v12459_v10 = vpop.f32.mrf.mxu0  ;;  %1411 = vmatmul.mubr.f32.gmra.mxu0 %v11042_v51  ;;  %3405 = vmatpush2.msra.mxu1 %v3321_v4  ;;  %v2092_v51 = vld [vmem:[#allocation8 + $0x70] sm:$0xff] }
 0x1f1   :  { %16807 = vst [vmem:[#allocation190_spill] sm:$0xff] %v12459_v10  ;;  %v12461_v24 = vpop.f32.mrf.mxu1  ;;  %2309 = vmatmul.mubr.f32.gmra.mxu1 %v187_v57  ;;  %1416 = vmatprep.mubr.f32.mxu0 %v11315_v0  ;;  %v11043_v52 = vld [vmem:[#allocation2 + $0x90] sm:$0xff]  ;;  %v3319_v57 = vld [vmem:[#allocation10 + $0xb8] sm:$0xff] }
 0x1f2   :  { %16808 = vst [vmem:[#allocation191_spill] sm:$0xff] %v12461_v24  ;;  %v12464_v54 = vpop.f32.mrf.mxu0  ;;  %2314 = vmatprep.mubr.f32.mxu1 %v11315_v0  ;;  %3406 = vmatprep.subr.mxu1 %v11315_v0 }
 0x1f3   :  { %16809 = vst [vmem:[#allocation192_spill] sm:$0xff] %v12464_v54  ;;  %v12468_v16 = vpop.f32.mrf.mxu1  ;;  %3407 = vmatpush2.msra.mxu1 %v3320_v53  ;;  %2615 = vmatprep.subr.mxu0 %v2093_v56 }
 0x1f4   :  { %16810 = vst [vmem:[#allocation193_spill] sm:$0xff] %v12468_v16  ;;  %v12470_v4 = vpop.f32.mrf.mxu0  ;;  %1417 = vmatmul.mubr.f32.gmra.mxu0 %v11043_v52  ;;  %3408 = vmatprep.subr.mxu1 %v11315_v0  ;;  %v189_v16 = vld [vmem:[#allocation5 + $0x98] sm:$0xff] }
 0x1f5   :  { %16811 = vst [vmem:[#allocation194_spill] sm:$0xff] %v12470_v4  ;;  %v12473_v24 = vpop.f32.mrf.mxu1  ;;  %2315 = vmatmul.mubr.f32.gmra.mxu1 %v188_v43  ;;  %1422 = vmatprep.mubr.f32.mxu0 %v11315_v0  ;;  %v11044_v52 = vld [vmem:[#allocation2 + $0x98] sm:$0xff] }
 0x1f6   :  { %16812 = vst [vmem:[#allocation195_spill] sm:$0xff] %v12473_v24  ;;  %v12476_v10 = vpop.f32.mrf.mxu0  ;;  %2320 = vmatprep.mubr.f32.mxu1 %v11315_v0  ;;  %2616 = vmatpush1.msra.mxu0 %v2092_v51  ;;  %v190_v24 = vld [vmem:[#allocation5 + $0xa0] sm:$0xff]  ;;  %v3318_v51 = vld [vmem:[#allocation10 + $0xb0] sm:$0xff] }
 0x1f7   :  { %16813 = vst [vmem:[#allocation196_spill] sm:$0xff] %v12476_v10  ;;  %v12479_v56 = vpop.f32.mrf.mxu1  ;;  %3409 = vmatpush2.msra.mxu1 %v3319_v57 }
 0x1f8   :  { %16814 = vst [vmem:[#allocation197_spill] sm:$0xff] %v12479_v56  ;;  %v12481_v53 = vpop.f32.mrf.mxu0  ;;  %1423 = vmatmul.mubr.f32.gmra.mxu0 %v11044_v52  ;;  %3410 = vmatprep.subr.mxu1 %v11315_v0  ;;  %v11045_v56 = vld [vmem:[#allocation2 + $0xa0] sm:$0xff] }
 0x1f9   :  { %16815 = vst [vmem:[#allocation198_spill] sm:$0xff] %v12481_v53  ;;  %v12484_v4 = vpop.f32.mrf.mxu1  ;;  %2321 = vmatmul.mubr.f32.gmra.mxu1 %v189_v16  ;;  %1428 = vmatprep.mubr.f32.mxu0 %v11315_v0  ;;  %v2089_v53 = vld [vmem:[#allocation8 + $0x58] sm:$0xff] }
 0x1fa   :  { %16816 = vst [vmem:[#allocation199_spill] sm:$0xff] %v12484_v4  ;;  %v12487_v43 = vpop.f32.mrf.mxu0  ;;  %2326 = vmatprep.mubr.f32.mxu1 %v11315_v0  ;;  %3411 = vmatpush2.msra.mxu1 %v3318_v51  ;;  %v191_v4 = vld [vmem:[#allocation5 + $0xa8] sm:$0xff]  ;;  %v2088_v51 = vld [vmem:[#allocation8 + $0x50] sm:$0xff] }
 0x1fb   :  { %16817 = vst [vmem:[#allocation200_spill] sm:$0xff] %v12487_v43  ;;  %v12490_v10 = vpop.f32.mrf.mxu1  ;;  %3412 = vmatprep.subr.mxu1 %v11315_v0  ;;  %2617 = vmatprep.subr.mxu0 %v2089_v53 }
 0x1fc   :  { %16818 = vst [vmem:[#allocation201_spill] sm:$0xff] %v12490_v10  ;;  %v12492_v57 = vpop.f32.mrf.mxu0  ;;  %1429 = vmatmul.mubr.f32.gmra.mxu0 %v11045_v56  ;;  %v11046_v56 = vld [vmem:[#allocation2 + $0xa8] sm:$0xff] }
 0x1fd   :  { %16819 = vst [vmem:[#allocation202_spill] sm:$0xff] %v12492_v57  ;;  %v12495_v52 = vpop.f32.mrf.mxu1  ;;  %2327 = vmatmul.mubr.f32.gmra.mxu1 %v190_v24  ;;  %1434 = vmatprep.mubr.f32.mxu0 %v11315_v0 }
 0x1fe   :  { %16820 = vst [vmem:[#allocation203_spill] sm:$0xff] %v12495_v52  ;;  %v12498_v16 = vpop.f32.mrf.mxu0  ;;  %2332 = vmatprep.mubr.f32.mxu1 %v11315_v0  ;;  %v192_v52 = vld [vmem:[#allocation5 + $0xb0] sm:$0xff]  ;;  %2618 = vmatpush1.msra.mxu0 %v2088_v51  ;;  %v193_v51 = vld [vmem:[#allocation5 + $0xb8] sm:$0xff] }
 0x1ff   :  { %16821 = vst [vmem:[#allocation204_spill] sm:$0xff] %v12498_v16  ;;  %v12501_v43 = vpop.f32.mrf.mxu1  ;;  %v3317_v16 = vld [vmem:[#allocation10 + $0xa8] sm:$0xff] }
 0x200   :  { %16822 = vst [vmem:[#allocation205_spill] sm:$0xff] %v12501_v43  ;;  %v12503_v10 = vpop.f32.mrf.mxu0  ;;  %1435 = vmatmul.mubr.f32.gmra.mxu0 %v11046_v56  ;;  %3413 = vmatpush2.msra.mxu1 %v3317_v16  ;;  %v11047_v43 = vld [vmem:[#allocation2 + $0xb0] sm:$0xff]  ;;  %v11048_v16 = vld [vmem:[#allocation2 + $0xb8] sm:$0xff] }
 0x201   :  { %16823 = vst [vmem:[#allocation206_spill] sm:$0xff] %v12503_v10  ;;  %v12505_v57 = vpop.f32.mrf.mxu1  ;;  %2333 = vmatmul.mubr.f32.gmra.mxu1 %v191_v4  ;;  %1440 = vmatprep.mubr.f32.mxu0 %v11315_v0 }
 0x202   :  { %16824 = vst [vmem:[#allocation207_spill] sm:$0xff] %v12505_v57  ;;  %v12508_v24 = vpop.f32.mrf.mxu0  ;;  %2338 = vmatprep.mubr.f32.mxu1 %v11315_v0  ;;  %3414 = vmatprep.subr.mxu1 %v11315_v0 }
 0x203   :  { %16825 = vst [vmem:[#allocation208_spill] sm:$0xff] %v12508_v24  ;;  %v12511_v54 = vpop.f32.mrf.mxu1 }
 0x204   :  { %16826 = vst [vmem:[#allocation209_spill] sm:$0xff] %v12511_v54  ;;  %v12513_v53 = vpop.f32.mrf.mxu0  ;;  %1441 = vmatmul.mubr.f32.gmra.mxu0 %v11047_v43 }
 0x205   :  { %16827 = vst [vmem:[#allocation210_spill] sm:$0xff] %v12513_v53  ;;  %v12516_v56 = vpop.f32.mrf.mxu1  ;;  %2339 = vmatmul.mubr.f32.gmra.mxu1 %v192_v52  ;;  %1446 = vmatprep.mubr.f32.mxu0 %v11315_v0  ;;  %v194_v52 = vld [vmem:[#allocation5 + $0xc0] sm:$0xff] }
 0x206   :  { %16828 = vst [vmem:[#allocation211_spill] sm:$0xff] %v12516_v56  ;;  %v12519_v4 = vpop.f32.mrf.mxu0  ;;  %2344 = vmatprep.mubr.f32.mxu1 %v11315_v0  ;;  %v3316_v56 = vld [vmem:[#allocation10 + $0xa0] sm:$0xff] }
 0x207   :  { %16829 = vst [vmem:[#allocation212_spill] sm:$0xff] %v12519_v4  ;;  %v12522_v57 = vpop.f32.mrf.mxu1  ;;  %3415 = vmatpush2.msra.mxu1 %v3316_v56  ;;  %v2084_v56 = vld [vmem:[#allocation8 + $0x30] sm:$0xff] }
 0x208   :  { %16830 = vst [vmem:[#allocation213_spill] sm:$0xff] %v12522_v57  ;;  %v12524_v54 = vpop.f32.mrf.mxu0  ;;  %1447 = vmatmul.mubr.f32.gmra.mxu0 %v11048_v16  ;;  %v11049_v57 = vld [vmem:[#allocation2 + $0xc0] sm:$0xff]  ;;  %3416 = vmatprep.subr.mxu1 %v11315_v0 }
 0x209   :  { %16831 = vst [vmem:[#allocation214_spill] sm:$0xff] %v12524_v54  ;;  %v12526_v53 = vpop.f32.mrf.mxu1  ;;  %2345 = vmatmul.mubr.f32.gmra.mxu1 %v193_v51  ;;  %1452 = vmatprep.mubr.f32.mxu0 %v11315_v0  ;;  %v2085_v54 = vld [vmem:[#allocation8 + $0x38] sm:$0xff] }
 0x20a   :  { %16832 = vst [vmem:[#allocation215_spill] sm:$0xff] %v12526_v53  ;;  %v12529_v43 = vpop.f32.mrf.mxu0  ;;  %2350 = vmatprep.mubr.f32.mxu1 %v11315_v0  ;;  %v195_v53 = vld [vmem:[#allocation5 + $0xc8] sm:$0xff]  ;;  %2619 = vmatprep.subr.mxu0 %v2085_v54 }
 0x20b   :  { %16833 = vst [vmem:[#allocation216_spill] sm:$0xff] %v12529_v43  ;;  %v12532_v4 = vpop.f32.mrf.mxu1  ;;  %2620 = vmatpush1.msra.mxu0 %v2084_v56  ;;  %v197_v56 = vld [vmem:[#allocation5 + $0xd8] sm:$0xff] }
 0x20c   :  { %16834 = vst [vmem:[#allocation217_spill] sm:$0xff] %v12532_v4  ;;  %v12534_v10 = vpop.f32.mrf.mxu0  ;;  %1453 = vmatmul.mubr.f32.gmra.mxu0 %v11049_v57  ;;  %v11050_v57 = vld [vmem:[#allocation2 + $0xc8] sm:$0xff] }
 0x20d   :  { %16835 = vst [vmem:[#allocation218_spill] sm:$0xff] %v12534_v10  ;;  %v12537_v16 = vpop.f32.mrf.mxu1  ;;  %2351 = vmatmul.mubr.f32.gmra.mxu1 %v194_v52  ;;  %1458 = vmatprep.mubr.f32.mxu0 %v11315_v0 }
 0x20e   :  { %16836 = vst [vmem:[#allocation219_spill] sm:$0xff] %v12537_v16  ;;  %v12540_v51 = vpop.f32.mrf.mxu0  ;;  %2356 = vmatprep.mubr.f32.mxu1 %v11315_v0  ;;  %v196_v16 = vld [vmem:[#allocation5 + $0xd0] sm:$0xff] }
 0x20f   :  { %16837 = vst [vmem:[#allocation220_spill] sm:$0xff] %v12540_v51  ;;  %v12543_v43 = vpop.f32.mrf.mxu1  ;;  %v3315_v51 = vld [vmem:[#allocation10 + $0x98] sm:$0xff] }
 0x210   :  { %16838 = vst [vmem:[#allocation221_spill] sm:$0xff] %v12543_v43  ;;  %v12545_v4 = vpop.f32.mrf.mxu0  ;;  %1459 = vmatmul.mubr.f32.gmra.mxu0 %v11050_v57  ;;  %3417 = vmatpush2.msra.mxu1 %v3315_v51  ;;  %v11051_v43 = vld [vmem:[#allocation2 + $0xd0] sm:$0xff]  ;;  %v11052_v51 = vld [vmem:[#allocation2 + $0xd8] sm:$0xff] }
 0x211   :  { %16839 = vst [vmem:[#allocation222_spill] sm:$0xff] %v12545_v4  ;;  %v12547_v10 = vpop.f32.mrf.mxu1  ;;  %2357 = vmatmul.mubr.f32.gmra.mxu1 %v195_v53  ;;  %1464 = vmatprep.mubr.f32.mxu0 %v11315_v0 }
 0x212   :  { %16840 = vst [vmem:[#allocation223_spill] sm:$0xff] %v12547_v10  ;;  %v12550_v52 = vpop.f32.mrf.mxu0  ;;  %2362 = vmatprep.mubr.f32.mxu1 %v11315_v0  ;;  %3418 = vmatprep.subr.mxu1 %v11315_v0 }
 0x213   :  { %16841 = vst [vmem:[#allocation224_spill] sm:$0xff] %v12550_v52  ;;  %v12553_v24 = vpop.f32.mrf.mxu1 }
 0x214   :  { %16842 = vst [vmem:[#allocation225_spill] sm:$0xff] %v12553_v24  ;;  %v12555_v54 = vpop.f32.mrf.mxu0  ;;  %1465 = vmatmul.mubr.f32.gmra.mxu0 %v11051_v43 }
 0x215   :  { %16843 = vst [vmem:[#allocation226_spill] sm:$0xff] %v12555_v54  ;;  %v12558_v57 = vpop.f32.mrf.mxu1  ;;  %2363 = vmatmul.mubr.f32.gmra.mxu1 %v196_v16  ;;  %1470 = vmatprep.mubr.f32.mxu0 %v11315_v0  ;;  %v198_v16 = vld [vmem:[#allocation5 + $0xe0] sm:$0xff] }
 0x216   :  { %16844 = vst [vmem:[#allocation227_spill] sm:$0xff] %v12558_v57  ;;  %v12561_v53 = vpop.f32.mrf.mxu0  ;;  %2368 = vmatprep.mubr.f32.mxu1 %v11315_v0  ;;  %v3314_v57 = vld [vmem:[#allocation10 + $0x90] sm:$0xff] }
 0x217   :  { %16845 = vst [vmem:[#allocation228_spill] sm:$0xff] %v12561_v53  ;;  %v12564_v10 = vpop.f32.mrf.mxu1  ;;  %3419 = vmatpush2.msra.mxu1 %v3314_v57  ;;  %v2080_v57 = vld [vmem:[#allocation8 + $0x10] sm:$0xff] }
 0x218   :  { %16846 = vst [vmem:[#allocation229_spill] sm:$0xff] %v12564_v10  ;;  %v12566_v24 = vpop.f32.mrf.mxu0  ;;  %1471 = vmatmul.mubr.f32.gmra.mxu0 %v11052_v51  ;;  %v11053_v10 = vld [vmem:[#allocation2 + $0xe0] sm:$0xff]  ;;  %3420 = vmatprep.subr.mxu1 %v11315_v0 }
 0x219   :  { %16847 = vst [vmem:[#allocation230_spill] sm:$0xff] %v12566_v24  ;;  %v12568_v54 = vpop.f32.mrf.mxu1  ;;  %2369 = vmatmul.mubr.f32.gmra.mxu1 %v197_v56  ;;  %1476 = vmatprep.mubr.f32.mxu0 %v11315_v0  ;;  %v2081_v24 = vld [vmem:[#allocation8 + $0x18] sm:$0xff] }
 0x21a   :  { %16848 = vst [vmem:[#allocation231_spill] sm:$0xff] %v12568_v54  ;;  %v12571_v43 = vpop.f32.mrf.mxu0  ;;  %2374 = vmatprep.mubr.f32.mxu1 %v11315_v0  ;;  %v199_v54 = vld [vmem:[#allocation5 + $0xe8] sm:$0xff]  ;;  %2621 = vmatprep.subr.mxu0 %v2081_v24 }
 0x21b   :  { %16849 = vst [vmem:[#allocation232_spill] sm:$0xff] %v12571_v43  ;;  %v12574_v53 = vpop.f32.mrf.mxu1  ;;  %2622 = vmatpush1.msra.mxu0 %v2080_v57  ;;  %v201_v57 = vld [vmem:[#allocation5 + $0xf8] sm:$0xff] }
 0x21c   :  { %16850 = vst [vmem:[#allocation233_spill] sm:$0xff] %v12574_v53  ;;  %v12576_v4 = vpop.f32.mrf.mxu0  ;;  %1477 = vmatmul.mubr.f32.gmra.mxu0 %v11053_v10  ;;  %v11054_v10 = vld [vmem:[#allocation2 + $0xe8] sm:$0xff]  ;;  %3745 = vmatprep.subr.mxu0 %v11315_v0 }
 0x21d   :  { %16851 = vst [vmem:[#allocation234_spill] sm:$0xff] %v12576_v4  ;;  %v12579_v51 = vpop.f32.mrf.mxu1  ;;  %2375 = vmatmul.mubr.f32.gmra.mxu1 %v198_v16  ;;  %1482 = vmatprep.mubr.f32.mxu0 %v11315_v0 }
 0x21e   :  { %16852 = vst [vmem:[#allocation235_spill] sm:$0xff] %v12579_v51  ;;  %v12582_v56 = vpop.f32.mrf.mxu0  ;;  %2380 = vmatprep.mubr.f32.mxu1 %v11315_v0  ;;  %v200_v51 = vld [vmem:[#allocation5 + $0xf0] sm:$0xff] }
 0x21f   :  { %16853 = vst [vmem:[#allocation236_spill] sm:$0xff] %v12582_v56  ;;  %v12585_v43 = vpop.f32.mrf.mxu1  ;;  %v3313_v56 = vld [vmem:[#allocation10 + $0x88] sm:$0xff] }
 0x220   :  { %16854 = vst [vmem:[#allocation237_spill] sm:$0xff] %v12585_v43  ;;  %v12587_v53 = vpop.f32.mrf.mxu0  ;;  %1483 = vmatmul.mubr.f32.gmra.mxu0 %v11054_v10  ;;  %3421 = vmatpush2.msra.mxu1 %v3313_v56  ;;  %v11055_v10 = vld [vmem:[#allocation2 + $0xf0] sm:$0xff]  ;;  %v11056_v43 = vld [vmem:[#allocation2 + $0xf8] sm:$0xff] }
 0x221   :  { %16855 = vst [vmem:[#allocation238_spill] sm:$0xff] %v12587_v53  ;;  %v12589_v4 = vpop.f32.mrf.mxu1  ;;  %2381 = vmatmul.mubr.f32.gmra.mxu1 %v199_v54  ;;  %1488 = vmatprep.mubr.f32.mxu0 %v11315_v0 }
 0x222   :  { %16856 = vst [vmem:[#allocation239_spill] sm:$0xff] %v12589_v4  ;;  %v12592_v16 = vpop.f32.mrf.mxu0  ;;  %2386 = vmatprep.mubr.f32.mxu1 %v11315_v0  ;;  %3422 = vmatprep.subr.mxu1 %v11315_v0 }
 0x223   :  { %16857 = vst [vmem:[#allocation240_spill] sm:$0xff] %v12592_v16  ;;  %v12595_v52 = vpop.f32.mrf.mxu1  ;;  %v11075_v16 = vld [vmem:[#allocation2 + $0x190] sm:$0xff] }
 0x224   :  { %16858 = vst [vmem:[#allocation241_spill] sm:$0xff] %v12595_v52  ;;  %v12598_v24 = vpop.f32.mrf.mxu0  ;;  %1489 = vmatmul.mubr.f32.gmra.mxu0 %v11055_v10 }
 0x225   :  { %16859 = vst [vmem:[#allocation242_spill] sm:$0xff] %v12598_v24  ;;  %v12601_v54 = vpop.f32.mrf.mxu1  ;;  %2387 = vmatmul.mubr.f32.gmra.mxu1 %v200_v51  ;;  %1494 = vmatprep.mubr.f32.mxu0 %v11315_v0  ;;  %v202_v51 = vld [vmem:[#allocation5 + $0x100] sm:$0xff] }
 0x226   :  { %16860 = vst [vmem:[#allocation243_spill] sm:$0xff] %v12601_v54  ;;  %v12604_v4 = vpop.f32.mrf.mxu0  ;;  %2392 = vmatprep.mubr.f32.mxu1 %v11315_v0  ;;  %v3312_v54 = vld [vmem:[#allocation10 + $0x80] sm:$0xff] }
 0x227   :  { %16861 = vst [vmem:[#allocation244_spill] sm:$0xff] %v12604_v4  ;;  %v12607_v52 = vpop.f32.mrf.mxu1  ;;  %3423 = vmatpush2.msra.mxu1 %v3312_v54  ;;  %v11058_v54 = vld [vmem:[#allocation2 + $0x108] sm:$0xff] }
 0x228   :  { %16862 = vst [vmem:[#allocation245_spill] sm:$0xff] %v12607_v52  ;;  %v12609_v56 = vpop.f32.mrf.mxu0  ;;  %1495 = vmatmul.mubr.f32.gmra.mxu0 %v11056_v43  ;;  %v11057_v52 = vld [vmem:[#allocation2 + $0x100] sm:$0xff]  ;;  %4354 = vmatprep.subr.mxu1 %v11315_v0 }
 0x229   :  { %16863 = vst [vmem:[#allocation246_spill] sm:$0xff] %v12609_v56  ;;  %v12611_v24 = vpop.f32.mrf.mxu1  ;;  %2393 = vmatmul.mubr.f32.gmra.mxu1 %v201_v57  ;;  %1500 = vmatprep.mubr.f32.mxu0 %v11315_v0 }
 0x22a   :  { %16864 = vst [vmem:[#allocation247_spill] sm:$0xff] %v12611_v24  ;;  %v12614_v10 = vpop.f32.mrf.mxu0  ;;  %2398 = vmatprep.mubr.f32.mxu1 %v11315_v0  ;;  %v203_v24 = vld [vmem:[#allocation5 + $0x108] sm:$0xff] }
 0x22b   :  { %16865 = vst [vmem:[#allocation248_spill] sm:$0xff] %v12614_v10  ;;  %v12617_v4 = vpop.f32.mrf.mxu1  ;;  %v11059_v10 = vld [vmem:[#allocation2 + $0x110] sm:$0xff] }
 0x22c   :  { %16866 = vst [vmem:[#allocation249_spill] sm:$0xff] %v12617_v4  ;;  %v12619_v53 = vpop.f32.mrf.mxu0  ;;  %1501 = vmatmul.mubr.f32.gmra.mxu0 %v11057_v52 }
 0x22d   :  { %16867 = vst [vmem:[#allocation250_spill] sm:$0xff] %v12619_v53  ;;  %v12622_v43 = vpop.f32.mrf.mxu1  ;;  %2399 = vmatmul.mubr.f32.gmra.mxu1 %v202_v51  ;;  %1506 = vmatprep.mubr.f32.mxu0 %v11315_v0  ;;  %v204_v51 = vld [vmem:[#allocation5 + $0x110] sm:$0xff] }
 0x22e   :  { %16868 = vst [vmem:[#allocation251_spill] sm:$0xff] %v12622_v43  ;;  %v12625_v57 = vpop.f32.mrf.mxu0  ;;  %2404 = vmatprep.mubr.f32.mxu1 %v11315_v0 }
 0x22f   :  { %16869 = vst [vmem:[#allocation252_spill] sm:$0xff] %v12625_v57  ;;  %v12628_v56 = vpop.f32.mrf.mxu1 }
 0x230   :  { %16870 = vst [vmem:[#allocation253_spill] sm:$0xff] %v12628_v56  ;;  %v12630_v4 = vpop.f32.mrf.mxu0  ;;  %1507 = vmatmul.mubr.f32.gmra.mxu0 %v11058_v54 }
 0x231   :  { %16871 = vst [vmem:[#allocation254_spill] sm:$0xff] %v12630_v4  ;;  %v12632_v53 = vpop.f32.mrf.mxu1  ;;  %2405 = vmatmul.mubr.f32.gmra.mxu1 %v203_v24  ;;  %1512 = vmatprep.mubr.f32.mxu0 %v11315_v0  ;;  %v205_v24 = vld [vmem:[#allocation5 + $0x118] sm:$0xff] }
 0x232   :  { %16872 = vst [vmem:[#allocation255_spill] sm:$0xff] %v12632_v53  ;;  %v12635_v52 = vpop.f32.mrf.mxu0  ;;  %2410 = vmatprep.mubr.f32.mxu1 %v11315_v0 }
 0x233   :  { %16873 = vst [vmem:[#allocation256_spill] sm:$0xff] %v12635_v52  ;;  %v12638_v43 = vpop.f32.mrf.mxu1  ;;  %v11060_v52 = vld [vmem:[#allocation2 + $0x118] sm:$0xff] }
 0x234   :  { %16874 = vst [vmem:[#allocation257_spill] sm:$0xff] %v12638_v43  ;;  %v12640_v57 = vpop.f32.mrf.mxu0  ;;  %1513 = vmatmul.mubr.f32.gmra.mxu0 %v11059_v10 }
 0x235   :  { %16875 = vst [vmem:[#allocation258_spill] sm:$0xff] %v12640_v57  ;;  %v12642_v56 = vpop.f32.mrf.mxu1  ;;  %2411 = vmatmul.mubr.f32.gmra.mxu1 %v204_v51  ;;  %1518 = vmatprep.mubr.f32.mxu0 %v11315_v0  ;;  %v206_v51 = vld [vmem:[#allocation5 + $0x120] sm:$0xff] }
 0x236   :  { %16876 = vst [vmem:[#allocation259_spill] sm:$0xff] %v12642_v56  ;;  %v12645_v54 = vpop.f32.mrf.mxu0  ;;  %2416 = vmatprep.mubr.f32.mxu1 %v11315_v0 }
 0x237   :  { %16877 = vst [vmem:[#allocation260_spill] sm:$0xff] %v12645_v54  ;;  %v12648_v53 = vpop.f32.mrf.mxu1  ;;  %v11061_v54 = vld [vmem:[#allocation2 + $0x120] sm:$0xff] }
 0x238   :  { %16878 = vst [vmem:[#allocation261_spill] sm:$0xff] %v12648_v53  ;;  %v12650_v4 = vpop.f32.mrf.mxu0  ;;  %1519 = vmatmul.mubr.f32.gmra.mxu0 %v11060_v52 }
 0x239   :  { %16879 = vst [vmem:[#allocation262_spill] sm:$0xff] %v12650_v4  ;;  %v12652_v43 = vpop.f32.mrf.mxu1  ;;  %2417 = vmatmul.mubr.f32.gmra.mxu1 %v205_v24  ;;  %1524 = vmatprep.mubr.f32.mxu0 %v11315_v0  ;;  %v207_v24 = vld [vmem:[#allocation5 + $0x128] sm:$0xff] }
 0x23a   :  { %16880 = vst [vmem:[#allocation263_spill] sm:$0xff] %v12652_v43  ;;  %v12655_v10 = vpop.f32.mrf.mxu0  ;;  %2422 = vmatprep.mubr.f32.mxu1 %v11315_v0 }
 0x23b   :  { %16881 = vst [vmem:[#allocation264_spill] sm:$0xff] %v12655_v10  ;;  %v12658_v56 = vpop.f32.mrf.mxu1  ;;  %v11062_v10 = vld [vmem:[#allocation2 + $0x128] sm:$0xff] }
 0x23c   :  { %16882 = vst [vmem:[#allocation265_spill] sm:$0xff] %v12658_v56  ;;  %v12660_v57 = vpop.f32.mrf.mxu0  ;;  %1525 = vmatmul.mubr.f32.gmra.mxu0 %v11061_v54 }
 0x23d   :  { %16883 = vst [vmem:[#allocation266_spill] sm:$0xff] %v12660_v57  ;;  %v12662_v53 = vpop.f32.mrf.mxu1  ;;  %2423 = vmatmul.mubr.f32.gmra.mxu1 %v206_v51  ;;  %1530 = vmatprep.mubr.f32.mxu0 %v11315_v0  ;;  %v208_v51 = vld [vmem:[#allocation5 + $0x130] sm:$0xff] }
 0x23e   :  { %16884 = vst [vmem:[#allocation267_spill] sm:$0xff] %v12662_v53  ;;  %v12665_v52 = vpop.f32.mrf.mxu0  ;;  %2428 = vmatprep.mubr.f32.mxu1 %v11315_v0 }
 0x23f   :  { %16885 = vst [vmem:[#allocation268_spill] sm:$0xff] %v12665_v52  ;;  %v12668_v43 = vpop.f32.mrf.mxu1  ;;  %v11063_v52 = vld [vmem:[#allocation2 + $0x130] sm:$0xff] }
 0x240   :  { %16886 = vst [vmem:[#allocation269_spill] sm:$0xff] %v12668_v43  ;;  %v12670_v4 = vpop.f32.mrf.mxu0  ;;  %1531 = vmatmul.mubr.f32.gmra.mxu0 %v11062_v10 }
 0x241   :  { %16887 = vst [vmem:[#allocation270_spill] sm:$0xff] %v12670_v4  ;;  %v12672_v56 = vpop.f32.mrf.mxu1  ;;  %2429 = vmatmul.mubr.f32.gmra.mxu1 %v207_v24  ;;  %1536 = vmatprep.mubr.f32.mxu0 %v11315_v0  ;;  %v209_v24 = vld [vmem:[#allocation5 + $0x138] sm:$0xff] }
 0x242   :  { %16888 = vst [vmem:[#allocation271_spill] sm:$0xff] %v12672_v56  ;;  %v12675_v54 = vpop.f32.mrf.mxu0  ;;  %2434 = vmatprep.mubr.f32.mxu1 %v11315_v0 }
 0x243   :  { %16889 = vst [vmem:[#allocation272_spill] sm:$0xff] %v12675_v54  ;;  %v12678_v53 = vpop.f32.mrf.mxu1  ;;  %v11064_v54 = vld [vmem:[#allocation2 + $0x138] sm:$0xff] }
 0x244   :  { %16890 = vst [vmem:[#allocation273_spill] sm:$0xff] %v12678_v53  ;;  %v12680_v57 = vpop.f32.mrf.mxu0  ;;  %1537 = vmatmul.mubr.f32.gmra.mxu0 %v11063_v52 }
 0x245   :  { %16891 = vst [vmem:[#allocation274_spill] sm:$0xff] %v12680_v57  ;;  %v12682_v43 = vpop.f32.mrf.mxu1  ;;  %2435 = vmatmul.mubr.f32.gmra.mxu1 %v208_v51  ;;  %1542 = vmatprep.mubr.f32.mxu0 %v11315_v0  ;;  %v210_v51 = vld [vmem:[#allocation5 + $0x140] sm:$0xff] }
 0x246   :  { %16892 = vst [vmem:[#allocation275_spill] sm:$0xff] %v12682_v43  ;;  %v12685_v10 = vpop.f32.mrf.mxu0  ;;  %2440 = vmatprep.mubr.f32.mxu1 %v11315_v0 }
 0x247   :  { %16893 = vst [vmem:[#allocation276_spill] sm:$0xff] %v12685_v10  ;;  %v12688_v56 = vpop.f32.mrf.mxu1  ;;  %v11065_v10 = vld [vmem:[#allocation2 + $0x140] sm:$0xff] }
 0x248   :  { %16894 = vst [vmem:[#allocation277_spill] sm:$0xff] %v12688_v56  ;;  %v12690_v4 = vpop.f32.mrf.mxu0  ;;  %1543 = vmatmul.mubr.f32.gmra.mxu0 %v11064_v54 }
 0x249   :  { %16895 = vst [vmem:[#allocation278_spill] sm:$0xff] %v12690_v4  ;;  %v12692_v53 = vpop.f32.mrf.mxu1  ;;  %2441 = vmatmul.mubr.f32.gmra.mxu1 %v209_v24  ;;  %1548 = vmatprep.mubr.f32.mxu0 %v11315_v0  ;;  %v211_v24 = vld [vmem:[#allocation5 + $0x148] sm:$0xff] }
 0x24a   :  { %16896 = vst [vmem:[#allocation279_spill] sm:$0xff] %v12692_v53  ;;  %v12695_v52 = vpop.f32.mrf.mxu0  ;;  %2446 = vmatprep.mubr.f32.mxu1 %v11315_v0 }
 0x24b   :  { %16897 = vst [vmem:[#allocation280_spill] sm:$0xff] %v12695_v52  ;;  %v12698_v43 = vpop.f32.mrf.mxu1  ;;  %v11066_v52 = vld [vmem:[#allocation2 + $0x148] sm:$0xff] }
 0x24c   :  { %16898 = vst [vmem:[#allocation281_spill] sm:$0xff] %v12698_v43  ;;  %v12700_v57 = vpop.f32.mrf.mxu0  ;;  %1549 = vmatmul.mubr.f32.gmra.mxu0 %v11065_v10 }
 0x24d   :  { %16899 = vst [vmem:[#allocation282_spill] sm:$0xff] %v12700_v57  ;;  %v12702_v56 = vpop.f32.mrf.mxu1  ;;  %2447 = vmatmul.mubr.f32.gmra.mxu1 %v210_v51  ;;  %1554 = vmatprep.mubr.f32.mxu0 %v11315_v0  ;;  %v212_v51 = vld [vmem:[#allocation5 + $0x150] sm:$0xff] }
 0x24e   :  { %16900 = vst [vmem:[#allocation283_spill] sm:$0xff] %v12702_v56  ;;  %v12705_v54 = vpop.f32.mrf.mxu0  ;;  %2452 = vmatprep.mubr.f32.mxu1 %v11315_v0 }
 0x24f   :  { %16901 = vst [vmem:[#allocation284_spill] sm:$0xff] %v12705_v54  ;;  %v12708_v53 = vpop.f32.mrf.mxu1  ;;  %v11067_v54 = vld [vmem:[#allocation2 + $0x150] sm:$0xff] }
 0x250   :  { %16902 = vst [vmem:[#allocation285_spill] sm:$0xff] %v12708_v53  ;;  %v12710_v4 = vpop.f32.mrf.mxu0  ;;  %1555 = vmatmul.mubr.f32.gmra.mxu0 %v11066_v52 }
 0x251   :  { %16903 = vst [vmem:[#allocation286_spill] sm:$0xff] %v12710_v4  ;;  %v12712_v43 = vpop.f32.mrf.mxu1  ;;  %2453 = vmatmul.mubr.f32.gmra.mxu1 %v211_v24  ;;  %1560 = vmatprep.mubr.f32.mxu0 %v11315_v0  ;;  %v213_v24 = vld [vmem:[#allocation5 + $0x158] sm:$0xff] }
 0x252   :  { %16904 = vst [vmem:[#allocation287_spill] sm:$0xff] %v12712_v43  ;;  %v12715_v10 = vpop.f32.mrf.mxu0  ;;  %2458 = vmatprep.mubr.f32.mxu1 %v11315_v0 }
 0x253   :  { %16905 = vst [vmem:[#allocation288_spill] sm:$0xff] %v12715_v10  ;;  %v12718_v56 = vpop.f32.mrf.mxu1  ;;  %v11068_v10 = vld [vmem:[#allocation2 + $0x158] sm:$0xff] }
 0x254   :  { %16906 = vst [vmem:[#allocation289_spill] sm:$0xff] %v12718_v56  ;;  %v12720_v57 = vpop.f32.mrf.mxu0  ;;  %1561 = vmatmul.mubr.f32.gmra.mxu0 %v11067_v54 }
 0x255   :  { %16907 = vst [vmem:[#allocation290_spill] sm:$0xff] %v12720_v57  ;;  %v12722_v53 = vpop.f32.mrf.mxu1  ;;  %2459 = vmatmul.mubr.f32.gmra.mxu1 %v212_v51  ;;  %1566 = vmatprep.mubr.f32.mxu0 %v11315_v0  ;;  %v214_v51 = vld [vmem:[#allocation5 + $0x160] sm:$0xff] }
 0x256   :  { %16908 = vst [vmem:[#allocation291_spill] sm:$0xff] %v12722_v53  ;;  %v12725_v52 = vpop.f32.mrf.mxu0  ;;  %2464 = vmatprep.mubr.f32.mxu1 %v11315_v0 }
 0x257   :  { %16909 = vst [vmem:[#allocation292_spill] sm:$0xff] %v12725_v52  ;;  %v12728_v43 = vpop.f32.mrf.mxu1  ;;  %v11069_v52 = vld [vmem:[#allocation2 + $0x160] sm:$0xff] }
 0x258   :  { %16910 = vst [vmem:[#allocation293_spill] sm:$0xff] %v12728_v43  ;;  %v12730_v4 = vpop.f32.mrf.mxu0  ;;  %1567 = vmatmul.mubr.f32.gmra.mxu0 %v11068_v10 }
 0x259   :  { %16911 = vst [vmem:[#allocation294_spill] sm:$0xff] %v12730_v4  ;;  %v12732_v56 = vpop.f32.mrf.mxu1  ;;  %2465 = vmatmul.mubr.f32.gmra.mxu1 %v213_v24  ;;  %1572 = vmatprep.mubr.f32.mxu0 %v11315_v0  ;;  %v215_v24 = vld [vmem:[#allocation5 + $0x168] sm:$0xff] }
 0x25a   :  { %16912 = vst [vmem:[#allocation295_spill] sm:$0xff] %v12732_v56  ;;  %v12735_v54 = vpop.f32.mrf.mxu0  ;;  %2470 = vmatprep.mubr.f32.mxu1 %v11315_v0 }
 0x25b   :  { %16913 = vst [vmem:[#allocation296_spill] sm:$0xff] %v12735_v54  ;;  %v12738_v53 = vpop.f32.mrf.mxu1  ;;  %v11070_v54 = vld [vmem:[#allocation2 + $0x168] sm:$0xff] }
 0x25c   :  { %16914 = vst [vmem:[#allocation297_spill] sm:$0xff] %v12738_v53  ;;  %v12740_v57 = vpop.f32.mrf.mxu0  ;;  %1573 = vmatmul.mubr.f32.gmra.mxu0 %v11069_v52 }
 0x25d   :  { %16915 = vst [vmem:[#allocation298_spill] sm:$0xff] %v12740_v57  ;;  %v12742_v43 = vpop.f32.mrf.mxu1  ;;  %2471 = vmatmul.mubr.f32.gmra.mxu1 %v214_v51  ;;  %1578 = vmatprep.mubr.f32.mxu0 %v11315_v0  ;;  %v216_v51 = vld [vmem:[#allocation5 + $0x170] sm:$0xff] }
 0x25e   :  { %16916 = vst [vmem:[#allocation299_spill] sm:$0xff] %v12742_v43  ;;  %v12745_v10 = vpop.f32.mrf.mxu0  ;;  %2476 = vmatprep.mubr.f32.mxu1 %v11315_v0 }
 0x25f   :  { %16917 = vst [vmem:[#allocation300_spill] sm:$0xff] %v12745_v10  ;;  %v12748_v56 = vpop.f32.mrf.mxu1  ;;  %v11071_v10 = vld [vmem:[#allocation2 + $0x170] sm:$0xff] }
 0x260   :  { %16918 = vst [vmem:[#allocation301_spill] sm:$0xff] %v12748_v56  ;;  %v12750_v4 = vpop.f32.mrf.mxu0  ;;  %1579 = vmatmul.mubr.f32.gmra.mxu0 %v11070_v54 }
 0x261   :  { %16919 = vst [vmem:[#allocation302_spill] sm:$0xff] %v12750_v4  ;;  %v12752_v53 = vpop.f32.mrf.mxu1  ;;  %2477 = vmatmul.mubr.f32.gmra.mxu1 %v215_v24  ;;  %1584 = vmatprep.mubr.f32.mxu0 %v11315_v0  ;;  %v217_v24 = vld [vmem:[#allocation5 + $0x178] sm:$0xff] }
 0x262   :  { %16920 = vst [vmem:[#allocation303_spill] sm:$0xff] %v12752_v53  ;;  %v12755_v52 = vpop.f32.mrf.mxu0  ;;  %2482 = vmatprep.mubr.f32.mxu1 %v11315_v0 }
 0x263   :  { %16921 = vst [vmem:[#allocation304_spill] sm:$0xff] %v12755_v52  ;;  %v12758_v43 = vpop.f32.mrf.mxu1  ;;  %v11072_v52 = vld [vmem:[#allocation2 + $0x178] sm:$0xff] }
 0x264   :  { %16922 = vst [vmem:[#allocation305_spill] sm:$0xff] %v12758_v43  ;;  %v12760_v57 = vpop.f32.mrf.mxu0  ;;  %1585 = vmatmul.mubr.f32.gmra.mxu0 %v11071_v10 }
 0x265   :  { %16923 = vst [vmem:[#allocation306_spill] sm:$0xff] %v12760_v57  ;;  %v12762_v56 = vpop.f32.mrf.mxu1  ;;  %2483 = vmatmul.mubr.f32.gmra.mxu1 %v216_v51  ;;  %1590 = vmatprep.mubr.f32.mxu0 %v11315_v0  ;;  %v218_v51 = vld [vmem:[#allocation5 + $0x180] sm:$0xff] }
 0x266   :  { %16924 = vst [vmem:[#allocation307_spill] sm:$0xff] %v12762_v56  ;;  %v12765_v54 = vpop.f32.mrf.mxu0  ;;  %2488 = vmatprep.mubr.f32.mxu1 %v11315_v0 }
 0x267   :  { %16925 = vst [vmem:[#allocation308_spill] sm:$0xff] %v12765_v54  ;;  %v12768_v53 = vpop.f32.mrf.mxu1  ;;  %v11073_v54 = vld [vmem:[#allocation2 + $0x180] sm:$0xff] }
 0x268   :  { %16926 = vst [vmem:[#allocation309_spill] sm:$0xff] %v12768_v53  ;;  %v12770_v4 = vpop.f32.mrf.mxu0  ;;  %1591 = vmatmul.mubr.f32.gmra.mxu0 %v11072_v52 }
 0x269   :  { %16927 = vst [vmem:[#allocation310_spill] sm:$0xff] %v12770_v4  ;;  %v12772_v43 = vpop.f32.mrf.mxu1  ;;  %2489 = vmatmul.mubr.f32.gmra.mxu1 %v217_v24  ;;  %1596 = vmatprep.mubr.f32.mxu0 %v11315_v0  ;;  %v219_v24 = vld [vmem:[#allocation5 + $0x188] sm:$0xff] }
 0x26a   :  { %16928 = vst [vmem:[#allocation311_spill] sm:$0xff] %v12772_v43  ;;  %v12775_v10 = vpop.f32.mrf.mxu0  ;;  %2494 = vmatprep.mubr.f32.mxu1 %v11315_v0 }
 0x26b   :  { %16929 = vst [vmem:[#allocation312_spill] sm:$0xff] %v12775_v10  ;;  %v12778_v56 = vpop.f32.mrf.mxu1  ;;  %v11074_v10 = vld [vmem:[#allocation2 + $0x188] sm:$0xff] }
 0x26c   :  { %16930 = vst [vmem:[#allocation313_spill] sm:$0xff] %v12778_v56  ;;  %v12780_v57 = vpop.f32.mrf.mxu0  ;;  %1597 = vmatmul.mubr.f32.gmra.mxu0 %v11073_v54 }
 0x26d   :  { %16931 = vst [vmem:[#allocation314_spill] sm:$0xff] %v12780_v57  ;;  %v12782_v53 = vpop.f32.mrf.mxu1  ;;  %2495 = vmatmul.mubr.f32.gmra.mxu1 %v218_v51  ;;  %1602 = vmatprep.mubr.f32.mxu0 %v11315_v0  ;;  %v220_v51 = vld [vmem:[#allocation5 + $0x190] sm:$0xff] }
 0x26e   :  { %v12785_v52 = vpop.f32.mrf.mxu0  ;;  %2500 = vmatprep.mubr.f32.mxu1 %v11315_v0 }
 0x26f   :  { %16932 = vst [vmem:[#allocation315_spill] sm:$0xff] %v12785_v52  ;;  %v12788_v43 = vpop.f32.mrf.mxu1 }
 0x270   :  { %v12790_v4 = vpop.f32.mrf.mxu0  ;;  %1603 = vmatmul.mubr.f32.gmra.mxu0 %v11074_v10 }
 0x271   :  { %16933 = vst [vmem:[#allocation316_spill] sm:$0xff] %v12790_v4  ;;  %v12792_v56 = vpop.f32.mrf.mxu1  ;;  %2501 = vmatmul.mubr.f32.gmra.mxu1 %v219_v24  ;;  %1608 = vmatprep.mubr.f32.mxu0 %v11315_v0  ;;  %v221_v24 = vld [vmem:[#allocation5 + $0x198] sm:$0xff] }
 0x272   :  { %v12795_v54 = vpop.f32.mrf.mxu0  ;;  %2506 = vmatprep.mubr.f32.mxu1 %v11315_v0 }
 0x273   :  { %16934 = vst [vmem:[#allocation317_spill] sm:$0xff] %v12795_v54  ;;  %v12798_v57 = vpop.f32.mrf.mxu1 }
 0x274   :  { %v12800_v52 = vpop.f32.mrf.mxu0  ;;  %1609 = vmatmul.mubr.f32.gmra.mxu0 %v11075_v16 }
 0x275   :  { %16935 = vst [vmem:[#allocation318_spill] sm:$0xff] %v12800_v52  ;;  %v12802_v47 = vpop.f32.mrf.mxu1  ;;  %2507 = vmatmul.mubr.f32.gmra.mxu1 %v220_v51  ;;  %1614 = vmatprep.mubr.f32.mxu0 %v11315_v0  ;;  %v222_v51 = vld [vmem:[#allocation5 + $0x1a0] sm:$0xff] }
 0x276   :  { %v12805_v10 = vpop.f32.mrf.mxu0  ;;  %2512 = vmatprep.mubr.f32.mxu1 %v11315_v0 }
 0x277   :  { %16936 = vst [vmem:[#allocation319_spill] sm:$0xff] %v12805_v10  ;;  %v12808_v4 = vpop.f32.mrf.mxu1 }
 0x278   :  { %v12810_v54 = vpop.f32.mrf.mxu0  ;;  %1615 = vmatmul.mubr.f32.gmra.mxu0 %v11076_v31 }
 0x279   :  { %16937 = vst [vmem:[#allocation320_spill] sm:$0xff] %v12810_v54  ;;  %v12812_v42 = vpop.f32.mrf.mxu1  ;;  %2513 = vmatmul.mubr.f32.gmra.mxu1 %v221_v24  ;;  %1620 = vmatprep.mubr.f32.mxu0 %v11315_v0  ;;  %v223_v24 = vld [vmem:[#allocation5 + $0x1a8] sm:$0xff] }
 0x27a   :  { %v12815_v16 = vpop.f32.mrf.mxu0  ;;  %2518 = vmatprep.mubr.f32.mxu1 %v11315_v0 }
 0x27b   :  { %16938 = vst [vmem:[#allocation321_spill] sm:$0xff] %v12815_v16  ;;  %v12818_v52 = vpop.f32.mrf.mxu1 }
 0x27c   :  { %v12820_v10 = vpop.f32.mrf.mxu0  ;;  %1621 = vmatmul.mubr.f32.gmra.mxu0 %v11077_v28 }
 0x27d   :  { %16939 = vst [vmem:[#allocation322_spill] sm:$0xff] %v12820_v10  ;;  %v12822_v50 = vpop.f32.mrf.mxu1  ;;  %2519 = vmatmul.mubr.f32.gmra.mxu1 %v222_v51  ;;  %1626 = vmatprep.mubr.f32.mxu0 %v11315_v0  ;;  %v224_v51 = vld [vmem:[#allocation5 + $0x1b0] sm:$0xff] }
 0x27e   :  { %v12825_v31 = vpop.f32.mrf.mxu0  ;;  %2524 = vmatprep.mubr.f32.mxu1 %v11315_v0 }
 0x27f   :  { %16940 = vst [vmem:[#allocation323_spill] sm:$0xff] %v12825_v31  ;;  %v12828_v54 = vpop.f32.mrf.mxu1 }
 0x280   :  { %v12830_v16 = vpop.f32.mrf.mxu0  ;;  %1627 = vmatmul.mubr.f32.gmra.mxu0 %v11078_v58 }
 0x281   :  { %16941 = vst [vmem:[#allocation324_spill] sm:$0xff] %v12830_v16  ;;  %v12832_v46 = vpop.f32.mrf.mxu1  ;;  %2525 = vmatmul.mubr.f32.gmra.mxu1 %v223_v24  ;;  %1632 = vmatprep.mubr.f32.mxu0 %v11315_v0  ;;  %v225_v24 = vld [vmem:[#allocation5 + $0x1b8] sm:$0xff] }
 0x282   :  { %v12835_v28 = vpop.f32.mrf.mxu0  ;;  %2530 = vmatprep.mubr.f32.mxu1 %v11315_v0 }
 0x283   :  { %16942 = vst [vmem:[#allocation325_spill] sm:$0xff] %v12835_v28  ;;  %v12838_v10 = vpop.f32.mrf.mxu1 }
 0x284   :  { %v12840_v31 = vpop.f32.mrf.mxu0  ;;  %1633 = vmatmul.mubr.f32.gmra.mxu0 %v11079_v55 }
 0x285   :  { %16943 = vst [vmem:[#allocation326_spill] sm:$0xff] %v12840_v31  ;;  %v12842_v48 = vpop.f32.mrf.mxu1  ;;  %2531 = vmatmul.mubr.f32.gmra.mxu1 %v224_v51  ;;  %1638 = vmatprep.mubr.f32.mxu0 %v11315_v0  ;;  %v226_v51 = vld [vmem:[#allocation5 + $0x1c0] sm:$0xff] }
 0x286   :  { %v12845_v58 = vpop.f32.mrf.mxu0  ;;  %2536 = vmatprep.mubr.f32.mxu1 %v11315_v0 }
 0x287   :  { %16944 = vst [vmem:[#allocation327_spill] sm:$0xff] %v12845_v58  ;;  %v12848_v16 = vpop.f32.mrf.mxu1 }
 0x288   :  { %v12850_v28 = vpop.f32.mrf.mxu0  ;;  %1639 = vmatmul.mubr.f32.gmra.mxu0 %v11080_v6 }
 0x289   :  { %16945 = vst [vmem:[#allocation328_spill] sm:$0xff] %v12850_v28  ;;  %v12852_v23 = vpop.f32.mrf.mxu1  ;;  %2537 = vmatmul.mubr.f32.gmra.mxu1 %v225_v24  ;;  %1644 = vmatprep.mubr.f32.mxu0 %v11315_v0  ;;  %v227_v24 = vld [vmem:[#allocation5 + $0x1c8] sm:$0xff] }
 0x28a   :  { %v12855_v55 = vpop.f32.mrf.mxu0  ;;  %2542 = vmatprep.mubr.f32.mxu1 %v11315_v0 }
 0x28b   :  { %16946 = vst [vmem:[#allocation329_spill] sm:$0xff] %v12855_v55  ;;  %v12858_v31 = vpop.f32.mrf.mxu1 }
 0x28c   :  { %v12860_v58 = vpop.f32.mrf.mxu0  ;;  %1645 = vmatmul.mubr.f32.gmra.mxu0 %v11081_v15 }
 0x28d   :  { %16947 = vst [vmem:[#allocation330_spill] sm:$0xff] %v12860_v58  ;;  %v12862_v34 = vpop.f32.mrf.mxu1  ;;  %2543 = vmatmul.mubr.f32.gmra.mxu1 %v226_v51  ;;  %1650 = vmatprep.mubr.f32.mxu0 %v11315_v0  ;;  %v228_v51 = vld [vmem:[#allocation5 + $0x1d0] sm:$0xff] }
 0x28e   :  { %v12865_v6 = vpop.f32.mrf.mxu0  ;;  %2548 = vmatprep.mubr.f32.mxu1 %v11315_v0 }
 0x28f   :  { %16948 = vst [vmem:[#allocation331_spill] sm:$0xff] %v12865_v6  ;;  %v12868_v28 = vpop.f32.mrf.mxu1 }
 0x290   :  { %v12870_v55 = vpop.f32.mrf.mxu0  ;;  %1651 = vmatmul.mubr.f32.gmra.mxu0 %v11082_v36 }
 0x291   :  { %16949 = vst [vmem:[#allocation332_spill] sm:$0xff] %v12870_v55  ;;  %v12872_v37 = vpop.f32.mrf.mxu1  ;;  %2549 = vmatmul.mubr.f32.gmra.mxu1 %v227_v24  ;;  %1656 = vmatprep.mubr.f32.mxu0 %v11315_v0  ;;  %v229_v24 = vld [vmem:[#allocation5 + $0x1d8] sm:$0xff] }
 0x292   :  { %v12875_v15 = vpop.f32.mrf.mxu0  ;;  %2554 = vmatprep.mubr.f32.mxu1 %v11315_v0 }
 0x293   :  { %16950 = vst [vmem:[#allocation333_spill] sm:$0xff] %v12875_v15  ;;  %v12878_v58 = vpop.f32.mrf.mxu1 }
 0x294   :  { %v12880_v6 = vpop.f32.mrf.mxu0  ;;  %1657 = vmatmul.mubr.f32.gmra.mxu0 %v11083_v63 }
 0x295   :  { %16951 = vst [vmem:[#allocation334_spill] sm:$0xff] %v12880_v6  ;;  %v12882_v32 = vpop.f32.mrf.mxu1  ;;  %2555 = vmatmul.mubr.f32.gmra.mxu1 %v228_v51  ;;  %1662 = vmatprep.mubr.f32.mxu0 %v11315_v0  ;;  %v230_v51 = vld [vmem:[#allocation5 + $0x1e0] sm:$0xff] }
 0x296   :  { %v12885_v36 = vpop.f32.mrf.mxu0  ;;  %2560 = vmatprep.mubr.f32.mxu1 %v11315_v0 }
 0x297   :  { %16952 = vst [vmem:[#allocation335_spill] sm:$0xff] %v12885_v36  ;;  %v12888_v55 = vpop.f32.mrf.mxu1 }
 0x298   :  { %v12890_v15 = vpop.f32.mrf.mxu0  ;;  %1663 = vmatmul.mubr.f32.gmra.mxu0 %v11084_v35 }
 0x299   :  { %16953 = vst [vmem:[#allocation336_spill] sm:$0xff] %v12890_v15  ;;  %v12892_v20 = vpop.f32.mrf.mxu1  ;;  %2561 = vmatmul.mubr.f32.gmra.mxu1 %v229_v24  ;;  %1668 = vmatprep.mubr.f32.mxu0 %v11315_v0  ;;  %v231_v24 = vld [vmem:[#allocation5 + $0x1e8] sm:$0xff] }
 0x29a   :  { %v12895_v63 = vpop.f32.mrf.mxu0  ;;  %2566 = vmatprep.mubr.f32.mxu1 %v11315_v0 }
 0x29b   :  { %16954 = vst [vmem:[#allocation337_spill] sm:$0xff] %v12895_v63  ;;  %v12898_v6 = vpop.f32.mrf.mxu1 }
 0x29c   :  { %v12900_v36 = vpop.f32.mrf.mxu0  ;;  %1669 = vmatmul.mubr.f32.gmra.mxu0 %v11085_v12 }
 0x29d   :  { %16955 = vst [vmem:[#allocation338_spill] sm:$0xff] %v12900_v36  ;;  %v12902_v8 = vpop.f32.mrf.mxu1  ;;  %2567 = vmatmul.mubr.f32.gmra.mxu1 %v230_v51  ;;  %1674 = vmatprep.mubr.f32.mxu0 %v11315_v0  ;;  %v232_v51 = vld [vmem:[#allocation5 + $0x1f0] sm:$0xff] }
 0x29e   :  { %v12905_v35 = vpop.f32.mrf.mxu0  ;;  %2572 = vmatprep.mubr.f32.mxu1 %v11315_v0 }
 0x29f   :  { %16956 = vst [vmem:[#allocation339_spill] sm:$0xff] %v12905_v35  ;;  %v12908_v15 = vpop.f32.mrf.mxu1 }
 0x2a0   :  { %v12910_v63 = vpop.f32.mrf.mxu0  ;;  %1675 = vmatmul.mubr.f32.gmra.mxu0 %v11086_v49 }
 0x2a1   :  { %16957 = vst [vmem:[#allocation340_spill] sm:$0xff] %v12910_v63  ;;  %v12912_v5 = vpop.f32.mrf.mxu1  ;;  %2573 = vmatmul.mubr.f32.gmra.mxu1 %v231_v24  ;;  %1680 = vmatprep.mubr.f32.mxu0 %v11315_v0  ;;  %v233_v24 = vld [vmem:[#allocation5 + $0x1f8] sm:$0xff] }
 0x2a2   :  { %16958 = vst [vmem:[#allocation341_spill] sm:$0xff] %v12912_v5  ;;  %v12915_v12 = vpop.f32.mrf.mxu0  ;;  %2578 = vmatprep.mubr.f32.mxu1 %v11315_v0 }
 0x2a3   :  { %16959 = vst [vmem:[#allocation342_spill] sm:$0xff] %v12915_v12  ;;  %v12918_v36 = vpop.f32.mrf.mxu1  ;;  %v16964_v12 = vld [vmem:[#allocation30_spill] sm:$0xff] }
 0x2a4   :  { %v12920_v35 = vpop.f32.mrf.mxu0  ;;  %1681 = vmatmul.mubr.f32.gmra.mxu0 %v11087_v39  ;;  %v3041_v33 = vmul.f32 %v12788_v43, %v16964_v12  ;;  %v3045_v43 = vmul.f32 %v12798_v57, %v11853_v13  ;;  %v3342_v13 = vld [vmem:[#allocation10 + $0x170] sm:$0xff]  ;;  %v3049_v57 = vmul.f32 %v12808_v4, %v11865_v59  ;;  %v3341_v4 = vld [vmem:[#allocation10 + $0x168] sm:$0xff] }
 0x2a5   :  { %16960 = vst [vmem:[#allocation343_spill] sm:$0xff] %v12920_v35  ;;  %v12922_v29 = vpop.f32.mrf.mxu1  ;;  %2579 = vmatmul.mubr.f32.gmra.mxu1 %v232_v51  ;;  %1686 = vmatprep.mubr.f32.mxu0 %v11315_v0  ;;  %v11088_v35 = vld [vmem:[#allocation2 + $0x1f8] sm:$0xff] }
 0x2a6   :  { %16961 = vst [vmem:[#allocation344_spill] sm:$0xff] %v12922_v29  ;;  %v12925_v49 = vpop.f32.mrf.mxu0  ;;  %2584 = vmatprep.mubr.f32.mxu1 %v11315_v0  ;;  %v16966_v29 = vld [vmem:[#allocation28_spill] sm:$0xff] }
 0x2a7   :  { %16962 = vst [vmem:[#allocation345_spill] sm:$0xff] %v12925_v49  ;;  %v12928_v63 = vpop.f32.mrf.mxu1  ;;  %v3343_v49 = vld [vmem:[#allocation10 + $0x178] sm:$0xff]  ;;  %v3040_v44 = vmul.f32 %v12782_v53, %v16966_v29  ;;  %v3044_v29 = vmul.f32 %v12792_v56, %v11846_v62  ;;  %v3053_v56 = vmul.f32 %v12818_v52, %v11877_v2  ;;  %v3340_v52 = vld [vmem:[#allocation10 + $0x160] sm:$0xff] }
 0x2a8   :  { %16963 = vst [vmem:[#allocation346_spill] sm:$0xff] %v12928_v63  ;;  %v12932_v5 = vpop.f32.mrf.mxu0  ;;  %1687 = vmatmul.mubr.f32.gmra.mxu0 %v11088_v35  ;;  %v11089_v35 = vld [vmem:[#allocation5] sm:$0xff] }
 0x2a9   :  { %16965 = vst [vmem:[#allocation30_spill] sm:$0xff] %v12932_v5  ;;  %v12934_v39 = vpop.f32.mrf.mxu1  ;;  %2585 = vmatmul.mubr.f32.gmra.mxu1 %v233_v24  ;;  %2655 = vmatprep.mubr.f32.mxu0 %v11315_v0  ;;  %v4337_v5 = vld [vmem:[#allocation11 + $0x78] sm:$0xff] }
 0x2aa   :  { %3424 = vmatprep.mubr.f32.mxu1 %v3041_v33  ;;  %v12937_v51 = vpop.f32.mrf.mxu0 }
 0x2ab   :  { %v12941_v63 = vpop.f32.mrf.mxu1 }
 0x2ac   :  { %v12945_v12 = vpop.f32.mrf.mxu0  ;;  %2656 = vmatmul.mubr.f32.vlgmr.msra.gmra.mxu0 %v11089_v35 }
 0x2ad   :  { %16967 = vst [vmem:[#allocation28_spill] sm:$0xff] %v12945_v12  ;;  %v12947_v24 = vpop.f32.mrf.mxu1  ;;  %3425 = vmatmul.mubr.f32.vlgmr.msra.gmra.mxu1 %v3040_v44  ;;  %3746 = vmatpush1.msra.mxu0 %v3343_v49  ;;  %v11090_v44 = vld [vmem:[#allocation5 + $0x8] sm:$0xff]  ;;  %v4336_v49 = vld [vmem:[#allocation11 + $0x70] sm:$0xff] }
 0x2ae   :  { %3429 = vmatprep.mubr.f32.mxu1 %v3045_v43  ;;  %v12949_v33 = vpop.f32.mrf.mxu0  ;;  %2661 = vmatprep.mubr.f32.mxu0 %v11315_v0 }
 0x2af   :  { %v12954_v53 = vpop.f32.mrf.mxu1  ;;  %4355 = vmatpush1.msra.mxu1 %v4337_v5  ;;  %3747 = vmatprep.subr.mxu0 %v11315_v0  ;;  %v3048_v5 = vmul.f32 %v12802_v47, %v11858_v7  ;;  %v3052_v47 = vmul.f32 %v12812_v42, %v11870_v3  ;;  %v3056_v42 = vmul.f32 %v12822_v50, %v11882_v60 }
 0x2b0   :  { %v12959_v35 = vpop.f32.mrf.mxu0  ;;  %2662 = vmatmul.mubr.f32.gmra.mxu0 %v11090_v44  ;;  %4356 = vmatprep.subr.mxu1 %v11315_v0  ;;  %v3060_v50 = vmul.f32 %v12832_v46, %v11894_v9  ;;  %v3064_v46 = vmul.f32 %v12842_v48, %v11906_v17  ;;  %v3068_v48 = vmul.f32 %v12852_v23, %v11918_v25 }
 0x2b1   :  { %16968 = vst [vmem:[#allocation347_spill] sm:$0xff] %v12959_v35  ;;  %v12962_v43 = vpop.f32.mrf.mxu1  ;;  %3430 = vmatmul.mubr.f32.gmra.mxu1 %v3044_v29  ;;  %2667 = vmatprep.mubr.f32.mxu0 %v11315_v0  ;;  %v11091_v29 = vld [vmem:[#allocation5 + $0x10] sm:$0xff]  ;;  %v3072_v23 = vmul.f32 %v12862_v34, %v11930_v18  ;;  %v3076_v34 = vmul.f32 %v12872_v37, %v11942_v26 }
 0x2b2   :  { %3434 = vmatprep.mubr.f32.mxu1 %v3049_v57  ;;  %v12965_v62 = vpop.f32.mrf.mxu0  ;;  %3748 = vmatpush1.msra.mxu0 %v3342_v13  ;;  %v4335_v57 = vld [vmem:[#allocation11 + $0x68] sm:$0xff]  ;;  %v3080_v37 = vmul.f32 %v12882_v32, %v11954_v41  ;;  %v3084_v32 = vmul.f32 %v12892_v20, %v11967_v61  ;;  %v3088_v20 = vmul.f32 %v12902_v8, %v11979_v11 }
 0x2b3   :  { %v12969_v59 = vpop.f32.mrf.mxu1  ;;  %4357 = vmatpush1.msra.mxu1 %v4336_v49  ;;  %3749 = vmatprep.subr.mxu0 %v11315_v0  ;;  %v3057_v49 = vmul.f32 %v12828_v54, %v11889_v21  ;;  %v3339_v54 = vld [vmem:[#allocation10 + $0x158] sm:$0xff]  ;;  %v16980_v8 = vld [vmem:[#allocation56_spill] sm:$0xff] }
 0x2b4   :  { %v12974_v44 = vpop.f32.mrf.mxu0  ;;  %2668 = vmatmul.mubr.f32.gmra.mxu0 %v11091_v29  ;;  %4358 = vmatprep.subr.mxu1 %v11315_v0 }
 0x2b5   :  { %16969 = vst [vmem:[#allocation348_spill] sm:$0xff] %v12974_v44  ;;  %v12977_v13 = vpop.f32.mrf.mxu1  ;;  %3435 = vmatmul.mubr.f32.gmra.mxu1 %v3048_v5  ;;  %2673 = vmatprep.mubr.f32.mxu0 %v11315_v0  ;;  %v11092_v5 = vld [vmem:[#allocation5 + $0x18] sm:$0xff] }
 0x2b6   :  { %3439 = vmatprep.mubr.f32.mxu1 %v3053_v56  ;;  %v12980_v7 = vpop.f32.mrf.mxu0  ;;  %3750 = vmatpush1.msra.mxu0 %v3341_v4  ;;  %v4334_v56 = vld [vmem:[#allocation11 + $0x60] sm:$0xff] }
 0x2b7   :  { %v12984_v2 = vpop.f32.mrf.mxu1  ;;  %4359 = vmatpush1.msra.mxu1 %v4335_v57  ;;  %3751 = vmatprep.subr.mxu0 %v11315_v0  ;;  %v3061_v57 = vmul.f32 %v12838_v10, %v11901_v14  ;;  %v3338_v10 = vld [vmem:[#allocation10 + $0x150] sm:$0xff] }
 0x2b8   :  { %v12989_v29 = vpop.f32.mrf.mxu0  ;;  %2674 = vmatmul.mubr.f32.gmra.mxu0 %v11092_v5  ;;  %4360 = vmatprep.subr.mxu1 %v11315_v0 }
 0x2b9   :  { %16970 = vst [vmem:[#allocation349_spill] sm:$0xff] %v12989_v29  ;;  %v12992_v4 = vpop.f32.mrf.mxu1  ;;  %3440 = vmatmul.mubr.f32.gmra.mxu1 %v3052_v47  ;;  %2679 = vmatprep.mubr.f32.mxu0 %v11315_v0  ;;  %v11093_v47 = vld [vmem:[#allocation5 + $0x20] sm:$0xff] }
 0x2ba   :  { %3444 = vmatprep.mubr.f32.mxu1 %v3057_v49  ;;  %v12995_v3 = vpop.f32.mrf.mxu0  ;;  %3752 = vmatpush1.msra.mxu0 %v3340_v52  ;;  %v4333_v49 = vld [vmem:[#allocation11 + $0x58] sm:$0xff] }
 0x2bb   :  { %v12999_v21 = vpop.f32.mrf.mxu1  ;;  %4361 = vmatpush1.msra.mxu1 %v4334_v56  ;;  %3753 = vmatprep.subr.mxu0 %v11315_v0  ;;  %v3065_v56 = vmul.f32 %v12848_v16, %v11913_v22  ;;  %v3337_v16 = vld [vmem:[#allocation10 + $0x148] sm:$0xff] }
 0x2bc   :  { %v13004_v5 = vpop.f32.mrf.mxu0  ;;  %2680 = vmatmul.mubr.f32.gmra.mxu0 %v11093_v47  ;;  %4362 = vmatprep.subr.mxu1 %v11315_v0 }
 0x2bd   :  { %16971 = vst [vmem:[#allocation350_spill] sm:$0xff] %v13004_v5  ;;  %v13007_v52 = vpop.f32.mrf.mxu1  ;;  %3445 = vmatmul.mubr.f32.gmra.mxu1 %v3056_v42  ;;  %2685 = vmatprep.mubr.f32.mxu0 %v11315_v0  ;;  %v11094_v42 = vld [vmem:[#allocation5 + $0x28] sm:$0xff] }
 0x2be   :  { %3449 = vmatprep.mubr.f32.mxu1 %v3061_v57  ;;  %v13010_v60 = vpop.f32.mrf.mxu0  ;;  %3754 = vmatpush1.msra.mxu0 %v3339_v54  ;;  %v4332_v57 = vld [vmem:[#allocation11 + $0x50] sm:$0xff] }
 0x2bf   :  { %v13014_v14 = vpop.f32.mrf.mxu1  ;;  %4363 = vmatpush1.msra.mxu1 %v4333_v49  ;;  %3755 = vmatprep.subr.mxu0 %v11315_v0  ;;  %v3069_v49 = vmul.f32 %v12858_v31, %v11925_v30  ;;  %v3336_v31 = vld [vmem:[#allocation10 + $0x140] sm:$0xff] }
 0x2c0   :  { %v13019_v47 = vpop.f32.mrf.mxu0  ;;  %2686 = vmatmul.mubr.f32.gmra.mxu0 %v11094_v42  ;;  %4364 = vmatprep.subr.mxu1 %v11315_v0 }
 0x2c1   :  { %16972 = vst [vmem:[#allocation351_spill] sm:$0xff] %v13019_v47  ;;  %v13022_v54 = vpop.f32.mrf.mxu1  ;;  %3450 = vmatmul.mubr.f32.gmra.mxu1 %v3060_v50  ;;  %2691 = vmatprep.mubr.f32.mxu0 %v11315_v0  ;;  %v11095_v50 = vld [vmem:[#allocation5 + $0x30] sm:$0xff] }
 0x2c2   :  { %3454 = vmatprep.mubr.f32.mxu1 %v3065_v56  ;;  %v13025_v9 = vpop.f32.mrf.mxu0  ;;  %3756 = vmatpush1.msra.mxu0 %v3338_v10  ;;  %v4331_v56 = vld [vmem:[#allocation11 + $0x48] sm:$0xff] }
 0x2c3   :  { %v13029_v22 = vpop.f32.mrf.mxu1  ;;  %4365 = vmatpush1.msra.mxu1 %v4332_v57  ;;  %3757 = vmatprep.subr.mxu0 %v11315_v0  ;;  %v3073_v57 = vmul.f32 %v12868_v28, %v11937_v45  ;;  %v3335_v28 = vld [vmem:[#allocation10 + $0x138] sm:$0xff] }
 0x2c4   :  { %v13034_v42 = vpop.f32.mrf.mxu0  ;;  %2692 = vmatmul.mubr.f32.gmra.mxu0 %v11095_v50  ;;  %4366 = vmatprep.subr.mxu1 %v11315_v0 }
 0x2c5   :  { %16973 = vst [vmem:[#allocation352_spill] sm:$0xff] %v13034_v42  ;;  %v13037_v10 = vpop.f32.mrf.mxu1  ;;  %3455 = vmatmul.mubr.f32.gmra.mxu1 %v3064_v46  ;;  %2697 = vmatprep.mubr.f32.mxu0 %v11315_v0  ;;  %v11096_v46 = vld [vmem:[#allocation5 + $0x38] sm:$0xff] }
 0x2c6   :  { %3459 = vmatprep.mubr.f32.mxu1 %v3069_v49  ;;  %v13040_v17 = vpop.f32.mrf.mxu0  ;;  %3758 = vmatpush1.msra.mxu0 %v3337_v16  ;;  %v4330_v49 = vld [vmem:[#allocation11 + $0x40] sm:$0xff] }
 0x2c7   :  { %v13044_v30 = vpop.f32.mrf.mxu1  ;;  %4367 = vmatpush1.msra.mxu1 %v4331_v56  ;;  %3759 = vmatprep.subr.mxu0 %v11315_v0  ;;  %v3077_v56 = vmul.f32 %v12878_v58, %v11949_v40  ;;  %v3334_v58 = vld [vmem:[#allocation10 + $0x130] sm:$0xff] }
 0x2c8   :  { %v13049_v50 = vpop.f32.mrf.mxu0  ;;  %2698 = vmatmul.mubr.f32.gmra.mxu0 %v11096_v46  ;;  %4368 = vmatprep.subr.mxu1 %v11315_v0 }
 0x2c9   :  { %16974 = vst [vmem:[#allocation353_spill] sm:$0xff] %v13049_v50  ;;  %v13052_v16 = vpop.f32.mrf.mxu1  ;;  %3460 = vmatmul.mubr.f32.gmra.mxu1 %v3068_v48  ;;  %2703 = vmatprep.mubr.f32.mxu0 %v11315_v0  ;;  %v11097_v48 = vld [vmem:[#allocation5 + $0x40] sm:$0xff] }
 0x2ca   :  { %3464 = vmatprep.mubr.f32.mxu1 %v3073_v57  ;;  %v13055_v25 = vpop.f32.mrf.mxu0  ;;  %3760 = vmatpush1.msra.mxu0 %v3336_v31  ;;  %v4329_v57 = vld [vmem:[#allocation11 + $0x38] sm:$0xff] }
 0x2cb   :  { %v13059_v45 = vpop.f32.mrf.mxu1  ;;  %4369 = vmatpush1.msra.mxu1 %v4330_v49  ;;  %3761 = vmatprep.subr.mxu0 %v11315_v0  ;;  %v3081_v49 = vmul.f32 %v12888_v55, %v11961_v19  ;;  %v3333_v55 = vld [vmem:[#allocation10 + $0x128] sm:$0xff] }
 0x2cc   :  { %v13064_v46 = vpop.f32.mrf.mxu0  ;;  %2704 = vmatmul.mubr.f32.gmra.mxu0 %v11097_v48  ;;  %4370 = vmatprep.subr.mxu1 %v11315_v0 }
 0x2cd   :  { %16975 = vst [vmem:[#allocation354_spill] sm:$0xff] %v13064_v46  ;;  %v13067_v31 = vpop.f32.mrf.mxu1  ;;  %3465 = vmatmul.mubr.f32.gmra.mxu1 %v3072_v23  ;;  %2709 = vmatprep.mubr.f32.mxu0 %v11315_v0  ;;  %v11098_v23 = vld [vmem:[#allocation5 + $0x48] sm:$0xff] }
 0x2ce   :  { %3469 = vmatprep.mubr.f32.mxu1 %v3077_v56  ;;  %v13070_v18 = vpop.f32.mrf.mxu0  ;;  %3762 = vmatpush1.msra.mxu0 %v3335_v28  ;;  %v4328_v56 = vld [vmem:[#allocation11 + $0x30] sm:$0xff] }
 0x2cf   :  { %v13074_v40 = vpop.f32.mrf.mxu1  ;;  %4371 = vmatpush1.msra.mxu1 %v4329_v57  ;;  %3763 = vmatprep.subr.mxu0 %v11315_v0  ;;  %v3085_v57 = vmul.f32 %v12898_v6, %v11974_v27  ;;  %v3332_v6 = vld [vmem:[#allocation10 + $0x120] sm:$0xff] }
 0x2d0   :  { %v13079_v48 = vpop.f32.mrf.mxu0  ;;  %2710 = vmatmul.mubr.f32.gmra.mxu0 %v11098_v23  ;;  %4372 = vmatprep.subr.mxu1 %v11315_v0 }
 0x2d1   :  { %16976 = vst [vmem:[#allocation355_spill] sm:$0xff] %v13079_v48  ;;  %v13082_v28 = vpop.f32.mrf.mxu1  ;;  %3470 = vmatmul.mubr.f32.gmra.mxu1 %v3076_v34  ;;  %2715 = vmatprep.mubr.f32.mxu0 %v11315_v0  ;;  %v11099_v34 = vld [vmem:[#allocation5 + $0x50] sm:$0xff] }
 0x2d2   :  { %3474 = vmatprep.mubr.f32.mxu1 %v3081_v49  ;;  %v13085_v26 = vpop.f32.mrf.mxu0  ;;  %3764 = vmatpush1.msra.mxu0 %v3334_v58  ;;  %v4327_v49 = vld [vmem:[#allocation11 + $0x28] sm:$0xff] }
 0x2d3   :  { %v13089_v19 = vpop.f32.mrf.mxu1  ;;  %4373 = vmatpush1.msra.mxu1 %v4328_v56  ;;  %3765 = vmatprep.subr.mxu0 %v11315_v0  ;;  %v3089_v56 = vmul.f32 %v12908_v15, %v11986_v38  ;;  %v3331_v15 = vld [vmem:[#allocation10 + $0x118] sm:$0xff] }
 0x2d4   :  { %v13094_v23 = vpop.f32.mrf.mxu0  ;;  %2716 = vmatmul.mubr.f32.gmra.mxu0 %v11099_v34  ;;  %4374 = vmatprep.subr.mxu1 %v11315_v0 }
 0x2d5   :  { %16977 = vst [vmem:[#allocation356_spill] sm:$0xff] %v13094_v23  ;;  %v13097_v58 = vpop.f32.mrf.mxu1  ;;  %3475 = vmatmul.mubr.f32.gmra.mxu1 %v3080_v37  ;;  %2721 = vmatprep.mubr.f32.mxu0 %v11315_v0  ;;  %v11100_v37 = vld [vmem:[#allocation5 + $0x58] sm:$0xff] }
 0x2d6   :  { %3479 = vmatprep.mubr.f32.mxu1 %v3085_v57  ;;  %v13100_v41 = vpop.f32.mrf.mxu0  ;;  %3766 = vmatpush1.msra.mxu0 %v3333_v55  ;;  %v4326_v57 = vld [vmem:[#allocation11 + $0x20] sm:$0xff] }
 0x2d7   :  { %v13104_v27 = vpop.f32.mrf.mxu1  ;;  %4375 = vmatpush1.msra.mxu1 %v4327_v49  ;;  %3767 = vmatprep.subr.mxu0 %v11315_v0  ;;  %v3093_v49 = vmul.f32 %v12918_v36, %v11998_v1  ;;  %v3330_v36 = vld [vmem:[#allocation10 + $0x110] sm:$0xff] }
 0x2d8   :  { %v13109_v34 = vpop.f32.mrf.mxu0  ;;  %2722 = vmatmul.mubr.f32.gmra.mxu0 %v11100_v37  ;;  %4376 = vmatprep.subr.mxu1 %v11315_v0 }
 0x2d9   :  { %16978 = vst [vmem:[#allocation357_spill] sm:$0xff] %v13109_v34  ;;  %v13112_v55 = vpop.f32.mrf.mxu1  ;;  %3480 = vmatmul.mubr.f32.gmra.mxu1 %v3084_v32  ;;  %2727 = vmatprep.mubr.f32.mxu0 %v11315_v0  ;;  %v11101_v32 = vld [vmem:[#allocation5 + $0x60] sm:$0xff] }
 0x2da   :  { %3484 = vmatprep.mubr.f32.mxu1 %v3089_v56  ;;  %v13115_v61 = vpop.f32.mrf.mxu0  ;;  %3768 = vmatpush1.msra.mxu0 %v3332_v6  ;;  %v4325_v56 = vld [vmem:[#allocation11 + $0x18] sm:$0xff] }
 0x2db   :  { %v13119_v38 = vpop.f32.mrf.mxu1  ;;  %4377 = vmatpush1.msra.mxu1 %v4326_v57  ;;  %3769 = vmatprep.subr.mxu0 %v11315_v0  ;;  %v16981_v57 = vld [vmem:[#allocation341_spill] sm:$0xff] }
 0x2dc   :  { %v13124_v37 = vpop.f32.mrf.mxu0  ;;  %2728 = vmatmul.mubr.f32.gmra.mxu0 %v11101_v32  ;;  %4378 = vmatprep.subr.mxu1 %v11315_v0  ;;  %v3092_v34 = vmul.f32 %v16981_v57, %v16980_v8  ;;  %v16982_v32 = vld [vmem:[#allocation61_spill] sm:$0xff]  ;;  %v16985_v8 = vld [vmem:[#allocation59_spill] sm:$0xff]  ;;  %v16986_v57 = vld [vmem:[#allocation344_spill] sm:$0xff] }
 0x2dd   :  { %16979 = vst [vmem:[#allocation358_spill] sm:$0xff] %v13124_v37  ;;  %v13127_v6 = vpop.f32.mrf.mxu1  ;;  %3485 = vmatmul.mubr.f32.gmra.mxu1 %v3088_v20  ;;  %2733 = vmatprep.mubr.f32.mxu0 %v11315_v0  ;;  %v16983_v37 = vld [vmem:[#allocation346_spill] sm:$0xff]  ;;  %v11102_v20 = vld [vmem:[#allocation5 + $0x68] sm:$0xff]  ;;  %v3096_v46 = vmul.f32 %v16986_v57, %v16985_v8 }
 0x2de   :  { %3489 = vmatprep.mubr.f32.mxu1 %v3093_v49  ;;  %v13130_v11 = vpop.f32.mrf.mxu0  ;;  %3770 = vmatpush1.msra.mxu0 %v3331_v15  ;;  %v3097_v23 = vmul.f32 %v16983_v37, %v16982_v32  ;;  %v4324_v49 = vld [vmem:[#allocation11 + $0x10] sm:$0xff]  ;;  %v3329_v32 = vld [vmem:[#allocation10 + $0x108] sm:$0xff] }
 0x2df   :  { %v13134_v1 = vpop.f32.mrf.mxu1  ;;  %4379 = vmatpush1.msra.mxu1 %v4325_v56  ;;  %3771 = vmatprep.subr.mxu0 %v11315_v0  ;;  %v16989_v8 = vld [vmem:[#allocation63_spill] sm:$0xff] }
 0x2e0   :  { %v13139_v48 = vpop.f32.mrf.mxu0  ;;  %2734 = vmatmul.mubr.f32.gmra.mxu0 %v11102_v20  ;;  %4380 = vmatprep.subr.mxu1 %v11315_v0  ;;  %v16987_v20 = vld [vmem:[#allocation65_spill] sm:$0xff]  ;;  %v3100_v57 = vmul.f32 %v12934_v39, %v16989_v8 }
 0x2e1   :  { %16984 = vst [vmem:[#allocation56_spill] sm:$0xff] %v13139_v48  ;;  %v13142_v15 = vpop.f32.mrf.mxu1  ;;  %3490 = vmatmul.mubr.f32.gmra.mxu1 %v3092_v34  ;;  %2739 = vmatprep.mubr.f32.mxu0 %v11315_v0  ;;  %v3101_v48 = vmul.f32 %v12941_v63, %v16987_v20  ;;  %v11103_v34 = vld [vmem:[#allocation5 + $0x70] sm:$0xff]  ;;  %v3328_v20 = vld [vmem:[#allocation10 + $0x100] sm:$0xff] }
 0x2e2   :  { %3494 = vmatprep.mubr.f32.mxu1 %v3097_v23  ;;  %v13145_v56 = vpop.f32.mrf.mxu0  ;;  %3772 = vmatpush1.msra.mxu0 %v3330_v36  ;;  %v4323_v23 = vld [vmem:[#allocation11 + $0x8] sm:$0xff] }
 0x2e3   :  { %v13149_v37 = vpop.f32.mrf.mxu1  ;;  %4381 = vmatpush1.msra.mxu1 %v4324_v49  ;;  %3773 = vmatprep.subr.mxu0 %v11315_v0 }
 0x2e4   :  { %v13154_v50 = vpop.f32.mrf.mxu0  ;;  %2740 = vmatmul.mubr.f32.gmra.mxu0 %v11103_v34  ;;  %4382 = vmatprep.subr.mxu1 %v11315_v0  ;;  %v16990_v34 = vld [vmem:[#allocation69_spill] sm:$0xff] }
 0x2e5   :  { %16988 = vst [vmem:[#allocation341_spill] sm:$0xff] %v13154_v50  ;;  %v13157_v36 = vpop.f32.mrf.mxu1  ;;  %3495 = vmatmul.mubr.f32.gmra.mxu1 %v3096_v46  ;;  %2745 = vmatprep.mubr.f32.mxu0 %v11315_v0  ;;  %v3105_v50 = vmul.f32 %v12954_v53, %v16990_v34  ;;  %v11104_v46 = vld [vmem:[#allocation5 + $0x78] sm:$0xff] }
 0x2e6   :  { %3499 = vmatprep.mubr.f32.mxu1 %v3101_v48  ;;  %v13160_v49 = vpop.f32.mrf.mxu0  ;;  %3774 = vmatpush1.msra.mxu0 %v3329_v32  ;;  %v4322_v48 = vld [vmem:[#allocation11] sm:$0xff]  ;;  %v3359_v34 = vld [vmem:[#allocation10 + $0x1f8] sm:$0xff] }
 0x2e7   :  { %v13164_v63 = vpop.f32.mrf.mxu1  ;;  %4383 = vmatpush1.msra.mxu1 %v4323_v23  ;;  %3775 = vmatprep.subr.mxu0 %v11315_v0  ;;  %v16992_v23 = vld [vmem:[#allocation67_spill] sm:$0xff] }
 0x2e8   :  { %v13169_v42 = vpop.f32.mrf.mxu0  ;;  %2746 = vmatmul.mubr.f32.gmra.mxu0 %v11104_v46  ;;  %4384 = vmatprep.subr.mxu1 %v11315_v0  ;;  %v3104_v8 = vmul.f32 %v12947_v24, %v16992_v23  ;;  %v16993_v46 = vld [vmem:[#allocation73_spill] sm:$0xff] }
 0x2e9   :  { %16991 = vst [vmem:[#allocation61_spill] sm:$0xff] %v13169_v42  ;;  %v13172_v32 = vpop.f32.mrf.mxu1  ;;  %3500 = vmatmul.mubr.f32.gmra.mxu1 %v3100_v57  ;;  %2751 = vmatprep.mubr.f32.mxu0 %v11315_v0  ;;  %v3109_v42 = vmul.f32 %v12969_v59, %v16993_v46  ;;  %v11105_v57 = vld [vmem:[#allocation5 + $0x80] sm:$0xff]  ;;  %v3358_v46 = vld [vmem:[#allocation10 + $0x1f0] sm:$0xff] }
 0x2ea   :  { %3504 = vmatprep.mubr.f32.mxu1 %v3105_v50  ;;  %v13175_v39 = vpop.f32.mrf.mxu0  ;;  %3776 = vmatpush1.msra.mxu0 %v3328_v20  ;;  %v4353_v50 = vld [vmem:[#allocation11 + $0xf8] sm:$0xff] }
 0x2eb   :  { %v13179_v53 = vpop.f32.mrf.mxu1  ;;  %4385 = vmatpush1.msra.mxu1 %v4322_v48  ;;  %3777 = vmatprep.subr.mxu0 %v11315_v0  ;;  %v16995_v48 = vld [vmem:[#allocation71_spill] sm:$0xff] }
 0x2ec   :  { %v13184_v47 = vpop.f32.mrf.mxu0  ;;  %2752 = vmatmul.mubr.f32.gmra.mxu0 %v11105_v57  ;;  %4386 = vmatprep.subr.mxu1 %v11315_v0  ;;  %v3108_v23 = vmul.f32 %v12962_v43, %v16995_v48  ;;  %v16996_v57 = vld [vmem:[#allocation77_spill] sm:$0xff] }
 0x2ed   :  { %16994 = vst [vmem:[#allocation346_spill] sm:$0xff] %v13184_v47  ;;  %v13187_v20 = vpop.f32.mrf.mxu1  ;;  %3505 = vmatmul.mubr.f32.gmra.mxu1 %v3104_v8  ;;  %2757 = vmatprep.mubr.f32.mxu0 %v11315_v0  ;;  %v3113_v47 = vmul.f32 %v12984_v2, %v16996_v57  ;;  %v11106_v8 = vld [vmem:[#allocation5 + $0x88] sm:$0xff] }
 0x2ee   :  { %3509 = vmatprep.mubr.f32.mxu1 %v3109_v42  ;;  %v13190_v24 = vpop.f32.mrf.mxu0  ;;  %3778 = vmatpush2.msra.mxu0 %v3359_v34  ;;  %v4352_v42 = vld [vmem:[#allocation11 + $0xf0] sm:$0xff]  ;;  %v3357_v57 = vld [vmem:[#allocation10 + $0x1e8] sm:$0xff] }
 0x2ef   :  { %v13194_v59 = vpop.f32.mrf.mxu1  ;;  %4387 = vmatpush2.msra.mxu1 %v4353_v50  ;;  %3779 = vmatprep.subr.mxu0 %v11315_v0  ;;  %v16999_v50 = vld [vmem:[#allocation75_spill] sm:$0xff] }
 0x2f0   :  { %v13199_v5 = vpop.f32.mrf.mxu0  ;;  %2758 = vmatmul.mubr.f32.gmra.mxu0 %v11106_v8  ;;  %4388 = vmatprep.subr.mxu1 %v11315_v0  ;;  %v3112_v48 = vmul.f32 %v12977_v13, %v16999_v50  ;;  %v17000_v8 = vld [vmem:[#allocation81_spill] sm:$0xff] }
 0x2f1   :  { %16997 = vst [vmem:[#allocation59_spill] sm:$0xff] %v13199_v5  ;;  %v13202_v34 = vpop.f32.mrf.mxu1  ;;  %3510 = vmatmul.mubr.f32.gmra.mxu1 %v3108_v23  ;;  %2763 = vmatprep.mubr.f32.mxu0 %v11315_v0  ;;  %v3117_v5 = vmul.f32 %v12999_v21, %v17000_v8  ;;  %v11107_v23 = vld [vmem:[#allocation5 + $0x90] sm:$0xff]  ;;  %v3356_v8 = vld [vmem:[#allocation10 + $0x1e0] sm:$0xff] }
 0x2f2   :  { %3514 = vmatprep.mubr.f32.mxu1 %v3113_v47  ;;  %v13205_v43 = vpop.f32.mrf.mxu0  ;;  %3780 = vmatpush2.msra.mxu0 %v3358_v46  ;;  %v4351_v47 = vld [vmem:[#allocation11 + $0xe8] sm:$0xff] }
 0x2f3   :  { %16998 = vst [vmem:[#allocation344_spill] sm:$0xff] %v13205_v43  ;;  %v13209_v2 = vpop.f32.mrf.mxu1  ;;  %4389 = vmatpush2.msra.mxu1 %v4352_v42  ;;  %3781 = vmatprep.subr.mxu0 %v11315_v0  ;;  %v17003_v42 = vld [vmem:[#allocation79_spill] sm:$0xff] }
 0x2f4   :  { %v13214_v29 = vpop.f32.mrf.mxu0  ;;  %2764 = vmatmul.mubr.f32.gmra.mxu0 %v11107_v23  ;;  %4390 = vmatprep.subr.mxu1 %v11315_v0  ;;  %v3116_v50 = vmul.f32 %v12992_v4, %v17003_v42  ;;  %v17004_v23 = vld [vmem:[#allocation20_spill] sm:$0xff] }
 0x2f5   :  { %17001 = vst [vmem:[#allocation65_spill] sm:$0xff] %v13214_v29  ;;  %v13217_v46 = vpop.f32.mrf.mxu1  ;;  %3515 = vmatmul.mubr.f32.gmra.mxu1 %v3112_v48  ;;  %2769 = vmatprep.mubr.f32.mxu0 %v11315_v0  ;;  %v3121_v29 = vmul.f32 %v13014_v14, %v17004_v23  ;;  %v11108_v48 = vld [vmem:[#allocation5 + $0x98] sm:$0xff] }
 0x2f6   :  { %3519 = vmatprep.mubr.f32.mxu1 %v3117_v5  ;;  %v13220_v13 = vpop.f32.mrf.mxu0  ;;  %3782 = vmatpush2.msra.mxu0 %v3357_v57  ;;  %v4350_v5 = vld [vmem:[#allocation11 + $0xe0] sm:$0xff]  ;;  %v3355_v23 = vld [vmem:[#allocation10 + $0x1d8] sm:$0xff] }
 0x2f7   :  { %17002 = vst [vmem:[#allocation63_spill] sm:$0xff] %v13220_v13  ;;  %v13224_v21 = vpop.f32.mrf.mxu1  ;;  %4391 = vmatpush2.msra.mxu1 %v4351_v47  ;;  %3783 = vmatprep.subr.mxu0 %v11315_v0  ;;  %v17007_v47 = vld [vmem:[#allocation82_spill] sm:$0xff] }
 0x2f8   :  { %v13229_v44 = vpop.f32.mrf.mxu0  ;;  %2770 = vmatmul.mubr.f32.gmra.mxu0 %v11108_v48  ;;  %4392 = vmatprep.subr.mxu1 %v11315_v0  ;;  %v3120_v42 = vmul.f32 %v13007_v52, %v17007_v47  ;;  %v17008_v48 = vld [vmem:[#allocation22_spill] sm:$0xff] }
 0x2f9   :  { %17005 = vst [vmem:[#allocation69_spill] sm:$0xff] %v13229_v44  ;;  %v13232_v57 = vpop.f32.mrf.mxu1  ;;  %3520 = vmatmul.mubr.f32.gmra.mxu1 %v3116_v50  ;;  %2775 = vmatprep.mubr.f32.mxu0 %v11315_v0  ;;  %v3125_v44 = vmul.f32 %v13029_v22, %v17008_v48  ;;  %v11109_v50 = vld [vmem:[#allocation5 + $0xa0] sm:$0xff]  ;;  %v3354_v48 = vld [vmem:[#allocation10 + $0x1d0] sm:$0xff] }
 0x2fa   :  { %3524 = vmatprep.mubr.f32.mxu1 %v3121_v29  ;;  %v13235_v4 = vpop.f32.mrf.mxu0  ;;  %3784 = vmatpush2.msra.mxu0 %v3356_v8  ;;  %v4349_v29 = vld [vmem:[#allocation11 + $0xd8] sm:$0xff] }
 0x2fb   :  { %17006 = vst [vmem:[#allocation67_spill] sm:$0xff] %v13235_v4  ;;  %v13239_v14 = vpop.f32.mrf.mxu1  ;;  %4393 = vmatpush2.msra.mxu1 %v4350_v5  ;;  %3785 = vmatprep.subr.mxu0 %v11315_v0  ;;  %v17011_v5 = vld [vmem:[#allocation84_spill] sm:$0xff] }
 0x2fc   :  { %v13244_v35 = vpop.f32.mrf.mxu0  ;;  %2776 = vmatmul.mubr.f32.gmra.mxu0 %v11109_v50  ;;  %4394 = vmatprep.subr.mxu1 %v11315_v0  ;;  %v3124_v47 = vmul.f32 %v13022_v54, %v17011_v5  ;;  %v17012_v50 = vld [vmem:[#allocation24_spill] sm:$0xff] }
 0x2fd   :  { %17009 = vst [vmem:[#allocation73_spill] sm:$0xff] %v13244_v35  ;;  %v13247_v8 = vpop.f32.mrf.mxu1  ;;  %3525 = vmatmul.mubr.f32.gmra.mxu1 %v3120_v42  ;;  %2781 = vmatprep.mubr.f32.mxu0 %v11315_v0  ;;  %v3129_v35 = vmul.f32 %v13044_v30, %v17012_v50  ;;  %v11110_v42 = vld [vmem:[#allocation5 + $0xa8] sm:$0xff] }
 0x2fe   :  { %3529 = vmatprep.mubr.f32.mxu1 %v3125_v44  ;;  %v13250_v52 = vpop.f32.mrf.mxu0  ;;  %3786 = vmatpush2.msra.mxu0 %v3355_v23  ;;  %v4348_v44 = vld [vmem:[#allocation11 + $0xd0] sm:$0xff]  ;;  %v3353_v50 = vld [vmem:[#allocation10 + $0x1c8] sm:$0xff] }
 0x2ff   :  { %17010 = vst [vmem:[#allocation71_spill] sm:$0xff] %v13250_v52  ;;  %v13254_v22 = vpop.f32.mrf.mxu1  ;;  %4395 = vmatpush2.msra.mxu1 %v4349_v29  ;;  %3787 = vmatprep.subr.mxu0 %v11315_v0  ;;  %v17015_v29 = vld [vmem:[#allocation86_spill] sm:$0xff] }
 0x300   :  { %v13259_v12 = vpop.f32.mrf.mxu0  ;;  %2782 = vmatmul.mubr.f32.gmra.mxu0 %v11110_v42  ;;  %4396 = vmatprep.subr.mxu1 %v11315_v0  ;;  %v3128_v5 = vmul.f32 %v13037_v10, %v17015_v29  ;;  %v17016_v42 = vld [vmem:[#allocation26_spill] sm:$0xff] }
 0x301   :  { %17013 = vst [vmem:[#allocation77_spill] sm:$0xff] %v13259_v12  ;;  %v13262_v23 = vpop.f32.mrf.mxu1  ;;  %3530 = vmatmul.mubr.f32.gmra.mxu1 %v3124_v47  ;;  %2787 = vmatprep.mubr.f32.mxu0 %v11315_v0  ;;  %v3133_v12 = vmul.f32 %v13059_v45, %v17016_v42  ;;  %v11111_v47 = vld [vmem:[#allocation5 + $0xb0] sm:$0xff]  ;;  %v3352_v42 = vld [vmem:[#allocation10 + $0x1c0] sm:$0xff] }
 0x302   :  { %3534 = vmatprep.mubr.f32.mxu1 %v3129_v35  ;;  %v13265_v54 = vpop.f32.mrf.mxu0  ;;  %3788 = vmatpush2.msra.mxu0 %v3354_v48  ;;  %v4347_v35 = vld [vmem:[#allocation11 + $0xc8] sm:$0xff] }
 0x303   :  { %17014 = vst [vmem:[#allocation75_spill] sm:$0xff] %v13265_v54  ;;  %v13269_v30 = vpop.f32.mrf.mxu1  ;;  %4397 = vmatpush2.msra.mxu1 %v4348_v44  ;;  %3789 = vmatprep.subr.mxu0 %v11315_v0  ;;  %v17019_v44 = vld [vmem:[#allocation88_spill] sm:$0xff] }
 0x304   :  { %v13274_v52 = vpop.f32.mrf.mxu0  ;;  %2788 = vmatmul.mubr.f32.gmra.mxu0 %v11111_v47  ;;  %4398 = vmatprep.subr.mxu1 %v11315_v0  ;;  %v3132_v29 = vmul.f32 %v13052_v16, %v17019_v44  ;;  %v17020_v47 = vld [vmem:[#allocation92_spill] sm:$0xff] }
 0x305   :  { %17017 = vst [vmem:[#allocation81_spill] sm:$0xff] %v13274_v52  ;;  %v13277_v48 = vpop.f32.mrf.mxu1  ;;  %3535 = vmatmul.mubr.f32.gmra.mxu1 %v3128_v5  ;;  %2793 = vmatprep.mubr.f32.mxu0 %v11315_v0  ;;  %v3137_v52 = vmul.f32 %v13074_v40, %v17020_v47  ;;  %v11112_v5 = vld [vmem:[#allocation5 + $0xb8] sm:$0xff] }
 0x306   :  { %3539 = vmatprep.mubr.f32.mxu1 %v3133_v12  ;;  %v13280_v10 = vpop.f32.mrf.mxu0  ;;  %3790 = vmatpush2.msra.mxu0 %v3353_v50  ;;  %v4346_v12 = vld [vmem:[#allocation11 + $0xc0] sm:$0xff]  ;;  %v3351_v47 = vld [vmem:[#allocation10 + $0x1b8] sm:$0xff] }
 0x307   :  { %17018 = vst [vmem:[#allocation79_spill] sm:$0xff] %v13280_v10  ;;  %v13284_v45 = vpop.f32.mrf.mxu1  ;;  %4399 = vmatpush2.msra.mxu1 %v4347_v35  ;;  %3791 = vmatprep.subr.mxu0 %v11315_v0  ;;  %v17023_v35 = vld [vmem:[#allocation90_spill] sm:$0xff] }
 0x308   :  { %v13289_v54 = vpop.f32.mrf.mxu0  ;;  %2794 = vmatmul.mubr.f32.gmra.mxu0 %v11112_v5  ;;  %4400 = vmatprep.subr.mxu1 %v11315_v0  ;;  %v3136_v44 = vmul.f32 %v13067_v31, %v17023_v35  ;;  %v17024_v5 = vld [vmem:[#allocation96_spill] sm:$0xff] }
 0x309   :  { %17021 = vst [vmem:[#allocation20_spill] sm:$0xff] %v13289_v54  ;;  %v13292_v50 = vpop.f32.mrf.mxu1  ;;  %3540 = vmatmul.mubr.f32.gmra.mxu1 %v3132_v29  ;;  %2799 = vmatprep.mubr.f32.mxu0 %v11315_v0  ;;  %v3141_v54 = vmul.f32 %v13089_v19, %v17024_v5  ;;  %v11113_v29 = vld [vmem:[#allocation5 + $0xc0] sm:$0xff]  ;;  %v3350_v5 = vld [vmem:[#allocation10 + $0x1b0] sm:$0xff] }
 0x30a   :  { %3544 = vmatprep.mubr.f32.mxu1 %v3137_v52  ;;  %v13295_v16 = vpop.f32.mrf.mxu0  ;;  %3792 = vmatpush2.msra.mxu0 %v3352_v42  ;;  %v4345_v52 = vld [vmem:[#allocation11 + $0xb8] sm:$0xff] }
 0x30b   :  { %17022 = vst [vmem:[#allocation82_spill] sm:$0xff] %v13295_v16  ;;  %v13299_v40 = vpop.f32.mrf.mxu1  ;;  %4401 = vmatpush2.msra.mxu1 %v4346_v12  ;;  %3793 = vmatprep.subr.mxu0 %v11315_v0  ;;  %v17027_v12 = vld [vmem:[#allocation94_spill] sm:$0xff] }
 0x30c   :  { %v13304_v10 = vpop.f32.mrf.mxu0  ;;  %2800 = vmatmul.mubr.f32.gmra.mxu0 %v11113_v29  ;;  %4402 = vmatprep.subr.mxu1 %v11315_v0  ;;  %v3140_v35 = vmul.f32 %v13082_v28, %v17027_v12  ;;  %v17028_v29 = vld [vmem:[#allocation100_spill] sm:$0xff] }
 0x30d   :  { %17025 = vst [vmem:[#allocation22_spill] sm:$0xff] %v13304_v10  ;;  %v13307_v42 = vpop.f32.mrf.mxu1  ;;  %3545 = vmatmul.mubr.f32.gmra.mxu1 %v3136_v44  ;;  %2805 = vmatprep.mubr.f32.mxu0 %v11315_v0  ;;  %v3145_v10 = vmul.f32 %v13104_v27, %v17028_v29  ;;  %v11114_v44 = vld [vmem:[#allocation5 + $0xc8] sm:$0xff] }
 0x30e   :  { %3549 = vmatprep.mubr.f32.mxu1 %v3141_v54  ;;  %v13310_v31 = vpop.f32.mrf.mxu0  ;;  %3794 = vmatpush2.msra.mxu0 %v3351_v47  ;;  %v4344_v54 = vld [vmem:[#allocation11 + $0xb0] sm:$0xff]  ;;  %v3349_v29 = vld [vmem:[#allocation10 + $0x1a8] sm:$0xff] }
 0x30f   :  { %17026 = vst [vmem:[#allocation84_spill] sm:$0xff] %v13310_v31  ;;  %v13314_v19 = vpop.f32.mrf.mxu1  ;;  %4403 = vmatpush2.msra.mxu1 %v4345_v52  ;;  %3795 = vmatprep.subr.mxu0 %v11315_v0  ;;  %v17031_v52 = vld [vmem:[#allocation98_spill] sm:$0xff] }
 0x310   :  { %v13319_v16 = vpop.f32.mrf.mxu0  ;;  %2806 = vmatmul.mubr.f32.gmra.mxu0 %v11114_v44  ;;  %4404 = vmatprep.subr.mxu1 %v11315_v0  ;;  %v3144_v12 = vmul.f32 %v13097_v58, %v17031_v52  ;;  %v17032_v44 = vld [vmem:[#allocation104_spill] sm:$0xff] }
 0x311   :  { %17029 = vst [vmem:[#allocation24_spill] sm:$0xff] %v13319_v16  ;;  %v13322_v47 = vpop.f32.mrf.mxu1  ;;  %3550 = vmatmul.mubr.f32.gmra.mxu1 %v3140_v35  ;;  %2811 = vmatprep.mubr.f32.mxu0 %v11315_v0  ;;  %v3149_v16 = vmul.f32 %v13119_v38, %v17032_v44  ;;  %v11115_v35 = vld [vmem:[#allocation5 + $0xd0] sm:$0xff]  ;;  %v3348_v44 = vld [vmem:[#allocation10 + $0x1a0] sm:$0xff] }
 0x312   :  { %3554 = vmatprep.mubr.f32.mxu1 %v3145_v10  ;;  %v13325_v28 = vpop.f32.mrf.mxu0  ;;  %3796 = vmatpush2.msra.mxu0 %v3350_v5  ;;  %v4343_v10 = vld [vmem:[#allocation11 + $0xa8] sm:$0xff] }
 0x313   :  { %17030 = vst [vmem:[#allocation86_spill] sm:$0xff] %v13325_v28  ;;  %v13329_v27 = vpop.f32.mrf.mxu1  ;;  %4405 = vmatpush2.msra.mxu1 %v4344_v54  ;;  %3797 = vmatprep.subr.mxu0 %v11315_v0  ;;  %v17035_v54 = vld [vmem:[#allocation102_spill] sm:$0xff] }
 0x314   :  { %v13334_v31 = vpop.f32.mrf.mxu0  ;;  %2812 = vmatmul.mubr.f32.gmra.mxu0 %v11115_v35  ;;  %4406 = vmatprep.subr.mxu1 %v11315_v0  ;;  %v3148_v52 = vmul.f32 %v13112_v55, %v17035_v54  ;;  %v17036_v35 = vld [vmem:[#allocation108_spill] sm:$0xff] }
 0x315   :  { %17033 = vst [vmem:[#allocation26_spill] sm:$0xff] %v13334_v31  ;;  %v13337_v5 = vpop.f32.mrf.mxu1  ;;  %3555 = vmatmul.mubr.f32.gmra.mxu1 %v3144_v12  ;;  %2817 = vmatprep.mubr.f32.mxu0 %v11315_v0  ;;  %v3153_v31 = vmul.f32 %v13134_v1, %v17036_v35  ;;  %v11116_v12 = vld [vmem:[#allocation5 + $0xd8] sm:$0xff] }
 0x316   :  { %3559 = vmatprep.mubr.f32.mxu1 %v3149_v16  ;;  %v13340_v58 = vpop.f32.mrf.mxu0  ;;  %3798 = vmatpush2.msra.mxu0 %v3349_v29  ;;  %v4342_v16 = vld [vmem:[#allocation11 + $0xa0] sm:$0xff]  ;;  %v3347_v35 = vld [vmem:[#allocation10 + $0x198] sm:$0xff] }
 0x317   :  { %17034 = vst [vmem:[#allocation88_spill] sm:$0xff] %v13340_v58  ;;  %v13344_v38 = vpop.f32.mrf.mxu1  ;;  %4407 = vmatpush2.msra.mxu1 %v4343_v10  ;;  %3799 = vmatprep.subr.mxu0 %v11315_v0  ;;  %v17039_v10 = vld [vmem:[#allocation106_spill] sm:$0xff] }
 0x318   :  { %v13349_v28 = vpop.f32.mrf.mxu0  ;;  %2818 = vmatmul.mubr.f32.gmra.mxu0 %v11116_v12  ;;  %4408 = vmatprep.subr.mxu1 %v11315_v0  ;;  %v3152_v54 = vmul.f32 %v13127_v6, %v17039_v10  ;;  %v17040_v12 = vld [vmem:[#allocation112_spill] sm:$0xff] }
 0x319   :  { %17037 = vst [vmem:[#allocation92_spill] sm:$0xff] %v13349_v28  ;;  %v13352_v29 = vpop.f32.mrf.mxu1  ;;  %3560 = vmatmul.mubr.f32.gmra.mxu1 %v3148_v52  ;;  %2823 = vmatprep.mubr.f32.mxu0 %v11315_v0  ;;  %v3157_v28 = vmul.f32 %v13149_v37, %v17040_v12  ;;  %v11117_v52 = vld [vmem:[#allocation5 + $0xe0] sm:$0xff]  ;;  %v3346_v12 = vld [vmem:[#allocation10 + $0x190] sm:$0xff] }
 0x31a   :  { %3564 = vmatprep.mubr.f32.mxu1 %v3153_v31  ;;  %v13355_v55 = vpop.f32.mrf.mxu0  ;;  %3800 = vmatpush2.msra.mxu0 %v3348_v44  ;;  %v4341_v31 = vld [vmem:[#allocation11 + $0x98] sm:$0xff] }
 0x31b   :  { %17038 = vst [vmem:[#allocation90_spill] sm:$0xff] %v13355_v55  ;;  %v13359_v1 = vpop.f32.mrf.mxu1  ;;  %4409 = vmatpush2.msra.mxu1 %v4342_v16  ;;  %3801 = vmatprep.subr.mxu0 %v11315_v0  ;;  %v17043_v16 = vld [vmem:[#allocation110_spill] sm:$0xff] }
 0x31c   :  { %v13364_v58 = vpop.f32.mrf.mxu0  ;;  %2824 = vmatmul.mubr.f32.gmra.mxu0 %v11117_v52  ;;  %4410 = vmatprep.subr.mxu1 %v11315_v0  ;;  %v3156_v10 = vmul.f32 %v13142_v15, %v17043_v16  ;;  %v17044_v52 = vld [vmem:[#allocation116_spill] sm:$0xff] }
 0x31d   :  { %17041 = vst [vmem:[#allocation96_spill] sm:$0xff] %v13364_v58  ;;  %v13367_v44 = vpop.f32.mrf.mxu1  ;;  %3565 = vmatmul.mubr.f32.gmra.mxu1 %v3152_v54  ;;  %2829 = vmatprep.mubr.f32.mxu0 %v11315_v0  ;;  %v3161_v58 = vmul.f32 %v13164_v63, %v17044_v52  ;;  %v11118_v54 = vld [vmem:[#allocation5 + $0xe8] sm:$0xff] }
 0x31e   :  { %3569 = vmatprep.mubr.f32.mxu1 %v3157_v28  ;;  %v13370_v6 = vpop.f32.mrf.mxu0  ;;  %3802 = vmatpush2.msra.mxu0 %v3347_v35  ;;  %v4340_v28 = vld [vmem:[#allocation11 + $0x90] sm:$0xff]  ;;  %v3345_v52 = vld [vmem:[#allocation10 + $0x188] sm:$0xff] }
 0x31f   :  { %17042 = vst [vmem:[#allocation94_spill] sm:$0xff] %v13370_v6  ;;  %v13374_v37 = vpop.f32.mrf.mxu1  ;;  %4411 = vmatpush2.msra.mxu1 %v4341_v31  ;;  %3803 = vmatprep.subr.mxu0 %v11315_v0  ;;  %v17047_v31 = vld [vmem:[#allocation114_spill] sm:$0xff] }
 0x320   :  { %v13379_v55 = vpop.f32.mrf.mxu0  ;;  %2830 = vmatmul.mubr.f32.gmra.mxu0 %v11118_v54  ;;  %4412 = vmatprep.subr.mxu1 %v11315_v0  ;;  %v3160_v16 = vmul.f32 %v13157_v36, %v17047_v31  ;;  %v17048_v54 = vld [vmem:[#allocation120_spill] sm:$0xff] }
 0x321   :  { %17045 = vst [vmem:[#allocation100_spill] sm:$0xff] %v13379_v55  ;;  %v13382_v35 = vpop.f32.mrf.mxu1  ;;  %3570 = vmatmul.mubr.f32.gmra.mxu1 %v3156_v10  ;;  %2835 = vmatprep.mubr.f32.mxu0 %v11315_v0  ;;  %v3165_v55 = vmul.f32 %v13179_v53, %v17048_v54  ;;  %v11119_v10 = vld [vmem:[#allocation5 + $0xf0] sm:$0xff]  ;;  %v3344_v54 = vld [vmem:[#allocation10 + $0x180] sm:$0xff] }
 0x322   :  { %3574 = vmatprep.mubr.f32.mxu1 %v3161_v58  ;;  %v13385_v15 = vpop.f32.mrf.mxu0  ;;  %3804 = vmatpush2.msra.mxu0 %v3346_v12  ;;  %v4339_v58 = vld [vmem:[#allocation11 + $0x88] sm:$0xff] }
 0x323   :  { %17046 = vst [vmem:[#allocation98_spill] sm:$0xff] %v13385_v15  ;;  %v13389_v63 = vpop.f32.mrf.mxu1  ;;  %4413 = vmatpush2.msra.mxu1 %v4340_v28  ;;  %3805 = vmatprep.subr.mxu0 %v11315_v0  ;;  %v17051_v28 = vld [vmem:[#allocation118_spill] sm:$0xff] }
 0x324   :  { %v13394_v6 = vpop.f32.mrf.mxu0  ;;  %2836 = vmatmul.mubr.f32.gmra.mxu0 %v11119_v10  ;;  %4414 = vmatprep.subr.mxu1 %v11315_v0  ;;  %v3164_v31 = vmul.f32 %v13172_v32, %v17051_v28  ;;  %v17052_v10 = vld [vmem:[#allocation124_spill] sm:$0xff] }
 0x325   :  { %17049 = vst [vmem:[#allocation104_spill] sm:$0xff] %v13394_v6  ;;  %v13397_v12 = vpop.f32.mrf.mxu1  ;;  %3575 = vmatmul.mubr.f32.gmra.mxu1 %v3160_v16  ;;  %2841 = vmatprep.mubr.f32.mxu0 %v11315_v0  ;;  %v3169_v6 = vmul.f32 %v13194_v59, %v17052_v10  ;;  %v11120_v16 = vld [vmem:[#allocation5 + $0xf8] sm:$0xff]  ;;  %v17056_v10 = vld [vmem:[#allocation128_spill] sm:$0xff] }
 0x326   :  { %3579 = vmatprep.mubr.f32.mxu1 %v3165_v55  ;;  %v13400_v36 = vpop.f32.mrf.mxu0  ;;  %3806 = vmatpush2.msra.mxu0 %v3345_v52  ;;  %v4338_v52 = vld [vmem:[#allocation11 + $0x80] sm:$0xff] }
 0x327   :  { %17050 = vst [vmem:[#allocation102_spill] sm:$0xff] %v13400_v36  ;;  %v13404_v53 = vpop.f32.mrf.mxu1  ;;  %4415 = vmatpush2.msra.mxu1 %v4339_v58  ;;  %3807 = vmatprep.subr.mxu0 %v11315_v0  ;;  %v17055_v58 = vld [vmem:[#allocation122_spill] sm:$0xff] }
 0x328   :  { %v13409_v15 = vpop.f32.mrf.mxu0  ;;  %2842 = vmatmul.mubr.f32.gmra.mxu0 %v11120_v16  ;;  %4416 = vmatprep.subr.mxu1 %v11315_v0  ;;  %v3168_v28 = vmul.f32 %v13187_v20, %v17055_v58  ;;  %v3173_v16 = vmul.f32 %v13209_v2, %v17056_v10  ;;  %v11121_v36 = vld [vmem:[#allocation5 + $0x100] sm:$0xff] }
 0x329   :  { %17053 = vst [vmem:[#allocation108_spill] sm:$0xff] %v13409_v15  ;;  %v13412_v55 = vpop.f32.mrf.mxu1  ;;  %3580 = vmatmul.mubr.f32.gmra.mxu1 %v3164_v31  ;;  %2847 = vmatprep.mubr.f32.mxu0 %v11315_v0 }
 0x32a   :  { %3584 = vmatprep.mubr.f32.mxu1 %v3169_v6  ;;  %v13415_v32 = vpop.f32.mrf.mxu0  ;;  %3808 = vmatpush2.msra.mxu0 %v3344_v54  ;;  %v17059_v54 = vld [vmem:[#allocation126_spill] sm:$0xff] }
 0x32b   :  { %17054 = vst [vmem:[#allocation106_spill] sm:$0xff] %v13415_v32  ;;  %v13419_v59 = vpop.f32.mrf.mxu1  ;;  %4417 = vmatpush2.msra.mxu1 %v4338_v52  ;;  %v3172_v20 = vmul.f32 %v13202_v34, %v17059_v54  ;;  %v17060_v52 = vld [vmem:[#allocation132_spill] sm:$0xff] }
 0x32c   :  { %v13423_v15 = vpop.f32.mrf.mxu0  ;;  %2848 = vmatmul.mubr.f32.gmra.mxu0 %v11121_v36  ;;  %v3177_v2 = vmul.f32 %v13224_v21, %v17060_v52 }
 0x32d   :  { %17057 = vst [vmem:[#allocation112_spill] sm:$0xff] %v13423_v15  ;;  %v13425_v31 = vpop.f32.mrf.mxu1  ;;  %3585 = vmatmul.mubr.f32.gmra.mxu1 %v3168_v28  ;;  %2853 = vmatprep.mubr.f32.mxu0 %v11315_v0  ;;  %v11122_v15 = vld [vmem:[#allocation5 + $0x108] sm:$0xff] }
 0x32e   :  { %3589 = vmatprep.mubr.f32.mxu1 %v3173_v16  ;;  %v13428_v6 = vpop.f32.mrf.mxu0  ;;  %v17063_v16 = vld [vmem:[#allocation130_spill] sm:$0xff] }
 0x32f   :  { %17058 = vst [vmem:[#allocation110_spill] sm:$0xff] %v13428_v6  ;;  %v13432_v58 = vpop.f32.mrf.mxu1  ;;  %v3176_v34 = vmul.f32 %v13217_v46, %v17063_v16  ;;  %v17064_v6 = vld [vmem:[#allocation136_spill] sm:$0xff] }
 0x330   :  { %v13436_v10 = vpop.f32.mrf.mxu0  ;;  %2854 = vmatmul.mubr.f32.gmra.mxu0 %v11122_v15  ;;  %v3181_v21 = vmul.f32 %v13239_v14, %v17064_v6 }
 0x331   :  { %17061 = vst [vmem:[#allocation116_spill] sm:$0xff] %v13436_v10  ;;  %v13438_v36 = vpop.f32.mrf.mxu1  ;;  %3590 = vmatmul.mubr.f32.gmra.mxu1 %v3172_v20  ;;  %2859 = vmatprep.mubr.f32.mxu0 %v11315_v0  ;;  %v11123_v10 = vld [vmem:[#allocation5 + $0x110] sm:$0xff] }
 0x332   :  { %3594 = vmatprep.mubr.f32.mxu1 %v3177_v2  ;;  %v13441_v28 = vpop.f32.mrf.mxu0  ;;  %v17067_v2 = vld [vmem:[#allocation134_spill] sm:$0xff] }
 0x333   :  { %17062 = vst [vmem:[#allocation114_spill] sm:$0xff] %v13441_v28  ;;  %v13445_v54 = vpop.f32.mrf.mxu1  ;;  %v3180_v46 = vmul.f32 %v13232_v57, %v17067_v2  ;;  %v17068_v28 = vld [vmem:[#allocation140_spill] sm:$0xff] }
 0x334   :  { %v13449_v52 = vpop.f32.mrf.mxu0  ;;  %2860 = vmatmul.mubr.f32.gmra.mxu0 %v11123_v10  ;;  %v3185_v14 = vmul.f32 %v13254_v22, %v17068_v28 }
 0x335   :  { %17065 = vst [vmem:[#allocation120_spill] sm:$0xff] %v13449_v52  ;;  %v13451_v15 = vpop.f32.mrf.mxu1  ;;  %3595 = vmatmul.mubr.f32.gmra.mxu1 %v3176_v34  ;;  %2865 = vmatprep.mubr.f32.mxu0 %v11315_v0  ;;  %v11124_v52 = vld [vmem:[#allocation5 + $0x118] sm:$0xff] }
 0x336   :  { %3599 = vmatprep.mubr.f32.mxu1 %v3181_v21  ;;  %v13454_v20 = vpop.f32.mrf.mxu0  ;;  %v17071_v21 = vld [vmem:[#allocation138_spill] sm:$0xff] }
 0x337   :  { %17066 = vst [vmem:[#allocation118_spill] sm:$0xff] %v13454_v20  ;;  %v13458_v16 = vpop.f32.mrf.mxu1  ;;  %v3184_v57 = vmul.f32 %v13247_v8, %v17071_v21  ;;  %v17072_v20 = vld [vmem:[#allocation144_spill] sm:$0xff] }
 0x338   :  { %v13462_v6 = vpop.f32.mrf.mxu0  ;;  %2866 = vmatmul.mubr.f32.gmra.mxu0 %v11124_v52  ;;  %v3189_v22 = vmul.f32 %v13269_v30, %v17072_v20 }
 0x339   :  { %17069 = vst [vmem:[#allocation124_spill] sm:$0xff] %v13462_v6  ;;  %v13464_v10 = vpop.f32.mrf.mxu1  ;;  %3600 = vmatmul.mubr.f32.gmra.mxu1 %v3180_v46  ;;  %2871 = vmatprep.mubr.f32.mxu0 %v11315_v0  ;;  %v11125_v6 = vld [vmem:[#allocation5 + $0x120] sm:$0xff] }
 0x33a   :  { %3604 = vmatprep.mubr.f32.mxu1 %v3185_v14  ;;  %v13467_v34 = vpop.f32.mrf.mxu0  ;;  %v17075_v14 = vld [vmem:[#allocation142_spill] sm:$0xff] }
 0x33b   :  { %17070 = vst [vmem:[#allocation122_spill] sm:$0xff] %v13467_v34  ;;  %v13471_v2 = vpop.f32.mrf.mxu1  ;;  %v3188_v8 = vmul.f32 %v13262_v23, %v17075_v14  ;;  %v17076_v34 = vld [vmem:[#allocation148_spill] sm:$0xff] }
 0x33c   :  { %v13475_v28 = vpop.f32.mrf.mxu0  ;;  %2872 = vmatmul.mubr.f32.gmra.mxu0 %v11125_v6  ;;  %v3193_v30 = vmul.f32 %v13284_v45, %v17076_v34 }
 0x33d   :  { %17073 = vst [vmem:[#allocation128_spill] sm:$0xff] %v13475_v28  ;;  %v13477_v52 = vpop.f32.mrf.mxu1  ;;  %3605 = vmatmul.mubr.f32.gmra.mxu1 %v3184_v57  ;;  %2877 = vmatprep.mubr.f32.mxu0 %v11315_v0  ;;  %v11126_v28 = vld [vmem:[#allocation5 + $0x128] sm:$0xff] }
 0x33e   :  { %3609 = vmatprep.mubr.f32.mxu1 %v3189_v22  ;;  %v13480_v46 = vpop.f32.mrf.mxu0  ;;  %v17079_v22 = vld [vmem:[#allocation146_spill] sm:$0xff] }
 0x33f   :  { %17074 = vst [vmem:[#allocation126_spill] sm:$0xff] %v13480_v46  ;;  %v13484_v21 = vpop.f32.mrf.mxu1  ;;  %v3192_v23 = vmul.f32 %v13277_v48, %v17079_v22  ;;  %v17080_v46 = vld [vmem:[#allocation152_spill] sm:$0xff] }
 0x340   :  { %v13488_v20 = vpop.f32.mrf.mxu0  ;;  %2878 = vmatmul.mubr.f32.gmra.mxu0 %v11126_v28  ;;  %v3197_v45 = vmul.f32 %v13299_v40, %v17080_v46 }
 0x341   :  { %17077 = vst [vmem:[#allocation132_spill] sm:$0xff] %v13488_v20  ;;  %v13490_v6 = vpop.f32.mrf.mxu1  ;;  %3610 = vmatmul.mubr.f32.gmra.mxu1 %v3188_v8  ;;  %2883 = vmatprep.mubr.f32.mxu0 %v11315_v0  ;;  %v11127_v20 = vld [vmem:[#allocation5 + $0x130] sm:$0xff] }
 0x342   :  { %3614 = vmatprep.mubr.f32.mxu1 %v3193_v30  ;;  %v13493_v57 = vpop.f32.mrf.mxu0  ;;  %v17083_v30 = vld [vmem:[#allocation150_spill] sm:$0xff] }
 0x343   :  { %17078 = vst [vmem:[#allocation130_spill] sm:$0xff] %v13493_v57  ;;  %v13497_v14 = vpop.f32.mrf.mxu1  ;;  %v3196_v48 = vmul.f32 %v13292_v50, %v17083_v30  ;;  %v17084_v57 = vld [vmem:[#allocation156_spill] sm:$0xff] }
 0x344   :  { %v13501_v34 = vpop.f32.mrf.mxu0  ;;  %2884 = vmatmul.mubr.f32.gmra.mxu0 %v11127_v20  ;;  %v3201_v40 = vmul.f32 %v13314_v19, %v17084_v57 }
 0x345   :  { %17081 = vst [vmem:[#allocation136_spill] sm:$0xff] %v13501_v34  ;;  %v13503_v28 = vpop.f32.mrf.mxu1  ;;  %3615 = vmatmul.mubr.f32.gmra.mxu1 %v3192_v23  ;;  %2889 = vmatprep.mubr.f32.mxu0 %v11315_v0  ;;  %v11128_v34 = vld [vmem:[#allocation5 + $0x138] sm:$0xff] }
 0x346   :  { %3619 = vmatprep.mubr.f32.mxu1 %v3197_v45  ;;  %v13506_v8 = vpop.f32.mrf.mxu0  ;;  %v17087_v45 = vld [vmem:[#allocation154_spill] sm:$0xff] }
 0x347   :  { %17082 = vst [vmem:[#allocation134_spill] sm:$0xff] %v13506_v8  ;;  %v13510_v22 = vpop.f32.mrf.mxu1  ;;  %v3200_v50 = vmul.f32 %v13307_v42, %v17087_v45  ;;  %v17088_v8 = vld [vmem:[#allocation160_spill] sm:$0xff] }
 0x348   :  { %v13514_v46 = vpop.f32.mrf.mxu0  ;;  %2890 = vmatmul.mubr.f32.gmra.mxu0 %v11128_v34  ;;  %v3205_v19 = vmul.f32 %v13329_v27, %v17088_v8 }
 0x349   :  { %17085 = vst [vmem:[#allocation140_spill] sm:$0xff] %v13514_v46  ;;  %v13516_v20 = vpop.f32.mrf.mxu1  ;;  %3620 = vmatmul.mubr.f32.gmra.mxu1 %v3196_v48  ;;  %2895 = vmatprep.mubr.f32.mxu0 %v11315_v0  ;;  %v11129_v46 = vld [vmem:[#allocation5 + $0x140] sm:$0xff] }
 0x34a   :  { %3624 = vmatprep.mubr.f32.mxu1 %v3201_v40  ;;  %v13519_v23 = vpop.f32.mrf.mxu0  ;;  %v17091_v40 = vld [vmem:[#allocation158_spill] sm:$0xff] }
 0x34b   :  { %17086 = vst [vmem:[#allocation138_spill] sm:$0xff] %v13519_v23  ;;  %v13523_v30 = vpop.f32.mrf.mxu1  ;;  %v3204_v42 = vmul.f32 %v13322_v47, %v17091_v40  ;;  %v17092_v23 = vld [vmem:[#allocation164_spill] sm:$0xff] }
 0x34c   :  { %v13527_v57 = vpop.f32.mrf.mxu0  ;;  %2896 = vmatmul.mubr.f32.gmra.mxu0 %v11129_v46  ;;  %v3209_v27 = vmul.f32 %v13344_v38, %v17092_v23 }
 0x34d   :  { %17089 = vst [vmem:[#allocation144_spill] sm:$0xff] %v13527_v57  ;;  %v13529_v34 = vpop.f32.mrf.mxu1  ;;  %3625 = vmatmul.mubr.f32.gmra.mxu1 %v3200_v50  ;;  %2901 = vmatprep.mubr.f32.mxu0 %v11315_v0  ;;  %v11130_v57 = vld [vmem:[#allocation5 + $0x148] sm:$0xff] }
 0x34e   :  { %3629 = vmatprep.mubr.f32.mxu1 %v3205_v19  ;;  %v13532_v48 = vpop.f32.mrf.mxu0  ;;  %v17095_v19 = vld [vmem:[#allocation162_spill] sm:$0xff] }
 0x34f   :  { %17090 = vst [vmem:[#allocation142_spill] sm:$0xff] %v13532_v48  ;;  %v13536_v45 = vpop.f32.mrf.mxu1  ;;  %v3208_v47 = vmul.f32 %v13337_v5, %v17095_v19  ;;  %v17096_v48 = vld [vmem:[#allocation168_spill] sm:$0xff] }
 0x350   :  { %v13540_v8 = vpop.f32.mrf.mxu0  ;;  %2902 = vmatmul.mubr.f32.gmra.mxu0 %v11130_v57  ;;  %v3213_v38 = vmul.f32 %v13359_v1, %v17096_v48 }
 0x351   :  { %17093 = vst [vmem:[#allocation148_spill] sm:$0xff] %v13540_v8  ;;  %v13542_v46 = vpop.f32.mrf.mxu1  ;;  %3630 = vmatmul.mubr.f32.gmra.mxu1 %v3204_v42  ;;  %2907 = vmatprep.mubr.f32.mxu0 %v11315_v0  ;;  %v11131_v8 = vld [vmem:[#allocation5 + $0x150] sm:$0xff] }
 0x352   :  { %3634 = vmatprep.mubr.f32.mxu1 %v3209_v27  ;;  %v13545_v50 = vpop.f32.mrf.mxu0  ;;  %v17099_v27 = vld [vmem:[#allocation166_spill] sm:$0xff] }
 0x353   :  { %17094 = vst [vmem:[#allocation146_spill] sm:$0xff] %v13545_v50  ;;  %v13549_v40 = vpop.f32.mrf.mxu1  ;;  %v3212_v5 = vmul.f32 %v13352_v29, %v17099_v27  ;;  %v17100_v50 = vld [vmem:[#allocation172_spill] sm:$0xff] }
 0x354   :  { %v13553_v23 = vpop.f32.mrf.mxu0  ;;  %2908 = vmatmul.mubr.f32.gmra.mxu0 %v11131_v8  ;;  %v3217_v1 = vmul.f32 %v13374_v37, %v17100_v50 }
 0x355   :  { %17097 = vst [vmem:[#allocation152_spill] sm:$0xff] %v13553_v23  ;;  %v13555_v57 = vpop.f32.mrf.mxu1  ;;  %3635 = vmatmul.mubr.f32.gmra.mxu1 %v3208_v47  ;;  %2913 = vmatprep.mubr.f32.mxu0 %v11315_v0  ;;  %v11132_v23 = vld [vmem:[#allocation5 + $0x158] sm:$0xff] }
 0x356   :  { %3639 = vmatprep.mubr.f32.mxu1 %v3213_v38  ;;  %v13558_v42 = vpop.f32.mrf.mxu0  ;;  %v17103_v38 = vld [vmem:[#allocation170_spill] sm:$0xff] }
 0x357   :  { %17098 = vst [vmem:[#allocation150_spill] sm:$0xff] %v13558_v42  ;;  %v13562_v19 = vpop.f32.mrf.mxu1  ;;  %v3216_v29 = vmul.f32 %v13367_v44, %v17103_v38  ;;  %v17104_v42 = vld [vmem:[#allocation176_spill] sm:$0xff] }
 0x358   :  { %v13566_v48 = vpop.f32.mrf.mxu0  ;;  %2914 = vmatmul.mubr.f32.gmra.mxu0 %v11132_v23  ;;  %v3221_v37 = vmul.f32 %v13389_v63, %v17104_v42 }
 0x359   :  { %17101 = vst [vmem:[#allocation156_spill] sm:$0xff] %v13566_v48  ;;  %v13568_v8 = vpop.f32.mrf.mxu1  ;;  %3640 = vmatmul.mubr.f32.gmra.mxu1 %v3212_v5  ;;  %2919 = vmatprep.mubr.f32.mxu0 %v11315_v0  ;;  %v11133_v48 = vld [vmem:[#allocation5 + $0x160] sm:$0xff] }
 0x35a   :  { %3644 = vmatprep.mubr.f32.mxu1 %v3217_v1  ;;  %v13571_v47 = vpop.f32.mrf.mxu0  ;;  %v17107_v1 = vld [vmem:[#allocation174_spill] sm:$0xff] }
 0x35b   :  { %17102 = vst [vmem:[#allocation154_spill] sm:$0xff] %v13571_v47  ;;  %v13575_v27 = vpop.f32.mrf.mxu1  ;;  %v3220_v44 = vmul.f32 %v13382_v35, %v17107_v1  ;;  %v17108_v47 = vld [vmem:[#allocation180_spill] sm:$0xff] }
 0x35c   :  { %v13579_v50 = vpop.f32.mrf.mxu0  ;;  %2920 = vmatmul.mubr.f32.gmra.mxu0 %v11133_v48  ;;  %v3225_v63 = vmul.f32 %v13404_v53, %v17108_v47 }
 0x35d   :  { %17105 = vst [vmem:[#allocation160_spill] sm:$0xff] %v13579_v50  ;;  %v13581_v23 = vpop.f32.mrf.mxu1  ;;  %3645 = vmatmul.mubr.f32.gmra.mxu1 %v3216_v29  ;;  %2925 = vmatprep.mubr.f32.mxu0 %v11315_v0  ;;  %v11134_v50 = vld [vmem:[#allocation5 + $0x168] sm:$0xff] }
 0x35e   :  { %3649 = vmatprep.mubr.f32.mxu1 %v3221_v37  ;;  %v13584_v5 = vpop.f32.mrf.mxu0  ;;  %v17111_v37 = vld [vmem:[#allocation178_spill] sm:$0xff] }
 0x35f   :  { %17106 = vst [vmem:[#allocation158_spill] sm:$0xff] %v13584_v5  ;;  %v13588_v38 = vpop.f32.mrf.mxu1  ;;  %v3224_v35 = vmul.f32 %v13397_v12, %v17111_v37  ;;  %v17112_v5 = vld [vmem:[#allocation184_spill] sm:$0xff] }
 0x360   :  { %v13592_v42 = vpop.f32.mrf.mxu0  ;;  %2926 = vmatmul.mubr.f32.gmra.mxu0 %v11134_v50  ;;  %v3229_v53 = vmul.f32 %v13419_v59, %v17112_v5 }
 0x361   :  { %17109 = vst [vmem:[#allocation164_spill] sm:$0xff] %v13592_v42  ;;  %v13594_v48 = vpop.f32.mrf.mxu1  ;;  %3650 = vmatmul.mubr.f32.gmra.mxu1 %v3220_v44  ;;  %2931 = vmatprep.mubr.f32.mxu0 %v11315_v0  ;;  %v11135_v42 = vld [vmem:[#allocation5 + $0x170] sm:$0xff] }
 0x362   :  { %3654 = vmatprep.mubr.f32.mxu1 %v3225_v63  ;;  %v13597_v29 = vpop.f32.mrf.mxu0  ;;  %v17115_v63 = vld [vmem:[#allocation182_spill] sm:$0xff] }
 0x363   :  { %17110 = vst [vmem:[#allocation162_spill] sm:$0xff] %v13597_v29  ;;  %v13601_v1 = vpop.f32.mrf.mxu1  ;;  %v3228_v12 = vmul.f32 %v13412_v55, %v17115_v63  ;;  %v17116_v29 = vld [vmem:[#allocation188_spill] sm:$0xff] }
 0x364   :  { %v13605_v47 = vpop.f32.mrf.mxu0  ;;  %2932 = vmatmul.mubr.f32.gmra.mxu0 %v11135_v42  ;;  %v3233_v59 = vmul.f32 %v13432_v58, %v17116_v29 }
 0x365   :  { %17113 = vst [vmem:[#allocation168_spill] sm:$0xff] %v13605_v47  ;;  %v13607_v50 = vpop.f32.mrf.mxu1  ;;  %3655 = vmatmul.mubr.f32.gmra.mxu1 %v3224_v35  ;;  %2937 = vmatprep.mubr.f32.mxu0 %v11315_v0  ;;  %v11136_v47 = vld [vmem:[#allocation5 + $0x178] sm:$0xff] }
 0x366   :  { %3659 = vmatprep.mubr.f32.mxu1 %v3229_v53  ;;  %v13610_v44 = vpop.f32.mrf.mxu0  ;;  %v17119_v53 = vld [vmem:[#allocation186_spill] sm:$0xff] }
 0x367   :  { %17114 = vst [vmem:[#allocation166_spill] sm:$0xff] %v13610_v44  ;;  %v13614_v37 = vpop.f32.mrf.mxu1  ;;  %v3232_v55 = vmul.f32 %v13425_v31, %v17119_v53  ;;  %v17120_v44 = vld [vmem:[#allocation192_spill] sm:$0xff] }
 0x368   :  { %v13618_v5 = vpop.f32.mrf.mxu0  ;;  %2938 = vmatmul.mubr.f32.gmra.mxu0 %v11136_v47  ;;  %v3237_v58 = vmul.f32 %v13445_v54, %v17120_v44  ;;  %v11138_v44 = vld [vmem:[#allocation5 + $0x188] sm:$0xff] }
 0x369   :  { %17117 = vst [vmem:[#allocation172_spill] sm:$0xff] %v13618_v5  ;;  %v13620_v42 = vpop.f32.mrf.mxu1  ;;  %3660 = vmatmul.mubr.f32.gmra.mxu1 %v3228_v12  ;;  %2943 = vmatprep.mubr.f32.mxu0 %v11315_v0  ;;  %v11137_v5 = vld [vmem:[#allocation5 + $0x180] sm:$0xff] }
 0x36a   :  { %3664 = vmatprep.mubr.f32.mxu1 %v3233_v59  ;;  %v13623_v35 = vpop.f32.mrf.mxu0  ;;  %v17122_v59 = vld [vmem:[#allocation190_spill] sm:$0xff] }
 0x36b   :  { %17118 = vst [vmem:[#allocation170_spill] sm:$0xff] %v13623_v35  ;;  %v13627_v63 = vpop.f32.mrf.mxu1  ;;  %v3236_v31 = vmul.f32 %v13438_v36, %v17122_v59  ;;  %v17123_v35 = vld [vmem:[#allocation196_spill] sm:$0xff] }
 0x36c   :  { %v13631_v29 = vpop.f32.mrf.mxu0  ;;  %2944 = vmatmul.mubr.f32.gmra.mxu0 %v11137_v5  ;;  %v3241_v32 = vmul.f32 %v13458_v16, %v17123_v35  ;;  %v17126_v59 = vld [vmem:[#allocation200_spill] sm:$0xff] }
 0x36d   :  { %v13633_v47 = vpop.f32.mrf.mxu1  ;;  %3665 = vmatmul.mubr.f32.gmra.mxu1 %v3232_v55  ;;  %2949 = vmatprep.mubr.f32.mxu0 %v11315_v0  ;;  %v11139_v35 = vld [vmem:[#allocation5 + $0x190] sm:$0xff] }
 0x36e   :  { %17121 = vst [vmem:[#allocation176_spill] sm:$0xff] %v13633_v47  ;;  %3669 = vmatprep.mubr.f32.mxu1 %v3237_v58  ;;  %v13636_v12 = vpop.f32.mrf.mxu0  ;;  %v17125_v58 = vld [vmem:[#allocation194_spill] sm:$0xff] }
 0x36f   :  { %v3428_v53 = vpop.f32.mrf.mxu1  ;;  %v3240_v47 = vmul.f32 %v13451_v15, %v17125_v58  ;;  %v17129_v58 = vld [vmem:[#allocation204_spill] sm:$0xff] }
 0x370   :  { %v13642_v54 = vpop.f32.mrf.mxu0  ;;  %2950 = vmatmul.mubr.f32.gmra.mxu0 %v11138_v44  ;;  %v3245_v53 = vmul.f32 %v13471_v2, %v17126_v59  ;;  %v11140_v59 = vld [vmem:[#allocation5 + $0x198] sm:$0xff] }
 0x371   :  { %v13644_v5 = vpop.f32.mrf.mxu1  ;;  %3670 = vmatmul.mubr.f32.gmra.mxu1 %v3236_v31  ;;  %2955 = vmatprep.mubr.f32.mxu0 %v11315_v0  ;;  %v17128_v31 = vld [vmem:[#allocation198_spill] sm:$0xff] }
 0x372   :  { %17124 = vst [vmem:[#allocation174_spill] sm:$0xff] %v13644_v5  ;;  %3674 = vmatprep.mubr.f32.mxu1 %v3241_v32  ;;  %v13647_v55 = vpop.f32.mrf.mxu0  ;;  %v3244_v5 = vmul.f32 %v13464_v10, %v17128_v31  ;;  %v17132_v31 = vld [vmem:[#allocation208_spill] sm:$0xff] }
 0x373   :  { %v3433_v36 = vpop.f32.mrf.mxu1 }
 0x374   :  { %v13653_v16 = vpop.f32.mrf.mxu0  ;;  %2956 = vmatmul.mubr.f32.gmra.mxu0 %v11139_v35  ;;  %v3249_v36 = vmul.f32 %v13484_v21, %v17129_v58  ;;  %v11141_v58 = vld [vmem:[#allocation5 + $0x1a0] sm:$0xff] }
 0x375   :  { %v13655_v44 = vpop.f32.mrf.mxu1  ;;  %3675 = vmatmul.mubr.f32.gmra.mxu1 %v3240_v47  ;;  %2961 = vmatprep.mubr.f32.mxu0 %v11315_v0 }
 0x376   :  { %17127 = vst [vmem:[#allocation180_spill] sm:$0xff] %v13655_v44  ;;  %3679 = vmatprep.mubr.f32.mxu1 %v3245_v53  ;;  %v13658_v32 = vpop.f32.mrf.mxu0  ;;  %v17131_v53 = vld [vmem:[#allocation202_spill] sm:$0xff] }
 0x377   :  { %v3438_v15 = vpop.f32.mrf.mxu1  ;;  %v3248_v44 = vmul.f32 %v13477_v52, %v17131_v53  ;;  %v17135_v53 = vld [vmem:[#allocation212_spill] sm:$0xff] }
 0x378   :  { %v13664_v2 = vpop.f32.mrf.mxu0  ;;  %2962 = vmatmul.mubr.f32.gmra.mxu0 %v11140_v59  ;;  %v3253_v15 = vmul.f32 %v13497_v14, %v17132_v31  ;;  %v11142_v31 = vld [vmem:[#allocation5 + $0x1a8] sm:$0xff] }
 0x379   :  { %v13666_v35 = vpop.f32.mrf.mxu1  ;;  %3680 = vmatmul.mubr.f32.gmra.mxu1 %v3244_v5  ;;  %2967 = vmatprep.mubr.f32.mxu0 %v11315_v0 }
 0x37a   :  { %17130 = vst [vmem:[#allocation178_spill] sm:$0xff] %v13666_v35  ;;  %3684 = vmatprep.mubr.f32.mxu1 %v3249_v36  ;;  %v13669_v47 = vpop.f32.mrf.mxu0  ;;  %v17134_v36 = vld [vmem:[#allocation206_spill] sm:$0xff] }
 0x37b   :  { %v3443_v10 = vpop.f32.mrf.mxu1  ;;  %v3252_v35 = vmul.f32 %v13490_v6, %v17134_v36  ;;  %v17138_v36 = vld [vmem:[#allocation216_spill] sm:$0xff] }
 0x37c   :  { %v13675_v21 = vpop.f32.mrf.mxu0  ;;  %2968 = vmatmul.mubr.f32.gmra.mxu0 %v11141_v58  ;;  %v3257_v10 = vmul.f32 %v13510_v22, %v17135_v53  ;;  %v11143_v53 = vld [vmem:[#allocation5 + $0x1b0] sm:$0xff] }
 0x37d   :  { %v13677_v59 = vpop.f32.mrf.mxu1  ;;  %3685 = vmatmul.mubr.f32.gmra.mxu1 %v3248_v44  ;;  %2973 = vmatprep.mubr.f32.mxu0 %v11315_v0 }
 0x37e   :  { %17133 = vst [vmem:[#allocation184_spill] sm:$0xff] %v13677_v59  ;;  %3689 = vmatprep.mubr.f32.mxu1 %v3253_v15  ;;  %v13680_v5 = vpop.f32.mrf.mxu0  ;;  %v17137_v15 = vld [vmem:[#allocation210_spill] sm:$0xff] }
 0x37f   :  { %v3448_v52 = vpop.f32.mrf.mxu1  ;;  %v3256_v59 = vmul.f32 %v13503_v28, %v17137_v15  ;;  %v17141_v15 = vld [vmem:[#allocation220_spill] sm:$0xff] }
 0x380   :  { %v13686_v14 = vpop.f32.mrf.mxu0  ;;  %2974 = vmatmul.mubr.f32.gmra.mxu0 %v11142_v31  ;;  %v3261_v52 = vmul.f32 %v13523_v30, %v17138_v36  ;;  %v11144_v36 = vld [vmem:[#allocation5 + $0x1b8] sm:$0xff] }
 0x381   :  { %v13688_v58 = vpop.f32.mrf.mxu1  ;;  %3690 = vmatmul.mubr.f32.gmra.mxu1 %v3252_v35  ;;  %2979 = vmatprep.mubr.f32.mxu0 %v11315_v0 }
 0x382   :  { %17136 = vst [vmem:[#allocation182_spill] sm:$0xff] %v13688_v58  ;;  %3694 = vmatprep.mubr.f32.mxu1 %v3257_v10  ;;  %v13691_v44 = vpop.f32.mrf.mxu0  ;;  %v17140_v10 = vld [vmem:[#allocation214_spill] sm:$0xff] }
 0x383   :  { %v3453_v6 = vpop.f32.mrf.mxu1  ;;  %v3260_v58 = vmul.f32 %v13516_v20, %v17140_v10  ;;  %v17144_v10 = vld [vmem:[#allocation224_spill] sm:$0xff] }
 0x384   :  { %v13697_v22 = vpop.f32.mrf.mxu0  ;;  %2980 = vmatmul.mubr.f32.gmra.mxu0 %v11143_v53  ;;  %v3265_v6 = vmul.f32 %v13536_v45, %v17141_v15  ;;  %v11145_v15 = vld [vmem:[#allocation5 + $0x1c0] sm:$0xff] }
 0x385   :  { %v13699_v31 = vpop.f32.mrf.mxu1  ;;  %3695 = vmatmul.mubr.f32.gmra.mxu1 %v3256_v59  ;;  %2985 = vmatprep.mubr.f32.mxu0 %v11315_v0 }
 0x386   :  { %17139 = vst [vmem:[#allocation188_spill] sm:$0xff] %v13699_v31  ;;  %3699 = vmatprep.mubr.f32.mxu1 %v3261_v52  ;;  %v13702_v35 = vpop.f32.mrf.mxu0  ;;  %v17143_v52 = vld [vmem:[#allocation218_spill] sm:$0xff] }
 0x387   :  { %v3458_v28 = vpop.f32.mrf.mxu1  ;;  %v3264_v31 = vmul.f32 %v13529_v34, %v17143_v52  ;;  %v17147_v52 = vld [vmem:[#allocation228_spill] sm:$0xff] }
 0x388   :  { %v13708_v30 = vpop.f32.mrf.mxu0  ;;  %2986 = vmatmul.mubr.f32.gmra.mxu0 %v11144_v36  ;;  %v3269_v28 = vmul.f32 %v13549_v40, %v17144_v10  ;;  %v11146_v10 = vld [vmem:[#allocation5 + $0x1c8] sm:$0xff] }
 0x389   :  { %v13710_v53 = vpop.f32.mrf.mxu1  ;;  %3700 = vmatmul.mubr.f32.gmra.mxu1 %v3260_v58  ;;  %2991 = vmatprep.mubr.f32.mxu0 %v11315_v0 }
 0x38a   :  { %17142 = vst [vmem:[#allocation186_spill] sm:$0xff] %v13710_v53  ;;  %3704 = vmatprep.mubr.f32.mxu1 %v3265_v6  ;;  %v13713_v59 = vpop.f32.mrf.mxu0  ;;  %v17146_v6 = vld [vmem:[#allocation222_spill] sm:$0xff] }
 0x38b   :  { %v3463_v20 = vpop.f32.mrf.mxu1  ;;  %v3268_v53 = vmul.f32 %v13542_v46, %v17146_v6  ;;  %v17150_v6 = vld [vmem:[#allocation232_spill] sm:$0xff] }
 0x38c   :  { %v13719_v45 = vpop.f32.mrf.mxu0  ;;  %2992 = vmatmul.mubr.f32.gmra.mxu0 %v11145_v15  ;;  %v3273_v20 = vmul.f32 %v13562_v19, %v17147_v52  ;;  %v11147_v52 = vld [vmem:[#allocation5 + $0x1d0] sm:$0xff] }
 0x38d   :  { %v13721_v36 = vpop.f32.mrf.mxu1  ;;  %3705 = vmatmul.mubr.f32.gmra.mxu1 %v3264_v31  ;;  %2997 = vmatprep.mubr.f32.mxu0 %v11315_v0 }
 0x38e   :  { %17145 = vst [vmem:[#allocation192_spill] sm:$0xff] %v13721_v36  ;;  %3709 = vmatprep.mubr.f32.mxu1 %v3269_v28  ;;  %v13724_v58 = vpop.f32.mrf.mxu0  ;;  %v17149_v28 = vld [vmem:[#allocation226_spill] sm:$0xff] }
 0x38f   :  { %v3468_v34 = vpop.f32.mrf.mxu1  ;;  %v3272_v36 = vmul.f32 %v13555_v57, %v17149_v28  ;;  %v17153_v28 = vld [vmem:[#allocation236_spill] sm:$0xff] }
 0x390   :  { %v13730_v40 = vpop.f32.mrf.mxu0  ;;  %2998 = vmatmul.mubr.f32.gmra.mxu0 %v11146_v10  ;;  %v3277_v34 = vmul.f32 %v13575_v27, %v17150_v6  ;;  %v11148_v6 = vld [vmem:[#allocation5 + $0x1d8] sm:$0xff] }
 0x391   :  { %v13732_v15 = vpop.f32.mrf.mxu1  ;;  %3710 = vmatmul.mubr.f32.gmra.mxu1 %v3268_v53  ;;  %3003 = vmatprep.mubr.f32.mxu0 %v11315_v0 }
 0x392   :  { %17148 = vst [vmem:[#allocation190_spill] sm:$0xff] %v13732_v15  ;;  %3714 = vmatprep.mubr.f32.mxu1 %v3273_v20  ;;  %v13735_v31 = vpop.f32.mrf.mxu0  ;;  %v17152_v20 = vld [vmem:[#allocation230_spill] sm:$0xff] }
 0x393   :  { %v3473_v46 = vpop.f32.mrf.mxu1  ;;  %v3276_v15 = vmul.f32 %v13568_v8, %v17152_v20  ;;  %v17156_v20 = vld [vmem:[#allocation240_spill] sm:$0xff] }
 0x394   :  { %v13741_v19 = vpop.f32.mrf.mxu0  ;;  %3004 = vmatmul.mubr.f32.gmra.mxu0 %v11147_v52  ;;  %v3281_v46 = vmul.f32 %v13588_v38, %v17153_v28  ;;  %v11149_v28 = vld [vmem:[#allocation5 + $0x1e0] sm:$0xff] }
 0x395   :  { %v13743_v10 = vpop.f32.mrf.mxu1  ;;  %3715 = vmatmul.mubr.f32.gmra.mxu1 %v3272_v36  ;;  %3009 = vmatprep.mubr.f32.mxu0 %v11315_v0 }
 0x396   :  { %17151 = vst [vmem:[#allocation196_spill] sm:$0xff] %v13743_v10  ;;  %3719 = vmatprep.mubr.f32.mxu1 %v3277_v34  ;;  %v13746_v53 = vpop.f32.mrf.mxu0  ;;  %v17155_v34 = vld [vmem:[#allocation234_spill] sm:$0xff] }
 0x397   :  { %v3478_v57 = vpop.f32.mrf.mxu1  ;;  %v3280_v10 = vmul.f32 %v13581_v23, %v17155_v34  ;;  %v17159_v34 = vld [vmem:[#allocation244_spill] sm:$0xff] }
 0x398   :  { %v13752_v27 = vpop.f32.mrf.mxu0  ;;  %3010 = vmatmul.mubr.f32.gmra.mxu0 %v11148_v6  ;;  %v3285_v57 = vmul.f32 %v13601_v1, %v17156_v20  ;;  %v11150_v20 = vld [vmem:[#allocation5 + $0x1e8] sm:$0xff] }
 0x399   :  { %v13754_v52 = vpop.f32.mrf.mxu1  ;;  %3720 = vmatmul.mubr.f32.gmra.mxu1 %v3276_v15  ;;  %3015 = vmatprep.mubr.f32.mxu0 %v11315_v0 }
 0x39a   :  { %17154 = vst [vmem:[#allocation194_spill] sm:$0xff] %v13754_v52  ;;  %3724 = vmatprep.mubr.f32.mxu1 %v3281_v46  ;;  %v13757_v36 = vpop.f32.mrf.mxu0  ;;  %v17158_v46 = vld [vmem:[#allocation238_spill] sm:$0xff] }
 0x39b   :  { %v3483_v8 = vpop.f32.mrf.mxu1  ;;  %v3284_v52 = vmul.f32 %v13594_v48, %v17158_v46  ;;  %v17162_v46 = vld [vmem:[#allocation248_spill] sm:$0xff] }
 0x39c   :  { %v13763_v38 = vpop.f32.mrf.mxu0  ;;  %3016 = vmatmul.mubr.f32.gmra.mxu0 %v11149_v28  ;;  %v3289_v8 = vmul.f32 %v13614_v37, %v17159_v34  ;;  %v11151_v34 = vld [vmem:[#allocation5 + $0x1f0] sm:$0xff] }
 0x39d   :  { %v13765_v6 = vpop.f32.mrf.mxu1  ;;  %3725 = vmatmul.mubr.f32.gmra.mxu1 %v3280_v10  ;;  %3021 = vmatprep.mubr.f32.mxu0 %v11315_v0 }
 0x39e   :  { %17157 = vst [vmem:[#allocation200_spill] sm:$0xff] %v13765_v6  ;;  %3729 = vmatprep.mubr.f32.mxu1 %v3285_v57  ;;  %v13768_v15 = vpop.f32.mrf.mxu0  ;;  %v17161_v57 = vld [vmem:[#allocation242_spill] sm:$0xff] }
 0x39f   :  { %v3488_v23 = vpop.f32.mrf.mxu1  ;;  %v3288_v6 = vmul.f32 %v13607_v50, %v17161_v57  ;;  %v17165_v50 = vld [vmem:[#allocation252_spill] sm:$0xff] }
 0x3a0   :  { %v13774_v1 = vpop.f32.mrf.mxu0  ;;  %3022 = vmatmul.mubr.f32.gmra.mxu0 %v11150_v20  ;;  %v3293_v23 = vmul.f32 %v13627_v63, %v17162_v46  ;;  %v3043_v57 = vmul.f32 %v13636_v12, %v17165_v50  ;;  %v17166_v63 = vld [vmem:[#allocation189_spill] sm:$0xff]  ;;  %v17170_v12 = vld [vmem:[#allocation256_spill] sm:$0xff] }
 0x3a1   :  { %v13776_v28 = vpop.f32.mrf.mxu1  ;;  %3730 = vmatmul.mubr.f32.gmra.mxu1 %v3284_v52  ;;  %3027 = vmatprep.mubr.f32.mxu0 %v11315_v0  ;;  %v4195_v46 = vmax.f32 %v17166_v63, 0.0  ;;  %v3047_v50 = vmul.f32 %v13647_v55, %v17170_v12  ;;  %v17171_v63 = vld [vmem:[#allocation187_spill] sm:$0xff] }
 0x3a2   :  { %17160 = vst [vmem:[#allocation198_spill] sm:$0xff] %v13776_v28  ;;  %3734 = vmatprep.mubr.f32.mxu1 %v3289_v8  ;;  %v13779_v10 = vpop.f32.mrf.mxu0  ;;  %v17164_v8 = vld [vmem:[#allocation246_spill] sm:$0xff]  ;;  %v4197_v13 = vmax.f32 %v17171_v63, 0.0 }
 0x3a3   :  { %v3493_v48 = vpop.f32.mrf.mxu1  ;;  %v3292_v28 = vmul.f32 %v13620_v42, %v17164_v8  ;;  %v17169_v42 = vld [vmem:[#allocation315_spill] sm:$0xff] }
 0x3a4   :  { %v13785_v37 = vpop.f32.mrf.mxu0  ;;  %3028 = vmatmul.mubr.f32.gmra.mxu0 %v11151_v34  ;;  %v11152_v34 = vld [vmem:[#allocation5 + $0x1f8] sm:$0xff]  ;;  %v4194_v8 = vmax.f32 %v17169_v42, 0.0  ;;  %v17175_v42 = vld [vmem:[#allocation260_spill] sm:$0xff] }
 0x3a5   :  { %v13787_v20 = vpop.f32.mrf.mxu1  ;;  %3735 = vmatmul.mubr.f32.gmra.mxu1 %v3288_v6  ;;  %3033 = vmatprep.mubr.f32.mxu0 %v11315_v0  ;;  %v17168_v0 = vld [vmem:[#allocation250_spill] sm:$0xff]  ;;  %v3051_v55 = vmul.f32 %v13658_v32, %v17175_v42 }
 0x3a6   :  { %17163 = vst [vmem:[#allocation204_spill] sm:$0xff] %v13787_v20  ;;  %3739 = vmatprep.mubr.f32.mxu1 %v3293_v23  ;;  %v13790_v52 = vpop.f32.mrf.mxu0  ;;  %v3042_v6 = vmul.f32 %v13631_v29, %v17168_v0 }
 0x3a7   :  { %v3498_v48 = vpop.f32.mrf.mxu1 }
 0x3a8   :  { %v13797_v4 = vpop.f32.mrf.mxu0  ;;  %3034 = vmatmul.mubr.f32.gmra.mxu0 %v11152_v34 }
 0x3a9   :  { %v13799_v20 = vpop.f32.mrf.mxu1  ;;  %3740 = vmatmul.mubr.f32.gmra.mxu1 %v3292_v28  ;;  %3809 = vmatprep.mubr.f32.mxu0 %v3043_v57  ;;  %v17173_v28 = vld [vmem:[#allocation254_spill] sm:$0xff] }
 0x3aa   :  { %17167 = vst [vmem:[#allocation202_spill] sm:$0xff] %v13799_v20  ;;  %4418 = vmatprep.mubr.f32.mxu1 %v4195_v46  ;;  %v13803_v23 = vpop.f32.mrf.mxu0  ;;  %v3046_v29 = vmul.f32 %v13642_v54, %v17173_v28  ;;  %v17174_v46 = vld [vmem:[#allocation317_spill] sm:$0xff] }
 0x3ab   :  { %v3503_v48 = vpop.f32.mrf.mxu1  ;;  %v4196_v0 = vmax.f32 %v17174_v46, 0.0  ;;  %v17180_v46 = vld [vmem:[#allocation264_spill] sm:$0xff] }
 0x3ac   :  { %v13809_v43 = vpop.f32.mrf.mxu0  ;;  %3810 = vmatmul.mubr.f32.vlgmr.msra.gmra.mxu0 %v3042_v6  ;;  %v17176_v48 = vld [vmem:[#allocation193_spill] sm:$0xff]  ;;  %v3055_v32 = vmul.f32 %v13669_v47, %v17180_v46 }
 0x3ad   :  { %v13811_v34 = vpop.f32.mrf.mxu1  ;;  %4419 = vmatmul.mubr.f32.vlgmr.msra.gmra.mxu1 %v4194_v8  ;;  %3814 = vmatprep.mubr.f32.mxu0 %v3047_v50  ;;  %v4199_v63 = vmax.f32 %v17176_v48, 0.0  ;;  %v17178_v8 = vld [vmem:[#allocation258_spill] sm:$0xff]  ;;  %v17179_v50 = vld [vmem:[#allocation319_spill] sm:$0xff] }
 0x3ae   :  { %17172 = vst [vmem:[#allocation208_spill] sm:$0xff] %v13811_v34  ;;  %4423 = vmatprep.mubr.f32.mxu1 %v4197_v13  ;;  %v13815_v57 = vpop.f32.mrf.mxu0  ;;  %v3050_v13 = vmul.f32 %v13653_v16, %v17178_v8  ;;  %v4198_v28 = vmax.f32 %v17179_v50, 0.0  ;;  %v17185_v50 = vld [vmem:[#allocation268_spill] sm:$0xff] }
 0x3af   :  { %v3508_v12 = vpop.f32.mrf.mxu1  ;;  %v3059_v47 = vmul.f32 %v13680_v5, %v17185_v50 }
 0x3b0   :  { %v13821_v20 = vpop.f32.mrf.mxu0  ;;  %3815 = vmatmul.mubr.f32.gmra.mxu0 %v3046_v29  ;;  %v17181_v12 = vld [vmem:[#allocation191_spill] sm:$0xff] }
 0x3b1   :  { %v13823_v6 = vpop.f32.mrf.mxu1  ;;  %4424 = vmatmul.mubr.f32.gmra.mxu1 %v4196_v0  ;;  %3819 = vmatprep.mubr.f32.mxu0 %v3051_v55  ;;  %v4201_v48 = vmax.f32 %v17181_v12, 0.0  ;;  %v17183_v0 = vld [vmem:[#allocation262_spill] sm:$0xff] }
 0x3b2   :  { %17177 = vst [vmem:[#allocation206_spill] sm:$0xff] %v13823_v6  ;;  %4428 = vmatprep.mubr.f32.mxu1 %v4199_v63  ;;  %v13827_v54 = vpop.f32.mrf.mxu0  ;;  %v3054_v16 = vmul.f32 %v13664_v2, %v17183_v0  ;;  %v17184_v63 = vld [vmem:[#allocation321_spill] sm:$0xff] }
 0x3b3   :  { %v3513_v42 = vpop.f32.mrf.mxu1  ;;  %v4200_v8 = vmax.f32 %v17184_v63, 0.0  ;;  %v17190_v63 = vld [vmem:[#allocation272_spill] sm:$0xff] }
 0x3b4   :  { %v13833_v34 = vpop.f32.mrf.mxu0  ;;  %3820 = vmatmul.mubr.f32.gmra.mxu0 %v3050_v13  ;;  %v17186_v42 = vld [vmem:[#allocation197_spill] sm:$0xff]  ;;  %v3063_v5 = vmul.f32 %v13691_v44, %v17190_v63 }
 0x3b5   :  { %v13835_v29 = vpop.f32.mrf.mxu1  ;;  %4429 = vmatmul.mubr.f32.gmra.mxu1 %v4198_v28  ;;  %3824 = vmatprep.mubr.f32.mxu0 %v3055_v32  ;;  %v4203_v12 = vmax.f32 %v17186_v42, 0.0  ;;  %v17188_v28 = vld [vmem:[#allocation266_spill] sm:$0xff] }
 0x3b6   :  { %17182 = vst [vmem:[#allocation212_spill] sm:$0xff] %v13835_v29  ;;  %4433 = vmatprep.mubr.f32.mxu1 %v4201_v48  ;;  %v13839_v55 = vpop.f32.mrf.mxu0  ;;  %v3058_v2 = vmul.f32 %v13675_v21, %v17188_v28  ;;  %v17189_v48 = vld [vmem:[#allocation323_spill] sm:$0xff] }
 0x3b7   :  { %v3518_v46 = vpop.f32.mrf.mxu1  ;;  %v4202_v0 = vmax.f32 %v17189_v48, 0.0  ;;  %v17195_v48 = vld [vmem:[#allocation276_spill] sm:$0xff] }
 0x3b8   :  { %v13845_v6 = vpop.f32.mrf.mxu0  ;;  %3825 = vmatmul.mubr.f32.gmra.mxu0 %v3054_v16  ;;  %v17191_v46 = vld [vmem:[#allocation195_spill] sm:$0xff]  ;;  %v3067_v44 = vmul.f32 %v13702_v35, %v17195_v48 }
 0x3b9   :  { %v13847_v13 = vpop.f32.mrf.mxu1  ;;  %4434 = vmatmul.mubr.f32.gmra.mxu1 %v4200_v8  ;;  %3829 = vmatprep.mubr.f32.mxu0 %v3059_v47  ;;  %v4205_v42 = vmax.f32 %v17191_v46, 0.0  ;;  %v17193_v8 = vld [vmem:[#allocation270_spill] sm:$0xff] }
 0x3ba   :  { %17187 = vst [vmem:[#allocation210_spill] sm:$0xff] %v13847_v13  ;;  %4438 = vmatprep.mubr.f32.mxu1 %v4203_v12  ;;  %v13851_v32 = vpop.f32.mrf.mxu0  ;;  %v3062_v21 = vmul.f32 %v13686_v14, %v17193_v8  ;;  %v17194_v12 = vld [vmem:[#allocation325_spill] sm:$0xff] }
 0x3bb   :  { %v3523_v50 = vpop.f32.mrf.mxu1  ;;  %v4204_v28 = vmax.f32 %v17194_v12, 0.0  ;;  %v17200_v12 = vld [vmem:[#allocation280_spill] sm:$0xff] }
 0x3bc   :  { %v13857_v29 = vpop.f32.mrf.mxu0  ;;  %3830 = vmatmul.mubr.f32.gmra.mxu0 %v3058_v2  ;;  %v17196_v50 = vld [vmem:[#allocation201_spill] sm:$0xff]  ;;  %v3071_v35 = vmul.f32 %v13713_v59, %v17200_v12 }
 0x3bd   :  { %v13859_v16 = vpop.f32.mrf.mxu1  ;;  %4439 = vmatmul.mubr.f32.gmra.mxu1 %v4202_v0  ;;  %3834 = vmatprep.mubr.f32.mxu0 %v3063_v5  ;;  %v4207_v46 = vmax.f32 %v17196_v50, 0.0  ;;  %v17198_v0 = vld [vmem:[#allocation274_spill] sm:$0xff] }
 0x3be   :  { %17192 = vst [vmem:[#allocation216_spill] sm:$0xff] %v13859_v16  ;;  %4443 = vmatprep.mubr.f32.mxu1 %v4205_v42  ;;  %v13863_v47 = vpop.f32.mrf.mxu0  ;;  %v3066_v14 = vmul.f32 %v13697_v22, %v17198_v0  ;;  %v17199_v42 = vld [vmem:[#allocation327_spill] sm:$0xff] }
 0x3bf   :  { %v3528_v63 = vpop.f32.mrf.mxu1  ;;  %v4206_v8 = vmax.f32 %v17199_v42, 0.0  ;;  %v17205_v42 = vld [vmem:[#allocation284_spill] sm:$0xff] }
 0x3c0   :  { %v13869_v13 = vpop.f32.mrf.mxu0  ;;  %3835 = vmatmul.mubr.f32.gmra.mxu0 %v3062_v21  ;;  %v17201_v63 = vld [vmem:[#allocation199_spill] sm:$0xff]  ;;  %v3075_v59 = vmul.f32 %v13724_v58, %v17205_v42 }
 0x3c1   :  { %v13871_v2 = vpop.f32.mrf.mxu1  ;;  %4444 = vmatmul.mubr.f32.gmra.mxu1 %v4204_v28  ;;  %3839 = vmatprep.mubr.f32.mxu0 %v3067_v44  ;;  %v4209_v50 = vmax.f32 %v17201_v63, 0.0  ;;  %v17203_v28 = vld [vmem:[#allocation278_spill] sm:$0xff] }
 0x3c2   :  { %17197 = vst [vmem:[#allocation214_spill] sm:$0xff] %v13871_v2  ;;  %4448 = vmatprep.mubr.f32.mxu1 %v4207_v46  ;;  %v13875_v5 = vpop.f32.mrf.mxu0  ;;  %v3070_v22 = vmul.f32 %v13708_v30, %v17203_v28  ;;  %v17204_v46 = vld [vmem:[#allocation329_spill] sm:$0xff] }
 0x3c3   :  { %v3533_v48 = vpop.f32.mrf.mxu1  ;;  %v4208_v0 = vmax.f32 %v17204_v46, 0.0  ;;  %v17210_v46 = vld [vmem:[#allocation288_spill] sm:$0xff] }
 0x3c4   :  { %v13881_v16 = vpop.f32.mrf.mxu0  ;;  %3840 = vmatmul.mubr.f32.gmra.mxu0 %v3066_v14  ;;  %v17206_v48 = vld [vmem:[#allocation205_spill] sm:$0xff]  ;;  %v3079_v58 = vmul.f32 %v13735_v31, %v17210_v46 }
 0x3c5   :  { %v13883_v21 = vpop.f32.mrf.mxu1  ;;  %4449 = vmatmul.mubr.f32.gmra.mxu1 %v4206_v8  ;;  %3844 = vmatprep.mubr.f32.mxu0 %v3071_v35  ;;  %v4211_v63 = vmax.f32 %v17206_v48, 0.0  ;;  %v17208_v8 = vld [vmem:[#allocation282_spill] sm:$0xff] }
 0x3c6   :  { %17202 = vst [vmem:[#allocation220_spill] sm:$0xff] %v13883_v21  ;;  %4453 = vmatprep.mubr.f32.mxu1 %v4209_v50  ;;  %v13887_v44 = vpop.f32.mrf.mxu0  ;;  %v3074_v30 = vmul.f32 %v13719_v45, %v17208_v8  ;;  %v17209_v50 = vld [vmem:[#allocation331_spill] sm:$0xff] }
 0x3c7   :  { %v3538_v12 = vpop.f32.mrf.mxu1  ;;  %v4210_v28 = vmax.f32 %v17209_v50, 0.0  ;;  %v17215_v50 = vld [vmem:[#allocation292_spill] sm:$0xff] }
 0x3c8   :  { %v13893_v2 = vpop.f32.mrf.mxu0  ;;  %3845 = vmatmul.mubr.f32.gmra.mxu0 %v3070_v22  ;;  %v17211_v12 = vld [vmem:[#allocation203_spill] sm:$0xff]  ;;  %v3083_v31 = vmul.f32 %v13746_v53, %v17215_v50 }
 0x3c9   :  { %v13895_v14 = vpop.f32.mrf.mxu1  ;;  %4454 = vmatmul.mubr.f32.gmra.mxu1 %v4208_v0  ;;  %3849 = vmatprep.mubr.f32.mxu0 %v3075_v59  ;;  %v4213_v48 = vmax.f32 %v17211_v12, 0.0  ;;  %v17213_v0 = vld [vmem:[#allocation286_spill] sm:$0xff] }
 0x3ca   :  { %17207 = vst [vmem:[#allocation218_spill] sm:$0xff] %v13895_v14  ;;  %4458 = vmatprep.mubr.f32.mxu1 %v4211_v63  ;;  %v13899_v35 = vpop.f32.mrf.mxu0  ;;  %v3078_v45 = vmul.f32 %v13730_v40, %v17213_v0  ;;  %v17214_v63 = vld [vmem:[#allocation333_spill] sm:$0xff] }
 0x3cb   :  { %v3543_v42 = vpop.f32.mrf.mxu1  ;;  %v4212_v8 = vmax.f32 %v17214_v63, 0.0  ;;  %v17220_v63 = vld [vmem:[#allocation296_spill] sm:$0xff] }
 0x3cc   :  { %v13905_v21 = vpop.f32.mrf.mxu0  ;;  %3850 = vmatmul.mubr.f32.gmra.mxu0 %v3074_v30  ;;  %v17216_v42 = vld [vmem:[#allocation209_spill] sm:$0xff]  ;;  %v3087_v53 = vmul.f32 %v13757_v36, %v17220_v63 }
 0x3cd   :  { %v13907_v22 = vpop.f32.mrf.mxu1  ;;  %4459 = vmatmul.mubr.f32.gmra.mxu1 %v4210_v28  ;;  %3854 = vmatprep.mubr.f32.mxu0 %v3079_v58  ;;  %v4215_v12 = vmax.f32 %v17216_v42, 0.0  ;;  %v17218_v28 = vld [vmem:[#allocation290_spill] sm:$0xff] }
 0x3ce   :  { %17212 = vst [vmem:[#allocation224_spill] sm:$0xff] %v13907_v22  ;;  %4463 = vmatprep.mubr.f32.mxu1 %v4213_v48  ;;  %v13911_v59 = vpop.f32.mrf.mxu0  ;;  %v3082_v40 = vmul.f32 %v13741_v19, %v17218_v28  ;;  %v17219_v48 = vld [vmem:[#allocation335_spill] sm:$0xff] }
 0x3cf   :  { %v3548_v46 = vpop.f32.mrf.mxu1  ;;  %v4214_v0 = vmax.f32 %v17219_v48, 0.0  ;;  %v17225_v48 = vld [vmem:[#allocation300_spill] sm:$0xff] }
 0x3d0   :  { %v13917_v14 = vpop.f32.mrf.mxu0  ;;  %3855 = vmatmul.mubr.f32.gmra.mxu0 %v3078_v45  ;;  %v17221_v46 = vld [vmem:[#allocation207_spill] sm:$0xff]  ;;  %v3091_v36 = vmul.f32 %v13768_v15, %v17225_v48 }
 0x3d1   :  { %v13919_v30 = vpop.f32.mrf.mxu1  ;;  %4464 = vmatmul.mubr.f32.gmra.mxu1 %v4212_v8  ;;  %3859 = vmatprep.mubr.f32.mxu0 %v3083_v31  ;;  %v4217_v42 = vmax.f32 %v17221_v46, 0.0  ;;  %v17223_v8 = vld [vmem:[#allocation294_spill] sm:$0xff] }
 0x3d2   :  { %17217 = vst [vmem:[#allocation222_spill] sm:$0xff] %v13919_v30  ;;  %4468 = vmatprep.mubr.f32.mxu1 %v4215_v12  ;;  %v13923_v58 = vpop.f32.mrf.mxu0  ;;  %v3086_v19 = vmul.f32 %v13752_v27, %v17223_v8  ;;  %v17224_v12 = vld [vmem:[#allocation337_spill] sm:$0xff] }
 0x3d3   :  { %v3553_v50 = vpop.f32.mrf.mxu1  ;;  %v4216_v28 = vmax.f32 %v17224_v12, 0.0  ;;  %v17230_v12 = vld [vmem:[#allocation304_spill] sm:$0xff] }
 0x3d4   :  { %v13929_v22 = vpop.f32.mrf.mxu0  ;;  %3860 = vmatmul.mubr.f32.gmra.mxu0 %v3082_v40  ;;  %v17226_v50 = vld [vmem:[#allocation213_spill] sm:$0xff]  ;;  %v3095_v15 = vmul.f32 %v13779_v10, %v17230_v12 }
 0x3d5   :  { %v13931_v45 = vpop.f32.mrf.mxu1  ;;  %4469 = vmatmul.mubr.f32.gmra.mxu1 %v4214_v0  ;;  %3864 = vmatprep.mubr.f32.mxu0 %v3087_v53  ;;  %v4219_v46 = vmax.f32 %v17226_v50, 0.0  ;;  %v17228_v0 = vld [vmem:[#allocation298_spill] sm:$0xff] }
 0x3d6   :  { %17222 = vst [vmem:[#allocation228_spill] sm:$0xff] %v13931_v45  ;;  %4473 = vmatprep.mubr.f32.mxu1 %v4217_v42  ;;  %v13935_v31 = vpop.f32.mrf.mxu0  ;;  %v3090_v27 = vmul.f32 %v13763_v38, %v17228_v0  ;;  %v17229_v42 = vld [vmem:[#allocation339_spill] sm:$0xff] }
 0x3d7   :  { %v3558_v63 = vpop.f32.mrf.mxu1  ;;  %v4218_v8 = vmax.f32 %v17229_v42, 0.0  ;;  %v17235_v42 = vld [vmem:[#allocation308_spill] sm:$0xff] }
 0x3d8   :  { %v13941_v30 = vpop.f32.mrf.mxu0  ;;  %3865 = vmatmul.mubr.f32.gmra.mxu0 %v3086_v19  ;;  %v17231_v63 = vld [vmem:[#allocation211_spill] sm:$0xff]  ;;  %v3099_v10 = vmul.f32 %v13790_v52, %v17235_v42 }
 0x3d9   :  { %v13943_v40 = vpop.f32.mrf.mxu1  ;;  %4474 = vmatmul.mubr.f32.gmra.mxu1 %v4216_v28  ;;  %3869 = vmatprep.mubr.f32.mxu0 %v3091_v36  ;;  %v4221_v50 = vmax.f32 %v17231_v63, 0.0  ;;  %v17233_v28 = vld [vmem:[#allocation302_spill] sm:$0xff] }
 0x3da   :  { %17227 = vst [vmem:[#allocation226_spill] sm:$0xff] %v13943_v40  ;;  %4478 = vmatprep.mubr.f32.mxu1 %v4219_v46  ;;  %v13947_v53 = vpop.f32.mrf.mxu0  ;;  %v3094_v38 = vmul.f32 %v13774_v1, %v17233_v28  ;;  %v17234_v46 = vld [vmem:[#allocation342_spill] sm:$0xff] }
 0x3db   :  { %v3563_v48 = vpop.f32.mrf.mxu1  ;;  %v4220_v0 = vmax.f32 %v17234_v46, 0.0  ;;  %v17239_v46 = vld [vmem:[#allocation312_spill] sm:$0xff] }
 0x3dc   :  { %v13953_v45 = vpop.f32.mrf.mxu0  ;;  %3870 = vmatmul.mubr.f32.gmra.mxu0 %v3090_v27  ;;  %v17236_v48 = vld [vmem:[#allocation217_spill] sm:$0xff]  ;;  %v3103_v52 = vmul.f32 %v13803_v23, %v17239_v46 }
 0x3dd   :  { %v13955_v19 = vpop.f32.mrf.mxu1  ;;  %4479 = vmatmul.mubr.f32.gmra.mxu1 %v4218_v8  ;;  %3874 = vmatprep.mubr.f32.mxu0 %v3095_v15  ;;  %v4223_v63 = vmax.f32 %v17236_v48, 0.0  ;;  %v17237_v8 = vld [vmem:[#allocation306_spill] sm:$0xff]  ;;  %v17243_v46 = vld [vmem:[#allocation221_spill] sm:$0xff] }
 0x3de   :  { %17232 = vst [vmem:[#allocation232_spill] sm:$0xff] %v13955_v19  ;;  %4483 = vmatprep.mubr.f32.mxu1 %v4221_v50  ;;  %v13959_v36 = vpop.f32.mrf.mxu0  ;;  %v3098_v1 = vmul.f32 %v13785_v37, %v17237_v8  ;;  %v17238_v50 = vld [vmem:[#allocation345_spill] sm:$0xff]  ;;  %v17242_v8 = vld [vmem:[#allocation31_spill] sm:$0xff] }
 0x3df   :  { %v3568_v12 = vpop.f32.mrf.mxu1  ;;  %v4222_v28 = vmax.f32 %v17238_v50, 0.0  ;;  %v3107_v23 = vmul.f32 %v13815_v57, %v17242_v8  ;;  %v17246_v8 = vld [vmem:[#allocation219_spill] sm:$0xff] }
 0x3e0   :  { %v13965_v40 = vpop.f32.mrf.mxu0  ;;  %3875 = vmatmul.mubr.f32.gmra.mxu0 %v3094_v38  ;;  %v17240_v12 = vld [vmem:[#allocation215_spill] sm:$0xff] }
 0x3e1   :  { %v13967_v27 = vpop.f32.mrf.mxu1  ;;  %4484 = vmatmul.mubr.f32.gmra.mxu1 %v4220_v0  ;;  %3879 = vmatprep.mubr.f32.mxu0 %v3099_v10  ;;  %v4225_v48 = vmax.f32 %v17240_v12, 0.0  ;;  %v17241_v0 = vld [vmem:[#allocation310_spill] sm:$0xff] }
 0x3e2   :  { %4488 = vmatprep.mubr.f32.mxu1 %v4223_v63  ;;  %v13971_v15 = vpop.f32.mrf.mxu0  ;;  %v3102_v37 = vmul.f32 %v13797_v4, %v17241_v0  ;;  %v4224_v63 = vmax.f32 %v12937_v51, 0.0  ;;  %v4226_v51 = vmax.f32 %v12949_v33, 0.0  ;;  %v4228_v33 = vmax.f32 %v12965_v62, 0.0 }
 0x3e3   :  { %v3573_v42 = vpop.f32.mrf.mxu1  ;;  %v4230_v62 = vmax.f32 %v12980_v7, 0.0  ;;  %v4232_v7 = vmax.f32 %v12995_v3, 0.0  ;;  %v4234_v3 = vmax.f32 %v13010_v60, 0.0  ;;  %v4236_v60 = vmax.f32 %v13025_v9, 0.0 }
 0x3e4   :  { %v13977_v19 = vpop.f32.mrf.mxu0  ;;  %3880 = vmatmul.mubr.f32.gmra.mxu0 %v3098_v1  ;;  %v4227_v42 = vmax.f32 %v17243_v46, 0.0  ;;  %v4238_v9 = vmax.f32 %v13040_v17, 0.0  ;;  %v4240_v17 = vmax.f32 %v13055_v25, 0.0  ;;  %v4242_v25 = vmax.f32 %v13070_v18, 0.0 }
 0x3e5   :  { %v13979_v38 = vpop.f32.mrf.mxu1  ;;  %4489 = vmatmul.mubr.f32.gmra.mxu1 %v4222_v28  ;;  %3884 = vmatprep.mubr.f32.mxu0 %v3103_v52  ;;  %v17244_v28 = vld [vmem:[#allocation29_spill] sm:$0xff]  ;;  %v4244_v18 = vmax.f32 %v13085_v26, 0.0  ;;  %v4246_v26 = vmax.f32 %v13100_v41, 0.0  ;;  %v4248_v41 = vmax.f32 %v13115_v61, 0.0  ;;  %v4250_v61 = vmax.f32 %v13130_v11, 0.0 }
 0x3e6   :  { %4493 = vmatprep.mubr.f32.mxu1 %v4225_v48  ;;  %v13983_v10 = vpop.f32.mrf.mxu0  ;;  %v3106_v4 = vmul.f32 %v13809_v43, %v17244_v28  ;;  %v17245_v48 = vld [vmem:[#allocation33_spill] sm:$0xff]  ;;  %v4252_v11 = vmax.f32 %v13145_v56, 0.0  ;;  %v4254_v56 = vmax.f32 %v13160_v49, 0.0  ;;  %v4256_v49 = vmax.f32 %v13175_v39, 0.0 }
 0x3e7   :  { %v3578_v50 = vpop.f32.mrf.mxu1  ;;  %v3111_v57 = vmul.f32 %v13827_v54, %v17245_v48  ;;  %v17249_v48 = vld [vmem:[#allocation225_spill] sm:$0xff]  ;;  %v4258_v39 = vmax.f32 %v13190_v24, 0.0  ;;  %v17301_v24 = vld [vmem:[#allocation344_spill] sm:$0xff] }
 0x3e8   :  { %v13989_v12 = vpop.f32.mrf.mxu0  ;;  %3885 = vmatmul.mubr.f32.gmra.mxu0 %v3102_v37  ;;  %v4229_v50 = vmax.f32 %v17246_v8, 0.0 }
 0x3e9   :  { %v13991_v1 = vpop.f32.mrf.mxu1  ;;  %4494 = vmatmul.mubr.f32.gmra.mxu1 %v4224_v63  ;;  %3889 = vmatprep.mubr.f32.mxu0 %v3107_v23  ;;  %v17247_v63 = vld [vmem:[#allocation32_spill] sm:$0xff] }
 0x3ea   :  { %4498 = vmatprep.mubr.f32.mxu1 %v4227_v42  ;;  %v13995_v52 = vpop.f32.mrf.mxu0  ;;  %v3110_v43 = vmul.f32 %v13821_v20, %v17247_v63  ;;  %v17248_v42 = vld [vmem:[#allocation35_spill] sm:$0xff] }
 0x3eb   :  { %v3583_v0 = vpop.f32.mrf.mxu1  ;;  %v3115_v54 = vmul.f32 %v13839_v55, %v17248_v42  ;;  %v17252_v42 = vld [vmem:[#allocation223_spill] sm:$0xff] }
 0x3ec   :  { %v14001_v46 = vpop.f32.mrf.mxu0  ;;  %3890 = vmatmul.mubr.f32.gmra.mxu0 %v3106_v4  ;;  %v4231_v0 = vmax.f32 %v17249_v48, 0.0 }
 0x3ed   :  { %v14003_v37 = vpop.f32.mrf.mxu1  ;;  %4499 = vmatmul.mubr.f32.gmra.mxu1 %v4226_v51  ;;  %3894 = vmatprep.mubr.f32.mxu0 %v3111_v57  ;;  %v17250_v51 = vld [vmem:[#allocation34_spill] sm:$0xff] }
 0x3ee   :  { %4503 = vmatprep.mubr.f32.mxu1 %v4229_v50  ;;  %v14007_v23 = vpop.f32.mrf.mxu0  ;;  %v3114_v20 = vmul.f32 %v13833_v34, %v17250_v51  ;;  %v17251_v50 = vld [vmem:[#allocation37_spill] sm:$0xff] }
 0x3ef   :  { %v3588_v28 = vpop.f32.mrf.mxu1  ;;  %v3119_v55 = vmul.f32 %v13851_v32, %v17251_v50  ;;  %v17255_v50 = vld [vmem:[#allocation229_spill] sm:$0xff] }
 0x3f0   :  { %v14013_v8 = vpop.f32.mrf.mxu0  ;;  %3895 = vmatmul.mubr.f32.gmra.mxu0 %v3110_v43  ;;  %v4233_v28 = vmax.f32 %v17252_v42, 0.0 }
 0x3f1   :  { %v14015_v4 = vpop.f32.mrf.mxu1  ;;  %4504 = vmatmul.mubr.f32.gmra.mxu1 %v4228_v33  ;;  %3899 = vmatprep.mubr.f32.mxu0 %v3115_v54  ;;  %v17253_v33 = vld [vmem:[#allocation36_spill] sm:$0xff] }
 0x3f2   :  { %4508 = vmatprep.mubr.f32.mxu1 %v4231_v0  ;;  %v14019_v57 = vpop.f32.mrf.mxu0  ;;  %v3118_v34 = vmul.f32 %v13845_v6, %v17253_v33  ;;  %v17254_v0 = vld [vmem:[#allocation39_spill] sm:$0xff] }
 0x3f3   :  { %v3593_v63 = vpop.f32.mrf.mxu1  ;;  %v3123_v32 = vmul.f32 %v13863_v47, %v17254_v0  ;;  %v17258_v0 = vld [vmem:[#allocation227_spill] sm:$0xff] }
 0x3f4   :  { %v14025_v48 = vpop.f32.mrf.mxu0  ;;  %3900 = vmatmul.mubr.f32.gmra.mxu0 %v3114_v20  ;;  %v4235_v63 = vmax.f32 %v17255_v50, 0.0 }
 0x3f5   :  { %v14027_v43 = vpop.f32.mrf.mxu1  ;;  %4509 = vmatmul.mubr.f32.gmra.mxu1 %v4230_v62  ;;  %3904 = vmatprep.mubr.f32.mxu0 %v3119_v55  ;;  %v17256_v62 = vld [vmem:[#allocation38_spill] sm:$0xff] }
 0x3f6   :  { %4513 = vmatprep.mubr.f32.mxu1 %v4233_v28  ;;  %v14031_v54 = vpop.f32.mrf.mxu0  ;;  %v3122_v6 = vmul.f32 %v13857_v29, %v17256_v62  ;;  %v17257_v28 = vld [vmem:[#allocation41_spill] sm:$0xff] }
 0x3f7   :  { %v3598_v51 = vpop.f32.mrf.mxu1  ;;  %v3127_v47 = vmul.f32 %v13875_v5, %v17257_v28  ;;  %v17261_v28 = vld [vmem:[#allocation233_spill] sm:$0xff] }
 0x3f8   :  { %v14037_v42 = vpop.f32.mrf.mxu0  ;;  %3905 = vmatmul.mubr.f32.gmra.mxu0 %v3118_v34  ;;  %v4237_v51 = vmax.f32 %v17258_v0, 0.0 }
 0x3f9   :  { %v14039_v20 = vpop.f32.mrf.mxu1  ;;  %4514 = vmatmul.mubr.f32.gmra.mxu1 %v4232_v7  ;;  %3909 = vmatprep.mubr.f32.mxu0 %v3123_v32  ;;  %v17259_v7 = vld [vmem:[#allocation40_spill] sm:$0xff] }
 0x3fa   :  { %4518 = vmatprep.mubr.f32.mxu1 %v4235_v63  ;;  %v14043_v55 = vpop.f32.mrf.mxu0  ;;  %v3126_v29 = vmul.f32 %v13869_v13, %v17259_v7  ;;  %v17260_v63 = vld [vmem:[#allocation43_spill] sm:$0xff] }
 0x3fb   :  { %v3603_v33 = vpop.f32.mrf.mxu1  ;;  %v3131_v5 = vmul.f32 %v13887_v44, %v17260_v63  ;;  %v17264_v63 = vld [vmem:[#allocation231_spill] sm:$0xff] }
 0x3fc   :  { %v14049_v50 = vpop.f32.mrf.mxu0  ;;  %3910 = vmatmul.mubr.f32.gmra.mxu0 %v3122_v6  ;;  %v4239_v33 = vmax.f32 %v17261_v28, 0.0 }
 0x3fd   :  { %v14051_v34 = vpop.f32.mrf.mxu1  ;;  %4519 = vmatmul.mubr.f32.gmra.mxu1 %v4234_v3  ;;  %3914 = vmatprep.mubr.f32.mxu0 %v3127_v47  ;;  %v17262_v3 = vld [vmem:[#allocation42_spill] sm:$0xff] }
 0x3fe   :  { %4523 = vmatprep.mubr.f32.mxu1 %v4237_v51  ;;  %v14055_v32 = vpop.f32.mrf.mxu0  ;;  %v3130_v13 = vmul.f32 %v13881_v16, %v17262_v3  ;;  %v17263_v51 = vld [vmem:[#allocation45_spill] sm:$0xff] }
 0x3ff   :  { %v3608_v62 = vpop.f32.mrf.mxu1  ;;  %v3135_v44 = vmul.f32 %v13899_v35, %v17263_v51  ;;  %v17267_v51 = vld [vmem:[#allocation237_spill] sm:$0xff] }
 0x400   :  { %v14061_v0 = vpop.f32.mrf.mxu0  ;;  %3915 = vmatmul.mubr.f32.gmra.mxu0 %v3126_v29  ;;  %v4241_v62 = vmax.f32 %v17264_v63, 0.0 }
 0x401   :  { %v14063_v6 = vpop.f32.mrf.mxu1  ;;  %4524 = vmatmul.mubr.f32.gmra.mxu1 %v4236_v60  ;;  %3919 = vmatprep.mubr.f32.mxu0 %v3131_v5  ;;  %v17265_v60 = vld [vmem:[#allocation44_spill] sm:$0xff] }
 0x402   :  { %4528 = vmatprep.mubr.f32.mxu1 %v4239_v33  ;;  %v14067_v47 = vpop.f32.mrf.mxu0  ;;  %v3134_v16 = vmul.f32 %v13893_v2, %v17265_v60  ;;  %v17266_v33 = vld [vmem:[#allocation47_spill] sm:$0xff] }
 0x403   :  { %v3613_v7 = vpop.f32.mrf.mxu1  ;;  %v3139_v35 = vmul.f32 %v13911_v59, %v17266_v33  ;;  %v17271_v33 = vld [vmem:[#allocation235_spill] sm:$0xff] }
 0x404   :  { %v14073_v28 = vpop.f32.mrf.mxu0  ;;  %3920 = vmatmul.mubr.f32.gmra.mxu0 %v3130_v13  ;;  %v4243_v7 = vmax.f32 %v17267_v51, 0.0 }
 0x405   :  { %v14075_v29 = vpop.f32.mrf.mxu1  ;;  %4529 = vmatmul.mubr.f32.gmra.mxu1 %v4238_v9  ;;  %3924 = vmatprep.mubr.f32.mxu0 %v3135_v44  ;;  %v17269_v9 = vld [vmem:[#allocation46_spill] sm:$0xff] }
 0x406   :  { %4533 = vmatprep.mubr.f32.mxu1 %v4241_v62  ;;  %v14079_v5 = vpop.f32.mrf.mxu0  ;;  %v3138_v2 = vmul.f32 %v13905_v21, %v17269_v9  ;;  %v17270_v62 = vld [vmem:[#allocation49_spill] sm:$0xff] }
 0x407   :  { %v3618_v3 = vpop.f32.mrf.mxu1  ;;  %v3143_v59 = vmul.f32 %v13923_v58, %v17270_v62  ;;  %v17275_v62 = vld [vmem:[#allocation241_spill] sm:$0xff] }
 0x408   :  { %v14085_v63 = vpop.f32.mrf.mxu0  ;;  %3925 = vmatmul.mubr.f32.gmra.mxu0 %v3134_v16  ;;  %v4245_v3 = vmax.f32 %v17271_v33, 0.0 }
 0x409   :  { %v14087_v13 = vpop.f32.mrf.mxu1  ;;  %4534 = vmatmul.mubr.f32.gmra.mxu1 %v4240_v17  ;;  %3929 = vmatprep.mubr.f32.mxu0 %v3139_v35  ;;  %v17273_v17 = vld [vmem:[#allocation48_spill] sm:$0xff] }
 0x40a   :  { %17268 = vst [vmem:[#allocation230_spill] sm:$0xff] %v14087_v13  ;;  %4538 = vmatprep.mubr.f32.mxu1 %v4243_v7  ;;  %v14091_v44 = vpop.f32.mrf.mxu0  ;;  %v3142_v21 = vmul.f32 %v13917_v14, %v17273_v17  ;;  %v17274_v7 = vld [vmem:[#allocation51_spill] sm:$0xff] }
 0x40b   :  { %v3623_v60 = vpop.f32.mrf.mxu1  ;;  %v3147_v58 = vmul.f32 %v13935_v31, %v17274_v7  ;;  %v17278_v7 = vld [vmem:[#allocation239_spill] sm:$0xff] }
 0x40c   :  { %v14097_v51 = vpop.f32.mrf.mxu0  ;;  %3930 = vmatmul.mubr.f32.gmra.mxu0 %v3138_v2  ;;  %v4247_v60 = vmax.f32 %v17275_v62, 0.0 }
 0x40d   :  { %v14099_v16 = vpop.f32.mrf.mxu1  ;;  %4539 = vmatmul.mubr.f32.gmra.mxu1 %v4242_v25  ;;  %3934 = vmatprep.mubr.f32.mxu0 %v3143_v59  ;;  %v17276_v25 = vld [vmem:[#allocation50_spill] sm:$0xff] }
 0x40e   :  { %17272 = vst [vmem:[#allocation236_spill] sm:$0xff] %v14099_v16  ;;  %4543 = vmatprep.mubr.f32.mxu1 %v4245_v3  ;;  %v14103_v35 = vpop.f32.mrf.mxu0  ;;  %v3146_v14 = vmul.f32 %v13929_v22, %v17276_v25  ;;  %v17277_v3 = vld [vmem:[#allocation53_spill] sm:$0xff] }
 0x40f   :  { %v3628_v9 = vpop.f32.mrf.mxu1  ;;  %v3151_v31 = vmul.f32 %v13947_v53, %v17277_v3  ;;  %v17282_v3 = vld [vmem:[#allocation245_spill] sm:$0xff] }
 0x410   :  { %v14109_v33 = vpop.f32.mrf.mxu0  ;;  %3935 = vmatmul.mubr.f32.gmra.mxu0 %v3142_v21  ;;  %v4249_v9 = vmax.f32 %v17278_v7, 0.0 }
 0x411   :  { %v14111_v2 = vpop.f32.mrf.mxu1  ;;  %4544 = vmatmul.mubr.f32.gmra.mxu1 %v4244_v18  ;;  %3939 = vmatprep.mubr.f32.mxu0 %v3147_v58  ;;  %v17280_v18 = vld [vmem:[#allocation52_spill] sm:$0xff] }
 0x412   :  { %4548 = vmatprep.mubr.f32.mxu1 %v4247_v60  ;;  %v14115_v59 = vpop.f32.mrf.mxu0  ;;  %v3150_v22 = vmul.f32 %v13941_v30, %v17280_v18  ;;  %v17281_v60 = vld [vmem:[#allocation55_spill] sm:$0xff] }
 0x413   :  { %v3633_v17 = vpop.f32.mrf.mxu1  ;;  %v3155_v53 = vmul.f32 %v13959_v36, %v17281_v60  ;;  %v17285_v60 = vld [vmem:[#allocation243_spill] sm:$0xff] }
 0x414   :  { %v14121_v62 = vpop.f32.mrf.mxu0  ;;  %3940 = vmatmul.mubr.f32.gmra.mxu0 %v3146_v14  ;;  %v4251_v17 = vmax.f32 %v17282_v3, 0.0 }
 0x415   :  { %v14123_v21 = vpop.f32.mrf.mxu1  ;;  %4549 = vmatmul.mubr.f32.gmra.mxu1 %v4246_v26  ;;  %3944 = vmatprep.mubr.f32.mxu0 %v3151_v31  ;;  %v17283_v26 = vld [vmem:[#allocation54_spill] sm:$0xff] }
 0x416   :  { %17279 = vst [vmem:[#allocation234_spill] sm:$0xff] %v14123_v21  ;;  %4553 = vmatprep.mubr.f32.mxu1 %v4249_v9  ;;  %v14127_v58 = vpop.f32.mrf.mxu0  ;;  %v3154_v30 = vmul.f32 %v13953_v45, %v17283_v26  ;;  %v17284_v9 = vld [vmem:[#allocation58_spill] sm:$0xff] }
 0x417   :  { %v3638_v25 = vpop.f32.mrf.mxu1  ;;  %v3159_v36 = vmul.f32 %v13971_v15, %v17284_v9  ;;  %v17289_v9 = vld [vmem:[#allocation249_spill] sm:$0xff] }
 0x418   :  { %v14133_v7 = vpop.f32.mrf.mxu0  ;;  %3945 = vmatmul.mubr.f32.gmra.mxu0 %v3150_v22  ;;  %v4253_v25 = vmax.f32 %v17285_v60, 0.0 }
 0x419   :  { %v14135_v14 = vpop.f32.mrf.mxu1  ;;  %4554 = vmatmul.mubr.f32.gmra.mxu1 %v4248_v41  ;;  %3949 = vmatprep.mubr.f32.mxu0 %v3155_v53  ;;  %v17287_v41 = vld [vmem:[#allocation57_spill] sm:$0xff] }
 0x41a   :  { %4558 = vmatprep.mubr.f32.mxu1 %v4251_v17  ;;  %v14139_v31 = vpop.f32.mrf.mxu0  ;;  %v3158_v45 = vmul.f32 %v13965_v40, %v17287_v41  ;;  %v17288_v17 = vld [vmem:[#allocation62_spill] sm:$0xff] }
 0x41b   :  { %v3643_v18 = vpop.f32.mrf.mxu1  ;;  %v3163_v15 = vmul.f32 %v13983_v10, %v17288_v17  ;;  %v17292_v17 = vld [vmem:[#allocation247_spill] sm:$0xff] }
 0x41c   :  { %v14145_v3 = vpop.f32.mrf.mxu0  ;;  %3950 = vmatmul.mubr.f32.gmra.mxu0 %v3154_v30  ;;  %v4255_v18 = vmax.f32 %v17289_v9, 0.0 }
 0x41d   :  { %v14147_v22 = vpop.f32.mrf.mxu1  ;;  %4559 = vmatmul.mubr.f32.gmra.mxu1 %v4250_v61  ;;  %3954 = vmatprep.mubr.f32.mxu0 %v3159_v36  ;;  %v17290_v61 = vld [vmem:[#allocation60_spill] sm:$0xff] }
 0x41e   :  { %17286 = vst [vmem:[#allocation240_spill] sm:$0xff] %v14147_v22  ;;  %4563 = vmatprep.mubr.f32.mxu1 %v4253_v25  ;;  %v14151_v53 = vpop.f32.mrf.mxu0  ;;  %v3162_v40 = vmul.f32 %v13977_v19, %v17290_v61  ;;  %v17291_v25 = vld [vmem:[#allocation66_spill] sm:$0xff] }
 0x41f   :  { %v3648_v26 = vpop.f32.mrf.mxu1  ;;  %v3167_v10 = vmul.f32 %v13995_v52, %v17291_v25  ;;  %v17296_v25 = vld [vmem:[#allocation253_spill] sm:$0xff] }
 0x420   :  { %v14157_v60 = vpop.f32.mrf.mxu0  ;;  %3955 = vmatmul.mubr.f32.gmra.mxu0 %v3158_v45  ;;  %v4257_v26 = vmax.f32 %v17292_v17, 0.0 }
 0x421   :  { %v14159_v30 = vpop.f32.mrf.mxu1  ;;  %4564 = vmatmul.mubr.f32.gmra.mxu1 %v4252_v11  ;;  %3959 = vmatprep.mubr.f32.mxu0 %v3163_v15  ;;  %v17294_v11 = vld [vmem:[#allocation64_spill] sm:$0xff] }
 0x422   :  { %4568 = vmatprep.mubr.f32.mxu1 %v4255_v18  ;;  %v14163_v36 = vpop.f32.mrf.mxu0  ;;  %v3166_v19 = vmul.f32 %v13989_v12, %v17294_v11  ;;  %v17295_v18 = vld [vmem:[#allocation70_spill] sm:$0xff] }
 0x423   :  { %v3653_v41 = vpop.f32.mrf.mxu1  ;;  %v3171_v52 = vmul.f32 %v14007_v23, %v17295_v18  ;;  %v17299_v18 = vld [vmem:[#allocation251_spill] sm:$0xff] }
 0x424   :  { %v14169_v9 = vpop.f32.mrf.mxu0  ;;  %3960 = vmatmul.mubr.f32.gmra.mxu0 %v3162_v40  ;;  %v4259_v41 = vmax.f32 %v17296_v25, 0.0 }
 0x425   :  { %v14171_v45 = vpop.f32.mrf.mxu1  ;;  %4569 = vmatmul.mubr.f32.gmra.mxu1 %v4254_v56  ;;  %3964 = vmatprep.mubr.f32.mxu0 %v3167_v10  ;;  %v17297_v56 = vld [vmem:[#allocation68_spill] sm:$0xff] }
 0x426   :  { %17293 = vst [vmem:[#allocation238_spill] sm:$0xff] %v14171_v45  ;;  %4573 = vmatprep.mubr.f32.mxu1 %v4257_v26  ;;  %v14175_v15 = vpop.f32.mrf.mxu0  ;;  %v3170_v12 = vmul.f32 %v14001_v46, %v17297_v56  ;;  %v17298_v26 = vld [vmem:[#allocation74_spill] sm:$0xff] }
 0x427   :  { %v3658_v61 = vpop.f32.mrf.mxu1  ;;  %v3175_v23 = vmul.f32 %v14019_v57, %v17298_v26  ;;  %v17302_v56 = vld [vmem:[#allocation78_spill] sm:$0xff] }
 0x428   :  { %v14181_v17 = vpop.f32.mrf.mxu0  ;;  %3965 = vmatmul.mubr.f32.gmra.mxu0 %v3166_v19  ;;  %v4261_v61 = vmax.f32 %v17299_v18, 0.0  ;;  %v3179_v57 = vmul.f32 %v14031_v54, %v17302_v56 }
 0x429   :  { %v14183_v40 = vpop.f32.mrf.mxu1  ;;  %4574 = vmatmul.mubr.f32.gmra.mxu1 %v4256_v49  ;;  %3969 = vmatprep.mubr.f32.mxu0 %v3171_v52  ;;  %v17300_v49 = vld [vmem:[#allocation72_spill] sm:$0xff] }
 0x42a   :  { %4578 = vmatprep.mubr.f32.mxu1 %v4259_v41  ;;  %v14187_v10 = vpop.f32.mrf.mxu0  ;;  %v3174_v46 = vmul.f32 %v14013_v8, %v17300_v49  ;;  %v4260_v41 = vmax.f32 %v17301_v24, 0.0  ;;  %v17307_v24 = vld [vmem:[#allocation19_spill] sm:$0xff] }
 0x42b   :  { %v3663_v11 = vpop.f32.mrf.mxu1  ;;  %v3183_v54 = vmul.f32 %v14043_v55, %v17307_v24 }
 0x42c   :  { %v14193_v25 = vpop.f32.mrf.mxu0  ;;  %3970 = vmatmul.mubr.f32.gmra.mxu0 %v3170_v12  ;;  %v17303_v11 = vld [vmem:[#allocation257_spill] sm:$0xff] }
 0x42d   :  { %v14195_v19 = vpop.f32.mrf.mxu1  ;;  %4579 = vmatmul.mubr.f32.gmra.mxu1 %v4258_v39  ;;  %3974 = vmatprep.mubr.f32.mxu0 %v3175_v23  ;;  %v4263_v18 = vmax.f32 %v17303_v11, 0.0  ;;  %v17305_v39 = vld [vmem:[#allocation76_spill] sm:$0xff] }
 0x42e   :  { %4583 = vmatprep.mubr.f32.mxu1 %v4261_v61  ;;  %v14199_v52 = vpop.f32.mrf.mxu0  ;;  %v3178_v8 = vmul.f32 %v14025_v48, %v17305_v39  ;;  %v17306_v61 = vld [vmem:[#allocation63_spill] sm:$0xff] }
 0x42f   :  { %v3668_v26 = vpop.f32.mrf.mxu1  ;;  %v4262_v49 = vmax.f32 %v17306_v61, 0.0  ;;  %v17312_v61 = vld [vmem:[#allocation21_spill] sm:$0xff] }
 0x430   :  { %v14205_v45 = vpop.f32.mrf.mxu0  ;;  %3975 = vmatmul.mubr.f32.gmra.mxu0 %v3174_v46  ;;  %v17308_v26 = vld [vmem:[#allocation255_spill] sm:$0xff]  ;;  %v3187_v55 = vmul.f32 %v14055_v32, %v17312_v61 }
 0x431   :  { %v14207_v12 = vpop.f32.mrf.mxu1  ;;  %4584 = vmatmul.mubr.f32.gmra.mxu1 %v4260_v41  ;;  %3979 = vmatprep.mubr.f32.mxu0 %v3179_v57  ;;  %v4265_v11 = vmax.f32 %v17308_v26, 0.0  ;;  %v17310_v41 = vld [vmem:[#allocation80_spill] sm:$0xff] }
 0x432   :  { %17304 = vst [vmem:[#allocation244_spill] sm:$0xff] %v14207_v12  ;;  %4588 = vmatprep.mubr.f32.mxu1 %v4263_v18  ;;  %v14211_v23 = vpop.f32.mrf.mxu0  ;;  %v3182_v48 = vmul.f32 %v14037_v42, %v17310_v41  ;;  %v17311_v18 = vld [vmem:[#allocation67_spill] sm:$0xff] }
 0x433   :  { %v3673_v56 = vpop.f32.mrf.mxu1  ;;  %v4264_v39 = vmax.f32 %v17311_v18, 0.0  ;;  %v17317_v18 = vld [vmem:[#allocation23_spill] sm:$0xff] }
 0x434   :  { %v14217_v22 = vpop.f32.mrf.mxu0  ;;  %3980 = vmatmul.mubr.f32.gmra.mxu0 %v3178_v8  ;;  %v17313_v56 = vld [vmem:[#allocation261_spill] sm:$0xff]  ;;  %v3191_v32 = vmul.f32 %v14067_v47, %v17317_v18 }
 0x435   :  { %v14219_v46 = vpop.f32.mrf.mxu1  ;;  %4589 = vmatmul.mubr.f32.gmra.mxu1 %v4262_v49  ;;  %3984 = vmatprep.mubr.f32.mxu0 %v3183_v54  ;;  %v4267_v26 = vmax.f32 %v17313_v56, 0.0  ;;  %v17315_v49 = vld [vmem:[#allocation83_spill] sm:$0xff] }
 0x436   :  { %17309 = vst [vmem:[#allocation242_spill] sm:$0xff] %v14219_v46  ;;  %4593 = vmatprep.mubr.f32.mxu1 %v4265_v11  ;;  %v14223_v57 = vpop.f32.mrf.mxu0  ;;  %v3186_v42 = vmul.f32 %v14049_v50, %v17315_v49  ;;  %v17316_v11 = vld [vmem:[#allocation71_spill] sm:$0xff] }
 0x437   :  { %v3678_v24 = vpop.f32.mrf.mxu1  ;;  %v4266_v41 = vmax.f32 %v17316_v11, 0.0  ;;  %v17322_v11 = vld [vmem:[#allocation25_spill] sm:$0xff] }
 0x438   :  { %v14229_v21 = vpop.f32.mrf.mxu0  ;;  %3985 = vmatmul.mubr.f32.gmra.mxu0 %v3182_v48  ;;  %v17318_v24 = vld [vmem:[#allocation259_spill] sm:$0xff]  ;;  %v3195_v47 = vmul.f32 %v14079_v5, %v17322_v11 }
 0x439   :  { %v14231_v8 = vpop.f32.mrf.mxu1  ;;  %4594 = vmatmul.mubr.f32.gmra.mxu1 %v4264_v39  ;;  %3989 = vmatprep.mubr.f32.mxu0 %v3187_v55  ;;  %v4269_v56 = vmax.f32 %v17318_v24, 0.0  ;;  %v17320_v39 = vld [vmem:[#allocation85_spill] sm:$0xff] }
 0x43a   :  { %17314 = vst [vmem:[#allocation248_spill] sm:$0xff] %v14231_v8  ;;  %4598 = vmatprep.mubr.f32.mxu1 %v4267_v26  ;;  %v14235_v54 = vpop.f32.mrf.mxu0  ;;  %v3190_v50 = vmul.f32 %v14061_v0, %v17320_v39  ;;  %v17321_v26 = vld [vmem:[#allocation75_spill] sm:$0xff] }
 0x43b   :  { %v3683_v61 = vpop.f32.mrf.mxu1  ;;  %v4268_v49 = vmax.f32 %v17321_v26, 0.0  ;;  %v17327_v26 = vld [vmem:[#allocation27_spill] sm:$0xff] }
 0x43c   :  { %v14241_v46 = vpop.f32.mrf.mxu0  ;;  %3990 = vmatmul.mubr.f32.gmra.mxu0 %v3186_v42  ;;  %v17323_v61 = vld [vmem:[#allocation265_spill] sm:$0xff]  ;;  %v3199_v5 = vmul.f32 %v14091_v44, %v17327_v26 }
 0x43d   :  { %v14243_v48 = vpop.f32.mrf.mxu1  ;;  %4599 = vmatmul.mubr.f32.gmra.mxu1 %v4266_v41  ;;  %3994 = vmatprep.mubr.f32.mxu0 %v3191_v32  ;;  %v4271_v24 = vmax.f32 %v17323_v61, 0.0  ;;  %v17325_v41 = vld [vmem:[#allocation87_spill] sm:$0xff] }
 0x43e   :  { %17319 = vst [vmem:[#allocation246_spill] sm:$0xff] %v14243_v48  ;;  %4603 = vmatprep.mubr.f32.mxu1 %v4269_v56  ;;  %v14247_v55 = vpop.f32.mrf.mxu0  ;;  %v3194_v0 = vmul.f32 %v14073_v28, %v17325_v41  ;;  %v17326_v56 = vld [vmem:[#allocation79_spill] sm:$0xff] }
 0x43f   :  { %v3688_v18 = vpop.f32.mrf.mxu1  ;;  %v4270_v39 = vmax.f32 %v17326_v56, 0.0  ;;  %v17332_v56 = vld [vmem:[#allocation93_spill] sm:$0xff] }
 0x440   :  { %v14253_v8 = vpop.f32.mrf.mxu0  ;;  %3995 = vmatmul.mubr.f32.gmra.mxu0 %v3190_v50  ;;  %v17328_v18 = vld [vmem:[#allocation263_spill] sm:$0xff]  ;;  %v3203_v44 = vmul.f32 %v14103_v35, %v17332_v56 }
 0x441   :  { %v14255_v42 = vpop.f32.mrf.mxu1  ;;  %4604 = vmatmul.mubr.f32.gmra.mxu1 %v4268_v49  ;;  %3999 = vmatprep.mubr.f32.mxu0 %v3195_v47  ;;  %v4273_v61 = vmax.f32 %v17328_v18, 0.0  ;;  %v17330_v49 = vld [vmem:[#allocation89_spill] sm:$0xff] }
 0x442   :  { %17324 = vst [vmem:[#allocation252_spill] sm:$0xff] %v14255_v42  ;;  %4608 = vmatprep.mubr.f32.mxu1 %v4271_v24  ;;  %v14259_v32 = vpop.f32.mrf.mxu0  ;;  %v3198_v28 = vmul.f32 %v14085_v63, %v17330_v49  ;;  %v17331_v24 = vld [vmem:[#allocation82_spill] sm:$0xff] }
 0x443   :  { %v3693_v11 = vpop.f32.mrf.mxu1  ;;  %v4272_v41 = vmax.f32 %v17331_v24, 0.0  ;;  %v17337_v24 = vld [vmem:[#allocation97_spill] sm:$0xff] }
 0x444   :  { %v14265_v48 = vpop.f32.mrf.mxu0  ;;  %4000 = vmatmul.mubr.f32.gmra.mxu0 %v3194_v0  ;;  %v17333_v11 = vld [vmem:[#allocation269_spill] sm:$0xff]  ;;  %v3207_v35 = vmul.f32 %v14115_v59, %v17337_v24 }
 0x445   :  { %v14267_v50 = vpop.f32.mrf.mxu1  ;;  %4609 = vmatmul.mubr.f32.gmra.mxu1 %v4270_v39  ;;  %4004 = vmatprep.mubr.f32.mxu0 %v3199_v5  ;;  %v4275_v18 = vmax.f32 %v17333_v11, 0.0  ;;  %v17335_v39 = vld [vmem:[#allocation91_spill] sm:$0xff] }
 0x446   :  { %17329 = vst [vmem:[#allocation189_spill] sm:$0xff] %v14267_v50  ;;  %4613 = vmatprep.mubr.f32.mxu1 %v4273_v61  ;;  %v14271_v47 = vpop.f32.mrf.mxu0  ;;  %v3202_v63 = vmul.f32 %v14097_v51, %v17335_v39  ;;  %v17336_v61 = vld [vmem:[#allocation84_spill] sm:$0xff] }
 0x447   :  { %v3698_v26 = vpop.f32.mrf.mxu1  ;;  %v4274_v49 = vmax.f32 %v17336_v61, 0.0  ;;  %v17342_v61 = vld [vmem:[#allocation101_spill] sm:$0xff] }
 0x448   :  { %v14277_v42 = vpop.f32.mrf.mxu0  ;;  %4005 = vmatmul.mubr.f32.gmra.mxu0 %v3198_v28  ;;  %v17338_v26 = vld [vmem:[#allocation267_spill] sm:$0xff]  ;;  %v3211_v59 = vmul.f32 %v14127_v58, %v17342_v61 }
 0x449   :  { %v14279_v0 = vpop.f32.mrf.mxu1  ;;  %4614 = vmatmul.mubr.f32.gmra.mxu1 %v4272_v41  ;;  %4009 = vmatprep.mubr.f32.mxu0 %v3203_v44  ;;  %v4277_v11 = vmax.f32 %v17338_v26, 0.0  ;;  %v17340_v41 = vld [vmem:[#allocation95_spill] sm:$0xff] }
 0x44a   :  { %17334 = vst [vmem:[#allocation250_spill] sm:$0xff] %v14279_v0  ;;  %4618 = vmatprep.mubr.f32.mxu1 %v4275_v18  ;;  %v14283_v5 = vpop.f32.mrf.mxu0  ;;  %v3206_v51 = vmul.f32 %v14109_v33, %v17340_v41  ;;  %v17341_v18 = vld [vmem:[#allocation86_spill] sm:$0xff] }
 0x44b   :  { %v3703_v56 = vpop.f32.mrf.mxu1  ;;  %v4276_v39 = vmax.f32 %v17341_v18, 0.0  ;;  %v17347_v18 = vld [vmem:[#allocation105_spill] sm:$0xff] }
 0x44c   :  { %v14289_v50 = vpop.f32.mrf.mxu0  ;;  %4010 = vmatmul.mubr.f32.gmra.mxu0 %v3202_v63  ;;  %v17343_v56 = vld [vmem:[#allocation273_spill] sm:$0xff]  ;;  %v3215_v58 = vmul.f32 %v14139_v31, %v17347_v18 }
 0x44d   :  { %v14291_v28 = vpop.f32.mrf.mxu1  ;;  %4619 = vmatmul.mubr.f32.gmra.mxu1 %v4274_v49  ;;  %4014 = vmatprep.mubr.f32.mxu0 %v3207_v35  ;;  %v4279_v26 = vmax.f32 %v17343_v56, 0.0  ;;  %v17345_v49 = vld [vmem:[#allocation99_spill] sm:$0xff] }
 0x44e   :  { %17339 = vst [vmem:[#allocation315_spill] sm:$0xff] %v14291_v28  ;;  %4623 = vmatprep.mubr.f32.mxu1 %v4277_v11  ;;  %v14295_v44 = vpop.f32.mrf.mxu0  ;;  %v3210_v33 = vmul.f32 %v14121_v62, %v17345_v49  ;;  %v17346_v11 = vld [vmem:[#allocation88_spill] sm:$0xff] }
 0x44f   :  { %v3708_v24 = vpop.f32.mrf.mxu1  ;;  %v4278_v41 = vmax.f32 %v17346_v11, 0.0  ;;  %v17352_v11 = vld [vmem:[#allocation109_spill] sm:$0xff] }
 0x450   :  { %v14301_v0 = vpop.f32.mrf.mxu0  ;;  %4015 = vmatmul.mubr.f32.gmra.mxu0 %v3206_v51  ;;  %v17348_v24 = vld [vmem:[#allocation271_spill] sm:$0xff]  ;;  %v3219_v31 = vmul.f32 %v14151_v53, %v17352_v11 }
 0x451   :  { %v14303_v63 = vpop.f32.mrf.mxu1  ;;  %4624 = vmatmul.mubr.f32.gmra.mxu1 %v4276_v39  ;;  %4019 = vmatprep.mubr.f32.mxu0 %v3211_v59  ;;  %v4281_v56 = vmax.f32 %v17348_v24, 0.0  ;;  %v17350_v39 = vld [vmem:[#allocation103_spill] sm:$0xff] }
 0x452   :  { %17344 = vst [vmem:[#allocation256_spill] sm:$0xff] %v14303_v63  ;;  %4628 = vmatprep.mubr.f32.mxu1 %v4279_v26  ;;  %v14307_v35 = vpop.f32.mrf.mxu0  ;;  %v3214_v62 = vmul.f32 %v14133_v7, %v17350_v39  ;;  %v17351_v26 = vld [vmem:[#allocation90_spill] sm:$0xff] }
 0x453   :  { %v3713_v61 = vpop.f32.mrf.mxu1  ;;  %v4280_v49 = vmax.f32 %v17351_v26, 0.0  ;;  %v17357_v26 = vld [vmem:[#allocation113_spill] sm:$0xff] }
 0x454   :  { %v14313_v28 = vpop.f32.mrf.mxu0  ;;  %4020 = vmatmul.mubr.f32.gmra.mxu0 %v3210_v33  ;;  %v17353_v61 = vld [vmem:[#allocation277_spill] sm:$0xff]  ;;  %v3223_v53 = vmul.f32 %v14163_v36, %v17357_v26 }
 0x455   :  { %v14315_v51 = vpop.f32.mrf.mxu1  ;;  %4629 = vmatmul.mubr.f32.gmra.mxu1 %v4278_v41  ;;  %4024 = vmatprep.mubr.f32.mxu0 %v3215_v58  ;;  %v4283_v24 = vmax.f32 %v17353_v61, 0.0  ;;  %v17355_v41 = vld [vmem:[#allocation107_spill] sm:$0xff] }
 0x456   :  { %17349 = vst [vmem:[#allocation187_spill] sm:$0xff] %v14315_v51  ;;  %4633 = vmatprep.mubr.f32.mxu1 %v4281_v56  ;;  %v14319_v59 = vpop.f32.mrf.mxu0  ;;  %v3218_v7 = vmul.f32 %v14145_v3, %v17355_v41  ;;  %v17356_v56 = vld [vmem:[#allocation94_spill] sm:$0xff] }
 0x457   :  { %v3718_v18 = vpop.f32.mrf.mxu1  ;;  %v4282_v39 = vmax.f32 %v17356_v56, 0.0  ;;  %v17362_v56 = vld [vmem:[#allocation117_spill] sm:$0xff] }
 0x458   :  { %v14325_v63 = vpop.f32.mrf.mxu0  ;;  %4025 = vmatmul.mubr.f32.gmra.mxu0 %v3214_v62  ;;  %v17358_v18 = vld [vmem:[#allocation275_spill] sm:$0xff]  ;;  %v3227_v36 = vmul.f32 %v14175_v15, %v17362_v56 }
 0x459   :  { %v14327_v33 = vpop.f32.mrf.mxu1  ;;  %4634 = vmatmul.mubr.f32.gmra.mxu1 %v4280_v49  ;;  %4029 = vmatprep.mubr.f32.mxu0 %v3219_v31  ;;  %v4285_v61 = vmax.f32 %v17358_v18, 0.0  ;;  %v17360_v49 = vld [vmem:[#allocation111_spill] sm:$0xff] }
 0x45a   :  { %17354 = vst [vmem:[#allocation254_spill] sm:$0xff] %v14327_v33  ;;  %4638 = vmatprep.mubr.f32.mxu1 %v4283_v24  ;;  %v14331_v58 = vpop.f32.mrf.mxu0  ;;  %v3222_v3 = vmul.f32 %v14157_v60, %v17360_v49  ;;  %v17361_v24 = vld [vmem:[#allocation98_spill] sm:$0xff] }
 0x45b   :  { %v3723_v11 = vpop.f32.mrf.mxu1  ;;  %v4284_v41 = vmax.f32 %v17361_v24, 0.0  ;;  %v17367_v24 = vld [vmem:[#allocation121_spill] sm:$0xff] }
 0x45c   :  { %v14337_v51 = vpop.f32.mrf.mxu0  ;;  %4030 = vmatmul.mubr.f32.gmra.mxu0 %v3218_v7  ;;  %v17363_v11 = vld [vmem:[#allocation281_spill] sm:$0xff]  ;;  %v3231_v15 = vmul.f32 %v14187_v10, %v17367_v24 }
 0x45d   :  { %v14339_v62 = vpop.f32.mrf.mxu1  ;;  %4639 = vmatmul.mubr.f32.gmra.mxu1 %v4282_v39  ;;  %4034 = vmatprep.mubr.f32.mxu0 %v3223_v53  ;;  %v4287_v18 = vmax.f32 %v17363_v11, 0.0  ;;  %v17365_v39 = vld [vmem:[#allocation115_spill] sm:$0xff] }
 0x45e   :  { %17359 = vst [vmem:[#allocation317_spill] sm:$0xff] %v14339_v62  ;;  %4643 = vmatprep.mubr.f32.mxu1 %v4285_v61  ;;  %v14343_v31 = vpop.f32.mrf.mxu0  ;;  %v3226_v60 = vmul.f32 %v14169_v9, %v17365_v39  ;;  %v17366_v61 = vld [vmem:[#allocation102_spill] sm:$0xff] }
 0x45f   :  { %v3728_v26 = vpop.f32.mrf.mxu1  ;;  %v4286_v49 = vmax.f32 %v17366_v61, 0.0  ;;  %v17372_v61 = vld [vmem:[#allocation125_spill] sm:$0xff] }
 0x460   :  { %v14349_v33 = vpop.f32.mrf.mxu0  ;;  %4035 = vmatmul.mubr.f32.gmra.mxu0 %v3222_v3  ;;  %v17368_v26 = vld [vmem:[#allocation279_spill] sm:$0xff]  ;;  %v3235_v10 = vmul.f32 %v14199_v52, %v17372_v61  ;;  %v17378_v52 = vld [vmem:[#allocation176_spill] sm:$0xff] }
 0x461   :  { %v14351_v7 = vpop.f32.mrf.mxu1  ;;  %4644 = vmatmul.mubr.f32.gmra.mxu1 %v4284_v41  ;;  %4039 = vmatprep.mubr.f32.mxu0 %v3227_v36  ;;  %v4289_v11 = vmax.f32 %v17368_v26, 0.0  ;;  %v17370_v41 = vld [vmem:[#allocation119_spill] sm:$0xff] }
 0x462   :  { %17364 = vst [vmem:[#allocation260_spill] sm:$0xff] %v14351_v7  ;;  %4648 = vmatprep.mubr.f32.mxu1 %v4287_v18  ;;  %v14355_v53 = vpop.f32.mrf.mxu0  ;;  %v3230_v9 = vmul.f32 %v14181_v17, %v17370_v41  ;;  %v17371_v18 = vld [vmem:[#allocation106_spill] sm:$0xff] }
 0x463   :  { %v3733_v56 = vpop.f32.mrf.mxu1  ;;  %v4288_v39 = vmax.f32 %v17371_v18, 0.0  ;;  %v17377_v18 = vld [vmem:[#allocation314_spill] sm:$0xff] }
 0x464   :  { %v14361_v62 = vpop.f32.mrf.mxu0  ;;  %4040 = vmatmul.mubr.f32.gmra.mxu0 %v3226_v60  ;;  %v17373_v56 = vld [vmem:[#allocation285_spill] sm:$0xff]  ;;  %v3427_v61 = vadd.f32 %v17378_v52, %v17377_v18  ;;  %v17383_v18 = vld [vmem:[#allocation316_spill] sm:$0xff]  ;;  %v17384_v52 = vld [vmem:[#allocation174_spill] sm:$0xff] }
 0x465   :  { %v14363_v3 = vpop.f32.mrf.mxu1  ;;  %4649 = vmatmul.mubr.f32.gmra.mxu1 %v4286_v49  ;;  %4044 = vmatprep.mubr.f32.mxu0 %v3231_v15  ;;  %v4291_v26 = vmax.f32 %v17373_v56, 0.0  ;;  %v17375_v49 = vld [vmem:[#allocation123_spill] sm:$0xff]  ;;  %v3432_v13 = vadd.f32 %v17384_v52, %v17383_v18  ;;  %v17389_v52 = vld [vmem:[#allocation318_spill] sm:$0xff] }
 0x466   :  { %17369 = vst [vmem:[#allocation193_spill] sm:$0xff] %v14363_v3  ;;  %4653 = vmatprep.mubr.f32.mxu1 %v4289_v11  ;;  %v14367_v36 = vpop.f32.mrf.mxu0  ;;  %v3234_v17 = vmul.f32 %v14193_v25, %v17375_v49  ;;  %v17376_v11 = vld [vmem:[#allocation110_spill] sm:$0xff]  ;;  %v17381_v25 = vld [vmem:[#allocation127_spill] sm:$0xff] }
 0x467   :  { %v3738_v24 = vpop.f32.mrf.mxu1  ;;  %v4290_v41 = vmax.f32 %v17376_v11, 0.0  ;;  %v17382_v11 = vld [vmem:[#allocation114_spill] sm:$0xff] }
 0x468   :  { %v14373_v7 = vpop.f32.mrf.mxu0  ;;  %4045 = vmatmul.mubr.f32.gmra.mxu0 %v3230_v9  ;;  %v17379_v24 = vld [vmem:[#allocation129_spill] sm:$0xff]  ;;  %v17380_v9 = vld [vmem:[#allocation283_spill] sm:$0xff]  ;;  %v4292_v16 = vmax.f32 %v17382_v11, 0.0  ;;  %v17388_v11 = vld [vmem:[#allocation118_spill] sm:$0xff] }
 0x469   :  { %v14375_v60 = vpop.f32.mrf.mxu1  ;;  %4654 = vmatmul.mubr.f32.gmra.mxu1 %v4288_v39  ;;  %4049 = vmatprep.mubr.f32.mxu0 %v3235_v10  ;;  %v3239_v56 = vmul.f32 %v14211_v23, %v17379_v24  ;;  %v4293_v12 = vmax.f32 %v17380_v9, 0.0  ;;  %v17385_v23 = vld [vmem:[#allocation133_spill] sm:$0xff]  ;;  %v4294_v18 = vmax.f32 %v17388_v11, 0.0 }
 0x46a   :  { %17374 = vst [vmem:[#allocation258_spill] sm:$0xff] %v14375_v60  ;;  %4658 = vmatprep.mubr.f32.mxu1 %v4291_v26  ;;  %v14379_v15 = vpop.f32.mrf.mxu0  ;;  %v3238_v26 = vmul.f32 %v14205_v45, %v17381_v25 }
 0x46b   :  { %v3743_v3 = vpop.f32.mrf.mxu1 }
 0x46c   :  { %v3811_v60 = vpop.f32.mrf.mxu0  ;;  %4050 = vmatmul.mubr.f32.gmra.mxu0 %v3234_v17  ;;  %v3243_v3 = vmul.f32 %v14223_v57, %v17385_v23  ;;  %v17386_v17 = vld [vmem:[#allocation289_spill] sm:$0xff]  ;;  %v17390_v57 = vld [vmem:[#allocation180_spill] sm:$0xff] }
 0x46d   :  { %v3812_v39 = vadd.f32 %v3811_v60, %v3427_v61  ;;  %v4420_v10 = vpop.f32.mrf.mxu1  ;;  %4659 = vmatmul.mubr.f32.gmra.mxu1 %v4290_v41  ;;  %4054 = vmatprep.mubr.f32.mxu0 %v3239_v56  ;;  %v4295_v60 = vmax.f32 %v17386_v17, 0.0  ;;  %v17391_v23 = vld [vmem:[#allocation137_spill] sm:$0xff] }
 0x46e   :  { %4663 = vmatprep.mubr.f32.mxu1 %v4293_v12  ;;  %v3813_v49 = vpop.f32.mrf.mxu0  ;;  %v17387_v12 = vld [vmem:[#allocation131_spill] sm:$0xff] }
 0x46f   :  { %v4130_v24 = vmax.f32 %v3812_v39, 0.0  ;;  %v4422_v9 = vpop.f32.mrf.mxu1  ;;  %v3242_v25 = vmul.f32 %v14217_v22, %v17387_v12  ;;  %v3437_v39 = vadd.f32 %v17390_v57, %v17389_v52 }
 0x470   :  { %v3816_v61 = vpop.f32.mrf.mxu0  ;;  %4055 = vmatmul.mubr.f32.gmra.mxu0 %v3238_v26  ;;  %v3247_v9 = vmul.f32 %v14235_v54, %v17391_v23  ;;  %v17395_v54 = vld [vmem:[#allocation320_spill] sm:$0xff] }
 0x471   :  { %v3817_v41 = vadd.f32 %v3816_v61, %v3432_v13  ;;  %v4425_v56 = vpop.f32.mrf.mxu1  ;;  %4664 = vmatmul.mubr.f32.gmra.mxu1 %v4292_v16  ;;  %4059 = vmatprep.mubr.f32.mxu0 %v3243_v3  ;;  %v4739_v45 = vmul.f32 %v4420_v10, %v4130_v24  ;;  %v17392_v13 = vld [vmem:[#allocation287_spill] sm:$0xff] }
 0x472   :  { %4668 = vmatprep.mubr.f32.mxu1 %v4295_v60  ;;  %v3818_v49 = vpop.f32.mrf.mxu0  ;;  %v4297_v16 = vmax.f32 %v17392_v13, 0.0  ;;  %v17393_v60 = vld [vmem:[#allocation135_spill] sm:$0xff] }
 0x473   :  { %v4131_v17 = vmax.f32 %v3817_v41, 0.0  ;;  %v4427_v26 = vpop.f32.mrf.mxu1  ;;  %4803 = vadd.xlane.f32.xlu0 %v4739_v45  ;;  %v3246_v61 = vmul.f32 %v14229_v21, %v17393_v60  ;;  %v17394_v49 = vld [vmem:[#allocation122_spill] sm:$0xff]  ;;  %v17397_v45 = vld [vmem:[#allocation141_spill] sm:$0xff] }
 0x474   :  { %v3821_v3 = vpop.f32.mrf.mxu0  ;;  %4060 = vmatmul.mubr.f32.gmra.mxu0 %v3242_v25  ;;  %v4296_v11 = vmax.f32 %v17394_v49, 0.0  ;;  %v17396_v41 = vld [vmem:[#allocation178_spill] sm:$0xff]  ;;  %v3251_v57 = vmul.f32 %v14247_v55, %v17397_v45  ;;  %v17399_v26 = vld [vmem:[#allocation139_spill] sm:$0xff] }
 0x475   :  { %v4740_v10 = vmul.f32 %v4425_v56, %v4131_v17  ;;  %v3822_v24 = vadd.f32 %v3821_v3, %v3437_v39  ;;  %v4430_v22 = vpop.f32.mrf.mxu1  ;;  %4669 = vmatmul.mubr.f32.gmra.mxu1 %v4294_v18  ;;  %4064 = vmatprep.mubr.f32.mxu0 %v3247_v9  ;;  %v3442_v52 = vadd.f32 %v17396_v41, %v17395_v54  ;;  %v17398_v56 = vld [vmem:[#allocation293_spill] sm:$0xff]  ;;  %v17400_v3 = vld [vmem:[#allocation126_spill] sm:$0xff]  ;;  %v17404_v41 = vld [vmem:[#allocation291_spill] sm:$0xff] }
 0x476   :  { %4673 = vmatprep.mubr.f32.mxu1 %v4297_v16  ;;  %v3823_v12 = vpop.f32.mrf.mxu0  ;;  %v4299_v39 = vmax.f32 %v17398_v56, 0.0  ;;  %v3250_v13 = vmul.f32 %v14241_v46, %v17399_v26  ;;  %v4298_v60 = vmax.f32 %v17400_v3, 0.0  ;;  %v17401_v55 = vld [vmem:[#allocation322_spill] sm:$0xff] }
 0x477   :  { %v4132_v23 = vmax.f32 %v3822_v24, 0.0  ;;  %v4432_v25 = vpop.f32.mrf.mxu1  ;;  %4805 = vadd.xlane.f32.xlu0 %v4740_v10  ;;  %v17402_v24 = vld [vmem:[#allocation184_spill] sm:$0xff]  ;;  %v17403_v10 = vld [vmem:[#allocation145_spill] sm:$0xff]  ;;  %v17406_v56 = vld [vmem:[#allocation130_spill] sm:$0xff] }
 0x478   :  { %v3826_v18 = vpop.f32.mrf.mxu0  ;;  %4065 = vmatmul.mubr.f32.gmra.mxu0 %v3246_v61  ;;  %v3447_v12 = vadd.f32 %v17402_v24, %v17401_v55  ;;  %v3255_v49 = vmul.f32 %v14259_v32, %v17403_v10  ;;  %v17407_v32 = vld [vmem:[#allocation324_spill] sm:$0xff] }
 0x479   :  { %v3827_v9 = vadd.f32 %v3826_v18, %v3442_v52  ;;  %v4435_v17 = vpop.f32.mrf.mxu1  ;;  %4674 = vmatmul.mubr.f32.gmra.mxu1 %v4296_v11  ;;  %4069 = vmatprep.mubr.f32.mxu0 %v3251_v57  ;;  %v4741_v21 = vmul.f32 %v4430_v22, %v4132_v23  ;;  %v4301_v11 = vmax.f32 %v17404_v41, 0.0  ;;  %v17405_v57 = vld [vmem:[#allocation143_spill] sm:$0xff]  ;;  %v17408_v18 = vld [vmem:[#allocation182_spill] sm:$0xff]  ;;  %v17414_v41 = vld [vmem:[#allocation188_spill] sm:$0xff] }
 0x47a   :  { %4678 = vmatprep.mubr.f32.mxu1 %v4299_v39  ;;  %v3828_v16 = vpop.f32.mrf.mxu0  ;;  %v3254_v23 = vmul.f32 %v14253_v8, %v17405_v57  ;;  %v4300_v39 = vmax.f32 %v17406_v56, 0.0 }
 0x47b   :  { %v4133_v54 = vmax.f32 %v3827_v9, 0.0  ;;  %v4437_v61 = vpop.f32.mrf.mxu1  ;;  %4807 = vadd.xlane.f32.xlu1 %v4741_v21  ;;  %v3452_v9 = vadd.f32 %v17408_v18, %v17407_v32  ;;  %v17409_v21 = vld [vmem:[#allocation149_spill] sm:$0xff]  ;;  %v17417_v32 = vld [vmem:[#allocation151_spill] sm:$0xff] }
 0x47c   :  { %v3831_v52 = vpop.f32.mrf.mxu0  ;;  %4070 = vmatmul.mubr.f32.gmra.mxu0 %v3250_v13  ;;  %v3259_v26 = vmul.f32 %v14271_v47, %v17409_v21  ;;  %v17413_v47 = vld [vmem:[#allocation326_spill] sm:$0xff]  ;;  %v3262_v18 = vmul.f32 %v14277_v42, %v17417_v32 }
 0x47d   :  { %v4742_v22 = vmul.f32 %v4435_v17, %v4133_v54  ;;  %v3832_v45 = vadd.f32 %v3831_v52, %v3447_v12  ;;  %v4440_v46 = vpop.f32.mrf.mxu1  ;;  %4679 = vmatmul.mubr.f32.gmra.mxu1 %v4298_v60  ;;  %4074 = vmatprep.mubr.f32.mxu0 %v3255_v49  ;;  %v17410_v17 = vld [vmem:[#allocation297_spill] sm:$0xff]  ;;  %v17411_v12 = vld [vmem:[#allocation147_spill] sm:$0xff]  ;;  %v17412_v54 = vld [vmem:[#allocation134_spill] sm:$0xff] }
 0x47e   :  { %4683 = vmatprep.mubr.f32.mxu1 %v4301_v11  ;;  %v3833_v25 = vpop.f32.mrf.mxu0  ;;  %v4303_v3 = vmax.f32 %v17410_v17, 0.0  ;;  %v3258_v10 = vmul.f32 %v14265_v48, %v17411_v12  ;;  %v4302_v61 = vmax.f32 %v17412_v54, 0.0  ;;  %v3457_v11 = vadd.f32 %v17414_v41, %v17413_v47  ;;  %v17415_v52 = vld [vmem:[#allocation153_spill] sm:$0xff]  ;;  %v17418_v21 = vld [vmem:[#allocation138_spill] sm:$0xff]  ;;  %v17423_v54 = vld [vmem:[#allocation155_spill] sm:$0xff] }
 0x47f   :  { %v4134_v16 = vmax.f32 %v3832_v45, 0.0  ;;  %v4442_v13 = vpop.f32.mrf.mxu1  ;;  %4809 = vadd.xlane.f32.xlu1 %v4742_v22  ;;  %v3263_v22 = vmul.f32 %v14283_v5, %v17415_v52  ;;  %v17419_v5 = vld [vmem:[#allocation328_spill] sm:$0xff]  ;;  %v17421_v17 = vld [vmem:[#allocation157_spill] sm:$0xff]  ;;  %v17424_v41 = vld [vmem:[#allocation142_spill] sm:$0xff] }
 0x480   :  { %v3836_v60 = vpop.f32.mrf.mxu0  ;;  %4075 = vmatmul.mubr.f32.gmra.mxu0 %v3254_v23  ;;  %v17426_v52 = vld [vmem:[#allocation192_spill] sm:$0xff] }
 0x481   :  { %v4743_v55 = vmul.f32 %v4440_v46, %v4134_v16  ;;  %v3837_v24 = vadd.f32 %v3836_v60, %v3452_v9  ;;  %v4445_v8 = vpop.f32.mrf.mxu1  ;;  %4684 = vmatmul.mubr.f32.gmra.mxu1 %v4300_v39  ;;  %4079 = vmatprep.mubr.f32.mxu0 %v3259_v26  ;;  %v17416_v46 = vld [vmem:[#allocation295_spill] sm:$0xff]  ;;  %v4304_v26 = vmax.f32 %v17418_v21, 0.0  ;;  %v17420_v16 = vld [vmem:[#allocation186_spill] sm:$0xff] }
 0x482   :  { %4688 = vmatprep.mubr.f32.mxu1 %v4303_v3  ;;  %v3838_v49 = vpop.f32.mrf.mxu0  ;;  %v4305_v23 = vmax.f32 %v17416_v46, 0.0  ;;  %v3462_v13 = vadd.f32 %v17420_v16, %v17419_v5  ;;  %v3267_v3 = vmul.f32 %v14295_v44, %v17421_v17  ;;  %v17425_v44 = vld [vmem:[#allocation330_spill] sm:$0xff]  ;;  %v17433_v17 = vld [vmem:[#allocation165_spill] sm:$0xff] }
 0x483   :  { %v4135_v45 = vmax.f32 %v3837_v24, 0.0  ;;  %v4447_v57 = vpop.f32.mrf.mxu1  ;;  %4811 = vadd.xlane.f32.xlu0 %v4743_v55  ;;  %v17422_v24 = vld [vmem:[#allocation301_spill] sm:$0xff]  ;;  %v17432_v16 = vld [vmem:[#allocation190_spill] sm:$0xff] }
 0x484   :  { %v3841_v25 = vpop.f32.mrf.mxu0  ;;  %4080 = vmatmul.mubr.f32.gmra.mxu0 %v3258_v10 }
 0x485   :  { %v4744_v56 = vmul.f32 %v4445_v8, %v4135_v45  ;;  %v3842_v39 = vadd.f32 %v3841_v25, %v3457_v11  ;;  %v4450_v48 = vpop.f32.mrf.mxu1  ;;  %4689 = vmatmul.mubr.f32.gmra.mxu1 %v4302_v61  ;;  %4084 = vmatprep.mubr.f32.mxu0 %v3263_v22  ;;  %v4307_v8 = vmax.f32 %v17422_v24, 0.0  ;;  %v3266_v61 = vmul.f32 %v14289_v50, %v17423_v54  ;;  %v17427_v45 = vld [vmem:[#allocation161_spill] sm:$0xff]  ;;  %v17428_v25 = vld [vmem:[#allocation299_spill] sm:$0xff] }
 0x486   :  { %4693 = vmatprep.mubr.f32.mxu1 %v4305_v23  ;;  %v3843_v9 = vpop.f32.mrf.mxu0  ;;  %v4306_v11 = vmax.f32 %v17424_v41, 0.0  ;;  %v3467_v22 = vadd.f32 %v17426_v52, %v17425_v44  ;;  %v3271_v57 = vmul.f32 %v14307_v35, %v17427_v45  ;;  %v17431_v35 = vld [vmem:[#allocation332_spill] sm:$0xff]  ;;  %v17434_v24 = vld [vmem:[#allocation305_spill] sm:$0xff] }
 0x487   :  { %v4136_v60 = vmax.f32 %v3842_v39, 0.0  ;;  %v4452_v55 = vpop.f32.mrf.mxu1  ;;  %4813 = vadd.xlane.f32.xlu1 %v4744_v56  ;;  %v4309_v56 = vmax.f32 %v17428_v25, 0.0  ;;  %v17439_v52 = vld [vmem:[#allocation169_spill] sm:$0xff] }
 0x488   :  { %v3846_v12 = vpop.f32.mrf.mxu0  ;;  %4085 = vmatmul.mubr.f32.gmra.mxu0 %v3262_v18  ;;  %v17429_v18 = vld [vmem:[#allocation159_spill] sm:$0xff] }
 0x489   :  { %v4745_v10 = vmul.f32 %v4450_v48, %v4136_v60  ;;  %v3847_v49 = vadd.f32 %v3846_v12, %v3462_v13  ;;  %v4455_v42 = vpop.f32.mrf.mxu1  ;;  %4694 = vmatmul.mubr.f32.gmra.mxu1 %v4304_v26  ;;  %4089 = vmatprep.mubr.f32.mxu0 %v3267_v3  ;;  %v3270_v9 = vmul.f32 %v14301_v0, %v17429_v18  ;;  %v17430_v26 = vld [vmem:[#allocation146_spill] sm:$0xff] }
 0x48a   :  { %4698 = vmatprep.mubr.f32.mxu1 %v4307_v8  ;;  %v3848_v47 = vpop.f32.mrf.mxu0  ;;  %v4308_v5 = vmax.f32 %v17430_v26, 0.0  ;;  %v3472_v13 = vadd.f32 %v17432_v16, %v17431_v35  ;;  %v3275_v3 = vmul.f32 %v14319_v59, %v17433_v17  ;;  %v4311_v8 = vmax.f32 %v17434_v24, 0.0  ;;  %v17437_v59 = vld [vmem:[#allocation334_spill] sm:$0xff]  ;;  %v17446_v17 = vld [vmem:[#allocation309_spill] sm:$0xff] }
 0x48b   :  { %v4137_v46 = vmax.f32 %v3847_v49, 0.0  ;;  %v4457_v23 = vpop.f32.mrf.mxu1  ;;  %4815 = vadd.xlane.f32.xlu0 %v4745_v10  ;;  %v17436_v47 = vld [vmem:[#allocation150_spill] sm:$0xff] }
 0x48c   :  { %v3851_v39 = vpop.f32.mrf.mxu0  ;;  %4090 = vmatmul.mubr.f32.gmra.mxu0 %v3266_v61  ;;  %v4310_v41 = vmax.f32 %v17436_v47, 0.0  ;;  %v17451_v47 = vld [vmem:[#allocation177_spill] sm:$0xff] }
 0x48d   :  { %v4746_v48 = vmul.f32 %v4455_v42, %v4137_v46  ;;  %v3852_v32 = vadd.f32 %v3851_v39, %v3467_v22  ;;  %v4460_v50 = vpop.f32.mrf.mxu1  ;;  %4699 = vmatmul.mubr.f32.gmra.mxu1 %v4306_v11  ;;  %4094 = vmatprep.mubr.f32.mxu0 %v3271_v57  ;;  %v17435_v42 = vld [vmem:[#allocation163_spill] sm:$0xff]  ;;  %v17438_v11 = vld [vmem:[#allocation196_spill] sm:$0xff]  ;;  %v3279_v22 = vmul.f32 %v14331_v58, %v17439_v52 }
 0x48e   :  { %4703 = vmatprep.mubr.f32.mxu1 %v4309_v56  ;;  %v3853_v21 = vpop.f32.mrf.mxu0  ;;  %v3274_v54 = vmul.f32 %v14313_v28, %v17435_v42  ;;  %v3477_v44 = vadd.f32 %v17438_v11, %v17437_v59  ;;  %v17440_v46 = vld [vmem:[#allocation303_spill] sm:$0xff]  ;;  %v17443_v58 = vld [vmem:[#allocation336_spill] sm:$0xff]  ;;  %v17449_v42 = vld [vmem:[#allocation338_spill] sm:$0xff] }
 0x48f   :  { %v4138_v60 = vmax.f32 %v3852_v32, 0.0  ;;  %v4462_v55 = vpop.f32.mrf.mxu1  ;;  %4817 = vadd.xlane.f32.xlu1 %v4746_v48  ;;  %v4313_v23 = vmax.f32 %v17440_v46, 0.0  ;;  %v17441_v48 = vld [vmem:[#allocation154_spill] sm:$0xff]  ;;  %v17453_v46 = vld [vmem:[#allocation175_spill] sm:$0xff] }
 0x490   :  { %v3856_v12 = vpop.f32.mrf.mxu0  ;;  %4095 = vmatmul.mubr.f32.gmra.mxu0 %v3270_v9  ;;  %v4312_v32 = vmax.f32 %v17441_v48, 0.0  ;;  %v17444_v21 = vld [vmem:[#allocation194_spill] sm:$0xff]  ;;  %v11316_v55 = vmov 0  }
 0x491   :  { %v4747_v10 = vmul.f32 %v4460_v50, %v4138_v60  ;;  %v3857_v49 = vadd.f32 %v3856_v12, %v3472_v13  ;;  %v4465_v0 = vpop.f32.mrf.mxu1  ;;  %4704 = vmatmul.mubr.f32.gmra.mxu1 %v4308_v5  ;;  %4099 = vmatprep.mubr.f32.mxu0 %v3275_v3  ;;  %v17442_v50 = vld [vmem:[#allocation167_spill] sm:$0xff]  ;;  %v3482_v26 = vadd.f32 %v17444_v21, %v17443_v58  ;;  %v17445_v5 = vld [vmem:[#allocation173_spill] sm:$0xff]  ;;  %v4315_v3 = vmax.f32 %v17446_v17, 0.0 }
 0x492   :  { %4708 = vmatprep.mubr.f32.mxu1 %v4311_v8  ;;  %v3858_v61 = vpop.f32.mrf.mxu0  ;;  %v3278_v18 = vmul.f32 %v14325_v63, %v17442_v50  ;;  %v3283_v35 = vmul.f32 %v14343_v31, %v17445_v5  ;;  %11024 = vset.pattern.permute.xlu1 %v11316_v55  ;;  %v17447_v12 = vld [vmem:[#allocation171_spill] sm:$0xff]  ;;  %v17448_v31 = vld [vmem:[#allocation158_spill] sm:$0xff]  ;;  %v17458_v58 = vld [vmem:[#allocation313_spill] sm:$0xff] }
 0x493   :  { %v4139_v45 = vmax.f32 %v3857_v49, 0.0  ;;  %v4467_v57 = vpop.f32.mrf.mxu1  ;;  %4819 = vadd.xlane.f32.xlu0 %v4747_v10  ;;  %v3282_v10 = vmul.f32 %v14337_v51, %v17447_v12  ;;  %v4319_v21 = vmax.f32 %v17458_v58, 0.0  ;;  %v17471_v58 = vld [vmem:[#allocation347_spill] sm:$0xff] }
 0x494   :  { %v3861_v25 = vpop.f32.mrf.mxu0  ;;  %4100 = vmatmul.mubr.f32.gmra.mxu0 %v3274_v54  ;;  %11023 = vset.pattern.permute.xlu0 %v11316_v55  ;;  %v17450_v54 = vld [vmem:[#allocation200_spill] sm:$0xff] }
 0x495   :  { %v4748_v56 = vmul.f32 %v4465_v0, %v4139_v45  ;;  %v3862_v39 = vadd.f32 %v3861_v25, %v3477_v44  ;;  %v4470_v28 = vpop.f32.mrf.mxu1  ;;  %4709 = vmatmul.mubr.f32.gmra.mxu1 %v4310_v41  ;;  %4104 = vmatprep.mubr.f32.mxu0 %v3279_v22  ;;  %v4314_v0 = vmax.f32 %v17448_v31, 0.0  ;;  %v3487_v61 = vadd.f32 %v17450_v54, %v17449_v42  ;;  %v17452_v44 = vld [vmem:[#allocation307_spill] sm:$0xff]  ;;  %v17462_v55 = vld [vmem:[#allocation204_spill] sm:$0xff] }
 0x496   :  { %4713 = vmatprep.mubr.f32.mxu1 %v4313_v23  ;;  %v3863_v9 = vpop.f32.mrf.mxu0  ;;  %v3287_v41 = vmul.f32 %v14355_v53, %v17451_v47  ;;  %v4317_v52 = vmax.f32 %v17452_v44, 0.0  ;;  %v3286_v23 = vmul.f32 %v14349_v33, %v17453_v46  ;;  %v17455_v53 = vld [vmem:[#allocation340_spill] sm:$0xff]  ;;  %v17468_v44 = vld [vmem:[#allocation202_spill] sm:$0xff] }
 0x497   :  { %v4140_v16 = vmax.f32 %v3862_v39, 0.0  ;;  %v4472_v13 = vpop.f32.mrf.mxu1  ;;  %4821 = vadd.xlane.f32.xlu1 %v4748_v56  ;;  %v17454_v56 = vld [vmem:[#allocation162_spill] sm:$0xff] }
 0x498   :  { %v3866_v60 = vpop.f32.mrf.mxu0  ;;  %4105 = vmatmul.mubr.f32.gmra.mxu0 %v3278_v18  ;;  %v4316_v39 = vmax.f32 %v17454_v56, 0.0  ;;  %v17469_v56 = vld [vmem:[#allocation28_spill] sm:$0xff] }
 0x499   :  { %v4749_v24 = vmul.f32 %v4470_v28, %v4140_v16  ;;  %v3867_v8 = vadd.f32 %v3866_v60, %v3482_v26  ;;  %v4475_v63 = vpop.f32.mrf.mxu1  ;;  %4714 = vmatmul.mubr.f32.gmra.mxu1 %v4312_v32  ;;  %4109 = vmatprep.mubr.f32.mxu0 %v3283_v35  ;;  %v17456_v28 = vld [vmem:[#allocation198_spill] sm:$0xff]  ;;  %v17457_v32 = vld [vmem:[#allocation181_spill] sm:$0xff]  ;;  %v17459_v16 = vld [vmem:[#allocation179_spill] sm:$0xff] }
 0x49a   :  { %4718 = vmatprep.mubr.f32.mxu1 %v4315_v3  ;;  %v3868_v49 = vpop.f32.mrf.mxu0  ;;  %v3492_v48 = vadd.f32 %v17456_v28, %v17455_v53  ;;  %v3291_v50 = vmul.f32 %v14367_v36, %v17457_v32  ;;  %v3290_v13 = vmul.f32 %v14361_v62, %v17459_v16  ;;  %v17460_v3 = vld [vmem:[#allocation166_spill] sm:$0xff]  ;;  %v17461_v36 = vld [vmem:[#allocation343_spill] sm:$0xff] }
 0x49b   :  { %v4141_v59 = vmax.f32 %v3867_v8, 0.0  ;;  %v4477_v11 = vpop.f32.mrf.mxu1  ;;  %4823 = vadd.xlane.f32.xlu0 %v4749_v24  ;;  %v4318_v60 = vmax.f32 %v17460_v3, 0.0  ;;  %v3497_v24 = vadd.f32 %v17462_v55, %v17461_v36  ;;  %v17463_v8 = vld [vmem:[#allocation185_spill] sm:$0xff]  ;;  %v17464_v49 = vld [vmem:[#allocation311_spill] sm:$0xff]  ;;  %v17474_v36 = vld [vmem:[#allocation212_spill] sm:$0xff] }
 0x49c   :  { %v3871_v22 = vpop.f32.mrf.mxu0  ;;  %4110 = vmatmul.mubr.f32.gmra.mxu0 %v3282_v10  ;;  %v4321_v31 = vmax.f32 %v17464_v49, 0.0 }
 0x49d   :  { %v4750_v45 = vmul.f32 %v4475_v63, %v4141_v59  ;;  %v3872_v51 = vadd.f32 %v3871_v22, %v3487_v61  ;;  %v4480_v57 = vpop.f32.mrf.mxu1  ;;  %4719 = vmatmul.mubr.f32.gmra.mxu1 %v4314_v0  ;;  %4114 = vmatprep.mubr.f32.mxu0 %v3287_v41  ;;  %v3295_v63 = vmul.f32 %v14379_v15, %v17463_v8  ;;  %v17465_v61 = vld [vmem:[#allocation183_spill] sm:$0xff]  ;;  %v17466_v59 = vld [vmem:[#allocation170_spill] sm:$0xff] }
 0x49e   :  { %4723 = vmatprep.mubr.f32.mxu1 %v4317_v52  ;;  %v3873_v25 = vpop.f32.mrf.mxu0  ;;  %v3294_v47 = vmul.f32 %v14373_v7, %v17465_v61  ;;  %v4320_v11 = vmax.f32 %v17466_v59, 0.0  ;;  %v17467_v15 = vld [vmem:[#allocation30_spill] sm:$0xff] }
 0x49f   :  { %v4142_v18 = vmax.f32 %v3872_v51, 0.0  ;;  %v4482_v9 = vpop.f32.mrf.mxu1  ;;  %4825 = vadd.xlane.f32.xlu1 %v4750_v45  ;;  %v3502_v52 = vadd.f32 %v17468_v44, %v17467_v15  ;;  %v17477_v44 = vld [vmem:[#allocation350_spill] sm:$0xff] }
 0x4a0   :  { %v3876_v26 = vpop.f32.mrf.mxu0  ;;  %4115 = vmatmul.mubr.f32.gmra.mxu0 %v3286_v23 }
 0x4a1   :  { %v4751_v5 = vmul.f32 %v4480_v57, %v4142_v18  ;;  %v3877_v35 = vadd.f32 %v3876_v26, %v3492_v48  ;;  %v4485_v33 = vpop.f32.mrf.mxu1  ;;  %4724 = vmatmul.mubr.f32.gmra.mxu1 %v4316_v39  ;;  %4119 = vmatprep.mubr.f32.mxu0 %v3291_v50  ;;  %v17470_v39 = vld [vmem:[#allocation208_spill] sm:$0xff] }
 0x4a2   :  { %4728 = vmatprep.mubr.f32.mxu1 %v4319_v21  ;;  %v3878_v17 = vpop.f32.mrf.mxu0  ;;  %v3507_v7 = vadd.f32 %v17470_v39, %v17469_v56  ;;  %v17472_v21 = vld [vmem:[#allocation206_spill] sm:$0xff]  ;;  %v17479_v39 = vld [vmem:[#allocation351_spill] sm:$0xff] }
 0x4a3   :  { %v4143_v12 = vmax.f32 %v3877_v35, 0.0  ;;  %v4487_v10 = vpop.f32.mrf.mxu1  ;;  %4827 = vadd.xlane.f32.xlu0 %v4751_v5  ;;  %v3512_v26 = vadd.f32 %v17472_v21, %v17471_v58  ;;  %v17481_v21 = vld [vmem:[#allocation352_spill] sm:$0xff] }
 0x4a4   :  { %v3881_v0 = vpop.f32.mrf.mxu0  ;;  %4120 = vmatmul.mubr.f32.gmra.mxu0 %v3290_v13 }
 0x4a5   :  { %v4752_v42 = vmul.f32 %v4485_v33, %v4143_v12  ;;  %v3882_v54 = vadd.f32 %v3881_v0, %v3497_v24  ;;  %v4490_v62 = vpop.f32.mrf.mxu1  ;;  %4729 = vmatmul.mubr.f32.gmra.mxu1 %v4318_v60  ;;  %4124 = vmatprep.mubr.f32.mxu0 %v3295_v63  ;;  %v17473_v60 = vld [vmem:[#allocation348_spill] sm:$0xff]  ;;  %v17475_v0 = vld [vmem:[#allocation349_spill] sm:$0xff] }
 0x4a6   :  { %4733 = vmatprep.mubr.f32.mxu1 %v4321_v31  ;;  %v3883_v41 = vpop.f32.mrf.mxu0  ;;  %v3517_v55 = vadd.f32 %v17474_v36, %v17473_v60  ;;  %v17483_v36 = vld [vmem:[#allocation353_spill] sm:$0xff] }
 0x4a7   :  { %v4144_v22 = vmax.f32 %v3882_v54, 0.0  ;;  %v4492_v45 = vpop.f32.mrf.mxu1  ;;  %4829 = vadd.xlane.f32.xlu1 %v4752_v42  ;;  %v17476_v42 = vld [vmem:[#allocation210_spill] sm:$0xff] }
 0x4a8   :  { %v3886_v51 = vpop.f32.mrf.mxu0  ;;  %4125 = vmatmul.mubr.f32.gmra.mxu0 %v3294_v47  ;;  %v3522_v54 = vadd.f32 %v17476_v42, %v17475_v0  ;;  %v17485_v42 = vld [vmem:[#allocation354_spill] sm:$0xff] }
 0x4a9   :  { %v4753_v57 = vmul.f32 %v4490_v62, %v4144_v22  ;;  %v3887_v46 = vadd.f32 %v3886_v51, %v3502_v52  ;;  %v4495_v23 = vpop.f32.mrf.mxu1  ;;  %4734 = vmatmul.mubr.f32.gmra.mxu1 %v4320_v11  ;;  %v17478_v52 = vld [vmem:[#allocation216_spill] sm:$0xff] }
 0x4aa   :  { %v3888_v25 = vpop.f32.mrf.mxu0  ;;  %v3527_v22 = vadd.f32 %v17478_v52, %v17477_v44  ;;  %v17487_v52 = vld [vmem:[#allocation355_spill] sm:$0xff] }
 0x4ab   :  { %v4145_v53 = vmax.f32 %v3887_v46, 0.0  ;;  %v4497_v28 = vpop.f32.mrf.mxu1  ;;  %4831 = vadd.xlane.f32.xlu0 %v4753_v57 }
 0x4ac   :  { %v3891_v48 = vpop.f32.mrf.mxu0 }
 0x4ad   :  { %v4754_v32 = vmul.f32 %v4495_v23, %v4145_v53  ;;  %v3892_v50 = vadd.f32 %v3891_v48, %v3507_v7  ;;  %v4500_v18 = vpop.f32.mrf.mxu1  ;;  %v17480_v7 = vld [vmem:[#allocation214_spill] sm:$0xff] }
 0x4ae   :  { %v3893_v9 = vpop.f32.mrf.mxu0  ;;  %v3532_v53 = vadd.f32 %v17480_v7, %v17479_v39  ;;  %v17489_v7 = vld [vmem:[#allocation356_spill] sm:$0xff] }
 0x4af   :  { %v4146_v5 = vmax.f32 %v3892_v50, 0.0  ;;  %v4502_v35 = vpop.f32.mrf.mxu1  ;;  %4833 = vadd.xlane.f32.xlu1 %v4754_v32 }
 0x4b0   :  { %v3896_v33 = vpop.f32.mrf.mxu0 }
 0x4b1   :  { %v4755_v16 = vmul.f32 %v4500_v18, %v4146_v5  ;;  %v3897_v13 = vadd.f32 %v3896_v33, %v3512_v26  ;;  %v4505_v17 = vpop.f32.mrf.mxu1  ;;  %v17482_v26 = vld [vmem:[#allocation220_spill] sm:$0xff] }
 0x4b2   :  { %v3898_v3 = vpop.f32.mrf.mxu0  ;;  %v3537_v5 = vadd.f32 %v17482_v26, %v17481_v21  ;;  %v17491_v26 = vld [vmem:[#allocation357_spill] sm:$0xff] }
 0x4b3   :  { %v4147_v24 = vmax.f32 %v3897_v13, 0.0  ;;  %v4507_v8 = vpop.f32.mrf.mxu1  ;;  %4835 = vadd.xlane.f32.xlu0 %v4755_v16 }
 0x4b4   :  { %v3901_v63 = vpop.f32.mrf.mxu0 }
 0x4b5   :  { %v4756_v12 = vmul.f32 %v4505_v17, %v4147_v24  ;;  %v3902_v10 = vadd.f32 %v3901_v63, %v3517_v55  ;;  %v4510_v49 = vpop.f32.mrf.mxu1  ;;  %v17484_v55 = vld [vmem:[#allocation218_spill] sm:$0xff] }
 0x4b6   :  { %v3903_v31 = vpop.f32.mrf.mxu0  ;;  %v3542_v24 = vadd.f32 %v17484_v55, %v17483_v36  ;;  %v17493_v55 = vld [vmem:[#allocation358_spill] sm:$0xff] }
 0x4b7   :  { %v4148_v62 = vmax.f32 %v3902_v10, 0.0  ;;  %v4512_v61 = vpop.f32.mrf.mxu1  ;;  %4837 = vadd.xlane.f32.xlu1 %v4756_v12 }
 0x4b8   :  { %v3906_v47 = vpop.f32.mrf.mxu0 }
 0x4b9   :  { %v4757_v41 = vmul.f32 %v4510_v49, %v4148_v62  ;;  %v3907_v59 = vadd.f32 %v3906_v47, %v3522_v54  ;;  %v4515_v11 = vpop.f32.mrf.mxu1  ;;  %v17486_v54 = vld [vmem:[#allocation224_spill] sm:$0xff] }
 0x4ba   :  { %v3908_v15 = vpop.f32.mrf.mxu0  ;;  %v3547_v62 = vadd.f32 %v17486_v54, %v17485_v42  ;;  %v17495_v54 = vld [vmem:[#allocation56_spill] sm:$0xff] }
 0x4bb   :  { %v4149_v45 = vmax.f32 %v3907_v59, 0.0  ;;  %v4517_v51 = vpop.f32.mrf.mxu1  ;;  %4839 = vadd.xlane.f32.xlu0 %v4757_v41 }
 0x4bc   :  { %v3911_v57 = vpop.f32.mrf.mxu0 }
 0x4bd   :  { %v4758_v46 = vmul.f32 %v4515_v11, %v4149_v45  ;;  %v3912_v23 = vadd.f32 %v3911_v57, %v3527_v22  ;;  %v4520_v25 = vpop.f32.mrf.mxu1  ;;  %v17488_v22 = vld [vmem:[#allocation222_spill] sm:$0xff] }
 0x4be   :  { %v3913_v56 = vpop.f32.mrf.mxu0  ;;  %v3552_v45 = vadd.f32 %v17488_v22, %v17487_v52  ;;  %v17496_v52 = vld [vmem:[#allocation341_spill] sm:$0xff] }
 0x4bf   :  { %v4150_v28 = vmax.f32 %v3912_v23, 0.0  ;;  %v4522_v48 = vpop.f32.mrf.mxu1  ;;  %4841 = vadd.xlane.f32.xlu1 %v4758_v46  ;;  %v3577_v22 = vadd.f32 %v13979_v38, %v17496_v52  ;;  %v17498_v38 = vld [vmem:[#allocation346_spill] sm:$0xff]  ;;  %v17502_v52 = vld [vmem:[#allocation73_spill] sm:$0xff] }
 0x4c0   :  { %v3916_v32 = vpop.f32.mrf.mxu0 }
 0x4c1   :  { %v4759_v50 = vmul.f32 %v4520_v25, %v4150_v28  ;;  %v3917_v18 = vadd.f32 %v3916_v32, %v3532_v53  ;;  %v4525_v9 = vpop.f32.mrf.mxu1  ;;  %v17490_v53 = vld [vmem:[#allocation228_spill] sm:$0xff] }
 0x4c2   :  { %v3918_v58 = vpop.f32.mrf.mxu0  ;;  %v3557_v28 = vadd.f32 %v17490_v53, %v17489_v7 }
 0x4c3   :  { %v4151_v35 = vmax.f32 %v3917_v18, 0.0  ;;  %v4527_v33 = vpop.f32.mrf.mxu1  ;;  %4843 = vadd.xlane.f32.xlu0 %v4759_v50 }
 0x4c4   :  { %v3921_v16 = vpop.f32.mrf.mxu0 }
 0x4c5   :  { %v4760_v13 = vmul.f32 %v4525_v9, %v4151_v35  ;;  %v3922_v17 = vadd.f32 %v3921_v16, %v3537_v5  ;;  %v4530_v3 = vpop.f32.mrf.mxu1  ;;  %v17492_v5 = vld [vmem:[#allocation226_spill] sm:$0xff] }
 0x4c6   :  { %v3923_v60 = vpop.f32.mrf.mxu0  ;;  %v3562_v35 = vadd.f32 %v17492_v5, %v17491_v26 }
 0x4c7   :  { %v4152_v8 = vmax.f32 %v3922_v17, 0.0  ;;  %v4532_v63 = vpop.f32.mrf.mxu1  ;;  %4845 = vadd.xlane.f32.xlu1 %v4760_v13 }
 0x4c8   :  { %v3926_v12 = vpop.f32.mrf.mxu0 }
 0x4c9   :  { %v4761_v10 = vmul.f32 %v4530_v3, %v4152_v8  ;;  %v3927_v49 = vadd.f32 %v3926_v12, %v3542_v24  ;;  %v4535_v31 = vpop.f32.mrf.mxu1  ;;  %v17494_v24 = vld [vmem:[#allocation232_spill] sm:$0xff] }
 0x4ca   :  { %v3928_v0 = vpop.f32.mrf.mxu0  ;;  %v3567_v8 = vadd.f32 %v17494_v24, %v17493_v55 }
 0x4cb   :  { %v4153_v61 = vmax.f32 %v3927_v49, 0.0  ;;  %v4537_v47 = vpop.f32.mrf.mxu1  ;;  %4847 = vadd.xlane.f32.xlu0 %v4761_v10 }
 0x4cc   :  { %v3931_v41 = vpop.f32.mrf.mxu0 }
 0x4cd   :  { %v4762_v59 = vmul.f32 %v4535_v31, %v4153_v61  ;;  %v3932_v11 = vadd.f32 %v3931_v41, %v3547_v62  ;;  %v4540_v15 = vpop.f32.mrf.mxu1  ;;  %v3572_v62 = vadd.f32 %v13967_v27, %v17495_v54  ;;  %v17497_v27 = vld [vmem:[#allocation61_spill] sm:$0xff] }
 0x4ce   :  { %v3933_v44 = vpop.f32.mrf.mxu0 }
 0x4cf   :  { %v4154_v51 = vmax.f32 %v3932_v11, 0.0  ;;  %v4542_v57 = vpop.f32.mrf.mxu1  ;;  %4849 = vadd.xlane.f32.xlu1 %v4762_v59 }
 0x4d0   :  { %v3936_v46 = vpop.f32.mrf.mxu0 }
 0x4d1   :  { %v4763_v23 = vmul.f32 %v4540_v15, %v4154_v51  ;;  %v3937_v25 = vadd.f32 %v3936_v46, %v3552_v45  ;;  %v4545_v56 = vpop.f32.mrf.mxu1 }
 0x4d2   :  { %v3938_v39 = vpop.f32.mrf.mxu0 }
 0x4d3   :  { %v4155_v48 = vmax.f32 %v3937_v25, 0.0  ;;  %v4547_v32 = vpop.f32.mrf.mxu1  ;;  %4851 = vadd.xlane.f32.xlu0 %v4763_v23  ;;  %v3582_v39 = vadd.f32 %v13991_v1, %v17497_v27  ;;  %v17499_v1 = vld [vmem:[#allocation59_spill] sm:$0xff] }
 0x4d4   :  { %v3941_v50 = vpop.f32.mrf.mxu0 }
 0x4d5   :  { %v4764_v18 = vmul.f32 %v4545_v56, %v4155_v48  ;;  %v3942_v9 = vadd.f32 %v3941_v50, %v3557_v28  ;;  %v4550_v58 = vpop.f32.mrf.mxu1 }
 0x4d6   :  { %v3943_v21 = vpop.f32.mrf.mxu0 }
 0x4d7   :  { %v4156_v33 = vmax.f32 %v3942_v9, 0.0  ;;  %v4552_v16 = vpop.f32.mrf.mxu1  ;;  %4853 = vadd.xlane.f32.xlu1 %v4764_v18  ;;  %v3587_v9 = vadd.f32 %v14003_v37, %v17498_v38  ;;  %v17500_v37 = vld [vmem:[#allocation65_spill] sm:$0xff] }
 0x4d8   :  { %v3946_v13 = vpop.f32.mrf.mxu0 }
 0x4d9   :  { %v4765_v17 = vmul.f32 %v4550_v58, %v4156_v33  ;;  %v3947_v3 = vadd.f32 %v3946_v13, %v3562_v35  ;;  %v4555_v60 = vpop.f32.mrf.mxu1  ;;  %v3592_v13 = vadd.f32 %v14015_v4, %v17499_v1 }
 0x4da   :  { %v3948_v36 = vpop.f32.mrf.mxu0 }
 0x4db   :  { %v4157_v63 = vmax.f32 %v3947_v3, 0.0  ;;  %v4557_v12 = vpop.f32.mrf.mxu1  ;;  %4855 = vadd.xlane.f32.xlu0 %v4765_v17 }
 0x4dc   :  { %v3951_v10 = vpop.f32.mrf.mxu0 }
 0x4dd   :  { %v4766_v49 = vmul.f32 %v4555_v60, %v4157_v63  ;;  %v3952_v31 = vadd.f32 %v3951_v10, %v3567_v8  ;;  %v4560_v0 = vpop.f32.mrf.mxu1  ;;  %v3597_v63 = vadd.f32 %v14027_v43, %v17500_v37 }
 0x4de   :  { %v3953_v42 = vpop.f32.mrf.mxu0 }
 0x4df   :  { %v4158_v61 = vmax.f32 %v3952_v31, 0.0  ;;  %v4562_v47 = vpop.f32.mrf.mxu1  ;;  %4857 = vadd.xlane.f32.xlu1 %v4766_v49  ;;  %v16557_v49 = vlaneseq }
 0x4e0   :  { %v3956_v41 = vpop.f32.mrf.mxu0 }
 0x4e1   :  { %v4767_v59 = vmul.f32 %v4560_v0, %v4158_v61  ;;  %v3957_v11 = vadd.f32 %v3956_v41, %v3572_v62  ;;  %v4565_v15 = vpop.f32.mrf.mxu1  ;;  %v17501_v62 = vld [vmem:[#allocation69_spill] sm:$0xff] }
 0x4e2   :  { %v3958_v44 = vpop.f32.mrf.mxu0  ;;  %v3602_v61 = vadd.f32 %v14039_v20, %v17501_v62 }
 0x4e3   :  { %v4159_v45 = vmax.f32 %v3957_v11, 0.0  ;;  %v4567_v51 = vpop.f32.mrf.mxu1  ;;  %4859 = vadd.xlane.f32.xlu0 %v4767_v59  ;;  %v14545_v59 = vshrl.u32 %v16557_v49, 7 }
 0x4e4   :  { %v3961_v57 = vpop.f32.mrf.mxu0  ;;  %v11317_v51 = vmov 1966171168  }
 0x4e5   :  { %v4768_v46 = vmul.f32 %v4565_v15, %v4159_v45  ;;  %v3962_v23 = vadd.f32 %v3961_v57, %v3577_v22  ;;  %v4570_v25 = vpop.f32.mrf.mxu1  ;;  %v3607_v22 = vadd.f32 %v14051_v34, %v17502_v52  ;;  %v7048_v57 = vunpack.c.l.s4 %v11317_v51 }
 0x4e6   :  { %v3963_v56 = vpop.f32.mrf.mxu0  ;;  %v14550_v20 = vsub.s32 0, %v14545_v59  ;;  %v14562_v34 = vsub.s32 4, %v14545_v59 }
 0x4e7   :  { %v4160_v7 = vmax.f32 %v3962_v23, 0.0  ;;  %v4572_v53 = vpop.f32.mrf.mxu1  ;;  %4861 = vadd.xlane.f32.xlu1 %v4768_v46  ;;  %v14556_v56 = vsub.s32 2, %v14545_v59 }
 0x4e8   :  { %v3966_v28 = vpop.f32.mrf.mxu0  ;;  %v14565_v53 = vsub.s32 5, %v14545_v59 }
 0x4e9   :  { %v4769_v48 = vmul.f32 %v4570_v25, %v4160_v7  ;;  %v3967_v32 = vadd.f32 %v3966_v28, %v3582_v39  ;;  %v4575_v50 = vpop.f32.mrf.mxu1  ;;  %v14553_v25 = vsub.s32 1, %v14545_v59  ;;  %v14559_v7 = vsub.s32 3, %v14545_v59 }
 0x4ea   :  { %v3968_v18 = vpop.f32.mrf.mxu0  ;;  %v14568_v28 = vsub.s32 6, %v14545_v59 }
 0x4eb   :  { %v4161_v58 = vmax.f32 %v3967_v32, 0.0  ;;  %v4577_v21 = vpop.f32.mrf.mxu1  ;;  %4863 = vadd.xlane.f32.xlu0 %v4769_v48  ;;  %v17503_v18 = vld [vmem:[#allocation77_spill] sm:$0xff] }
 0x4ec   :  { %v3971_v26 = vpop.f32.mrf.mxu0  ;;  %v3612_v38 = vadd.f32 %v14063_v6, %v17503_v18  ;;  %v7049_v21 = vunpack.c.0.s8 %v7048_v57 }
 0x4ed   :  { %v4770_v5 = vmul.f32 %v4575_v50, %v4161_v58  ;;  %v3972_v35 = vadd.f32 %v3971_v26, %v3587_v9  ;;  %v4580_v33 = vpop.f32.mrf.mxu1  ;;  %v14573_v58 = vsub.s32 7, %v14545_v59 }
 0x4ee   :  { %v3973_v16 = vpop.f32.mrf.mxu0 }
 0x4ef   :  { %v4162_v17 = vmax.f32 %v3972_v35, 0.0  ;;  %v4582_v3 = vpop.f32.mrf.mxu1  ;;  %4865 = vadd.xlane.f32.xlu1 %v4770_v5 }
 0x4f0   :  { %v3976_v60 = vpop.f32.mrf.mxu0 }
 0x4f1   :  { %v4771_v36 = vmul.f32 %v4580_v33, %v4162_v17  ;;  %v3977_v55 = vadd.f32 %v3976_v60, %v3592_v13  ;;  %v4585_v24 = vpop.f32.mrf.mxu1 }
 0x4f2   :  { %v3978_v8 = vpop.f32.mrf.mxu0 }
 0x4f3   :  { %v4163_v12 = vmax.f32 %v3977_v55, 0.0  ;;  %v4587_v10 = vpop.f32.mrf.mxu1  ;;  %4867 = vadd.xlane.f32.xlu0 %v4771_v36 }
 0x4f4   :  { %v3981_v31 = vpop.f32.mrf.mxu0 }
 0x4f5   :  { %v4772_v0 = vmul.f32 %v4585_v24, %v4163_v12  ;;  %v3982_v42 = vadd.f32 %v3981_v31, %v3597_v63  ;;  %v4590_v54 = vpop.f32.mrf.mxu1 }
 0x4f6   :  { %v3983_v4 = vpop.f32.mrf.mxu0 }
 0x4f7   :  { %v4164_v47 = vmax.f32 %v3982_v42, 0.0  ;;  %v4592_v41 = vpop.f32.mrf.mxu1  ;;  %4869 = vadd.xlane.f32.xlu1 %v4772_v0 }
 0x4f8   :  { %v3986_v11 = vpop.f32.mrf.mxu0 }
 0x4f9   :  { %v4773_v43 = vmul.f32 %v4590_v54, %v4164_v47  ;;  %v3987_v15 = vadd.f32 %v3986_v11, %v3602_v61  ;;  %v4595_v44 = vpop.f32.mrf.mxu1 }
 0x4fa   :  { %v3988_v45 = vpop.f32.mrf.mxu0 }
 0x4fb   :  { %v4165_v46 = vmax.f32 %v3987_v15, 0.0  ;;  %v4597_v23 = vpop.f32.mrf.mxu1  ;;  %4871 = vadd.xlane.f32.xlu0 %v4773_v43  ;;  %v14596_v43 = vsub.s32 %v7049_v21, %v14545_v59 }
 0x4fc   :  { %v3991_v27 = vpop.f32.mrf.mxu0  ;;  %v4804_v39 = vpop.xlane.xlu0 %4803 }
 0x4fd   :  { %v4774_v48 = vmul.f32 %v4595_v44, %v4165_v46  ;;  %v3992_v32 = vadd.f32 %v3991_v27, %v3607_v22  ;;  %v4600_v50 = vpop.f32.mrf.mxu1  ;;  %v4998_v35 = vrot.slane %v4804_v39, %v14550_v20  ;;  %v5002_v33 = vrot.slane %v4804_v39, %v14553_v25 }
 0x4fe   :  { %v3993_v9 = vpop.f32.mrf.mxu0  ;;  %v5006_v16 = vrot.slane %v4804_v39, %v14556_v56  ;;  %v5010_v17 = vrot.slane %v4804_v39, %v14559_v7  ;;  %v5014_v6 = vrot.slane %v4804_v39, %v14562_v34  ;;  %v5018_v3 = vrot.slane %v4804_v39, %v14565_v53 }
 0x4ff   :  { %v4166_v26 = vmax.f32 %v3992_v32, 0.0  ;;  %v4602_v5 = vpop.f32.mrf.mxu1  ;;  %4873 = vadd.xlane.f32.xlu1 %v4774_v48  ;;  %v5022_v60 = vrot.slane %v4804_v39, %v14568_v28  ;;  %v5026_v61 = vrot.slane %v4804_v39, %v14573_v58  ;;  %v7043_v57 = vcombine.low %v4998_v35, %v5002_v33 }
 0x500   :  { %v3996_v1 = vpop.f32.mrf.mxu0  ;;  %v4806_v13 = vpop.xlane.xlu0 %4805  ;;  %v7044_v46 = vcombine.low %v5006_v16, %v5010_v17  ;;  %v7045_v23 = vcombine.low %v5014_v6, %v5018_v3  ;;  %v17504_v3 = vld [vmem:[#allocation24_spill] sm:$0xff] }
 0x501   :  { %v4775_v36 = vmul.f32 %v4600_v50, %v4166_v26  ;;  %v3997_v55 = vadd.f32 %v3996_v1, %v3612_v38  ;;  %v4605_v24 = vpop.f32.mrf.mxu1  ;;  %v5030_v8 = vrot.slane %v4806_v13, %v14550_v20  ;;  %v5034_v37 = vrot.slane %v4806_v13, %v14553_v25 }
 0x502   :  { %v3998_v63 = vpop.f32.mrf.mxu0  ;;  %v5038_v12 = vrot.slane %v4806_v13, %v14556_v56  ;;  %v5042_v10 = vrot.slane %v4806_v13, %v14559_v7  ;;  %v5046_v31 = vrot.slane %v4806_v13, %v14562_v34  ;;  %v5050_v0 = vrot.slane %v4806_v13, %v14565_v53 }
 0x503   :  { %v4167_v42 = vmax.f32 %v3997_v55, 0.0  ;;  %v4607_v54 = vpop.f32.mrf.mxu1  ;;  %4875 = vadd.xlane.f32.xlu0 %v4775_v36  ;;  %v5054_v4 = vrot.slane %v4806_v13, %v14568_v28  ;;  %v5058_v62 = vrot.slane %v4806_v13, %v14573_v58  ;;  %v7092_v44 = vcombine.low %v5030_v8, %v5034_v37 }
 0x504   :  { %v14591_v47 = vpop.f32.mrf.mxu0  ;;  %v7093_v52 = vcombine.low %v5038_v12, %v5042_v10  ;;  %v7094_v22 = vcombine.low %v5046_v31, %v5050_v0  ;;  %v7046_v27 = vcombine.low %v5022_v60, %v5026_v61  ;;  %v7053_v26 = vrot.slane %v7043_v57, %v14596_v43 }
 0x505   :  { %v4776_v41 = vmul.f32 %v4605_v24, %v4167_v42  ;;  %v14593_v11 = vpop.f32.mrf.mxu1  ;;  %v7095_v45 = vcombine.low %v5054_v4, %v5058_v62  ;;  %v7102_v50 = vrot.slane %v7092_v44, %v14596_v43  ;;  %v7060_v5 = vrot.slane %v7044_v46, %v14596_v43  ;;  %v17505_v44 = vld [vmem:[#allocation92_spill] sm:$0xff] }
 0x506   :  { %v4003_v15 = vpop.f32.mrf.mxu0  ;;  %v7109_v18 = vrot.slane %v7093_v52, %v14596_v43  ;;  %v7116_v38 = vrot.slane %v7094_v22, %v14596_v43  ;;  %v7067_v35 = vrot.slane %v7045_v23, %v14596_v43  ;;  %v7074_v33 = vrot.slane %v7046_v27, %v14596_v43 }
 0x507   :  { %v4612_v51 = vpop.f32.mrf.mxu1  ;;  %4877 = vadd.xlane.f32.xlu1 %v4776_v41  ;;  %v7123_v9 = vrot.slane %v7095_v45, %v14596_v43  ;;  %v3632_v60 = vadd.f32 %v14111_v2, %v17504_v3  ;;  %v7075_v55 = vcombine.low %v7053_v26, %v7060_v5  ;;  %v3642_v52 = vadd.f32 %v14135_v14, %v17505_v44  ;;  %v17511_v44 = vld [vmem:[#allocation230_spill] sm:$0xff] }
 0x508   :  { %v14598_v39 = vpop.f32.mrf.mxu0  ;;  %v7124_v17 = vcombine.low %v7102_v50, %v7109_v18  ;;  %v7076_v24 = vcombine.low %v7067_v35, %v7074_v33 }
 0x509   :  { %v14600_v48 = vpop.f32.mrf.mxu1  ;;  %v7125_v6 = vcombine.low %v7116_v38, %v7123_v9  ;;  %v7083_v54 = vrot.slane %v7075_v55, %v14596_v43 }
 0x50a   :  { %v4008_v32 = vpop.f32.mrf.mxu0  ;;  %v7132_v10 = vrot.slane %v7124_v17, %v14596_v43  ;;  %v7090_v4 = vrot.slane %v7076_v24, %v14596_v43  ;;  %v17507_v24 = vld [vmem:[#allocation108_spill] sm:$0xff] }
 0x50b   :  { %v4617_v21 = vpop.f32.mrf.mxu1  ;;  %v7139_v31 = vrot.slane %v7125_v6, %v14596_v43 }
 0x50c   :  { %v14610_v16 = vpop.f32.mrf.mxu0  ;;  %v7091_v45 = vcombine.low %v7083_v54, %v7090_v4  ;;  %v17506_v21 = vld [vmem:[#allocation100_spill] sm:$0xff] }
 0x50d   :  { %v14612_v1 = vpop.f32.mrf.mxu1  ;;  %v7140_v15 = vcombine.low %v7132_v10, %v7139_v31  ;;  %v3652_v14 = vadd.f32 %v14159_v30, %v17506_v21  ;;  %v17508_v10 = vld [vmem:[#allocation81_spill] sm:$0xff]  ;;  %v17515_v21 = vld [vmem:[#allocation244_spill] sm:$0xff] }
 0x50e   :  { %v4013_v13 = vpop.f32.mrf.mxu0  ;;  %v3617_v31 = vadd.f32 %v14075_v29, %v17508_v10  ;;  %v4808_v29 = vpop.xlane.xlu1 %4807 }
 0x50f   :  { %v4622_v36 = vpop.f32.mrf.mxu1  ;;  %v5074_v10 = vrot.slane %v4808_v29, %v14559_v7 }
 0x510   :  { %v4016_v8 = vpop.f32.mrf.mxu0 }
 0x511   :  { %v4017_v37 = vadd.f32 %v4016_v8, %v3632_v60  ;;  %v4625_v63 = vpop.f32.mrf.mxu1  ;;  %v3662_v8 = vadd.f32 %v14183_v40, %v17507_v24 }
 0x512   :  { %v4018_v12 = vpop.f32.mrf.mxu0 }
 0x513   :  { %v4171_v0 = vmax.f32 %v4017_v37, 0.0  ;;  %v4627_v42 = vpop.f32.mrf.mxu1 }
 0x514   :  { %v14620_v62 = vpop.f32.mrf.mxu0  ;;  %v17509_v42 = vld [vmem:[#allocation112_spill] sm:$0xff] }
 0x515   :  { %v14622_v2 = vmul.f32 %v4625_v63, %v4171_v0  ;;  %v14624_v61 = vpop.f32.mrf.mxu1  ;;  %v3667_v54 = vadd.f32 %v14195_v19, %v17509_v42  ;;  %v17514_v19 = vld [vmem:[#allocation116_spill] sm:$0xff] }
 0x516   :  { %v4023_v41 = vpop.f32.mrf.mxu0 }
 0x517   :  { %v4632_v22 = vpop.f32.mrf.mxu1 }
 0x518   :  { %v4026_v51 = vpop.f32.mrf.mxu0  ;;  %10183 = vperm.xlu1 %11024, %v7140_v15   ;;  %v17510_v15 = vld [vmem:[#allocation20_spill] sm:$0xff]  ;;  %v4002_v22 = vadd.f32 %v14591_v47, %v3617_v31  ;;  %v5078_v31 = vrot.slane %v4808_v29, %v14562_v34 }
 0x519   :  { %v4027_v57 = vadd.f32 %v4026_v51, %v3642_v52  ;;  %v4635_v46 = vpop.f32.mrf.mxu1  ;;  %10180 = vperm.xlu0 %11023, %v7091_v45   ;;  %v3622_v52 = vadd.f32 %v17511_v44, %v17510_v15  ;;  %v17519_v15 = vld [vmem:[#allocation234_spill] sm:$0xff] }
 0x51a   :  { %v4028_v23 = vpop.f32.mrf.mxu0 }
 0x51b   :  { %v4173_v27 = vmax.f32 %v4027_v57, 0.0  ;;  %v4637_v32 = vpop.f32.mrf.mxu1  ;;  %v17513_v23 = vld [vmem:[#allocation236_spill] sm:$0xff] }
 0x51c   :  { %v14628_v50 = vpop.f32.mrf.mxu0  ;;  %v4007_v32 = vadd.f32 %v14598_v39, %v3622_v52  ;;  %v5066_v39 = vrot.slane %v4808_v29, %v14553_v25  ;;  %v17520_v52 = vld [vmem:[#allocation96_spill] sm:$0xff] }
 0x51d   :  { %v14630_v18 = vmul.f32 %v4635_v46, %v4173_v27  ;;  %v14632_v38 = vpop.f32.mrf.mxu1  ;;  %v17512_v46 = vld [vmem:[#allocation22_spill] sm:$0xff] }
 0x51e   :  { %v4033_v9 = vpop.f32.mrf.mxu0  ;;  %v3627_v27 = vadd.f32 %v17513_v23, %v17512_v46  ;;  %v4810_v23 = vpop.xlane.xlu1 %4809 }
 0x51f   :  { %v4642_v26 = vpop.f32.mrf.mxu1 }
 0x520   :  { %v4036_v5 = vpop.f32.mrf.mxu0 }
 0x521   :  { %v4037_v35 = vadd.f32 %v4036_v5, %v3652_v14  ;;  %v4645_v33 = vpop.f32.mrf.mxu1  ;;  %v3672_v14 = vadd.f32 %v17515_v21, %v17514_v19  ;;  %v17525_v19 = vld [vmem:[#allocation248_spill] sm:$0xff] }
 0x522   :  { %v4038_v13 = vpop.f32.mrf.mxu0 }
 0x523   :  { %v4175_v17 = vmax.f32 %v4037_v35, 0.0  ;;  %v4647_v6 = vpop.f32.mrf.mxu1  ;;  %v17516_v35 = vld [vmem:[#allocation120_spill] sm:$0xff]  ;;  %v4168_v13 = vmax.f32 %v4002_v22, 0.0 }
 0x524   :  { %v14636_v3 = vpop.f32.mrf.mxu0  ;;  %v17521_v22 = vld [vmem:[#allocation240_spill] sm:$0xff] }
 0x525   :  { %v14638_v60 = vmul.f32 %v4645_v33, %v4175_v17  ;;  %v14640_v36 = vpop.f32.mrf.mxu1  ;;  %v17517_v33 = vld [vmem:[#allocation242_spill] sm:$0xff]  ;;  %v4012_v17 = vadd.f32 %v14610_v16, %v3627_v27  ;;  %v5082_v16 = vrot.slane %v4808_v29, %v14565_v53 }
 0x526   :  { %v4043_v55 = vpop.f32.mrf.mxu0  ;;  %v3677_v47 = vadd.f32 %v17517_v33, %v17516_v35 }
 0x527   :  { %v4652_v37 = vpop.f32.mrf.mxu1  ;;  %v4170_v27 = vmax.f32 %v4012_v17, 0.0  ;;  %v7143_v17 = vcombine.low %v5078_v31, %v5082_v16  ;;  %v5118_v31 = vrot.slane %v4810_v23, %v14568_v28  ;;  %v17526_v16 = vld [vmem:[#allocation128_spill] sm:$0xff] }
 0x528   :  { %v4046_v63 = vpop.f32.mrf.mxu0  ;;  %v5062_v37 = vrot.slane %v4808_v29, %v14550_v20 }
 0x529   :  { %v4047_v30 = vadd.f32 %v4046_v63, %v3662_v8  ;;  %v4655_v12 = vpop.f32.mrf.mxu1  ;;  %v4169_v63 = vmax.f32 %v4007_v32, 0.0 }
 0x52a   :  { %v4048_v0 = vpop.f32.mrf.mxu0 }
 0x52b   :  { %v4177_v4 = vmax.f32 %v4047_v30, 0.0  ;;  %v4657_v41 = vpop.f32.mrf.mxu1  ;;  %v4778_v35 = vmul.f32 %v14600_v48, %v4169_v63  ;;  %v5106_v48 = vrot.slane %v4810_v23, %v14559_v7  ;;  %v5114_v63 = vrot.slane %v4810_v23, %v14565_v53 }
 0x52c   :  { %v4051_v45 = vpop.f32.mrf.mxu0  ;;  %v17518_v41 = vld [vmem:[#allocation26_spill] sm:$0xff] }
 0x52d   :  { %v14651_v40 = vmul.f32 %v4655_v12, %v4177_v4  ;;  %v4052_v51 = vadd.f32 %v4051_v45, %v3667_v54  ;;  %v4660_v57 = vpop.f32.mrf.mxu1  ;;  %v5070_v12 = vrot.slane %v4808_v29, %v14556_v56  ;;  %v5086_v54 = vrot.slane %v4808_v29, %v14568_v28 }
 0x52e   :  { %v4053_v9 = vpop.f32.mrf.mxu0  ;;  %v5090_v4 = vrot.slane %v4808_v29, %v14573_v58  ;;  %v3637_v44 = vadd.f32 %v17519_v15, %v17518_v41  ;;  %v3647_v45 = vadd.f32 %v17521_v22, %v17520_v52  ;;  %v5094_v52 = vrot.slane %v4810_v23, %v14550_v20 }
 0x52f   :  { %v4178_v26 = vmax.f32 %v4052_v51, 0.0  ;;  %v4662_v5 = vpop.f32.mrf.mxu1  ;;  %v17522_v51 = vld [vmem:[#allocation104_spill] sm:$0xff]  ;;  %v4779_v22 = vmul.f32 %v14612_v1, %v4170_v27 }
 0x530   :  { %v4056_v6 = vpop.f32.mrf.mxu0  ;;  %v17524_v9 = vld [vmem:[#allocation124_spill] sm:$0xff]  ;;  %v4022_v33 = vadd.f32 %v14620_v62, %v3637_v44  ;;  %v7144_v15 = vcombine.low %v5086_v54, %v5090_v4  ;;  %v17527_v54 = vld [vmem:[#allocation246_spill] sm:$0xff]  ;;  %v14698_v44 = vpop.xlane.xlu1 %4813 }
 0x531   :  { %v14661_v55 = vmul.f32 %v4660_v57, %v4178_v26  ;;  %v4057_v24 = vadd.f32 %v4056_v6, %v3672_v14  ;;  %v4665_v8 = vpop.f32.mrf.mxu1  ;;  %v17523_v57 = vld [vmem:[#allocation238_spill] sm:$0xff]  ;;  %v3682_v21 = vadd.f32 %v17525_v19, %v17524_v9  ;;  %v4777_v14 = vmul.f32 %v14593_v11, %v4168_v13 }
 0x532   :  { %v4058_v30 = vpop.f32.mrf.mxu0  ;;  %v3657_v46 = vadd.f32 %v17523_v57, %v17522_v51  ;;  %v5102_v13 = vrot.slane %v4810_v23, %v14556_v56  ;;  %v3687_v4 = vadd.f32 %v17527_v54, %v17526_v16  ;;  %v5174_v49 = vrot.slane %v14698_v44, %v14562_v34 }
 0x533   :  { %v4179_v0 = vmax.f32 %v4057_v24, 0.0  ;;  %v4667_v42 = vpop.f32.mrf.mxu1  ;;  %v7141_v24 = vcombine.low %v5062_v37, %v5066_v39  ;;  %v7142_v30 = vcombine.low %v5070_v12, %v5074_v10  ;;  %v5110_v39 = vrot.slane %v4810_v23, %v14562_v34 }
 0x534   :  { %v4061_v32 = vpop.f32.mrf.mxu0  ;;  %v4172_v12 = vmax.f32 %v4022_v33, 0.0  ;;  %v4032_v10 = vadd.f32 %v14628_v50, %v3647_v45  ;;  %v7165_v50 = vrot.slane %v7143_v17, %v14596_v43  ;;  %v7172_v45 = vrot.slane %v7144_v15, %v14596_v43  ;;  %v14710_v17 = vpop.xlane.xlu1 %4817 }
 0x535   :  { %v14680_v26 = vmul.f32 %v4665_v8, %v4179_v0  ;;  %v4062_v29 = vadd.f32 %v4061_v32, %v3677_v47  ;;  %v4670_v5 = vpop.f32.mrf.mxu1  ;;  %v5098_v47 = vrot.slane %v4810_v23, %v14553_v25  ;;  %v5122_v0 = vrot.slane %v4810_v23, %v14573_v58 }
 0x536   :  { %v4063_v6 = vpop.f32.mrf.mxu0  ;;  %v7151_v27 = vrot.slane %v7141_v24, %v14596_v43  ;;  %v7158_v32 = vrot.slane %v7142_v30, %v14596_v43  ;;  %v4781_v33 = vmul.f32 %v14624_v61, %v4172_v12  ;;  %v4042_v24 = vadd.f32 %v14636_v3, %v3657_v46 }
 0x537   :  { %v4180_v42 = vmax.f32 %v4062_v29, 0.0  ;;  %v4672_v41 = vpop.f32.mrf.mxu1  ;;  %v7190_v19 = vcombine.low %v5094_v52, %v5098_v47  ;;  %v7191_v29 = vcombine.low %v5102_v13, %v5106_v48  ;;  %v4174_v6 = vmax.f32 %v4032_v10, 0.0 }
 0x538   :  { %v4066_v11 = vpop.f32.mrf.mxu0  ;;  %4879 = vadd.xlane.f32.xlu0 %v4777_v14  ;;  %v17528_v41 = vld [vmem:[#allocation132_spill] sm:$0xff]  ;;  %v7173_v47 = vcombine.low %v7151_v27, %v7158_v32  ;;  %v4822_v16 = vpop.xlane.xlu1 %4821 }
 0x539   :  { %v14689_v62 = vmul.f32 %v4670_v5, %v4180_v42  ;;  %v4067_v8 = vadd.f32 %v4066_v11, %v3682_v21  ;;  %v4675_v37 = vpop.f32.mrf.mxu1  ;;  %v7192_v5 = vcombine.low %v5110_v39, %v5114_v63  ;;  %v7193_v42 = vcombine.low %v5118_v31, %v5122_v0  ;;  %v17531_v31 = vld [vmem:[#allocation189_spill] sm:$0xff] }
 0x53a   :  { %v4068_v1 = vpop.f32.mrf.mxu0  ;;  %v7207_v3 = vrot.slane %v7191_v29, %v14596_v43  ;;  %v4783_v46 = vmul.f32 %v14632_v38, %v4174_v6  ;;  %v4176_v39 = vmax.f32 %v4042_v24, 0.0 }
 0x53b   :  { %v4181_v51 = vmax.f32 %v4067_v8, 0.0  ;;  %v4677_v57 = vpop.f32.mrf.mxu1  ;;  %v7174_v8 = vcombine.low %v7165_v50, %v7172_v45  ;;  %v7214_v12 = vrot.slane %v7192_v5, %v14596_v43  ;;  %v7221_v10 = vrot.slane %v7193_v42, %v14596_v43  ;;  %v17530_v1 = vld [vmem:[#allocation136_spill] sm:$0xff] }
 0x53c   :  { %v4071_v9 = vpop.f32.mrf.mxu0  ;;  %4883 = vadd.xlane.f32.xlu0 %v4779_v22  ;;  %4881 = vadd.xlane.f32.xlu1 %v4778_v35  ;;  %v17529_v35 = vld [vmem:[#allocation252_spill] sm:$0xff]  ;;  %v3697_v0 = vadd.f32 %v17531_v31, %v17530_v1  ;;  %v17533_v57 = vld [vmem:[#allocation250_spill] sm:$0xff]  ;;  %v7181_v45 = vrot.slane %v7173_v47, %v14596_v43  ;;  %v5294_v42 = vrot.slane %v4822_v16, %v14556_v56 }
 0x53d   :  { %v14704_v23 = vmul.f32 %v4675_v37, %v4181_v51  ;;  %v4072_v21 = vadd.f32 %v4071_v9, %v3687_v4  ;;  %v4680_v14 = vpop.f32.mrf.mxu1  ;;  %v3692_v22 = vadd.f32 %v17529_v35, %v17528_v41  ;;  %v7200_v37 = vrot.slane %v7190_v19, %v14596_v43  ;;  %v17532_v51 = vld [vmem:[#allocation140_spill] sm:$0xff] }
 0x53e   :  { %v4073_v30 = vpop.f32.mrf.mxu0  ;;  %v3702_v27 = vadd.f32 %v17533_v57, %v17532_v51  ;;  %v7188_v19 = vrot.slane %v7174_v8, %v14596_v43  ;;  %v7223_v5 = vcombine.low %v7214_v12, %v7221_v10  ;;  %v5298_v41 = vrot.slane %v4822_v16, %v14559_v7 }
 0x53f   :  { %v4182_v15 = vmax.f32 %v4072_v21, 0.0  ;;  %v4682_v52 = vpop.f32.mrf.mxu1  ;;  %v4785_v21 = vmul.f32 %v14640_v36, %v4176_v39  ;;  %v7222_v29 = vcombine.low %v7200_v37, %v7207_v3  ;;  %v5290_v30 = vrot.slane %v4822_v16, %v14553_v25 }
 0x540   :  { %v4076_v11 = vpop.f32.mrf.mxu0  ;;  %4887 = vadd.xlane.f32.xlu0 %v4781_v33  ;;  %v5286_v33 = vrot.slane %v4822_v16, %v14550_v20  ;;  %v5310_v36 = vrot.slane %v4822_v16, %v14568_v28  ;;  %v5314_v52 = vrot.slane %v4822_v16, %v14573_v58  ;;  %v7237_v10 = vrot.slane %v7223_v5, %v14596_v43 }
 0x541   :  { %v14712_v13 = vmul.f32 %v4680_v14, %v4182_v15  ;;  %v4077_v48 = vadd.f32 %v4076_v11, %v3692_v22  ;;  %v4685_v61 = vpop.f32.mrf.mxu1  ;;  %v5302_v22 = vrot.slane %v4822_v16, %v14562_v34  ;;  %v5306_v15 = vrot.slane %v4822_v16, %v14565_v53 }
 0x542   :  { %v4078_v63 = vpop.f32.mrf.mxu0  ;;  %v7230_v12 = vrot.slane %v7222_v29, %v14596_v43  ;;  %v7484_v31 = vcombine.low %v5286_v33, %v5290_v30  ;;  %v7487_v16 = vcombine.low %v5310_v36, %v5314_v52 }
 0x543   :  { %v4183_v54 = vmax.f32 %v4077_v48, 0.0  ;;  %v4687_v4 = vpop.f32.mrf.mxu1  ;;  %v17534_v48 = vld [vmem:[#allocation144_spill] sm:$0xff]  ;;  %v7189_v63 = vcombine.low %v7181_v45, %v7188_v19 }
 0x544   :  { %v4081_v32 = vpop.f32.mrf.mxu0  ;;  %4891 = vadd.xlane.f32.xlu0 %v4783_v46  ;;  %v7494_v5 = vrot.slane %v7484_v31, %v14596_v43 }
 0x545   :  { %v14723_v9 = vmul.f32 %v4685_v61, %v4183_v54  ;;  %v4082_v38 = vadd.f32 %v4081_v32, %v3697_v0  ;;  %v4690_v50 = vpop.f32.mrf.mxu1  ;;  %v17535_v61 = vld [vmem:[#allocation315_spill] sm:$0xff]  ;;  %v7485_v0 = vcombine.low %v5294_v42, %v5298_v41  ;;  %v7486_v54 = vcombine.low %v5302_v22, %v5306_v15  ;;  %v17537_v32 = vld [vmem:[#allocation148_spill] sm:$0xff] }
 0x546   :  { %v4083_v14 = vpop.f32.mrf.mxu0  ;;  %v3707_v37 = vadd.f32 %v17535_v61, %v17534_v48  ;;  %v17539_v22 = vld [vmem:[#allocation152_spill] sm:$0xff]  ;;  %v17540_v15 = vld [vmem:[#allocation187_spill] sm:$0xff] }
 0x547   :  { %v4184_v6 = vmax.f32 %v4082_v38, 0.0  ;;  %v4692_v24 = vpop.f32.mrf.mxu1  ;;  %v17538_v38 = vld [vmem:[#allocation256_spill] sm:$0xff]  ;;  %v7238_v14 = vcombine.low %v7230_v12, %v7237_v10  ;;  %v7501_v33 = vrot.slane %v7485_v0, %v14596_v43  ;;  %v3717_v36 = vadd.f32 %v17540_v15, %v17539_v22  ;;  %v17543_v10 = vld [vmem:[#allocation254_spill] sm:$0xff] }
 0x548   :  { %v4086_v35 = vpop.f32.mrf.mxu0  ;;  %4895 = vadd.xlane.f32.xlu0 %v4785_v21  ;;  %v14746_v21 = vpop.xlane.xlu0 %4811  ;;  %v7515_v24 = vrot.slane %v7487_v16, %v14596_v43  ;;  %v17542_v12 = vld [vmem:[#allocation156_spill] sm:$0xff] }
 0x549   :  { %v14736_v11 = vmul.f32 %v4690_v50, %v4184_v6  ;;  %v4087_v47 = vadd.f32 %v4086_v35, %v3702_v27  ;;  %v4695_v8 = vpop.f32.mrf.mxu1  ;;  %v3712_v50 = vadd.f32 %v17538_v38, %v17537_v32  ;;  %v7508_v6 = vrot.slane %v7486_v54, %v14596_v43 }
 0x54a   :  { %v4088_v3 = vpop.f32.mrf.mxu0  ;;  %v7516_v61 = vcombine.low %v7494_v5, %v7501_v33 }
 0x54b   :  { %v4185_v46 = vmax.f32 %v4087_v47, 0.0  ;;  %v4697_v39 = vpop.f32.mrf.mxu1 }
 0x54c   :  { %v4091_v1 = vpop.f32.mrf.mxu0  ;;  %v14756_v52 = vpop.xlane.xlu0 %4815 }
 0x54d   :  { %v14742_v4 = vmul.f32 %v4695_v8, %v4185_v46  ;;  %v4092_v51 = vadd.f32 %v4091_v1, %v3707_v37  ;;  %v4700_v57 = vpop.f32.mrf.mxu1  ;;  %10186 = vperm.xlu1 %11024, %v7189_v63   ;;  %v7517_v37 = vcombine.low %v7508_v6, %v7515_v24  ;;  %v3722_v1 = vadd.f32 %v17543_v10, %v17542_v12  ;;  %v14772_v6 = vpop.xlane.xlu1 %4825 }
 0x54e   :  { %v4093_v27 = vpop.f32.mrf.mxu0 }
 0x54f   :  { %17536 = vst [vmem:[#allocation319_spill] sm:$0xff] %v14742_v4  ;;  %v4186_v45 = vmax.f32 %v4092_v51, 0.0  ;;  %v4702_v19 = vpop.f32.mrf.mxu1  ;;  %v7524_v51 = vrot.slane %v7516_v61, %v14596_v43 }
 0x550   :  { %v4096_v29 = vpop.f32.mrf.mxu0  ;;  %v14762_v31 = vpop.xlane.xlu0 %4819  ;;  %v17545_v19 = vld [vmem:[#allocation317_spill] sm:$0xff] }
 0x551   :  { %v14752_v30 = vmul.f32 %v4700_v57, %v4186_v45  ;;  %v4097_v42 = vadd.f32 %v4096_v29, %v3712_v50  ;;  %v4705_v41 = vpop.f32.mrf.mxu1  ;;  %10189 = vperm.xlu1 %11024, %v7238_v14   ;;  %v7531_v57 = vrot.slane %v7517_v37, %v14596_v43  ;;  %v17544_v45 = vld [vmem:[#allocation160_spill] sm:$0xff] }
 0x552   :  { %v4098_v35 = vpop.f32.mrf.mxu0  ;;  %v3727_v14 = vadd.f32 %v17545_v19, %v17544_v45 }
 0x553   :  { %v4187_v47 = vmax.f32 %v4097_v42, 0.0  ;;  %v4707_v8 = vpop.f32.mrf.mxu1  ;;  %v7532_v42 = vcombine.low %v7524_v51, %v7531_v57 }
 0x554   :  { %v4101_v48 = vpop.f32.mrf.mxu0  ;;  %v14770_v29 = vpop.xlane.xlu0 %4823 }
 0x555   :  { %v14758_v3 = vmul.f32 %v4705_v41, %v4187_v47  ;;  %v4102_v46 = vadd.f32 %v4101_v48, %v3717_v36  ;;  %v4710_v39 = vpop.f32.mrf.mxu1  ;;  %v17547_v36 = vld [vmem:[#allocation164_spill] sm:$0xff] }
 0x556   :  { %v4103_v63 = vpop.f32.mrf.mxu0  ;;  %v17548_v47 = vld [vmem:[#allocation260_spill] sm:$0xff] }
 0x557   :  { %17541 = vst [vmem:[#allocation264_spill] sm:$0xff] %v14758_v3  ;;  %v4188_v0 = vmax.f32 %v4102_v46, 0.0  ;;  %v4712_v54 = vpop.f32.mrf.mxu1  ;;  %v3732_v8 = vadd.f32 %v17548_v47, %v17547_v36  ;;  %v14780_v46 = vpop.xlane.xlu1 %4829 }
 0x558   :  { %v4106_v16 = vpop.f32.mrf.mxu0  ;;  %v14778_v48 = vpop.xlane.xlu0 %4827  ;;  %v17550_v54 = vld [vmem:[#allocation193_spill] sm:$0xff] }
 0x559   :  { %v14766_v27 = vmul.f32 %v4710_v39, %v4188_v0  ;;  %v4107_v32 = vadd.f32 %v4106_v16, %v3722_v1  ;;  %v4715_v38 = vpop.f32.mrf.mxu1  ;;  %v17549_v0 = vld [vmem:[#allocation168_spill] sm:$0xff] }
 0x55a   :  { %v4108_v50 = vpop.f32.mrf.mxu0  ;;  %v3737_v16 = vadd.f32 %v17550_v54, %v17549_v0  ;;  %v5126_v0 = vrot.slane %v14746_v21, %v14550_v20  ;;  %v5130_v54 = vrot.slane %v14746_v21, %v14553_v25 }
 0x55b   :  { %v4189_v5 = vmax.f32 %v4107_v32, 0.0  ;;  %v4717_v33 = vpop.f32.mrf.mxu1 }
 0x55c   :  { %v4111_v24 = vpop.f32.mrf.mxu0  ;;  %v14786_v51 = vpop.xlane.xlu0 %4831  ;;  %v17552_v33 = vld [vmem:[#allocation172_spill] sm:$0xff] }
 0x55d   :  { %v14774_v41 = vmul.f32 %v4715_v38, %v4189_v5  ;;  %v4112_v35 = vadd.f32 %v4111_v24, %v3727_v14  ;;  %v4720_v22 = vpop.f32.mrf.mxu1  ;;  %v14788_v38 = vpop.xlane.xlu1 %4833  ;;  %v17553_v24 = vld [vmem:[#allocation258_spill] sm:$0xff] }
 0x55e   :  { %v4113_v15 = vpop.f32.mrf.mxu0  ;;  %10207 = vperm.xlu0 %11023, %v7532_v42   ;;  %v3742_v42 = vadd.f32 %v17553_v24, %v17552_v33  ;;  %v7239_v24 = vcombine.low %v5126_v0, %v5130_v54  ;;  %v5178_v0 = vrot.slane %v14698_v44, %v14565_v53  ;;  %v5182_v54 = vrot.slane %v14698_v44, %v14568_v28 }
 0x55f   :  { %17546 = vst [vmem:[#allocation191_spill] sm:$0xff] %v14774_v41  ;;  %v4190_v61 = vmax.f32 %v4112_v35, 0.0  ;;  %v4722_v37 = vpop.f32.mrf.mxu1 }
 0x560   :  { %v4116_v39 = vpop.f32.mrf.mxu0  ;;  %v14794_v35 = vpop.xlane.xlu0 %4835  ;;  %v7290_v41 = vcombine.low %v5174_v49, %v5178_v0  ;;  %v5350_v49 = vrot.slane %v14772_v6, %v14550_v20 }
 0x561   :  { %v14782_v63 = vmul.f32 %v4720_v22, %v4190_v61  ;;  %v4117_v12 = vadd.f32 %v4116_v39, %v3732_v8  ;;  %v4725_v10 = vpop.f32.mrf.mxu1  ;;  %v14796_v36 = vpop.xlane.xlu1 %4837 }
 0x562   :  { %v4118_v1 = vpop.f32.mrf.mxu0 }
 0x563   :  { %v4191_v57 = vmax.f32 %v4117_v12, 0.0  ;;  %v4727_v32 = vpop.f32.mrf.mxu1 }
 0x564   :  { %v4121_v50 = vpop.f32.mrf.mxu0  ;;  %v5142_v32 = vrot.slane %v14746_v21, %v14562_v34 }
 0x565   :  { %v14790_v45 = vmul.f32 %v4725_v10, %v4191_v57  ;;  %v4122_v19 = vadd.f32 %v4121_v50, %v3737_v16  ;;  %v4730_v14 = vpop.f32.mrf.mxu1  ;;  %v14804_v10 = vpop.xlane.xlu0 %4839  ;;  %v5134_v16 = vrot.slane %v14746_v21, %v14556_v56  ;;  %v5138_v57 = vrot.slane %v14746_v21, %v14559_v7 }
 0x566   :  { %v4123_v5 = vpop.f32.mrf.mxu0  ;;  %v14806_v1 = vpop.xlane.xlu1 %4841  ;;  %v5146_v50 = vrot.slane %v14746_v21, %v14565_v53 }
 0x567   :  { %17551 = vst [vmem:[#allocation262_spill] sm:$0xff] %v14790_v45  ;;  %v4192_v22 = vmax.f32 %v4122_v19, 0.0  ;;  %v4732_v15 = vpop.f32.mrf.mxu1  ;;  %v5150_v19 = vrot.slane %v14746_v21, %v14568_v28 }
 0x568   :  { %v4126_v47 = vpop.f32.mrf.mxu0 }
 0x569   :  { %v14798_v8 = vmul.f32 %v4730_v14, %v4192_v22  ;;  %v14800_v61 = vpop.f32.mrf.mxu1  ;;  %v14802_v37 = vadd.f32 %v4126_v47, %v3742_v42  ;;  %v5154_v14 = vrot.slane %v14746_v21, %v14573_v58  ;;  %v14824_v5 = vpop.xlane.xlu0 %4843  ;;  %v7240_v42 = vcombine.low %v5134_v16, %v5138_v57 }
 0x56a   :  { %17555 = vst [vmem:[#allocation268_spill] sm:$0xff] %v14800_v61  ;;  %v4128_v39 = vpop.f32.mrf.mxu0  ;;  %17557 = vst [vmem:[#allocation266_spill] sm:$0xff] %v14824_v5  ;;  %v14826_v33 = vpop.xlane.xlu1 %4845  ;;  %v7241_v22 = vcombine.low %v5142_v32, %v5146_v50  ;;  %v5158_v47 = vrot.slane %v14698_v44, %v14550_v20  ;;  %v5170_v21 = vrot.slane %v14698_v44, %v14559_v7 }
 0x56b   :  { %17554 = vst [vmem:[#allocation321_spill] sm:$0xff] %v14798_v8  ;;  %17556 = vst [vmem:[#allocation197_spill] sm:$0xff] %v14802_v37  ;;  %v4737_v12 = vpop.f32.mrf.mxu1  ;;  %v7242_v15 = vcombine.low %v5150_v19, %v5154_v14  ;;  %v5162_v39 = vrot.slane %v14698_v44, %v14553_v25  ;;  %v5186_v16 = vrot.slane %v14698_v44, %v14573_v58 }
 0x56c   :  { %v5166_v12 = vrot.slane %v14698_v44, %v14556_v56  ;;  %v7249_v50 = vrot.slane %v7239_v24, %v14596_v43  ;;  %v7256_v19 = vrot.slane %v7240_v42, %v14596_v43  ;;  %v7263_v14 = vrot.slane %v7241_v22, %v14596_v43 }
 0x56d   :  { %v14844_v57 = vpop.xlane.xlu0 %4847  ;;  %v7270_v61 = vrot.slane %v7242_v15, %v14596_v43  ;;  %v7288_v37 = vcombine.low %v5158_v47, %v5162_v39  ;;  %v7291_v3 = vcombine.low %v5182_v54, %v5186_v16  ;;  %v7312_v42 = vrot.slane %v7290_v41, %v14596_v43 }
 0x56e   :  { %17558 = vst [vmem:[#allocation323_spill] sm:$0xff] %v14844_v57  ;;  %v14846_v32 = vpop.xlane.xlu1 %4849  ;;  %v7289_v45 = vcombine.low %v5166_v12, %v5170_v21  ;;  %v7271_v57 = vcombine.low %v7249_v50, %v7256_v19  ;;  %v5354_v47 = vrot.slane %v14772_v6, %v14553_v25  ;;  %v5370_v41 = vrot.slane %v14772_v6, %v14565_v53 }
 0x56f   :  { %v7272_v4 = vcombine.low %v7263_v14, %v7270_v61  ;;  %v7319_v22 = vrot.slane %v7291_v3, %v14596_v43  ;;  %v5358_v61 = vrot.slane %v14772_v6, %v14556_v56  ;;  %v5366_v3 = vrot.slane %v14772_v6, %v14562_v34 }
 0x570   :  { %v7305_v24 = vrot.slane %v7289_v45, %v14596_v43  ;;  %v5362_v45 = vrot.slane %v14772_v6, %v14559_v7  ;;  %v5378_v39 = vrot.slane %v14772_v6, %v14573_v58  ;;  %v7279_v0 = vrot.slane %v7271_v57, %v14596_v43 }
 0x571   :  { %v14853_v5 = vpop.xlane.xlu0 %4851  ;;  %v7321_v16 = vcombine.low %v7312_v42, %v7319_v22  ;;  %v7582_v50 = vcombine.low %v5350_v49, %v5354_v47  ;;  %v7584_v14 = vcombine.low %v5366_v3, %v5370_v41 }
 0x572   :  { %17559 = vst [vmem:[#allocation272_spill] sm:$0xff] %v14853_v5  ;;  %v14855_v44 = vpop.xlane.xlu1 %4853  ;;  %v7583_v19 = vcombine.low %v5358_v61, %v5362_v45  ;;  %v17568_v61 = vlaneseq }
 0x573   :  { %17560 = vst [vmem:[#allocation195_spill] sm:$0xff] %v14855_v44 }
 0x574   :  { %v7599_v57 = vrot.slane %v7583_v19, %v14596_v43  ;;  %v14903_v45 = vand.u32 127, %v17568_v61  ;;  %v5234_v61 = vrot.slane %v14710_v17, %v14559_v7 }
 0x575   :  { %4885 = vadd.xlane.f32.xlu1 %v14622_v2  ;;  %v7298_v2 = vrot.slane %v7288_v37, %v14596_v43  ;;  %v14861_v8 = vpop.xlane.xlu0 %4855  ;;  %v5374_v37 = vrot.slane %v14772_v6, %v14568_v28 }
 0x576   :  { %17561 = vst [vmem:[#allocation270_spill] sm:$0xff] %v14861_v8  ;;  %v14863_v15 = vpop.xlane.xlu1 %4857 }
 0x577   :  { %17562 = vst [vmem:[#allocation325_spill] sm:$0xff] %v14863_v15  ;;  %v7320_v54 = vcombine.low %v7298_v2, %v7305_v24  ;;  %v7585_v8 = vcombine.low %v5374_v37, %v5378_v39 }
 0x579   :  { %v14882_v12 = vpop.xlane.xlu0 %4859  ;;  %v7328_v6 = vrot.slane %v7320_v54, %v14596_v43  ;;  %v7613_v2 = vrot.slane %v7585_v8, %v14596_v43 }
 0x57a   :  { %17563 = vst [vmem:[#allocation276_spill] sm:$0xff] %v14882_v12  ;;  %v14884_v21 = vpop.xlane.xlu1 %4861  ;;  %v7335_v12 = vrot.slane %v7321_v16, %v14596_v43 }
 0x57b   :  { %17564 = vst [vmem:[#allocation201_spill] sm:$0xff] %v14884_v21  ;;  %v7592_v21 = vrot.slane %v7582_v50, %v14596_v43 }
 0x57c   :  { %v7336_v22 = vcombine.low %v7328_v6, %v7335_v12  ;;  %v5190_v6 = vrot.slane %v14756_v52, %v14550_v20 }
 0x57d   :  { %4899 = vadd.xlane.f32.xlu0 %v14661_v55  ;;  %v7286_v55 = vrot.slane %v7272_v4, %v14596_v43  ;;  %v14888_v5 = vpop.xlane.xlu0 %4863  ;;  %v7606_v4 = vrot.slane %v7584_v14, %v14596_v43  ;;  %v7614_v49 = vcombine.low %v7592_v21, %v7599_v57  ;;  %v5194_v57 = vrot.slane %v14756_v52, %v14553_v25 }
 0x57e   :  { %17565 = vst [vmem:[#allocation274_spill] sm:$0xff] %v14888_v5  ;;  %v14890_v15 = vpop.xlane.xlu1 %4865  ;;  %v5414_v5 = vrot.slane %v14780_v46, %v14550_v20 }
 0x57f   :  { %v7287_v44 = vcombine.low %v7279_v0, %v7286_v55  ;;  %v7615_v47 = vcombine.low %v7606_v4, %v7613_v2  ;;  %v7622_v37 = vrot.slane %v7614_v49, %v14596_v43  ;;  %v14921_v55 = vsub.s32 %v14903_v45, %v14545_v59 }
 0x580   :  { %v5198_v4 = vrot.slane %v14756_v52, %v14556_v56  ;;  %v5202_v2 = vrot.slane %v14756_v52, %v14559_v7  ;;  %v5210_v49 = vrot.slane %v14756_v52, %v14565_v53 }
 0x581   :  { %v14898_v24 = vpop.xlane.xlu0 %4867  ;;  %v7629_v8 = vrot.slane %v7615_v47, %v14596_v43  ;;  %17574 = vst [vmem:[#allocation282_spill] sm:$0xff] %v14921_v55  ;;  %v5214_v47 = vrot.slane %v14756_v52, %v14568_v28 }
 0x582   :  { %17566 = vst [vmem:[#allocation327_spill] sm:$0xff] %v14898_v24  ;;  %v14900_v42 = vpop.xlane.xlu1 %4869 }
 0x583   :  { %17567 = vst [vmem:[#allocation280_spill] sm:$0xff] %v14900_v42  ;;  %v7630_v12 = vcombine.low %v7622_v37, %v7629_v8  ;;  %v5218_v37 = vrot.slane %v14756_v52, %v14573_v58  ;;  %v7337_v8 = vcombine.low %v5190_v6, %v5194_v57  ;;  %v5246_v6 = vrot.slane %v14710_v17, %v14568_v28 }
 0x584   :  { %v5250_v57 = vrot.slane %v14710_v17, %v14573_v58 }
 0x585   :  { %v14905_v3 = vpop.xlane.xlu0 %4871 }
 0x586   :  { %10192 = vperm.xlu1 %11024, %v7287_v44   ;;  %17569 = vst [vmem:[#allocation199_spill] sm:$0xff] %v14905_v3  ;;  %v10377_v44 = vadd.s32 4294967288, %v14903_v45  ;;  %v7389_v24 = vcombine.low %v5246_v6, %v5250_v57 }
 0x588   :  { %v14907_v41 = vpop.xlane.xlu1 %4873  ;;  %v14917_v21 = vsub.s32 %v10377_v44, %v14545_v59  ;;  %v7338_v44 = vcombine.low %v5198_v4, %v5202_v2  ;;  %v7347_v4 = vrot.slane %v7337_v8, %v14596_v43  ;;  %v5426_v8 = vrot.slane %v14780_v46, %v14559_v7 }
 0x589   :  { %17570 = vst [vmem:[#allocation278_spill] sm:$0xff] %v14907_v41 }
 0x58a   :  { %10195 = vperm.xlu1 %11024, %v7336_v22   ;;  %17573 = vst [vmem:[#allocation205_spill] sm:$0xff] %v14917_v21  ;;  %v5206_v22 = vrot.slane %v14756_v52, %v14562_v34  ;;  %v5242_v52 = vrot.slane %v14710_v17, %v14565_v53  ;;  %v7354_v2 = vrot.slane %v7338_v44, %v14596_v43 }
 0x58b   :  { %v5430_v44 = vrot.slane %v14780_v46, %v14562_v34 }
 0x58c   :  { %v14912_v39 = vpop.xlane.xlu0 %4875 }
 0x58d   :  { %17571 = vst [vmem:[#allocation329_spill] sm:$0xff] %v14912_v39  ;;  %v5238_v39 = vrot.slane %v14710_v17, %v14562_v34 }
 0x58f   :  { %v7388_v3 = vcombine.low %v5238_v39, %v5242_v52  ;;  %v5438_v39 = vrot.slane %v14780_v46, %v14568_v28  ;;  %v7417_v52 = vrot.slane %v7389_v24, %v14596_v43 }
 0x590   :  { %v14914_v0 = vpop.xlane.xlu1 %4877 }
 0x591   :  { %17572 = vst [vmem:[#allocation284_spill] sm:$0xff] %v14914_v0 }
 0x593   :  { %10213 = vperm.xlu0 %11023, %v7630_v12   ;;  %v7339_v12 = vcombine.low %v5206_v22, %v5210_v49 }
 0x594   :  { %v10184_v54 = vpop.permute.xlu1 %10183  ;;  %v10181_v16 = vpop.permute.xlu0 %10180 }
 0x595   :  { %v10381_v50 = vrot.slane %v10184_v54, %v14917_v21  ;;  %v10376_v19 = vrot.slane %v10181_v16, %v14921_v55  ;;  %v7340_v54 = vcombine.low %v5214_v47, %v5218_v37  ;;  %v5222_v16 = vrot.slane %v14710_v17, %v14550_v20 }
 0x596   :  { %v7361_v22 = vrot.slane %v7339_v12, %v14596_v43  ;;  %v5442_v12 = vrot.slane %v14780_v46, %v14573_v58 }
 0x597   :  { %v14926_v14 = vsel %vm10382_vm0, %v10381_v50, %v10376_v19  ;;  %v5226_v50 = vrot.slane %v14710_v17, %v14553_v25  ;;  %v5230_v19 = vrot.slane %v14710_v17, %v14556_v56  ;;  %v7368_v49 = vrot.slane %v7340_v54, %v14596_v43 }
 0x598   :  { %v5418_v17 = vrot.slane %v14780_v46, %v14553_v25  ;;  %v7369_v54 = vcombine.low %v7347_v4, %v7354_v2  ;;  %v7683_v21 = vcombine.low %v5438_v39, %v5442_v12 }
 0x599   :  { %v7386_v47 = vcombine.low %v5222_v16, %v5226_v50  ;;  %v7387_v37 = vcombine.low %v5230_v19, %v5234_v61  ;;  %v5434_v61 = vrot.slane %v14780_v46, %v14565_v53  ;;  %v7370_v16 = vcombine.low %v7361_v22, %v7368_v49 }
 0x59a   :  { %v7680_v6 = vcombine.low %v5414_v5, %v5418_v17  ;;  %v7377_v0 = vrot.slane %v7369_v54, %v14596_v43 }
 0x59b   :  { %v7396_v50 = vrot.slane %v7386_v47, %v14596_v43  ;;  %v7403_v19 = vrot.slane %v7387_v37, %v14596_v43  ;;  %v7682_v55 = vcombine.low %v5430_v44, %v5434_v61  ;;  %v7384_v41 = vrot.slane %v7370_v16, %v14596_v43 }
 0x59c   :  { %v7690_v4 = vrot.slane %v7680_v6, %v14596_v43  ;;  %v10384_v44 = vadd.s32 4294967280, %v14903_v45  ;;  %v5266_v6 = vrot.slane %v14762_v31, %v14559_v7 }
 0x59d   :  { %v7418_v42 = vcombine.low %v7396_v50, %v7403_v19  ;;  %v7704_v22 = vrot.slane %v7682_v55, %v14596_v43  ;;  %v7385_v49 = vcombine.low %v7377_v0, %v7384_v41  ;;  %v5254_v19 = vrot.slane %v14762_v31, %v14550_v20 }
 0x59e   :  { %v15000_v41 = vsub.s32 %v10384_v44, %v14545_v59 }
 0x59f   :  { %v7426_v5 = vrot.slane %v7418_v42, %v14596_v43  ;;  %v10391_v42 = vadd.s32 4294967272, %v14903_v45 }
 0x5a0   :  { %17575 = vst [vmem:[#allocation331_spill] sm:$0xff] %v15000_v41 }
 0x5a1   :  { %v15005_v39 = vsub.s32 %v10391_v42, %v14545_v59 }
 0x5a3   :  { %17576 = vst [vmem:[#allocation288_spill] sm:$0xff] %v15005_v39 }
 0x5ae   :  { %4889 = vadd.xlane.f32.xlu1 %v14630_v18  ;;  %v5422_v18 = vrot.slane %v14780_v46, %v14556_v56 }
 0x5b0   :  { %v7681_v57 = vcombine.low %v5422_v18, %v5426_v8 }
 0x5b2   :  { %4903 = vadd.xlane.f32.xlu0 %v14689_v62  ;;  %v7410_v62 = vrot.slane %v7388_v3, %v14596_v43  ;;  %v7697_v2 = vrot.slane %v7681_v57, %v14596_v43  ;;  %v7711_v3 = vrot.slane %v7683_v21, %v14596_v43  ;;  %v5274_v57 = vrot.slane %v14762_v31, %v14565_v53 }
 0x5b4   :  { %v7419_v46 = vcombine.low %v7410_v62, %v7417_v52  ;;  %v7712_v47 = vcombine.low %v7690_v4, %v7697_v2  ;;  %v7713_v37 = vcombine.low %v7704_v22, %v7711_v3  ;;  %v5258_v62 = vrot.slane %v14762_v31, %v14553_v25 }
 0x5b5   :  { %v5262_v52 = vrot.slane %v14762_v31, %v14556_v56  ;;  %v5282_v4 = vrot.slane %v14762_v31, %v14573_v58 }
 0x5b6   :  { %v7433_v24 = vrot.slane %v7419_v46, %v14596_v43  ;;  %v7720_v18 = vrot.slane %v7712_v47, %v14596_v43  ;;  %v7727_v8 = vrot.slane %v7713_v37, %v14596_v43  ;;  %v5278_v46 = vrot.slane %v14762_v31, %v14568_v28 }
 0x5b7   :  { %v7435_v2 = vcombine.low %v5254_v19, %v5258_v62  ;;  %v7436_v22 = vcombine.low %v5262_v52, %v5266_v6  ;;  %v5486_v47 = vrot.slane %v14788_v38, %v14556_v56  ;;  %v5490_v37 = vrot.slane %v14788_v38, %v14559_v7 }
 0x5b8   :  { %v7434_v17 = vcombine.low %v7426_v5, %v7433_v24  ;;  %v7728_v55 = vcombine.low %v7720_v18, %v7727_v8  ;;  %v5478_v5 = vrot.slane %v14788_v38, %v14550_v20  ;;  %v5482_v24 = vrot.slane %v14788_v38, %v14553_v25 }
 0x5b9   :  { %v5502_v18 = vrot.slane %v14788_v38, %v14568_v28  ;;  %v5506_v8 = vrot.slane %v14788_v38, %v14573_v58  ;;  %v7445_v44 = vrot.slane %v7435_v2, %v14596_v43 }
 0x5bf   :  { %10198 = vperm.xlu1 %11024, %v7385_v49   ;;  %v7438_v49 = vcombine.low %v5278_v46, %v5282_v4 }
 0x5c3   :  { %10201 = vperm.xlu1 %11024, %v7434_v17   ;;  %v5494_v17 = vrot.slane %v14788_v38, %v14562_v34 }
 0x5c5   :  { %v14997_v61 = vpop.xlane.xlu1 %4881 }
 0x5c8   :  { %10219 = vperm.xlu0 %11023, %v7728_v55   ;;  %v7452_v55 = vrot.slane %v7436_v22, %v14596_v43 }
 0x5c9   :  { %v10187_v0 = vpop.permute.xlu1 %10186 }
 0x5ca   :  { %v10388_v21 = vrot.slane %v10187_v0, %v15000_v41  ;;  %v7466_v0 = vrot.slane %v7438_v49, %v14596_v43  ;;  %v10398_v49 = vadd.s32 4294967264, %v14903_v45 }
 0x5cc   :  { %v10390_v12 = vsel %vm10389_vm1, %v10388_v21, %v14926_v14  ;;  %v5270_v14 = vrot.slane %v14762_v31, %v14562_v34  ;;  %v5498_v31 = vrot.slane %v14788_v38, %v14565_v53  ;;  %v7779_v21 = vcombine.low %v5486_v47, %v5490_v37 }
 0x5cd   :  { %v10190_v54 = vpop.permute.xlu1 %10189  ;;  %v10405_v47 = vadd.s32 4294967256, %v14903_v45 }
 0x5ce   :  { %v10395_v16 = vrot.slane %v10190_v54, %v15005_v39  ;;  %v7437_v3 = vcombine.low %v5270_v14, %v5274_v57  ;;  %v7467_v54 = vcombine.low %v7445_v44, %v7452_v55  ;;  %v7795_v62 = vrot.slane %v7779_v21, %v14596_v43 }
 0x5cf   :  { %v5330_v21 = vrot.slane %v14770_v29, %v14559_v7 }
 0x5d0   :  { %v10397_v50 = vsel %vm10396_vm2, %v10395_v16, %v10390_v12  ;;  %v7459_v42 = vrot.slane %v7437_v3, %v14596_v43  ;;  %v7781_v12 = vcombine.low %v5502_v18, %v5506_v8  ;;  %v7475_v6 = vrot.slane %v7467_v54, %v14596_v43 }
 0x5d1   :  { %v5346_v54 = vrot.slane %v14770_v29, %v14573_v58 }
 0x5d2   :  { %v7468_v16 = vcombine.low %v7459_v42, %v7466_v0  ;;  %v7809_v52 = vrot.slane %v7781_v12, %v14596_v43  ;;  %v5318_v42 = vrot.slane %v14770_v29, %v14550_v20  ;;  %v5322_v0 = vrot.slane %v14770_v29, %v14553_v25 }
 0x5d3   :  { %v5342_v12 = vrot.slane %v14770_v29, %v14568_v28 }
 0x5d4   :  { %v7482_v14 = vrot.slane %v7468_v16, %v14596_v43  ;;  %v7533_v16 = vcombine.low %v5318_v42, %v5322_v0 }
 0x5d6   :  { %v7483_v4 = vcombine.low %v7475_v6, %v7482_v14  ;;  %v5546_v6 = vrot.slane %v14796_v36, %v14553_v25  ;;  %v5550_v14 = vrot.slane %v14796_v36, %v14556_v56 }
 0x5e7   :  { %4907 = vadd.xlane.f32.xlu0 %v14712_v13  ;;  %4893 = vadd.xlane.f32.xlu1 %v14638_v60  ;;  %v7778_v13 = vcombine.low %v5478_v5, %v5482_v24  ;;  %v7780_v60 = vcombine.low %v5494_v17, %v5498_v31  ;;  %v15061_v24 = vsub.s32 %v10398_v49, %v14545_v59 }
 0x5e8   :  { %v15066_v31 = vsub.s32 %v10405_v47, %v14545_v59 }
 0x5e9   :  { %v7788_v19 = vrot.slane %v7778_v13, %v14596_v43  ;;  %v7802_v38 = vrot.slane %v7780_v60, %v14596_v43  ;;  %17577 = vst [vmem:[#allocation203_spill] sm:$0xff] %v15061_v24  ;;  %v5326_v13 = vrot.slane %v14770_v29, %v14556_v56  ;;  %v5338_v60 = vrot.slane %v14770_v29, %v14565_v53 }
 0x5ea   :  { %17578 = vst [vmem:[#allocation286_spill] sm:$0xff] %v15066_v31 }
 0x5eb   :  { %v7810_v57 = vcombine.low %v7788_v19, %v7795_v62  ;;  %v7811_v46 = vcombine.low %v7802_v38, %v7809_v52  ;;  %v7534_v19 = vcombine.low %v5326_v13, %v5330_v21  ;;  %v7536_v38 = vcombine.low %v5342_v12, %v5346_v54 }
 0x5ec   :  { %v5542_v52 = vrot.slane %v14796_v36, %v14550_v20 }
 0x5ed   :  { %v7818_v2 = vrot.slane %v7810_v57, %v14596_v43  ;;  %v7825_v22 = vrot.slane %v7811_v46, %v14596_v43  ;;  %v5554_v57 = vrot.slane %v14796_v36, %v14559_v7  ;;  %v5558_v46 = vrot.slane %v14796_v36, %v14562_v34 }
 0x5ee   :  { %v7564_v47 = vrot.slane %v7536_v38, %v14596_v43 }
 0x5ef   :  { %v7826_v3 = vcombine.low %v7818_v2, %v7825_v22  ;;  %v5570_v2 = vrot.slane %v14796_v36, %v14573_v58  ;;  %v7543_v22 = vrot.slane %v7533_v16, %v14596_v43 }
 0x5f8   :  { %10204 = vperm.xlu1 %11024, %v7483_v4   ;;  %v5566_v4 = vrot.slane %v14796_v36, %v14568_v28 }
 0x5fd   :  { %10225 = vperm.xlu0 %11023, %v7826_v3   ;;  %v7550_v3 = vrot.slane %v7534_v19, %v14596_v43 }
 0x5fe   :  { %v15058_v5 = vpop.xlane.xlu1 %4885 }
 0x602   :  { %v10193_v37 = vpop.permute.xlu1 %10192 }
 0x603   :  { %v10402_v17 = vrot.slane %v10193_v37, %v15061_v24  ;;  %v7877_v37 = vcombine.low %v5550_v14, %v5554_v57 }
 0x605   :  { %v10404_v18 = vsel %vm10403_vm3, %v10402_v17, %v10397_v50  ;;  %v5334_v50 = vrot.slane %v14770_v29, %v14562_v34  ;;  %v5562_v29 = vrot.slane %v14796_v36, %v14565_v53  ;;  %v7879_v17 = vcombine.low %v5566_v4, %v5570_v2 }
 0x606   :  { %v10196_v8 = vpop.permute.xlu1 %10195  ;;  %v7893_v42 = vrot.slane %v7877_v37, %v14596_v43  ;;  %v5402_v37 = vrot.slane %v14778_v48, %v14565_v53 }
 0x607   :  { %v10409_v44 = vrot.slane %v10196_v8, %v15066_v31  ;;  %v7535_v62 = vcombine.low %v5334_v50, %v5338_v60  ;;  %v7907_v0 = vrot.slane %v7879_v17, %v14596_v43  ;;  %v5410_v17 = vrot.slane %v14778_v48, %v14573_v58 }
 0x609   :  { %v10411_v55 = vsel %vm10410_vm4, %v10409_v44, %v10404_v18  ;;  %v7557_v49 = vrot.slane %v7535_v62, %v14596_v43  ;;  %v7565_v18 = vcombine.low %v7543_v22, %v7550_v3  ;;  %v10412_v62 = vadd.s32 4294967248, %v14903_v45 }
 0x60a   :  { %v5382_v3 = vrot.slane %v14778_v48, %v14550_v20 }
 0x60b   :  { %v7566_v8 = vcombine.low %v7557_v49, %v7564_v47  ;;  %v7573_v13 = vrot.slane %v7565_v18, %v14596_v43  ;;  %v5386_v49 = vrot.slane %v14778_v48, %v14553_v25  ;;  %v5390_v47 = vrot.slane %v14778_v48, %v14556_v56 }
 0x60d   :  { %v7580_v21 = vrot.slane %v7566_v8, %v14596_v43  ;;  %v7631_v18 = vcombine.low %v5382_v3, %v5386_v49 }
 0x60f   :  { %v7581_v12 = vcombine.low %v7573_v13, %v7580_v21  ;;  %v5614_v13 = vrot.slane %v14806_v1, %v14556_v56  ;;  %v5618_v21 = vrot.slane %v14806_v1, %v14559_v7 }
 0x61c   :  { %4911 = vadd.xlane.f32.xlu0 %v14736_v11  ;;  %4897 = vadd.xlane.f32.xlu1 %v14651_v40  ;;  %v7876_v11 = vcombine.low %v5542_v52, %v5546_v6  ;;  %v7878_v40 = vcombine.low %v5558_v46, %v5562_v29  ;;  %v15121_v52 = vsub.s32 %v10412_v62, %v14545_v59  ;;  %v10419_v6 = vadd.s32 4294967240, %v14903_v45 }
 0x61e   :  { %v7886_v44 = vrot.slane %v7876_v11, %v14596_v43  ;;  %v7900_v36 = vrot.slane %v7878_v40, %v14596_v43  ;;  %17580 = vst [vmem:[#allocation292_spill] sm:$0xff] %v15121_v52  ;;  %v15126_v46 = vsub.s32 %v10419_v6, %v14545_v59  ;;  %v5394_v11 = vrot.slane %v14778_v48, %v14559_v7 }
 0x61f   :  { %v5406_v40 = vrot.slane %v14778_v48, %v14568_v28  ;;  %v7975_v6 = vcombine.low %v5614_v13, %v5618_v21  ;;  %v10433_v13 = vadd.s32 4294967224, %v14903_v45 }
 0x620   :  { %v7908_v50 = vcombine.low %v7886_v44, %v7893_v42  ;;  %v7909_v60 = vcombine.low %v7900_v36, %v7907_v0  ;;  %17581 = vst [vmem:[#allocation209_spill] sm:$0xff] %v15126_v46  ;;  %v7632_v8 = vcombine.low %v5390_v47, %v5394_v11  ;;  %v5606_v36 = vrot.slane %v14806_v1, %v14550_v20 }
 0x621   :  { %v7634_v42 = vcombine.low %v5406_v40, %v5410_v17  ;;  %v5610_v0 = vrot.slane %v14806_v1, %v14553_v25 }
 0x622   :  { %v7916_v54 = vrot.slane %v7908_v50, %v14596_v43  ;;  %v7923_v16 = vrot.slane %v7909_v60, %v14596_v43  ;;  %v5622_v50 = vrot.slane %v14806_v1, %v14562_v34  ;;  %v5630_v60 = vrot.slane %v14806_v1, %v14568_v28 }
 0x623   :  { %v7662_v62 = vrot.slane %v7634_v42, %v14596_v43 }
 0x624   :  { %v7924_v19 = vcombine.low %v7916_v54, %v7923_v16  ;;  %v7641_v54 = vrot.slane %v7631_v18, %v14596_v43  ;;  %v7648_v16 = vrot.slane %v7632_v8, %v14596_v43 }
 0x62d   :  { %10210 = vperm.xlu1 %11024, %v7581_v12   ;;  %v5634_v12 = vrot.slane %v14806_v1, %v14573_v58 }
 0x632   :  { %10231 = vperm.xlu0 %11023, %v7924_v19  }
 0x637   :  { %v15118_v38 = vpop.xlane.xlu1 %4889 }
 0x638   :  { %17579 = vst [vmem:[#allocation333_spill] sm:$0xff] %v15118_v38 }
 0x63b   :  { %v10199_v14 = vpop.permute.xlu1 %10198 }
 0x63c   :  { %v10416_v57 = vrot.slane %v10199_v14, %v15121_v52  ;;  %v7977_v14 = vcombine.low %v5630_v60, %v5634_v12  ;;  %v15197_v60 = vsub.s32 %v10433_v13, %v14545_v59 }
 0x63e   :  { %v10418_v29 = vsel %vm10417_vm5, %v10416_v57, %v10411_v55  ;;  %v5398_v55 = vrot.slane %v14778_v48, %v14562_v34  ;;  %v5626_v48 = vrot.slane %v14806_v1, %v14565_v53  ;;  %v15171_v57 = vpop.xlane.xlu0 %4879  ;;  %v7991_v1 = vrot.slane %v7975_v6, %v14596_v43  ;;  %17589 = vst [vmem:[#allocation213_spill] sm:$0xff] %v15197_v60 }
 0x63f   :  { %v10202_v4 = vpop.permute.xlu1 %10201  ;;  %17582 = vst [vmem:[#allocation290_spill] sm:$0xff] %v15171_v57  ;;  %v8005_v49 = vrot.slane %v7977_v14, %v14596_v43  ;;  %v5446_v6 = vrot.slane %v14786_v51, %v14550_v20  ;;  %v5454_v14 = vrot.slane %v14786_v51, %v14556_v56 }
 0x640   :  { %v10423_v2 = vrot.slane %v10202_v4, %v15126_v46  ;;  %v7633_v44 = vcombine.low %v5398_v55, %v5402_v37 }
 0x642   :  { %v15131_v22 = vsel %vm10424_vm6, %v10423_v2, %v10418_v29  ;;  %v7655_v19 = vrot.slane %v7633_v44, %v14596_v43  ;;  %v7663_v29 = vcombine.low %v7641_v54, %v7648_v16  ;;  %v15179_v55 = vpop.xlane.xlu0 %4883 }
 0x643   :  { %17583 = vst [vmem:[#allocation335_spill] sm:$0xff] %v15179_v55 }
 0x644   :  { %v7664_v4 = vcombine.low %v7655_v19, %v7662_v62  ;;  %v7671_v47 = vrot.slane %v7663_v29, %v14596_v43  ;;  %v5458_v29 = vrot.slane %v14786_v51, %v14559_v7 }
 0x646   :  { %v7678_v11 = vrot.slane %v7664_v4, %v14596_v43  ;;  %v15183_v44 = vpop.xlane.xlu0 %4887  ;;  %v5462_v4 = vrot.slane %v14786_v51, %v14562_v34 }
 0x647   :  { %17584 = vst [vmem:[#allocation296_spill] sm:$0xff] %v15183_v44 }
 0x648   :  { %v7679_v17 = vcombine.low %v7671_v47, %v7678_v11  ;;  %v5670_v11 = vrot.slane %v14826_v33, %v14550_v20 }
 0x651   :  { %4915 = vadd.xlane.f32.xlu0 %v14752_v30  ;;  %4901 = vadd.xlane.f32.xlu1 %v14680_v26  ;;  %v7974_v30 = vcombine.low %v5606_v36, %v5610_v0  ;;  %v7976_v26 = vcombine.low %v5622_v50, %v5626_v48  ;;  %v15185_v36 = vpop.xlane.xlu0 %4891  ;;  %v10426_v0 = vadd.s32 4294967232, %v14903_v45 }
 0x652   :  { %17585 = vst [vmem:[#allocation207_spill] sm:$0xff] %v15185_v36 }
 0x653   :  { %v7984_v2 = vrot.slane %v7974_v30, %v14596_v43  ;;  %v7998_v3 = vrot.slane %v7976_v26, %v14596_v43  ;;  %v15194_v48 = vsub.s32 %v10426_v0, %v14545_v59  ;;  %v5450_v26 = vrot.slane %v14786_v51, %v14553_v25 }
 0x654   :  { %v5698_v0 = vrot.slane %v14826_v33, %v14573_v58 }
 0x655   :  { %v8006_v37 = vcombine.low %v7984_v2, %v7991_v1  ;;  %v8007_v40 = vcombine.low %v7998_v3, %v8005_v49  ;;  %v15189_v21 = vpop.xlane.xlu0 %4895  ;;  %17588 = vst [vmem:[#allocation300_spill] sm:$0xff] %v15194_v48  ;;  %v5470_v2 = vrot.slane %v14786_v51, %v14568_v28  ;;  %v5474_v1 = vrot.slane %v14786_v51, %v14573_v58 }
 0x656   :  { %17586 = vst [vmem:[#allocation294_spill] sm:$0xff] %v15189_v21  ;;  %v7729_v3 = vcombine.low %v5446_v6, %v5450_v26  ;;  %v7730_v49 = vcombine.low %v5454_v14, %v5458_v29 }
 0x657   :  { %v8014_v18 = vrot.slane %v8006_v37, %v14596_v43  ;;  %v8021_v8 = vrot.slane %v8007_v40, %v14596_v43  ;;  %v5674_v37 = vrot.slane %v14826_v33, %v14553_v25  ;;  %v7732_v40 = vcombine.low %v5470_v2, %v5474_v1 }
 0x658   :  { %v7739_v13 = vrot.slane %v7729_v3, %v14596_v43 }
 0x659   :  { %v8022_v42 = vcombine.low %v8014_v18, %v8021_v8  ;;  %v10208_v12 = vpop.permute.xlu0 %10207  ;;  %v5682_v18 = vrot.slane %v14826_v33, %v14559_v7  ;;  %v5686_v8 = vrot.slane %v14826_v33, %v14562_v34 }
 0x65a   :  { %v10437_v19 = vrot.slane %v10208_v12, %v15197_v60  ;;  %v7746_v12 = vrot.slane %v7730_v49, %v14596_v43 }
 0x65c   :  { %v7761_v6 = vcombine.low %v7739_v13, %v7746_v12 }
 0x662   :  { %10216 = vperm.xlu1 %11024, %v7679_v17   ;;  %v5678_v17 = vrot.slane %v14826_v33, %v14556_v56 }
 0x667   :  { %10237 = vperm.xlu0 %11023, %v8022_v42   ;;  %v5694_v42 = vrot.slane %v14826_v33, %v14568_v28 }
 0x670   :  { %v15191_v50 = vpop.xlane.xlu1 %4893 }
 0x671   :  { %17587 = vst [vmem:[#allocation337_spill] sm:$0xff] %v15191_v50 }
 0x674   :  { %v10205_v54 = vpop.permute.xlu1 %10204 }
 0x675   :  { %v10430_v16 = vrot.slane %v10205_v54, %v15194_v48 }
 0x677   :  { %v10432_v62 = vsel %vm10431_vm7, %v10430_v16, %v15131_v22  ;;  %v5466_v22 = vrot.slane %v14786_v51, %v14565_v53  ;;  %v5690_v51 = vrot.slane %v14826_v33, %v14565_v53  ;;  %v7760_v16 = vrot.slane %v7732_v40, %v14596_v43 }
 0x678   :  { %v10439_v30 = vsel %vm10438_vm8, %v10437_v19, %v10432_v62  ;;  %v8073_v19 = vcombine.low %v5678_v17, %v5682_v18  ;;  %v8075_v62 = vcombine.low %v5694_v42, %v5698_v0  ;;  %v10440_v40 = vadd.s32 4294967216, %v14903_v45  ;;  %v15252_v18 = vpop.xlane.xlu0 %4899 }
 0x679   :  { %v7731_v47 = vcombine.low %v5462_v4, %v5466_v22  ;;  %v7769_v22 = vrot.slane %v7761_v6, %v14596_v43  ;;  %v10447_v17 = vadd.s32 4294967208, %v14903_v45  ;;  %17590 = vst [vmem:[#allocation298_spill] sm:$0xff] %v15252_v18  ;;  %v5522_v6 = vrot.slane %v14794_v35, %v14559_v7 }
 0x67a   :  { %v8089_v29 = vrot.slane %v8073_v19, %v14596_v43  ;;  %v8103_v4 = vrot.slane %v8075_v62, %v14596_v43  ;;  %v5510_v19 = vrot.slane %v14794_v35, %v14550_v20  ;;  %v5518_v62 = vrot.slane %v14794_v35, %v14556_v56 }
 0x67b   :  { %v7753_v54 = vrot.slane %v7731_v47, %v14596_v43  ;;  %v15260_v42 = vsub.s32 %v10447_v17, %v14545_v59 }
 0x67c   :  { %v10214_v0 = vpop.permute.xlu0 %10213 }
 0x67d   :  { %v7762_v26 = vcombine.low %v7753_v54, %v7760_v16  ;;  %17593 = vst [vmem:[#allocation211_spill] sm:$0xff] %v15260_v42  ;;  %v10451_v54 = vrot.slane %v10214_v0, %v15260_v42 }
 0x67f   :  { %v7776_v2 = vrot.slane %v7762_v26, %v14596_v43  ;;  %v5526_v26 = vrot.slane %v14794_v35, %v14562_v34 }
 0x681   :  { %v7777_v49 = vcombine.low %v7769_v22, %v7776_v2 }
 0x686   :  { %4919 = vadd.xlane.f32.xlu0 %v14766_v27  ;;  %4905 = vadd.xlane.f32.xlu1 %v14704_v23  ;;  %v8072_v27 = vcombine.low %v5670_v11, %v5674_v37  ;;  %v8074_v23 = vcombine.low %v5686_v8, %v5690_v51  ;;  %v15257_v51 = vsub.s32 %v10440_v40, %v14545_v59 }
 0x687   :  { %v5762_v40 = vrot.slane %v14846_v32, %v14573_v58 }
 0x688   :  { %v8082_v14 = vrot.slane %v8072_v27, %v14596_v43  ;;  %v8096_v33 = vrot.slane %v8074_v23, %v14596_v43  ;;  %17592 = vst [vmem:[#allocation304_spill] sm:$0xff] %v15257_v51  ;;  %v5514_v23 = vrot.slane %v14794_v35, %v14553_v25 }
 0x68a   :  { %v8104_v1 = vcombine.low %v8082_v14, %v8089_v29  ;;  %v8105_v3 = vcombine.low %v8096_v33, %v8103_v4  ;;  %v5534_v14 = vrot.slane %v14794_v35, %v14568_v28  ;;  %v5538_v29 = vrot.slane %v14794_v35, %v14573_v58 }
 0x68b   :  { %v7827_v33 = vcombine.low %v5510_v19, %v5514_v23  ;;  %v7828_v4 = vcombine.low %v5518_v62, %v5522_v6 }
 0x68c   :  { %v8112_v47 = vrot.slane %v8104_v1, %v14596_v43  ;;  %v8119_v11 = vrot.slane %v8105_v3, %v14596_v43  ;;  %v7830_v2 = vcombine.low %v5534_v14, %v5538_v29  ;;  %v5734_v1 = vrot.slane %v14846_v32, %v14550_v20 }
 0x68d   :  { %v5738_v3 = vrot.slane %v14846_v32, %v14553_v25  ;;  %v7837_v17 = vrot.slane %v7827_v33, %v14596_v43  ;;  %v7844_v0 = vrot.slane %v7828_v4, %v14596_v43 }
 0x68e   :  { %v8120_v37 = vcombine.low %v8112_v47, %v8119_v11  ;;  %v5746_v47 = vrot.slane %v14846_v32, %v14559_v7  ;;  %v5750_v11 = vrot.slane %v14846_v32, %v14562_v34 }
 0x68f   :  { %v7859_v19 = vcombine.low %v7837_v17, %v7844_v0  ;;  %v5594_v17 = vrot.slane %v14804_v10, %v14565_v53  ;;  %v15328_v0 = vpop.xlane.xlu0 %4903 }
 0x690   :  { %17594 = vst [vmem:[#allocation302_spill] sm:$0xff] %v15328_v0 }
 0x697   :  { %10222 = vperm.xlu1 %11024, %v7777_v49   ;;  %v5742_v49 = vrot.slane %v14846_v32, %v14556_v56 }
 0x69c   :  { %10243 = vperm.xlu0 %11023, %v8120_v37   ;;  %v5758_v37 = vrot.slane %v14846_v32, %v14568_v28 }
 0x6a5   :  { %v15254_v8 = vpop.xlane.xlu1 %4897 }
 0x6a6   :  { %17591 = vst [vmem:[#allocation339_spill] sm:$0xff] %v15254_v8 }
 0x6a9   :  { %v10211_v13 = vpop.permute.xlu1 %10210 }
 0x6aa   :  { %v10444_v12 = vrot.slane %v10211_v13, %v15257_v51 }
 0x6ac   :  { %v10446_v16 = vsel %vm10445_vm9, %v10444_v12, %v10439_v30  ;;  %v5530_v30 = vrot.slane %v14794_v35, %v14565_v53  ;;  %v5754_v35 = vrot.slane %v14846_v32, %v14565_v53  ;;  %v7858_v12 = vrot.slane %v7830_v2, %v14596_v43 }
 0x6ad   :  { %v15266_v27 = vsel %vm10452_vm10, %v10451_v54, %v10446_v16  ;;  %v8171_v54 = vcombine.low %v5742_v49, %v5746_v47  ;;  %v8173_v16 = vcombine.low %v5758_v37, %v5762_v40  ;;  %v5574_v49 = vrot.slane %v14804_v10, %v14550_v20 }
 0x6ae   :  { %v7829_v22 = vcombine.low %v5526_v26, %v5530_v30  ;;  %v7867_v30 = vrot.slane %v7859_v19, %v14596_v43  ;;  %v5578_v47 = vrot.slane %v14804_v10, %v14553_v25  ;;  %v5586_v37 = vrot.slane %v14804_v10, %v14559_v7 }
 0x6af   :  { %v8187_v6 = vrot.slane %v8171_v54, %v14596_v43  ;;  %v8201_v26 = vrot.slane %v8173_v16, %v14596_v43  ;;  %v5590_v40 = vrot.slane %v14804_v10, %v14562_v34 }
 0x6b0   :  { %v7851_v13 = vrot.slane %v7829_v22, %v14596_v43  ;;  %v7925_v16 = vcombine.low %v5574_v49, %v5578_v47 }
 0x6b2   :  { %v7860_v23 = vcombine.low %v7851_v13, %v7858_v12  ;;  %v5598_v13 = vrot.slane %v14804_v10, %v14568_v28  ;;  %v5602_v12 = vrot.slane %v14804_v10, %v14573_v58  ;;  %v7935_v49 = vrot.slane %v7925_v16, %v14596_v43 }
 0x6b4   :  { %v7874_v14 = vrot.slane %v7860_v23, %v14596_v43  ;;  %v7927_v23 = vcombine.low %v5590_v40, %v5594_v17 }
 0x6b6   :  { %v7875_v4 = vcombine.low %v7867_v30, %v7874_v14 }
 0x6bb   :  { %4923 = vadd.xlane.f32.xlu0 %v14782_v63  ;;  %4909 = vadd.xlane.f32.xlu1 %v14723_v9  ;;  %v8170_v63 = vcombine.low %v5734_v1, %v5738_v3  ;;  %v8172_v9 = vcombine.low %v5750_v11, %v5754_v35  ;;  %v10454_v3 = vadd.s32 4294967200, %v14903_v45  ;;  %v5582_v11 = vrot.slane %v14804_v10, %v14556_v56 }
 0x6bc   :  { %v10461_v35 = vadd.s32 4294967192, %v14903_v45 }
 0x6bd   :  { %v8180_v62 = vrot.slane %v8170_v63, %v14596_v43  ;;  %v8194_v32 = vrot.slane %v8172_v9, %v14596_v43  ;;  %v15337_v54 = vsub.s32 %v10454_v3, %v14545_v59  ;;  %v7926_v19 = vcombine.low %v5582_v11, %v5586_v37 }
 0x6be   :  { %v15340_v9 = vsub.s32 %v10461_v35, %v14545_v59  ;;  %v7949_v35 = vrot.slane %v7927_v23, %v14596_v43 }
 0x6bf   :  { %v8202_v29 = vcombine.low %v8180_v62, %v8187_v6  ;;  %v8203_v33 = vcombine.low %v8194_v32, %v8201_v26  ;;  %17595 = vst [vmem:[#allocation342_spill] sm:$0xff] %v15337_v54  ;;  %v10220_v62 = vpop.permute.xlu0 %10219  ;;  %v7928_v6 = vcombine.low %v5598_v13, %v5602_v12  ;;  %v17597_v32 = vld [vmem:[#allocation195_spill] sm:$0xff]  ;;  %v7942_v47 = vrot.slane %v7926_v19, %v14596_v43  ;;  %v17598_v12 = vld [vmem:[#allocation325_spill] sm:$0xff] }
 0x6c0   :  { %17596 = vst [vmem:[#allocation308_spill] sm:$0xff] %v15340_v9  ;;  %v5798_v26 = vrot.slane %v17597_v32, %v14550_v20  ;;  %v5802_v30 = vrot.slane %v17597_v32, %v14553_v25  ;;  %v5806_v10 = vrot.slane %v17597_v32, %v14556_v56  ;;  %v10465_v3 = vrot.slane %v10220_v62, %v15340_v9 }
 0x6c1   :  { %v8210_v22 = vrot.slane %v8202_v29, %v14596_v43  ;;  %v8217_v2 = vrot.slane %v8203_v33, %v14596_v43  ;;  %v5810_v29 = vrot.slane %v17597_v32, %v14559_v7  ;;  %v5814_v33 = vrot.slane %v17597_v32, %v14562_v34 }
 0x6c2   :  { %v7956_v37 = vrot.slane %v7928_v6, %v14596_v43  ;;  %v8268_v40 = vcombine.low %v5798_v26, %v5802_v30  ;;  %v5866_v16 = vrot.slane %v17598_v12, %v14553_v25  ;;  %v5874_v19 = vrot.slane %v17598_v12, %v14559_v7 }
 0x6c3   :  { %v8218_v1 = vcombine.low %v8210_v22, %v8217_v2  ;;  %v5822_v2 = vrot.slane %v17597_v32, %v14568_v28  ;;  %v8269_v17 = vcombine.low %v5806_v10, %v5810_v29  ;;  %v5878_v23 = vrot.slane %v17598_v12, %v14562_v34 }
 0x6c4   :  { %v5882_v6 = vrot.slane %v17598_v12, %v14565_v53  ;;  %v5886_v26 = vrot.slane %v17598_v12, %v14568_v28  ;;  %v5890_v30 = vrot.slane %v17598_v12, %v14573_v58  ;;  %v7957_v10 = vcombine.low %v7935_v49, %v7942_v47 }
 0x6c5   :  { %v7958_v29 = vcombine.low %v7949_v35, %v7956_v37 }
 0x6c6   :  { %v8369_v9 = vcombine.low %v5886_v26, %v5890_v30 }
 0x6cc   :  { %10228 = vperm.xlu1 %11024, %v7875_v4   ;;  %v5818_v4 = vrot.slane %v17597_v32, %v14565_v53 }
 0x6ce   :  { %v8270_v13 = vcombine.low %v5814_v33, %v5818_v4  ;;  %v8278_v33 = vrot.slane %v8268_v40, %v14596_v43  ;;  %v8285_v4 = vrot.slane %v8269_v17, %v14596_v43  ;;  %v7965_v40 = vrot.slane %v7957_v10, %v14596_v43 }
 0x6cf   :  { %v7972_v17 = vrot.slane %v7958_v29, %v14596_v43 }
 0x6d1   :  { %10249 = vperm.xlu0 %11023, %v8218_v1   ;;  %v5826_v1 = vrot.slane %v17597_v32, %v14573_v58  ;;  %v5862_v32 = vrot.slane %v17598_v12, %v14550_v20  ;;  %v15415_v51 = vcombine.low %v7965_v40, %v7972_v17  ;;  %v6010_v40 = vrot.slane %v14890_v15, %v14565_v53 }
 0x6d2   :  { %v6014_v17 = vrot.slane %v14890_v15, %v14568_v28 }
 0x6d3   :  { %v8271_v62 = vcombine.low %v5822_v2, %v5826_v1  ;;  %v8366_v1 = vcombine.low %v5862_v32, %v5866_v16 }
 0x6d5   :  { %v8299_v2 = vrot.slane %v8271_v62, %v14596_v43  ;;  %v15407_v62 = vcombine.low %v8278_v33, %v8285_v4 }
 0x6da   :  { %v15334_v63 = vpop.xlane.xlu1 %4901 }
 0x6de   :  { %v10217_v14 = vpop.permute.xlu1 %10216 }
 0x6df   :  { %v10458_v22 = vrot.slane %v10217_v14, %v15337_v54  ;;  %v17599_v54 = vld [vmem:[#allocation201_spill] sm:$0xff] }
 0x6e0   :  { %v5926_v42 = vrot.slane %v17599_v54, %v14550_v20  ;;  %v5934_v49 = vrot.slane %v17599_v54, %v14556_v56  ;;  %v5938_v47 = vrot.slane %v17599_v54, %v14559_v7  ;;  %v5942_v35 = vrot.slane %v17599_v54, %v14562_v34 }
 0x6e1   :  { %v10460_v11 = vsel %vm10459_vm11, %v10458_v22, %v15266_v27  ;;  %v5870_v27 = vrot.slane %v17598_v12, %v14556_v56  ;;  %v8292_v22 = vrot.slane %v8270_v13, %v14596_v43  ;;  %v5930_v12 = vrot.slane %v17599_v54, %v14553_v25 }
 0x6e2   :  { %v15369_v14 = vsel %vm10466_vm12, %v10465_v3, %v10460_v11  ;;  %v8368_v11 = vcombine.low %v5878_v23, %v5882_v6  ;;  %v5946_v37 = vrot.slane %v17599_v54, %v14565_v53  ;;  %v5950_v13 = vrot.slane %v17599_v54, %v14568_v28 }
 0x6e3   :  { %v8367_v3 = vcombine.low %v5870_v27, %v5874_v19  ;;  %v5954_v32 = vrot.slane %v17599_v54, %v14573_v58  ;;  %v15409_v16 = vcombine.low %v8292_v22, %v8299_v2  ;;  %v8376_v27 = vrot.slane %v8366_v1, %v14596_v43  ;;  %v17600_v22 = vld [vmem:[#allocation321_spill] sm:$0xff]  ;;  %v17601_v2 = vld [vmem:[#allocation319_spill] sm:$0xff] }
 0x6e4   :  { %v8390_v23 = vrot.slane %v8368_v11, %v14596_v43  ;;  %v8397_v6 = vrot.slane %v8369_v9, %v14596_v43  ;;  %v8464_v26 = vcombine.low %v5926_v42, %v5930_v12  ;;  %v8465_v30 = vcombine.low %v5934_v49, %v5938_v47 }
 0x6e5   :  { %v8383_v19 = vrot.slane %v8367_v3, %v14596_v43  ;;  %v8466_v10 = vcombine.low %v5942_v35, %v5946_v37  ;;  %v8467_v29 = vcombine.low %v5950_v13, %v5954_v32  ;;  %v5990_v42 = vrot.slane %v14890_v15, %v14550_v20  ;;  %v17602_v32 = vld [vmem:[#allocation280_spill] sm:$0xff] }
 0x6e6   :  { %v15425_v1 = vcombine.low %v8390_v23, %v8397_v6  ;;  %v5994_v9 = vrot.slane %v14890_v15, %v14553_v25  ;;  %v8474_v3 = vrot.slane %v8464_v26, %v14596_v43  ;;  %v8481_v11 = vrot.slane %v8465_v30, %v14596_v43 }
 0x6e7   :  { %v15421_v4 = vcombine.low %v8376_v27, %v8383_v19  ;;  %v8488_v12 = vrot.slane %v8466_v10, %v14596_v43  ;;  %v5998_v49 = vrot.slane %v14890_v15, %v14556_v56  ;;  %v8495_v47 = vrot.slane %v8467_v29, %v14596_v43  ;;  %v17603_v29 = vld [vmem:[#allocation278_spill] sm:$0xff] }
 0x6e8   :  { %v6002_v35 = vrot.slane %v14890_v15, %v14559_v7  ;;  %v6006_v37 = vrot.slane %v14890_v15, %v14562_v34  ;;  %v6018_v13 = vrot.slane %v14890_v15, %v14573_v58  ;;  %v6054_v27 = vrot.slane %v17602_v32, %v14550_v20 }
 0x6e9   :  { %v6058_v19 = vrot.slane %v17602_v32, %v14553_v25  ;;  %v6062_v23 = vrot.slane %v17602_v32, %v14556_v56  ;;  %v6066_v6 = vrot.slane %v17602_v32, %v14559_v7  ;;  %v6070_v26 = vrot.slane %v17602_v32, %v14562_v34 }
 0x6ea   :  { %v6074_v30 = vrot.slane %v17602_v32, %v14565_v53  ;;  %v6078_v15 = vrot.slane %v17602_v32, %v14568_v28  ;;  %v6082_v10 = vrot.slane %v17602_v32, %v14573_v58  ;;  %v6126_v54 = vrot.slane %v17603_v29, %v14556_v56 }
 0x6eb   :  { %v6130_v33 = vrot.slane %v17603_v29, %v14559_v7  ;;  %v6134_v60 = vrot.slane %v17603_v29, %v14562_v34  ;;  %v6138_v48 = vrot.slane %v17603_v29, %v14565_v53  ;;  %v15475_v8 = vcombine.low %v8474_v3, %v8481_v11  ;;  %v17604_v11 = vld [vmem:[#allocation284_spill] sm:$0xff] }
 0x6ec   :  { %v15477_v32 = vcombine.low %v8488_v12, %v8495_v47  ;;  %v6142_v46 = vrot.slane %v17603_v29, %v14568_v28  ;;  %v6146_v52 = vrot.slane %v17603_v29, %v14573_v58  ;;  %v8562_v50 = vcombine.low %v5990_v42, %v5994_v9 }
 0x6ed   :  { %v8563_v0 = vcombine.low %v5998_v49, %v6002_v35  ;;  %v8564_v21 = vcombine.low %v6006_v37, %v6010_v40  ;;  %v8565_v38 = vcombine.low %v6014_v17, %v6018_v13  ;;  %v8660_v18 = vcombine.low %v6054_v27, %v6058_v19 }
 0x6ee   :  { %v8661_v36 = vcombine.low %v6062_v23, %v6066_v6  ;;  %v8662_v44 = vcombine.low %v6070_v26, %v6074_v30  ;;  %v8663_v55 = vcombine.low %v6078_v15, %v6082_v10  ;;  %v8759_v31 = vcombine.low %v6126_v54, %v6130_v33 }
 0x6ef   :  { %v8760_v3 = vcombine.low %v6134_v60, %v6138_v48  ;;  %v6182_v12 = vrot.slane %v17604_v11, %v14550_v20  ;;  %v8761_v47 = vcombine.low %v6142_v46, %v6146_v52  ;;  %v6186_v24 = vrot.slane %v17604_v11, %v14553_v25 }
 0x6f0   :  { %4927 = vadd.xlane.f32.xlu0 %v17600_v22  ;;  %4913 = vadd.xlane.f32.xlu1 %v17601_v2  ;;  %v6118_v22 = vrot.slane %v17603_v29, %v14550_v20  ;;  %v6122_v2 = vrot.slane %v17603_v29, %v14553_v25  ;;  %v6190_v42 = vrot.slane %v17604_v11, %v14556_v56 }
 0x6f1   :  { %v6194_v9 = vrot.slane %v17604_v11, %v14559_v7  ;;  %v6198_v49 = vrot.slane %v17604_v11, %v14562_v34  ;;  %v6202_v54 = vrot.slane %v17604_v11, %v14565_v53  ;;  %v6206_v48 = vrot.slane %v17604_v11, %v14568_v28 }
 0x6f2   :  { %v8758_v57 = vcombine.low %v6118_v22, %v6122_v2  ;;  %v6210_v52 = vrot.slane %v17604_v11, %v14573_v58  ;;  %v8572_v46 = vrot.slane %v8562_v50, %v14596_v43  ;;  %v8579_v60 = vrot.slane %v8563_v0, %v14596_v43 }
 0x6f3   :  { %v8586_v33 = vrot.slane %v8564_v21, %v14596_v43  ;;  %v8593_v35 = vrot.slane %v8565_v38, %v14596_v43  ;;  %v8670_v37 = vrot.slane %v8660_v18, %v14596_v43  ;;  %v8677_v40 = vrot.slane %v8661_v36, %v14596_v43 }
 0x6f4   :  { %v8684_v17 = vrot.slane %v8662_v44, %v14596_v43  ;;  %v8691_v13 = vrot.slane %v8663_v55, %v14596_v43  ;;  %v8768_v27 = vrot.slane %v8758_v57, %v14596_v43  ;;  %v8775_v19 = vrot.slane %v8759_v31, %v14596_v43 }
 0x6f5   :  { %v8782_v50 = vrot.slane %v8760_v3, %v14596_v43  ;;  %v8789_v0 = vrot.slane %v8761_v47, %v14596_v43  ;;  %v8856_v23 = vcombine.low %v6182_v12, %v6186_v24  ;;  %v8857_v21 = vcombine.low %v6190_v42, %v6194_v9 }
 0x6f6   :  { %v8858_v6 = vcombine.low %v6198_v49, %v6202_v54  ;;  %v8859_v38 = vcombine.low %v6206_v48, %v6210_v52  ;;  %v17605_v36 = vrot.slane %v15409_v16, %v14596_v43  ;;  %v17606_v55 = vrot.slane %v15407_v62, %v14596_v43 }
 0x6f7   :  { %v8406_v31 = vrot.slane %v15421_v4, %v14596_v43  ;;  %v8413_v57 = vrot.slane %v15425_v1, %v14596_v43  ;;  %v8504_v24 = vrot.slane %v15475_v8, %v14596_v43  ;;  %v8511_v18 = vrot.slane %v15477_v32, %v14596_v43 }
 0x6f8   :  { %v8316_v44 = vcombine.low %v17606_v55, %v17605_v36  ;;  %v8595_v26 = vcombine.low %v8586_v33, %v8593_v35  ;;  %v8692_v30 = vcombine.low %v8670_v37, %v8677_v40  ;;  %v8693_v16 = vcombine.low %v8684_v17, %v8691_v13 }
 0x6f9   :  { %v8790_v15 = vcombine.low %v8768_v27, %v8775_v19  ;;  %v8791_v10 = vcombine.low %v8782_v50, %v8789_v0  ;;  %v8866_v62 = vrot.slane %v8856_v23, %v14596_v43  ;;  %v8873_v29 = vrot.slane %v8857_v21, %v14596_v43 }
 0x6fa   :  { %v8880_v4 = vrot.slane %v8858_v6, %v14596_v43  ;;  %v8887_v1 = vrot.slane %v8859_v38, %v14596_v43  ;;  %v6246_v8 = vrot.slane %v14997_v61, %v14550_v20  ;;  %v6250_v22 = vrot.slane %v14997_v61, %v14553_v25 }
 0x6fb   :  { %v6254_v2 = vrot.slane %v14997_v61, %v14556_v56  ;;  %v6258_v32 = vrot.slane %v14997_v61, %v14559_v7  ;;  %v6262_v3 = vrot.slane %v14997_v61, %v14562_v34  ;;  %v6266_v11 = vrot.slane %v14997_v61, %v14565_v53 }
 0x6fc   :  { %v6270_v12 = vrot.slane %v14997_v61, %v14568_v28  ;;  %v6274_v47 = vrot.slane %v14997_v61, %v14573_v58  ;;  %v8414_v42 = vcombine.low %v8406_v31, %v8413_v57  ;;  %v8512_v9 = vcombine.low %v8504_v24, %v8511_v18  ;;  %v15574_v57 = vpop.xlane.xlu0 %4907 }
 0x6fd   :  { %v8609_v54 = vrot.slane %v8595_v26, %v14596_v43  ;;  %v8700_v48 = vrot.slane %v8692_v30, %v14596_v43  ;;  %v8707_v52 = vrot.slane %v8693_v16, %v14596_v43  ;;  %v15552_v33 = vcombine.low %v8866_v62, %v8873_v29 }
 0x6fe   :  { %v15554_v35 = vcombine.low %v8880_v4, %v8887_v1  ;;  %v8954_v37 = vcombine.low %v6246_v8, %v6250_v22  ;;  %v8955_v61 = vcombine.low %v6254_v2, %v6258_v32  ;;  %v10475_v40 = vadd.s32 4294967176, %v14903_v45 }
 0x6ff   :  { %v8956_v17 = vcombine.low %v6262_v3, %v6266_v11  ;;  %v8957_v13 = vcombine.low %v6270_v12, %v6274_v47  ;;  %v6310_v27 = vrot.slane %v15058_v5, %v14550_v20  ;;  %v6314_v19 = vrot.slane %v15058_v5, %v14553_v25 }
 0x700   :  { %v6318_v50 = vrot.slane %v15058_v5, %v14556_v56  ;;  %v6322_v0 = vrot.slane %v15058_v5, %v14559_v7  ;;  %v6326_v23 = vrot.slane %v15058_v5, %v14562_v34  ;;  %v10468_v21 = vadd.s32 4294967184, %v14903_v45  ;;  %v10226_v32 = vpop.permute.xlu0 %10225 }
 0x701   :  { %10234 = vperm.xlu1 %11024, %v15415_v51   ;;  %v8594_v51 = vcombine.low %v8572_v46, %v8579_v60  ;;  %v8798_v46 = vrot.slane %v8790_v15, %v14596_v43  ;;  %v8805_v60 = vrot.slane %v8791_v10, %v14596_v43  ;;  %v6330_v6 = vrot.slane %v15058_v5, %v14565_v53 }
 0x702   :  { %v6334_v38 = vrot.slane %v15058_v5, %v14568_v28  ;;  %v6338_v36 = vrot.slane %v15058_v5, %v14573_v58  ;;  %v8896_v24 = vrot.slane %v15552_v33, %v14596_v43  ;;  %v8903_v45 = vrot.slane %v15554_v35, %v14596_v43 }
 0x703   :  { %v8602_v49 = vrot.slane %v8594_v51, %v14596_v43  ;;  %v8806_v31 = vcombine.low %v8798_v46, %v8805_v60  ;;  %v8964_v18 = vrot.slane %v8954_v37, %v14596_v43  ;;  %v8971_v51 = vrot.slane %v8955_v61, %v14596_v43 }
 0x704   :  { %v15583_v26 = vsub.s32 %v10475_v40, %v14545_v59  ;;  %v8978_v30 = vrot.slane %v8956_v17, %v14596_v43  ;;  %v8985_v16 = vrot.slane %v8957_v13, %v14596_v43  ;;  %v9052_v15 = vcombine.low %v6310_v27, %v6314_v19 }
 0x705   :  { %v8610_v55 = vcombine.low %v8602_v49, %v8609_v54  ;;  %v15588_v10 = vsub.s32 %v10468_v21, %v14545_v59  ;;  %v9053_v62 = vcombine.low %v6318_v50, %v6322_v0  ;;  %v9054_v29 = vcombine.low %v6326_v23, %v6330_v6  ;;  %v17610_v6 = vld [vmem:[#allocation266_spill] sm:$0xff] }
 0x706   :  { %10255 = vperm.xlu0 %11023, %v8316_v44   ;;  %v8708_v44 = vcombine.low %v8700_v48, %v8707_v52  ;;  %17607 = vst [vmem:[#allocation217_spill] sm:$0xff] %v15583_v26  ;;  %v9055_v4 = vcombine.low %v6334_v38, %v6338_v36  ;;  %v6566_v1 = vrot.slane %v15334_v63, %v14550_v20 }
 0x707   :  { %17608 = vst [vmem:[#allocation306_spill] sm:$0xff] %v15588_v10  ;;  %v6570_v8 = vrot.slane %v15334_v63, %v14553_v25  ;;  %v6574_v22 = vrot.slane %v15334_v63, %v14556_v56  ;;  %v6578_v2 = vrot.slane %v15334_v63, %v14559_v7  ;;  %v6582_v59 = vrot.slane %v15334_v63, %v14562_v34 }
 0x708   :  { %v6586_v3 = vrot.slane %v15334_v63, %v14565_v53  ;;  %v6590_v11 = vrot.slane %v15334_v63, %v14568_v28  ;;  %v6594_v12 = vrot.slane %v15334_v63, %v14573_v58  ;;  %v9062_v49 = vrot.slane %v9052_v15, %v14596_v43 }
 0x709   :  { %v9069_v48 = vrot.slane %v9053_v62, %v14596_v43  ;;  %v9076_v52 = vrot.slane %v9054_v29, %v14596_v43  ;;  %v10479_v46 = vrot.slane %v10226_v32, %v15583_v26  ;;  %v9083_v60 = vrot.slane %v9055_v4, %v14596_v43  ;;  %v17646_v26 = vld [vmem:[#allocation292_spill] sm:$0xff] }
 0x70a   :  { %10261 = vperm.xlu0 %11023, %v8414_v42   ;;  %v8986_v42 = vcombine.low %v8964_v18, %v8971_v51  ;;  %v9444_v33 = vcombine.low %v6566_v1, %v6570_v8  ;;  %v9445_v35 = vcombine.low %v6574_v22, %v6578_v2  ;;  %v9446_v37 = vcombine.low %v6582_v59, %v6586_v3 }
 0x70b   :  { %v9447_v61 = vcombine.low %v6590_v11, %v6594_v12  ;;  %v8904_v21 = vcombine.low %v8896_v24, %v8903_v45  ;;  %v5638_v38 = vrot.slane %v17610_v6, %v14550_v20  ;;  %v9085_v18 = vcombine.low %v9076_v52, %v9083_v60 }
 0x70c   :  { %v8994_v36 = vrot.slane %v8986_v42, %v14596_v43  ;;  %v9454_v51 = vrot.slane %v9444_v33, %v14596_v43  ;;  %v5646_v29 = vrot.slane %v17610_v6, %v14556_v56  ;;  %v5650_v4 = vrot.slane %v17610_v6, %v14559_v7 }
 0x70d   :  { %v9475_v15 = vrot.slane %v9447_v61, %v14596_v43  ;;  %v5654_v1 = vrot.slane %v17610_v6, %v14562_v34  ;;  %v5658_v22 = vrot.slane %v17610_v6, %v14565_v53  ;;  %v5662_v2 = vrot.slane %v17610_v6, %v14568_v28  ;;  %v17611_v61 = vld [vmem:[#allocation264_spill] sm:$0xff] }
 0x70e   :  { %10267 = vperm.xlu0 %11023, %v8512_v9   ;;  %v8987_v9 = vcombine.low %v8978_v30, %v8985_v16  ;;  %v9461_v30 = vrot.slane %v9445_v35, %v14596_v43  ;;  %v9468_v16 = vrot.slane %v9446_v37, %v14596_v43  ;;  %v5666_v32 = vrot.slane %v17610_v6, %v14573_v58 }
 0x70f   :  { %v4906_v5 = vpop.xlane.xlu1 %4905  ;;  %v9099_v3 = vrot.slane %v9085_v18, %v14596_v43  ;;  %v8024_v52 = vcombine.low %v5646_v29, %v5650_v4 }
 0x710   :  { %v6630_v40 = vrot.slane %v4906_v5, %v14550_v20  ;;  %v6634_v13 = vrot.slane %v4906_v5, %v14553_v25  ;;  %v6638_v27 = vrot.slane %v4906_v5, %v14556_v56  ;;  %v6642_v19 = vrot.slane %v4906_v5, %v14559_v7 }
 0x711   :  { %v6646_v50 = vrot.slane %v4906_v5, %v14562_v34  ;;  %v6650_v0 = vrot.slane %v4906_v5, %v14565_v53  ;;  %v6658_v23 = vrot.slane %v4906_v5, %v14573_v58  ;;  %v9476_v11 = vcombine.low %v9454_v51, %v9461_v30 }
 0x712   :  { %10273 = vperm.xlu0 %11023, %v8610_v55   ;;  %v9001_v55 = vrot.slane %v8987_v9, %v14596_v43  ;;  %v9543_v24 = vcombine.low %v6638_v27, %v6642_v19  ;;  %v9477_v12 = vcombine.low %v9468_v16, %v9475_v15  ;;  %v8026_v60 = vcombine.low %v5662_v2, %v5666_v32  ;;  %v17612_v2 = vld [vmem:[#allocation205_spill] sm:$0xff] }
 0x713   :  { %v10223_v47 = vpop.permute.xlu1 %10222  ;;  %v9544_v45 = vcombine.low %v6646_v50, %v6650_v0  ;;  %v9484_v33 = vrot.slane %v9476_v11, %v14596_v43 }
 0x714   :  { %v10472_v54 = vrot.slane %v10223_v47, %v15588_v10  ;;  %v9002_v8 = vcombine.low %v8994_v36, %v9001_v55  ;;  %v9559_v42 = vrot.slane %v9543_v24, %v14596_v43  ;;  %v9491_v35 = vrot.slane %v9477_v12, %v14596_v43 }
 0x715   :  { %v9566_v9 = vrot.slane %v9544_v45, %v14596_v43 }
 0x716   :  { %v10474_v63 = vsel %vm10473_vm13, %v10472_v54, %v15369_v14  ;;  %10279 = vperm.xlu0 %11023, %v8708_v44   ;;  %v6654_v14 = vrot.slane %v4906_v5, %v14568_v28  ;;  %v9084_v44 = vcombine.low %v9062_v49, %v9069_v48  ;;  %v9542_v5 = vcombine.low %v6630_v40, %v6634_v13 }
 0x717   :  { %v15616_v17 = vsel %vm10480_vm14, %v10479_v46, %v10474_v63  ;;  %v8025_v46 = vcombine.low %v5654_v1, %v5658_v22  ;;  %v8040_v13 = vrot.slane %v8024_v52, %v14596_v43  ;;  %v9492_v19 = vcombine.low %v9484_v33, %v9491_v35 }
 0x718   :  { %17609 = vst [vmem:[#allocation345_spill] sm:$0xff] %v15616_v17  ;;  %v9545_v62 = vcombine.low %v6654_v14, %v6658_v23  ;;  %v9092_v59 = vrot.slane %v9084_v44, %v14596_v43  ;;  %v9552_v47 = vrot.slane %v9542_v5, %v14596_v43  ;;  %v8054_v14 = vrot.slane %v8026_v60, %v14596_v43  ;;  %v15664_v44 = vpop.xlane.xlu0 %4911  ;;  %v17614_v60 = vld [vmem:[#allocation323_spill] sm:$0xff] }
 0x719   :  { %v8047_v27 = vrot.slane %v8025_v46, %v14596_v43  ;;  %v5702_v33 = vrot.slane %v17614_v60, %v14550_v20  ;;  %v5706_v35 = vrot.slane %v17614_v60, %v14553_v25 }
 0x71a   :  { %10285 = vperm.xlu0 %11023, %v8806_v31   ;;  %v5642_v31 = vrot.slane %v17610_v6, %v14553_v25  ;;  %v9573_v49 = vrot.slane %v9545_v62, %v14596_v43  ;;  %v9100_v48 = vcombine.low %v9092_v59, %v9099_v3  ;;  %v9574_v63 = vcombine.low %v9552_v47, %v9559_v42  ;;  %v17613_v59 = vld [vmem:[#allocation282_spill] sm:$0xff] }
 0x71b   :  { %v8056_v6 = vcombine.low %v8047_v27, %v8054_v14  ;;  %v5730_v27 = vrot.slane %v17614_v60, %v14573_v58 }
 0x71c   :  { %v8023_v54 = vcombine.low %v5638_v38, %v5642_v31  ;;  %v9575_v37 = vcombine.low %v9566_v9, %v9573_v49  ;;  %v9582_v50 = vrot.slane %v9574_v63, %v14596_v43  ;;  %v10232_v5 = vpop.permute.xlu0 %10231  ;;  %v5710_v63 = vrot.slane %v17614_v60, %v14556_v56 }
 0x71d   :  { %v8070_v36 = vrot.slane %v8056_v6, %v14596_v43  ;;  %v10489_v32 = vrot.slane %v10232_v5, %v17612_v2 }
 0x71e   :  { %10291 = vperm.xlu0 %11023, %v8904_v21   ;;  %v8033_v40 = vrot.slane %v8023_v54, %v14596_v43  ;;  %v9589_v0 = vrot.slane %v9575_v37, %v14596_v43  ;;  %v5714_v37 = vrot.slane %v17614_v60, %v14559_v7 }
 0x720   :  { %v9590_v23 = vcombine.low %v9582_v50, %v9589_v0  ;;  %v8055_v21 = vcombine.low %v8033_v40, %v8040_v13  ;;  %v5722_v40 = vrot.slane %v17614_v60, %v14565_v53  ;;  %v5726_v13 = vrot.slane %v17614_v60, %v14568_v28 }
 0x721   :  { %v8122_v50 = vcombine.low %v5710_v63, %v5714_v37 }
 0x722   :  { %10297 = vperm.xlu0 %11023, %v9002_v8   ;;  %v8063_v38 = vrot.slane %v8055_v21, %v14596_v43  ;;  %v8124_v14 = vcombine.low %v5726_v13, %v5730_v27 }
 0x723   :  { %v8138_v6 = vrot.slane %v8122_v50, %v14596_v43 }
 0x724   :  { %v8071_v55 = vcombine.low %v8063_v38, %v8070_v36  ;;  %v8152_v36 = vrot.slane %v8124_v14, %v14596_v43 }
 0x725   :  { %4917 = vadd.xlane.f32.xlu1 %v17611_v61  ;;  %v5718_v61 = vrot.slane %v17614_v60, %v14562_v34 }
 0x726   :  { %10303 = vperm.xlu0 %11023, %v9100_v48  }
 0x727   :  { %v8123_v0 = vcombine.low %v5718_v61, %v5722_v40  ;;  %v17617_v40 = vld [vmem:[#allocation272_spill] sm:$0xff] }
 0x728   :  { %v5766_v13 = vrot.slane %v17617_v40, %v14550_v20  ;;  %v5770_v27 = vrot.slane %v17617_v40, %v14553_v25  ;;  %v5782_v50 = vrot.slane %v17617_v40, %v14562_v34 }
 0x729   :  { %v8145_v38 = vrot.slane %v8123_v0, %v14596_v43  ;;  %v5786_v0 = vrot.slane %v17617_v40, %v14565_v53 }
 0x72a   :  { %10327 = vperm.xlu0 %11023, %v9492_v19   ;;  %v8121_v19 = vcombine.low %v5702_v33, %v5706_v35 }
 0x72c   :  { %v8131_v21 = vrot.slane %v8121_v19, %v14596_v43  ;;  %v5774_v19 = vrot.slane %v17617_v40, %v14556_v56 }
 0x72e   :  { %10333 = vperm.xlu0 %11023, %v9590_v23   ;;  %v17615_v23 = vld [vmem:[#allocation191_spill] sm:$0xff] }
 0x736   :  { %10240 = vperm.xlu1 %11024, %v8071_v55   ;;  %v8153_v55 = vcombine.low %v8131_v21, %v8138_v6  ;;  %v5794_v21 = vrot.slane %v17617_v40, %v14573_v58  ;;  %v8219_v6 = vcombine.low %v5766_v13, %v5770_v27 }
 0x744   :  { %v4910_v18 = vpop.xlane.xlu1 %4909 }
 0x745   :  { %v6694_v51 = vrot.slane %v4910_v18, %v14550_v20  ;;  %v6698_v30 = vrot.slane %v4910_v18, %v14553_v25  ;;  %v6702_v16 = vrot.slane %v4910_v18, %v14556_v56  ;;  %v6706_v15 = vrot.slane %v4910_v18, %v14559_v7 }
 0x746   :  { %v6710_v24 = vrot.slane %v4910_v18, %v14562_v34  ;;  %v6714_v45 = vrot.slane %v4910_v18, %v14565_v53  ;;  %v6718_v62 = vrot.slane %v4910_v18, %v14568_v28  ;;  %v6722_v31 = vrot.slane %v4910_v18, %v14573_v58 }
 0x747   :  { %v9640_v29 = vcombine.low %v6694_v51, %v6698_v30  ;;  %v9641_v4 = vcombine.low %v6702_v16, %v6706_v15  ;;  %v8154_v18 = vcombine.low %v8145_v38, %v8152_v36  ;;  %v8161_v51 = vrot.slane %v8153_v55, %v14596_v43  ;;  %v15706_v15 = vpop.xlane.xlu0 %4915 }
 0x748   :  { %v10229_v1 = vpop.permute.xlu1 %10228  ;;  %v9642_v8 = vcombine.low %v6710_v24, %v6714_v45  ;;  %v9643_v22 = vcombine.low %v6718_v62, %v6722_v31  ;;  %17616 = vst [vmem:[#allocation312_spill] sm:$0xff] %v15706_v15  ;;  %v8221_v36 = vcombine.low %v5782_v50, %v5786_v0 }
 0x749   :  { %v10485_v3 = vrot.slane %v10229_v1, %v17613_v59  ;;  %v9650_v11 = vrot.slane %v9640_v29, %v14596_v43  ;;  %v9657_v12 = vrot.slane %v9641_v4, %v14596_v43  ;;  %v8168_v30 = vrot.slane %v8154_v18, %v14596_v43 }
 0x74a   :  { %v9664_v47 = vrot.slane %v9642_v8, %v14596_v43  ;;  %v9671_v42 = vrot.slane %v9643_v22, %v14596_v43  ;;  %v8229_v18 = vrot.slane %v8219_v6, %v14596_v43 }
 0x74b   :  { %v10490_v9 = vsel %vm10382_vm0, %v10489_v32, %v10485_v3  ;;  %v9672_v49 = vcombine.low %v9650_v11, %v9657_v12  ;;  %v8169_v16 = vcombine.low %v8161_v51, %v8168_v30  ;;  %v10238_v22 = vpop.permute.xlu0 %10237  ;;  %v8243_v30 = vrot.slane %v8221_v36, %v14596_v43 }
 0x74c   :  { %v9673_v54 = vcombine.low %v9664_v47, %v9671_v42 }
 0x74d   :  { %v9680_v48 = vrot.slane %v9672_v49, %v14596_v43 }
 0x74e   :  { %v9687_v52 = vrot.slane %v9673_v54, %v14596_v43 }
 0x750   :  { %v9688_v46 = vcombine.low %v9680_v48, %v9687_v52  ;;  %v10499_v48 = vrot.slane %v10238_v22, %v15005_v39  ;;  %v17619_v22 = vld [vmem:[#allocation262_spill] sm:$0xff]  ;;  %v17627_v39 = vld [vmem:[#allocation203_spill] sm:$0xff] }
 0x752   :  { %10339 = vperm.xlu0 %11023, %v9688_v46  }
 0x75a   :  { %4921 = vadd.xlane.f32.xlu1 %v17615_v23  ;;  %v5790_v23 = vrot.slane %v17617_v40, %v14568_v28 }
 0x75c   :  { %v8222_v55 = vcombine.low %v5790_v23, %v5794_v21  ;;  %v17621_v23 = vld [vmem:[#allocation274_spill] sm:$0xff] }
 0x75d   :  { %v5958_v21 = vrot.slane %v17621_v23, %v14550_v20  ;;  %v5966_v36 = vrot.slane %v17621_v23, %v14556_v56 }
 0x76b   :  { %10246 = vperm.xlu1 %11024, %v8169_v16   ;;  %v17618_v16 = vld [vmem:[#allocation270_spill] sm:$0xff] }
 0x779   :  { %v4914_v5 = vpop.xlane.xlu1 %4913 }
 0x77a   :  { %v6758_v24 = vrot.slane %v4914_v5, %v14550_v20  ;;  %v6762_v45 = vrot.slane %v4914_v5, %v14553_v25  ;;  %v6766_v62 = vrot.slane %v4914_v5, %v14556_v56  ;;  %v6770_v31 = vrot.slane %v4914_v5, %v14559_v7 }
 0x77b   :  { %v6774_v29 = vrot.slane %v4914_v5, %v14562_v34  ;;  %v6778_v4 = vrot.slane %v4914_v5, %v14565_v53  ;;  %v6782_v1 = vrot.slane %v4914_v5, %v14568_v28  ;;  %v6786_v8 = vrot.slane %v4914_v5, %v14573_v58 }
 0x77c   :  { %v9738_v32 = vcombine.low %v6758_v24, %v6762_v45  ;;  %v9739_v3 = vcombine.low %v6766_v62, %v6770_v31  ;;  %v5830_v5 = vrot.slane %v17618_v16, %v14550_v20  ;;  %v8250_v24 = vrot.slane %v8222_v55, %v14596_v43 }
 0x77d   :  { %v10235_v11 = vpop.permute.xlu1 %10234  ;;  %v9740_v12 = vcombine.low %v6774_v29, %v6778_v4  ;;  %v9741_v47 = vcombine.low %v6782_v1, %v6786_v8  ;;  %v5834_v45 = vrot.slane %v17618_v16, %v14553_v25  ;;  %v5838_v62 = vrot.slane %v17618_v16, %v14556_v56 }
 0x77e   :  { %v10494_v42 = vrot.slane %v10235_v11, %v15000_v41  ;;  %v9748_v49 = vrot.slane %v9738_v32, %v14596_v43  ;;  %v9755_v54 = vrot.slane %v9739_v3, %v14596_v43  ;;  %v5842_v31 = vrot.slane %v17618_v16, %v14559_v7 }
 0x77f   :  { %v9762_v52 = vrot.slane %v9740_v12, %v14596_v43  ;;  %v9769_v46 = vrot.slane %v9741_v47, %v14596_v43  ;;  %v5846_v29 = vrot.slane %v17618_v16, %v14562_v34  ;;  %v5850_v4 = vrot.slane %v17618_v16, %v14565_v53 }
 0x780   :  { %v10495_v60 = vsel %vm10389_vm1, %v10494_v42, %v10490_v9  ;;  %v9770_v33 = vcombine.low %v9748_v49, %v9755_v54  ;;  %v5778_v9 = vrot.slane %v17617_v40, %v14559_v7  ;;  %v5854_v1 = vrot.slane %v17618_v16, %v14568_v28  ;;  %v17620_v49 = vld [vmem:[#allocation276_spill] sm:$0xff] }
 0x781   :  { %v9771_v35 = vcombine.low %v9762_v52, %v9769_v46  ;;  %v15724_v63 = vsel %vm10396_vm2, %v10499_v48, %v10495_v60  ;;  %v5858_v8 = vrot.slane %v17618_v16, %v14573_v58  ;;  %v8252_v3 = vcombine.low %v8243_v30, %v8250_v24 }
 0x782   :  { %v9778_v37 = vrot.slane %v9770_v33, %v14596_v43  ;;  %v8220_v38 = vcombine.low %v5774_v19, %v5778_v9  ;;  %v8317_v11 = vcombine.low %v5830_v5, %v5834_v45  ;;  %v8318_v12 = vcombine.low %v5838_v62, %v5842_v31 }
 0x783   :  { %v9785_v61 = vrot.slane %v9771_v35, %v14596_v43  ;;  %v8319_v47 = vcombine.low %v5846_v29, %v5850_v4  ;;  %v8320_v42 = vcombine.low %v5854_v1, %v5858_v8  ;;  %v5894_v54 = vrot.slane %v17620_v49, %v14550_v20 }
 0x784   :  { %v8236_v51 = vrot.slane %v8220_v38, %v14596_v43  ;;  %v5898_v48 = vrot.slane %v17620_v49, %v14553_v25  ;;  %v5902_v52 = vrot.slane %v17620_v49, %v14556_v56  ;;  %v5906_v46 = vrot.slane %v17620_v49, %v14559_v7 }
 0x785   :  { %v9786_v14 = vcombine.low %v9778_v37, %v9785_v61  ;;  %v5910_v60 = vrot.slane %v17620_v49, %v14562_v34  ;;  %v5914_v33 = vrot.slane %v17620_v49, %v14565_v53  ;;  %v5918_v35 = vrot.slane %v17620_v49, %v14568_v28 }
 0x786   :  { %v8251_v32 = vcombine.low %v8229_v18, %v8236_v51  ;;  %v5922_v37 = vrot.slane %v17620_v49, %v14573_v58  ;;  %v8266_v40 = vrot.slane %v8252_v3, %v14596_v43  ;;  %v8327_v13 = vrot.slane %v8317_v11, %v14596_v43  ;;  %v17622_v3 = vld [vmem:[#allocation327_spill] sm:$0xff]  ;;  %v17623_v49 = vld [vmem:[#allocation197_spill] sm:$0xff] }
 0x787   :  { %10345 = vperm.xlu0 %11023, %v9786_v14   ;;  %v8334_v27 = vrot.slane %v8318_v12, %v14596_v43  ;;  %v8341_v19 = vrot.slane %v8319_v47, %v14596_v43  ;;  %v8348_v9 = vrot.slane %v8320_v42, %v14596_v43  ;;  %v8415_v50 = vcombine.low %v5894_v54, %v5898_v48 }
 0x788   :  { %v8259_v61 = vrot.slane %v8251_v32, %v14596_v43  ;;  %v8416_v0 = vcombine.low %v5902_v52, %v5906_v46  ;;  %v8417_v14 = vcombine.low %v5910_v60, %v5914_v33  ;;  %v8418_v6 = vcombine.low %v5918_v35, %v5922_v37 }
 0x789   :  { %v5962_v38 = vrot.slane %v17621_v23, %v14553_v25  ;;  %v5970_v55 = vrot.slane %v17621_v23, %v14559_v7  ;;  %v5974_v18 = vrot.slane %v17621_v23, %v14562_v34  ;;  %v5978_v51 = vrot.slane %v17621_v23, %v14565_v53 }
 0x78a   :  { %v5982_v30 = vrot.slane %v17621_v23, %v14568_v28  ;;  %v5986_v16 = vrot.slane %v17621_v23, %v14573_v58  ;;  %v8267_v5 = vcombine.low %v8259_v61, %v8266_v40  ;;  %v8349_v24 = vcombine.low %v8327_v13, %v8334_v27  ;;  %v17625_v23 = vld [vmem:[#allocation199_spill] sm:$0xff] }
 0x78b   :  { %v8350_v45 = vcombine.low %v8341_v19, %v8348_v9  ;;  %v8425_v62 = vrot.slane %v8415_v50, %v14596_v43  ;;  %v8432_v31 = vrot.slane %v8416_v0, %v14596_v43  ;;  %v8439_v29 = vrot.slane %v8417_v14, %v14596_v43  ;;  %v17624_v0 = vld [vmem:[#allocation268_spill] sm:$0xff] }
 0x78c   :  { %v8446_v4 = vrot.slane %v8418_v6, %v14596_v43  ;;  %v8513_v1 = vcombine.low %v5958_v21, %v5962_v38  ;;  %v8514_v8 = vcombine.low %v5966_v36, %v5970_v55  ;;  %v8516_v32 = vcombine.low %v5982_v30, %v5986_v16 }
 0x78d   :  { %v6022_v11 = vrot.slane %v17622_v3, %v14550_v20  ;;  %v6026_v12 = vrot.slane %v17622_v3, %v14553_v25  ;;  %v6030_v47 = vrot.slane %v17622_v3, %v14556_v56  ;;  %v6034_v42 = vrot.slane %v17622_v3, %v14559_v7 }
 0x78e   :  { %v4193_v54 = vmax.f32 %v17623_v49, 0.0  ;;  %v8357_v48 = vrot.slane %v8349_v24, %v14596_v43  ;;  %v8364_v52 = vrot.slane %v8350_v45, %v14596_v43  ;;  %v15818_v46 = vcombine.low %v8425_v62, %v8432_v31  ;;  %v4920_v24 = vpop.xlane.xlu0 %4919 }
 0x78f   :  { %4925 = vadd.xlane.f32.xlu1 %v17619_v22  ;;  %v8515_v22 = vcombine.low %v5974_v18, %v5978_v51  ;;  %v15820_v60 = vcombine.low %v8439_v29, %v8446_v4  ;;  %v6038_v33 = vrot.slane %v17622_v3, %v14562_v34  ;;  %v6042_v35 = vrot.slane %v17622_v3, %v14565_v53 }
 0x790   :  { %v8523_v37 = vrot.slane %v8513_v1, %v14596_v43  ;;  %v8530_v61 = vrot.slane %v8514_v8, %v14596_v43  ;;  %v8544_v13 = vrot.slane %v8516_v32, %v14596_v43  ;;  %v6046_v27 = vrot.slane %v17622_v3, %v14568_v28 }
 0x791   :  { %v8537_v40 = vrot.slane %v8515_v22, %v14596_v43  ;;  %v6050_v19 = vrot.slane %v17622_v3, %v14573_v58  ;;  %v15834_v9 = vcombine.low %v6022_v11, %v6026_v12  ;;  %v15836_v50 = vcombine.low %v6030_v47, %v6034_v42  ;;  %v17626_v11 = vld [vmem:[#allocation329_spill] sm:$0xff] }
 0x792   :  { %v15839_v14 = vmul.f32 %v17624_v0, %v4193_v54  ;;  %v6086_v21 = vrot.slane %v17625_v23, %v14550_v20  ;;  %v6090_v6 = vrot.slane %v17625_v23, %v14553_v25  ;;  %v15845_v38 = vcombine.low %v8357_v48, %v8364_v52 }
 0x793   :  { %v15847_v36 = vcombine.low %v6038_v33, %v6042_v35  ;;  %v6094_v55 = vrot.slane %v17625_v23, %v14556_v56  ;;  %v6098_v18 = vrot.slane %v17625_v23, %v14559_v7  ;;  %v15857_v16 = vcombine.low %v8523_v37, %v8530_v61 }
 0x794   :  { %v15861_v45 = vcombine.low %v6046_v27, %v6050_v19  ;;  %v6102_v29 = vrot.slane %v17625_v23, %v14562_v34  ;;  %v6106_v4 = vrot.slane %v17625_v23, %v14565_v53  ;;  %v6110_v1 = vrot.slane %v17625_v23, %v14568_v28 }
 0x795   :  { %v6114_v8 = vrot.slane %v17625_v23, %v14573_v58  ;;  %v15875_v22 = vcombine.low %v6086_v21, %v6090_v6  ;;  %v15879_v3 = vcombine.low %v6094_v55, %v6098_v18  ;;  %v6150_v12 = vrot.slane %v17626_v11, %v14550_v20 }
 0x796   :  { %v6154_v47 = vrot.slane %v17626_v11, %v14553_v25  ;;  %v6854_v42 = vrot.slane %v4920_v24, %v14550_v20  ;;  %v6858_v49 = vrot.slane %v4920_v24, %v14553_v25  ;;  %v6862_v54 = vrot.slane %v4920_v24, %v14556_v56 }
 0x797   :  { %v6866_v48 = vrot.slane %v4920_v24, %v14559_v7  ;;  %v6870_v52 = vrot.slane %v4920_v24, %v14562_v34  ;;  %v6874_v33 = vrot.slane %v4920_v24, %v14565_v53  ;;  %v6878_v35 = vrot.slane %v4920_v24, %v14568_v28 }
 0x798   :  { %v6882_v37 = vrot.slane %v4920_v24, %v14573_v58  ;;  %v6158_v0 = vrot.slane %v17626_v11, %v14556_v56  ;;  %v6162_v23 = vrot.slane %v17626_v11, %v14559_v7  ;;  %v6166_v21 = vrot.slane %v17626_v11, %v14562_v34 }
 0x799   :  { %v9885_v6 = vcombine.low %v6854_v42, %v6858_v49  ;;  %v9886_v55 = vcombine.low %v6862_v54, %v6866_v48  ;;  %v6170_v18 = vrot.slane %v17626_v11, %v14565_v53  ;;  %v6174_v24 = vrot.slane %v17626_v11, %v14568_v28 }
 0x79a   :  { %v8807_v27 = vcombine.low %v6150_v12, %v6154_v47  ;;  %v8808_v59 = vcombine.low %v6158_v0, %v6162_v23 }
 0x79b   :  { %v9895_v12 = vrot.slane %v9885_v6, %v14596_v43  ;;  %v9902_v47 = vrot.slane %v9886_v55, %v14596_v43 }
 0x7a0   :  { %10252 = vperm.xlu1 %11024, %v8267_v5   ;;  %v15859_v5 = vcombine.low %v8537_v40, %v8544_v13  ;;  %v15895_v40 = vcombine.low %v6102_v29, %v6106_v4  ;;  %v15897_v13 = vcombine.low %v6110_v1, %v6114_v8  ;;  %v9887_v4 = vcombine.low %v6870_v52, %v6874_v33  ;;  %v10244_v33 = vpop.permute.xlu0 %10243 }
 0x7a1   :  { %v9888_v1 = vcombine.low %v6878_v35, %v6882_v37  ;;  %v6178_v8 = vrot.slane %v17626_v11, %v14573_v58 }
 0x7a2   :  { %v9909_v51 = vrot.slane %v9887_v4, %v14596_v43 }
 0x7a3   :  { %v9916_v30 = vrot.slane %v9888_v1, %v14596_v43  ;;  %v8733_v1 = vrot.slane %v15895_v40, %v14596_v43  ;;  %v8824_v40 = vrot.slane %v8808_v59, %v14596_v43 }
 0x7ae   :  { %v4918_v29 = vpop.xlane.xlu1 %4917 }
 0x7af   :  { %v6822_v19 = vrot.slane %v4918_v29, %v14550_v20  ;;  %v6826_v32 = vrot.slane %v4918_v29, %v14553_v25  ;;  %v6830_v42 = vrot.slane %v4918_v29, %v14556_v56  ;;  %v6834_v49 = vrot.slane %v4918_v29, %v14559_v7 }
 0x7b0   :  { %v6838_v54 = vrot.slane %v4918_v29, %v14562_v34  ;;  %v6842_v48 = vrot.slane %v4918_v29, %v14565_v53  ;;  %v6846_v61 = vrot.slane %v4918_v29, %v14568_v28  ;;  %v6850_v52 = vrot.slane %v4918_v29, %v14573_v58 }
 0x7b1   :  { %v9836_v35 = vcombine.low %v6822_v19, %v6826_v32  ;;  %v9837_v11 = vcombine.low %v6830_v42, %v6834_v49  ;;  %v17628_v32 = vld [vmem:[#allocation286_spill] sm:$0xff]  ;;  %v8809_v42 = vcombine.low %v6166_v21, %v6170_v18  ;;  %v8810_v49 = vcombine.low %v6174_v24, %v6178_v8 }
 0x7b2   :  { %v10241_v37 = vpop.permute.xlu1 %10240  ;;  %v9838_v62 = vcombine.low %v6838_v54, %v6842_v48  ;;  %v9839_v31 = vcombine.low %v6846_v61, %v6850_v52  ;;  %v10509_v19 = vrot.slane %v10244_v33, %v17628_v32  ;;  %v9917_v48 = vcombine.low %v9895_v12, %v9902_v47 }
 0x7b3   :  { %v10504_v2 = vrot.slane %v10241_v37, %v17627_v39  ;;  %v9846_v41 = vrot.slane %v9836_v35, %v14596_v43  ;;  %v9853_v29 = vrot.slane %v9837_v11, %v14596_v43  ;;  %v9918_v52 = vcombine.low %v9909_v51, %v9916_v30 }
 0x7b4   :  { %v9860_v6 = vrot.slane %v9838_v62, %v14596_v43  ;;  %v9867_v55 = vrot.slane %v9839_v31, %v14596_v43  ;;  %v8740_v62 = vrot.slane %v15897_v13, %v14596_v43  ;;  %v8817_v31 = vrot.slane %v8807_v27, %v14596_v43 }
 0x7b5   :  { %v10505_v61 = vsel %vm10403_vm3, %v10504_v2, %v15724_v63  ;;  %v9868_v4 = vcombine.low %v9846_v41, %v9853_v29  ;;  %v17629_v2 = vld [vmem:[#allocation290_spill] sm:$0xff]  ;;  %v8831_v21 = vrot.slane %v8809_v42, %v14596_v43  ;;  %v8838_v30 = vrot.slane %v8810_v49, %v14596_v43 }
 0x7b6   :  { %v9869_v54 = vcombine.low %v9860_v6, %v9867_v55  ;;  %v15938_v0 = vsel %vm10410_vm4, %v10509_v19, %v10505_v61  ;;  %v6214_v41 = vrot.slane %v17629_v2, %v14550_v20  ;;  %v6218_v51 = vrot.slane %v17629_v2, %v14553_v25 }
 0x7b7   :  { %v9876_v23 = vrot.slane %v9868_v4, %v14596_v43  ;;  %v6222_v18 = vrot.slane %v17629_v2, %v14556_v56  ;;  %v6226_v13 = vrot.slane %v17629_v2, %v14559_v7  ;;  %v6230_v27 = vrot.slane %v17629_v2, %v14562_v34 }
 0x7b8   :  { %v9883_v63 = vrot.slane %v9869_v54, %v14596_v43  ;;  %v9925_v8 = vrot.slane %v9917_v48, %v14596_v43  ;;  %v9932_v59 = vrot.slane %v9918_v52, %v14596_v43  ;;  %v6234_v33 = vrot.slane %v17629_v2, %v14565_v53 }
 0x7b9   :  { %v17630_v35 = vrot.slane %v15820_v60, %v14596_v43  ;;  %v17631_v11 = vrot.slane %v15818_v46, %v14596_v43  ;;  %v8553_v47 = vrot.slane %v15857_v16, %v14596_v43  ;;  %v6238_v37 = vrot.slane %v17629_v2, %v14568_v28 }
 0x7ba   :  { %v9884_v24 = vcombine.low %v9876_v23, %v9883_v63  ;;  %v6242_v29 = vrot.slane %v17629_v2, %v14573_v58  ;;  %v8560_v19 = vrot.slane %v15859_v5, %v14596_v43  ;;  %v17632_v60 = vrot.slane %v15836_v50, %v14596_v43 }
 0x7bb   :  { %v15968_v12 = vcombine.low %v17631_v11, %v17630_v35  ;;  %v17633_v46 = vrot.slane %v15834_v9, %v14596_v43  ;;  %v17634_v55 = vrot.slane %v15861_v45, %v14596_v43  ;;  %v17635_v42 = vrot.slane %v15847_v36, %v14596_v43  ;;  %v17638_v45 = vld [vmem:[#allocation335_spill] sm:$0xff] }
 0x7bc   :  { %10351 = vperm.xlu0 %11023, %v9884_v24   ;;  %v17636_v4 = vrot.slane %v15879_v3, %v14596_v43  ;;  %v17637_v5 = vrot.slane %v15875_v22, %v14596_v43  ;;  %v8742_v50 = vcombine.low %v8733_v1, %v8740_v62  ;;  %v8839_v54 = vcombine.low %v8817_v31, %v8824_v40  ;;  %v17639_v40 = vld [vmem:[#allocation296_spill] sm:$0xff] }
 0x7bd   :  { %v15984_v6 = vcombine.low %v17633_v46, %v17632_v60  ;;  %v8644_v61 = vcombine.low %v17635_v42, %v17634_v55  ;;  %v8840_v48 = vcombine.low %v8831_v21, %v8838_v30  ;;  %v8905_v9 = vcombine.low %v6214_v41, %v6218_v51 }
 0x7be   :  { %v8741_v49 = vcombine.low %v17637_v5, %v17636_v4  ;;  %v9933_v52 = vcombine.low %v9925_v8, %v9932_v59  ;;  %v8906_v23 = vcombine.low %v6222_v18, %v6226_v13  ;;  %v8907_v2 = vcombine.low %v6230_v27, %v6234_v33 }
 0x7bf   :  { %v6278_v63 = vrot.slane %v17638_v45, %v14550_v20  ;;  %v8908_v24 = vcombine.low %v6238_v37, %v6242_v29  ;;  %v6282_v36 = vrot.slane %v17638_v45, %v14553_v25  ;;  %v6286_v3 = vrot.slane %v17638_v45, %v14556_v56 }
 0x7c0   :  { %v6290_v22 = vrot.slane %v17638_v45, %v14559_v7  ;;  %10354 = vperm.xlu0 %11023, %v9933_v52   ;;  %v6294_v1 = vrot.slane %v17638_v45, %v14562_v34  ;;  %v6298_v62 = vrot.slane %v17638_v45, %v14565_v53  ;;  %v6302_v31 = vrot.slane %v17638_v45, %v14568_v28 }
 0x7c1   :  { %v6306_v41 = vrot.slane %v17638_v45, %v14573_v58  ;;  %v6342_v21 = vrot.slane %v17639_v40, %v14550_v20  ;;  %v6346_v51 = vrot.slane %v17639_v40, %v14553_v25  ;;  %v6350_v30 = vrot.slane %v17639_v40, %v14556_v56 }
 0x7c2   :  { %v6354_v18 = vrot.slane %v17639_v40, %v14559_v7  ;;  %v6358_v13 = vrot.slane %v17639_v40, %v14562_v34  ;;  %v6362_v27 = vrot.slane %v17639_v40, %v14565_v53  ;;  %v6366_v8 = vrot.slane %v17639_v40, %v14568_v28 }
 0x7c3   :  { %v6370_v59 = vrot.slane %v17639_v40, %v14573_v58  ;;  %v8915_v33 = vrot.slane %v8905_v9, %v14596_v43  ;;  %v8922_v35 = vrot.slane %v8906_v23, %v14596_v43  ;;  %v8929_v11 = vrot.slane %v8907_v2, %v14596_v43 }
 0x7c4   :  { %v8936_v37 = vrot.slane %v8908_v24, %v14596_v43  ;;  %4929 = vadd.xlane.f32.xlu1 %v15839_v14  ;;  %v9003_v29 = vcombine.low %v6278_v63, %v6282_v36  ;;  %v9004_v60 = vcombine.low %v6286_v3, %v6290_v22  ;;  %v9005_v46 = vcombine.low %v6294_v1, %v6298_v62  ;;  %v17640_v1 = vld [vmem:[#allocation207_spill] sm:$0xff] }
 0x7c5   :  { %v9006_v55 = vcombine.low %v6302_v31, %v6306_v41  ;;  %v8651_v42 = vrot.slane %v15984_v6, %v14596_v43  ;;  %v8658_v4 = vrot.slane %v8644_v61, %v14596_v43  ;;  %v9101_v5 = vcombine.low %v6342_v21, %v6346_v51 }
 0x7c6   :  { %v9102_v52 = vcombine.low %v6350_v30, %v6354_v18  ;;  %v8749_v9 = vrot.slane %v8741_v49, %v14596_v43  ;;  %v8756_v23 = vrot.slane %v8742_v50, %v14596_v43  ;;  %v9103_v2 = vcombine.low %v6358_v13, %v6362_v27 }
 0x7c7   :  { %v9104_v45 = vcombine.low %v6366_v8, %v6370_v59  ;;  %v8847_v24 = vrot.slane %v8839_v54, %v14596_v43  ;;  %v8854_v14 = vrot.slane %v8840_v48, %v14596_v43  ;;  %v8937_v63 = vcombine.low %v8915_v33, %v8922_v35 }
 0x7c8   :  { %v8938_v36 = vcombine.low %v8929_v11, %v8936_v37  ;;  %v9013_v3 = vrot.slane %v9003_v29, %v14596_v43  ;;  %v9020_v6 = vrot.slane %v9004_v60, %v14596_v43  ;;  %v9027_v61 = vrot.slane %v9005_v46, %v14596_v43  ;;  %v17641_v60 = vld [vmem:[#allocation298_spill] sm:$0xff] }
 0x7c9   :  { %v9034_v22 = vrot.slane %v9006_v55, %v14596_v43  ;;  %v9111_v49 = vrot.slane %v9101_v5, %v14596_v43  ;;  %v9118_v50 = vrot.slane %v9102_v52, %v14596_v43  ;;  %v6406_v62 = vrot.slane %v17640_v1, %v14550_v20  ;;  %v17642_v5 = vld [vmem:[#allocation333_spill] sm:$0xff] }
 0x7ca   :  { %v6410_v54 = vrot.slane %v17640_v1, %v14553_v25  ;;  %v9125_v48 = vrot.slane %v9103_v2, %v14596_v43  ;;  %v9132_v31 = vrot.slane %v9104_v45, %v14596_v43  ;;  %v6414_v41 = vrot.slane %v17640_v1, %v14556_v56 }
 0x7cb   :  { %v6418_v40 = vrot.slane %v17640_v1, %v14559_v7  ;;  %v16061_v21 = vcombine.low %v8553_v47, %v8560_v19  ;;  %v16063_v51 = vcombine.low %v8651_v42, %v8658_v4  ;;  %v16065_v30 = vcombine.low %v8749_v9, %v8756_v23 }
 0x7cc   :  { %v16067_v18 = vcombine.low %v8847_v24, %v8854_v14  ;;  %v8945_v13 = vrot.slane %v8937_v63, %v14596_v43  ;;  %v8952_v27 = vrot.slane %v8938_v36, %v14596_v43  ;;  %v9035_v8 = vcombine.low %v9013_v3, %v9020_v6 }
 0x7cd   :  { %v9036_v59 = vcombine.low %v9027_v61, %v9034_v22  ;;  %v9133_v33 = vcombine.low %v9111_v49, %v9118_v50  ;;  %v6422_v35 = vrot.slane %v17640_v1, %v14562_v34  ;;  %v6426_v16 = vrot.slane %v17640_v1, %v14565_v53 }
 0x7ce   :  { %v6430_v47 = vrot.slane %v17640_v1, %v14568_v28  ;;  %v9134_v19 = vcombine.low %v9125_v48, %v9132_v31  ;;  %v6434_v11 = vrot.slane %v17640_v1, %v14573_v58  ;;  %v9199_v37 = vcombine.low %v6406_v62, %v6410_v54 }
 0x7cf   :  { %v9200_v29 = vcombine.low %v6414_v41, %v6418_v40  ;;  %v6534_v46 = vrot.slane %v17641_v60, %v14550_v20  ;;  %v6538_v55 = vrot.slane %v17641_v60, %v14553_v25  ;;  %v6542_v42 = vrot.slane %v17641_v60, %v14556_v56 }
 0x7d0   :  { %v6546_v4 = vrot.slane %v17641_v60, %v14559_v7  ;;  %v6374_v52 = vrot.slane %v17642_v5, %v14550_v20  ;;  %v6378_v9 = vrot.slane %v17642_v5, %v14553_v25  ;;  %v6382_v23 = vrot.slane %v17642_v5, %v14556_v56 }
 0x7d1   :  { %v6386_v2 = vrot.slane %v17642_v5, %v14559_v7  ;;  %v6390_v45 = vrot.slane %v17642_v5, %v14562_v34  ;;  %v6394_v24 = vrot.slane %v17642_v5, %v14565_v53  ;;  %v6398_v14 = vrot.slane %v17642_v5, %v14568_v28 }
 0x7d2   :  { %v6402_v63 = vrot.slane %v17642_v5, %v14573_v58  ;;  %v9201_v36 = vcombine.low %v6422_v35, %v6426_v16  ;;  %v9202_v3 = vcombine.low %v6430_v47, %v6434_v11  ;;  %v9209_v6 = vrot.slane %v9199_v37, %v14596_v43 }
 0x7d3   :  { %v9216_v61 = vrot.slane %v9200_v29, %v14596_v43  ;;  %v6550_v22 = vrot.slane %v17641_v60, %v14562_v34  ;;  %v6554_v49 = vrot.slane %v17641_v60, %v14565_v53  ;;  %v6558_v50 = vrot.slane %v17641_v60, %v14568_v28 }
 0x7d4   :  { %v6562_v1 = vrot.slane %v17641_v60, %v14573_v58  ;;  %v9043_v62 = vrot.slane %v9035_v8, %v14596_v43  ;;  %v9050_v54 = vrot.slane %v9036_v59, %v14596_v43  ;;  %v9395_v48 = vcombine.low %v6534_v46, %v6538_v55 }
 0x7d5   :  { %v9396_v31 = vcombine.low %v6542_v42, %v6546_v4  ;;  %10258 = vperm.xlu1 %11024, %v15845_v38   ;;  %v9150_v41 = vcombine.low %v6374_v52, %v6378_v9  ;;  %v9151_v40 = vcombine.low %v6382_v23, %v6386_v2  ;;  %v9152_v35 = vcombine.low %v6390_v45, %v6394_v24 }
 0x7d6   :  { %v9153_v16 = vcombine.low %v6398_v14, %v6402_v63  ;;  %v16116_v47 = vcombine.low %v8945_v13, %v8952_v27  ;;  %v9141_v11 = vrot.slane %v9133_v33, %v14596_v43  ;;  %v9148_v37 = vrot.slane %v9134_v19, %v14596_v43  ;;  %v17643_v27 = vld [vmem:[#allocation294_spill] sm:$0xff] }
 0x7d7   :  { %v9223_v29 = vrot.slane %v9201_v36, %v14596_v43  ;;  %v9230_v8 = vrot.slane %v9202_v3, %v14596_v43  ;;  %v16122_v60 = vcombine.low %v9209_v6, %v9216_v61  ;;  %v16124_v59 = vcombine.low %v6550_v22, %v6554_v49  ;;  %v17644_v3 = vld [vmem:[#allocation302_spill] sm:$0xff] }
 0x7d8   :  { %v16126_v46 = vcombine.low %v6558_v50, %v6562_v1  ;;  %v16128_v38 = vcombine.low %v9043_v62, %v9050_v54  ;;  %v9405_v55 = vrot.slane %v9395_v48, %v14596_v43  ;;  %v9412_v13 = vrot.slane %v9396_v31, %v14596_v43 }
 0x7d9   :  { %10264 = vperm.xlu1 %11024, %v15968_v12   ;;  %v9160_v19 = vrot.slane %v9150_v41, %v14596_v43  ;;  %v9167_v42 = vrot.slane %v9151_v40, %v14596_v43  ;;  %v9174_v4 = vrot.slane %v9152_v35, %v14596_v43  ;;  %v9181_v5 = vrot.slane %v9153_v16, %v14596_v43  ;;  %v4924_v12 = vpop.xlane.xlu0 %4923 }
 0x7da   :  { %v16139_v52 = vcombine.low %v9141_v11, %v9148_v37  ;;  %v16147_v45 = vcombine.low %v9223_v29, %v9230_v8  ;;  %v16155_v36 = vcombine.low %v9405_v55, %v9412_v13  ;;  %v6598_v6 = vrot.slane %v17644_v3, %v14550_v20  ;;  %v17645_v55 = vld [vmem:[#allocation337_spill] sm:$0xff] }
 0x7db   :  { %v6602_v61 = vrot.slane %v17644_v3, %v14553_v25  ;;  %v6606_v22 = vrot.slane %v17644_v3, %v14556_v56  ;;  %v16164_v49 = vcombine.low %v9160_v19, %v9167_v42  ;;  %v16166_v50 = vcombine.low %v9174_v4, %v9181_v5 }
 0x7dc   :  { %v6610_v1 = vrot.slane %v17644_v3, %v14559_v7  ;;  %v6918_v54 = vrot.slane %v4924_v12, %v14550_v20  ;;  %v6922_v48 = vrot.slane %v4924_v12, %v14553_v25  ;;  %v6926_v31 = vrot.slane %v4924_v12, %v14556_v56 }
 0x7dd   :  { %10270 = vperm.xlu1 %11024, %v16061_v21   ;;  %v6930_v41 = vrot.slane %v4924_v12, %v14559_v7  ;;  %v6934_v21 = vrot.slane %v4924_v12, %v14562_v34  ;;  %v6938_v40 = vrot.slane %v4924_v12, %v14565_v53  ;;  %v6942_v35 = vrot.slane %v4924_v12, %v14568_v28 }
 0x7de   :  { %v6946_v16 = vrot.slane %v4924_v12, %v14573_v58  ;;  %v6618_v11 = vrot.slane %v17644_v3, %v14565_v53  ;;  %v6622_v37 = vrot.slane %v17644_v3, %v14568_v28  ;;  %v6626_v29 = vrot.slane %v17644_v3, %v14573_v58 }
 0x7df   :  { %v16186_v8 = vcombine.low %v6598_v6, %v6602_v61  ;;  %v6438_v13 = vrot.slane %v17645_v55, %v14550_v20  ;;  %v6442_v19 = vrot.slane %v17645_v55, %v14553_v25  ;;  %v6446_v42 = vrot.slane %v17645_v55, %v14556_v56 }
 0x7e0   :  { %v16195_v4 = vcombine.low %v6606_v22, %v6610_v1  ;;  %v9983_v5 = vcombine.low %v6918_v54, %v6922_v48  ;;  %v9984_v12 = vcombine.low %v6926_v31, %v6930_v41  ;;  %v6450_v23 = vrot.slane %v17645_v55, %v14559_v7 }
 0x7e1   :  { %10276 = vperm.xlu1 %11024, %v16063_v51   ;;  %v6454_v6 = vrot.slane %v17645_v55, %v14562_v34  ;;  %v9985_v61 = vcombine.low %v6934_v21, %v6938_v40  ;;  %v9986_v2 = vcombine.low %v6942_v35, %v6946_v16  ;;  %v6458_v33 = vrot.slane %v17645_v55, %v14565_v53  ;;  %v10250_v35 = vpop.permute.xlu0 %10249 }
 0x7e2   :  { %v6462_v9 = vrot.slane %v17645_v55, %v14568_v28  ;;  %v9993_v14 = vrot.slane %v9983_v5, %v14596_v43  ;;  %v10000_v63 = vrot.slane %v9984_v12, %v14596_v43 }
 0x7e3   :  { %v4922_v51 = vpop.xlane.xlu1 %4921  ;;  %v10014_v17 = vrot.slane %v9986_v2, %v14596_v43 }
 0x7e4   :  { %v6886_v22 = vrot.slane %v4922_v51, %v14550_v20  ;;  %v6890_v1 = vrot.slane %v4922_v51, %v14553_v25  ;;  %v6894_v54 = vrot.slane %v4922_v51, %v14556_v56  ;;  %v6898_v48 = vrot.slane %v4922_v51, %v14559_v7 }
 0x7e5   :  { %10282 = vperm.xlu1 %11024, %v16065_v30   ;;  %v6902_v31 = vrot.slane %v4922_v51, %v14562_v34  ;;  %v6906_v41 = vrot.slane %v4922_v51, %v14565_v53  ;;  %v6910_v21 = vrot.slane %v4922_v51, %v14568_v28  ;;  %v6914_v40 = vrot.slane %v4922_v51, %v14573_v58 }
 0x7e6   :  { %v9934_v16 = vcombine.low %v6886_v22, %v6890_v1  ;;  %v9935_v24 = vcombine.low %v6894_v54, %v6898_v48  ;;  %v10007_v30 = vrot.slane %v9985_v61, %v14596_v43  ;;  %v6466_v22 = vrot.slane %v17645_v55, %v14573_v58  ;;  %v17647_v1 = vld [vmem:[#allocation209_spill] sm:$0xff] }
 0x7e7   :  { %v10247_v62 = vpop.permute.xlu1 %10246  ;;  %v9936_v32 = vcombine.low %v6902_v31, %v6906_v41  ;;  %v9937_v39 = vcombine.low %v6910_v21, %v6914_v40  ;;  %v10519_v5 = vrot.slane %v10250_v35, %v17647_v1  ;;  %v9248_v61 = vcombine.low %v6438_v13, %v6442_v19 }
 0x7e8   :  { %v10514_v10 = vrot.slane %v10247_v62, %v17646_v26  ;;  %v9944_v15 = vrot.slane %v9934_v16, %v14596_v43  ;;  %v9951_v51 = vrot.slane %v9935_v24, %v14596_v43  ;;  %v9249_v48 = vcombine.low %v6446_v42, %v6450_v23 }
 0x7e9   :  { %10288 = vperm.xlu1 %11024, %v16067_v18   ;;  %v9958_v12 = vrot.slane %v9936_v32, %v14596_v43  ;;  %v9965_v54 = vrot.slane %v9937_v39, %v14596_v43  ;;  %v9250_v31 = vcombine.low %v6454_v6, %v6458_v33  ;;  %v10015_v24 = vcombine.low %v9993_v14, %v10000_v63 }
 0x7ea   :  { %v10515_v2 = vsel %vm10417_vm5, %v10514_v10, %v15938_v0  ;;  %v9966_v62 = vcombine.low %v9944_v15, %v9951_v51  ;;  %v10016_v21 = vcombine.low %v10007_v30, %v10014_v17  ;;  %v9251_v18 = vcombine.low %v6462_v9, %v6466_v22 }
 0x7eb   :  { %v9967_v41 = vcombine.low %v9958_v12, %v9965_v54  ;;  %v16230_v55 = vsel %vm10424_vm6, %v10519_v5, %v10515_v2  ;;  %v17648_v32 = vrot.slane %v17644_v3, %v14562_v34  ;;  %v9496_v13 = vcombine.low %v6622_v37, %v6626_v29 }
 0x7ec   :  { %v9974_v40 = vrot.slane %v9966_v62, %v14596_v43  ;;  %v6662_v15 = vrot.slane %v15574_v57, %v14550_v20  ;;  %v6666_v17 = vrot.slane %v15574_v57, %v14553_v25  ;;  %v6670_v0 = vrot.slane %v15574_v57, %v14556_v56 }
 0x7ed   :  { %v9495_v39 = vcombine.low %v17648_v32, %v6618_v11  ;;  %10294 = vperm.xlu1 %11024, %v16116_v47   ;;  %v9981_v10 = vrot.slane %v9967_v41, %v14596_v43  ;;  %v9258_v33 = vrot.slane %v9248_v61, %v14596_v43  ;;  %v9265_v9 = vrot.slane %v9249_v48, %v14596_v43 }
 0x7ee   :  { %v6674_v23 = vrot.slane %v15574_v57, %v14559_v7  ;;  %v6678_v47 = vrot.slane %v15574_v57, %v14562_v34  ;;  %v10023_v63 = vrot.slane %v10015_v24, %v14596_v43  ;;  %v10030_v3 = vrot.slane %v10016_v21, %v14596_v43 }
 0x7ef   :  { %v9982_v14 = vcombine.low %v9974_v40, %v9981_v10  ;;  %v9272_v11 = vrot.slane %v9250_v31, %v14596_v43  ;;  %v9279_v37 = vrot.slane %v9251_v18, %v14596_v43  ;;  %v6682_v29 = vrot.slane %v15574_v57, %v14565_v53 }
 0x7f0   :  { %v6686_v19 = vrot.slane %v15574_v57, %v14568_v28  ;;  %v6690_v42 = vrot.slane %v15574_v57, %v14573_v58  ;;  %v17649_v6 = vrot.slane %v16126_v46, %v14596_v43  ;;  %v17650_v35 = vrot.slane %v16124_v59, %v14596_v43 }
 0x7f1   :  { %10357 = vperm.xlu0 %11023, %v9982_v14   ;;  %10300 = vperm.xlu1 %11024, %v16128_v38   ;;  %v9503_v30 = vrot.slane %v16186_v8, %v14596_v43  ;;  %v9510_v51 = vrot.slane %v16195_v4, %v14596_v43  ;;  %v9190_v22 = vrot.slane %v16164_v49, %v14596_v43 }
 0x7f2   :  { %v9428_v16 = vcombine.low %v17650_v35, %v17649_v6  ;;  %v9197_v57 = vrot.slane %v16166_v50, %v14596_v43  ;;  %v9246_v38 = vrot.slane %v16147_v45, %v14596_v43  ;;  %v9517_v46 = vrot.slane %v9495_v39, %v14596_v43  ;;  %v17654_v35 = vld [vmem:[#allocation312_spill] sm:$0xff] }
 0x7f3   :  { %v10031_v5 = vcombine.low %v10023_v63, %v10030_v3  ;;  %v9280_v59 = vcombine.low %v9258_v33, %v9265_v9  ;;  %v9524_v12 = vrot.slane %v9496_v13, %v14596_v43  ;;  %v9591_v54 = vcombine.low %v6662_v15, %v6666_v17 }
 0x7f4   :  { %v9281_v8 = vcombine.low %v9272_v11, %v9279_v37  ;;  %v9592_v61 = vcombine.low %v6670_v0, %v6674_v23  ;;  %v9593_v2 = vcombine.low %v6678_v47, %v6682_v29  ;;  %v9594_v4 = vcombine.low %v6686_v19, %v6690_v42 }
 0x7f5   :  { %10360 = vperm.xlu0 %11023, %v10031_v5   ;;  %10306 = vperm.xlu1 %11024, %v16139_v52   ;;  %v9435_v49 = vrot.slane %v16155_v36, %v14596_v43  ;;  %v9442_v50 = vrot.slane %v9428_v16, %v14596_v43  ;;  %v9525_v45 = vcombine.low %v9503_v30, %v9510_v51 }
 0x7f6   :  { %v6486_v62 = vrot.slane %v17643_v27, %v14562_v34  ;;  %v6490_v48 = vrot.slane %v17643_v27, %v14565_v53  ;;  %v6494_v31 = vrot.slane %v17643_v27, %v14568_v28  ;;  %v6498_v41 = vrot.slane %v17643_v27, %v14573_v58 }
 0x7f7   :  { %v9198_v24 = vcombine.low %v9190_v22, %v9197_v57  ;;  %v9288_v52 = vrot.slane %v9280_v59, %v14596_v43  ;;  %v9526_v21 = vcombine.low %v9517_v46, %v9524_v12  ;;  %v9601_v36 = vrot.slane %v9591_v54, %v14596_v43 }
 0x7f8   :  { %v9295_v40 = vrot.slane %v9281_v8, %v14596_v43  ;;  %v9608_v18 = vrot.slane %v9592_v61, %v14596_v43  ;;  %v9615_v32 = vrot.slane %v9593_v2, %v14596_v43  ;;  %v9622_v39 = vrot.slane %v9594_v4, %v14596_v43  ;;  %v17655_v8 = vld [vmem:[#allocation339_spill] sm:$0xff] }
 0x7f9   :  { %10309 = vperm.xlu1 %11024, %v9198_v24   ;;  %v17651_v13 = vrot.slane %v16122_v60, %v14596_v43  ;;  %v9443_v15 = vcombine.low %v9435_v49, %v9442_v50  ;;  %v9533_v17 = vrot.slane %v9525_v45, %v14596_v43  ;;  %v17652_v0 = vrot.slane %v17643_v27, %v14553_v25 }
 0x7fa   :  { %v17653_v33 = vrot.slane %v17643_v27, %v14550_v20  ;;  %v6726_v23 = vrot.slane %v15664_v44, %v14550_v20  ;;  %v6730_v47 = vrot.slane %v15664_v44, %v14553_v25  ;;  %v6734_v60 = vrot.slane %v15664_v44, %v14556_v56 }
 0x7fb   :  { %v9247_v10 = vcombine.low %v17651_v13, %v9246_v38  ;;  %v6738_v14 = vrot.slane %v15664_v44, %v14559_v7  ;;  %v6742_v63 = vrot.slane %v15664_v44, %v14562_v34  ;;  %v6746_v3 = vrot.slane %v15664_v44, %v14565_v53 }
 0x7fc   :  { %v16307_v9 = vcombine.low %v17653_v33, %v17652_v0  ;;  %v6750_v11 = vrot.slane %v15664_v44, %v14568_v28  ;;  %v6754_v37 = vrot.slane %v15664_v44, %v14573_v58  ;;  %v9296_v29 = vcombine.low %v9288_v52, %v9295_v40 }
 0x7fd   :  { %v9540_v19 = vrot.slane %v9526_v21, %v14596_v43  ;;  %v9623_v42 = vcombine.low %v9601_v36, %v9608_v18  ;;  %v9624_v6 = vcombine.low %v9615_v32, %v9622_v39  ;;  %10312 = vperm.xlu1 %11024, %v9247_v10   ;;  %v6790_v16 = vrot.slane %v17654_v35, %v14550_v20 }
 0x7fe   :  { %v6794_v30 = vrot.slane %v17654_v35, %v14553_v25  ;;  %v6798_v51 = vrot.slane %v17654_v35, %v14556_v56  ;;  %v6802_v22 = vrot.slane %v17654_v35, %v14559_v7  ;;  %v6806_v44 = vrot.slane %v17654_v35, %v14562_v34 }
 0x7ff   :  { %v6810_v57 = vrot.slane %v17654_v35, %v14565_v53  ;;  %v6814_v38 = vrot.slane %v17654_v35, %v14568_v28  ;;  %v6818_v46 = vrot.slane %v17654_v35, %v14573_v58  ;;  %v9689_v5 = vcombine.low %v6726_v23, %v6730_v47 }
 0x800   :  { %v9690_v59 = vcombine.low %v6734_v60, %v6738_v14  ;;  %v9691_v12 = vcombine.low %v6742_v63, %v6746_v3  ;;  %v9692_v54 = vcombine.low %v6750_v11, %v6754_v37  ;;  %v6502_v61 = vrot.slane %v17655_v8, %v14550_v20 }
 0x801   :  { %v6506_v2 = vrot.slane %v17655_v8, %v14553_v25  ;;  %v6510_v4 = vrot.slane %v17655_v8, %v14556_v56  ;;  %v6514_v49 = vrot.slane %v17655_v8, %v14559_v7  ;;  %10315 = vperm.xlu1 %11024, %v9296_v29   ;;  %v6518_v50 = vrot.slane %v17655_v8, %v14562_v34 }
 0x802   :  { %v6522_v45 = vrot.slane %v17655_v8, %v14565_v53  ;;  %v6526_v24 = vrot.slane %v17655_v8, %v14568_v28  ;;  %v6530_v52 = vrot.slane %v17655_v8, %v14573_v58  ;;  %v9787_v21 = vcombine.low %v6790_v16, %v6794_v30 }
 0x803   :  { %v9788_v36 = vcombine.low %v6798_v51, %v6802_v22  ;;  %v9789_v40 = vcombine.low %v6806_v44, %v6810_v57  ;;  %v9790_v18 = vcombine.low %v6814_v38, %v6818_v46  ;;  %v9699_v32 = vrot.slane %v9689_v5, %v14596_v43 }
 0x804   :  { %v9706_v39 = vrot.slane %v9690_v59, %v14596_v43  ;;  %v9713_v13 = vrot.slane %v9691_v12, %v14596_v43  ;;  %v9720_v10 = vrot.slane %v9692_v54, %v14596_v43  ;;  %v9541_v0 = vcombine.low %v9533_v17, %v9540_v19 }
 0x805   :  { %v17656_v33 = vrot.slane %v17643_v27, %v14559_v7  ;;  %v17657_v23 = vrot.slane %v17643_v27, %v14556_v56  ;;  %v9299_v60 = vcombine.low %v6486_v62, %v6490_v48  ;;  %v9300_v14 = vcombine.low %v6494_v31, %v6498_v41  ;;  %10324 = vperm.xlu1 %11024, %v9443_v15  }
 0x806   :  { %v9346_v63 = vcombine.low %v6502_v61, %v6506_v2  ;;  %v9347_v3 = vcombine.low %v6510_v4, %v6514_v49  ;;  %v9348_v11 = vcombine.low %v6518_v50, %v6522_v45  ;;  %v9349_v37 = vcombine.low %v6526_v24, %v6530_v52  ;;  %v4928_v4 = vpop.xlane.xlu0 %4927 }
 0x807   :  { %v9298_v47 = vcombine.low %v17657_v23, %v17656_v33  ;;  %v9797_v29 = vrot.slane %v9787_v21, %v14596_v43  ;;  %v9804_v35 = vrot.slane %v9788_v36, %v14596_v43  ;;  %v9811_v17 = vrot.slane %v9789_v40, %v14596_v43 }
 0x808   :  { %v9818_v19 = vrot.slane %v9790_v18, %v14596_v43  ;;  %v9631_v16 = vrot.slane %v9623_v42, %v14596_v43  ;;  %v9638_v27 = vrot.slane %v9624_v6, %v14596_v43  ;;  %v9721_v30 = vcombine.low %v9699_v32, %v9706_v39 }
 0x809   :  { %v9722_v62 = vcombine.low %v9713_v13, %v9720_v10  ;;  %v9307_v48 = vrot.slane %v16307_v9, %v14596_v43  ;;  %v9314_v31 = vrot.slane %v9298_v47, %v14596_v43  ;;  %10330 = vperm.xlu1 %11024, %v9541_v0   ;;  %v9321_v41 = vrot.slane %v9299_v60, %v14596_v43 }
 0x80a   :  { %v9328_v15 = vrot.slane %v9300_v14, %v14596_v43  ;;  %v9356_v51 = vrot.slane %v9346_v63, %v14596_v43  ;;  %v9363_v22 = vrot.slane %v9347_v3, %v14596_v43  ;;  %v9819_v44 = vcombine.low %v9797_v29, %v9804_v35 }
 0x80b   :  { %v9820_v42 = vcombine.low %v9811_v17, %v9818_v19  ;;  %v9370_v6 = vrot.slane %v9348_v11, %v14596_v43  ;;  %v9377_v57 = vrot.slane %v9349_v37, %v14596_v43  ;;  %v9639_v38 = vcombine.low %v9631_v16, %v9638_v27  ;;  %v10256_v27 = vpop.permute.xlu0 %10255 }
 0x80c   :  { %v9729_v9 = vrot.slane %v9721_v30, %v14596_v43  ;;  %v9736_v46 = vrot.slane %v9722_v62, %v14596_v43  ;;  %v9329_v5 = vcombine.low %v9307_v48, %v9314_v31  ;;  %v9330_v59 = vcombine.low %v9321_v41, %v9328_v15 }
 0x80d   :  { %10336 = vperm.xlu1 %11024, %v9639_v38   ;;  %v9827_v12 = vrot.slane %v9819_v44, %v14596_v43  ;;  %v9834_v54 = vrot.slane %v9820_v42, %v14596_v43  ;;  %v9378_v8 = vcombine.low %v9356_v51, %v9363_v22  ;;  %v9379_v61 = vcombine.low %v9370_v6, %v9377_v57  ;;  %v17658_v42 = vld [vmem:[#allocation300_spill] sm:$0xff] }
 0x80e   :  { %v9737_v2 = vcombine.low %v9729_v9, %v9736_v46  ;;  %v9337_v49 = vrot.slane %v9329_v5, %v14596_v43  ;;  %v9344_v45 = vrot.slane %v9330_v59, %v14596_v43  ;;  %v6982_v21 = vrot.slane %v4928_v4, %v14550_v20  ;;  %v17659_v9 = vld [vmem:[#allocation213_spill] sm:$0xff] }
 0x80f   :  { %v9835_v50 = vcombine.low %v9827_v12, %v9834_v54  ;;  %v9386_v24 = vrot.slane %v9378_v8, %v14596_v43  ;;  %v9393_v52 = vrot.slane %v9379_v61, %v14596_v43  ;;  %v6986_v36 = vrot.slane %v4928_v4, %v14553_v25 }
 0x810   :  { %v6990_v40 = vrot.slane %v4928_v4, %v14556_v56  ;;  %v6994_v18 = vrot.slane %v4928_v4, %v14559_v7  ;;  %v6998_v32 = vrot.slane %v4928_v4, %v14562_v34  ;;  %v7002_v39 = vrot.slane %v4928_v4, %v14565_v53 }
 0x811   :  { %10342 = vperm.xlu1 %11024, %v9737_v2   ;;  %v7006_v13 = vrot.slane %v4928_v4, %v14568_v28  ;;  %v7010_v10 = vrot.slane %v4928_v4, %v14573_v58  ;;  %v9345_v0 = vcombine.low %v9337_v49, %v9344_v45  ;;  %v10081_v33 = vcombine.low %v6982_v21, %v6986_v36  ;;  %v10262_v36 = vpop.permute.xlu0 %10261 }
 0x812   :  { %v10082_v23 = vcombine.low %v6990_v40, %v6994_v18  ;;  %v9394_v60 = vcombine.low %v9386_v24, %v9393_v52  ;;  %v10083_v14 = vcombine.low %v6998_v32, %v7002_v39  ;;  %v10529_v46 = vrot.slane %v10256_v27, %v17659_v9 }
 0x813   :  { %v10084_v63 = vcombine.low %v7006_v13, %v7010_v10  ;;  %v10091_v48 = vrot.slane %v10081_v33, %v14596_v43 }
 0x814   :  { %v10098_v31 = vrot.slane %v10082_v23, %v14596_v43  ;;  %v10105_v22 = vrot.slane %v10083_v14, %v14596_v43 }
 0x815   :  { %10348 = vperm.xlu1 %11024, %v9835_v50   ;;  %v10112_v44 = vrot.slane %v10084_v63, %v14596_v43 }
 0x816   :  { %v10113_v61 = vcombine.low %v10091_v48, %v10098_v31 }
 0x817   :  { %v10114_v2 = vcombine.low %v10105_v22, %v10112_v44  ;;  %v17664_v44 = vld [vmem:[#allocation306_spill] sm:$0xff] }
 0x818   :  { %v4926_v47 = vpop.xlane.xlu1 %4925  ;;  %v10121_v24 = vrot.slane %v10113_v61, %v14596_v43 }
 0x819   :  { %10318 = vperm.xlu1 %11024, %v9345_v0   ;;  %v6950_v3 = vrot.slane %v4926_v47, %v14550_v20  ;;  %v6954_v11 = vrot.slane %v4926_v47, %v14553_v25  ;;  %v6958_v37 = vrot.slane %v4926_v47, %v14556_v56  ;;  %v6962_v29 = vrot.slane %v4926_v47, %v14559_v7 }
 0x81a   :  { %v6966_v35 = vrot.slane %v4926_v47, %v14562_v34  ;;  %v6970_v17 = vrot.slane %v4926_v47, %v14565_v53  ;;  %v6974_v19 = vrot.slane %v4926_v47, %v14568_v28  ;;  %v6978_v16 = vrot.slane %v4926_v47, %v14573_v58 }
 0x81b   :  { %v10032_v30 = vcombine.low %v6950_v3, %v6954_v11  ;;  %v10033_v62 = vcombine.low %v6958_v37, %v6962_v29  ;;  %v10128_v52 = vrot.slane %v10114_v2, %v14596_v43  ;;  %v17660_v3 = vld [vmem:[#allocation304_spill] sm:$0xff]  ;;  %v17661_v11 = vld [vmem:[#allocation211_spill] sm:$0xff] }
 0x81c   :  { %v10253_v41 = vpop.permute.xlu1 %10252  ;;  %v10034_v15 = vcombine.low %v6966_v35, %v6970_v17  ;;  %v10035_v51 = vcombine.low %v6974_v19, %v6978_v16  ;;  %v17662_v19 = vld [vmem:[#allocation342_spill] sm:$0xff] }
 0x81d   :  { %v10524_v6 = vrot.slane %v10253_v41, %v17658_v42  ;;  %10321 = vperm.xlu1 %11024, %v9394_v60   ;;  %v10042_v57 = vrot.slane %v10032_v30, %v14596_v43  ;;  %v10049_v38 = vrot.slane %v10033_v62, %v14596_v43  ;;  %v10129_v21 = vcombine.low %v10121_v24, %v10128_v52  ;;  %v17663_v30 = vld [vmem:[#allocation308_spill] sm:$0xff] }
 0x81e   :  { %v10056_v5 = vrot.slane %v10034_v15, %v14596_v43  ;;  %v10063_v59 = vrot.slane %v10035_v51, %v14596_v43 }
 0x81f   :  { %v10525_v12 = vsel %vm10431_vm7, %v10524_v6, %v16230_v55  ;;  %v10064_v54 = vcombine.low %v10042_v57, %v10049_v38  ;;  %v17665_v57 = vld [vmem:[#allocation217_spill] sm:$0xff] }
 0x820   :  { %v10065_v8 = vcombine.low %v10056_v5, %v10063_v59  ;;  %v10530_v4 = vsel %vm10438_vm8, %v10529_v46, %v10525_v12  ;;  %v17666_v59 = vld [vmem:[#allocation345_spill] sm:$0xff] }
 0x821   :  { %v10072_v49 = vrot.slane %v10064_v54, %v14596_v43 }
 0x822   :  { %v10079_v50 = vrot.slane %v10065_v8, %v14596_v43 }
 0x824   :  { %v10080_v45 = vcombine.low %v10072_v49, %v10079_v50 }
 0x826   :  { %10363 = vperm.xlu0 %11023, %v10080_v45  }
 0x82a   :  { %10366 = vperm.xlu0 %11023, %v10129_v21  }
 0x84d   :  { %v4930_v55 = vpop.xlane.xlu1 %4929 }
 0x84e   :  { %v7014_v40 = vrot.slane %v4930_v55, %v14550_v20  ;;  %v7018_v18 = vrot.slane %v4930_v55, %v14553_v25  ;;  %v7022_v32 = vrot.slane %v4930_v55, %v14556_v56  ;;  %v7026_v39 = vrot.slane %v4930_v55, %v14559_v7  ;;  %v10268_v20 = vpop.permute.xlu0 %10267 }
 0x84f   :  { %v7030_v13 = vrot.slane %v4930_v55, %v14562_v34  ;;  %v7034_v10 = vrot.slane %v4930_v55, %v14565_v53  ;;  %v7038_v0 = vrot.slane %v4930_v55, %v14568_v28  ;;  %v7042_v33 = vrot.slane %v4930_v55, %v14573_v58 }
 0x850   :  { %v10130_v23 = vcombine.low %v7014_v40, %v7018_v18  ;;  %v10131_v47 = vcombine.low %v7022_v32, %v7026_v39  ;;  %v10539_v34 = vrot.slane %v10262_v36, %v17661_v11  ;;  %v10549_v62 = vrot.slane %v10268_v20, %v17663_v30  ;;  %v17669_v20 = vld [vmem:[#allocation205_spill] sm:$0xff] }
 0x851   :  { %v10259_v60 = vpop.permute.xlu1 %10258  ;;  %v10132_v14 = vcombine.low %v7030_v13, %v7034_v10  ;;  %v10133_v63 = vcombine.low %v7038_v0, %v7042_v33 }
 0x852   :  { %v10534_v25 = vrot.slane %v10259_v60, %v17660_v3  ;;  %v10140_v56 = vrot.slane %v10130_v23, %v14596_v43  ;;  %v10147_v7 = vrot.slane %v10131_v47, %v14596_v43  ;;  %v10274_v31 = vpop.permute.xlu0 %10273  ;;  %v17667_v47 = vld [vmem:[#allocation282_spill] sm:$0xff] }
 0x853   :  { %v10154_v53 = vrot.slane %v10132_v14, %v14596_v43  ;;  %v10161_v28 = vrot.slane %v10133_v63, %v14596_v43  ;;  %v10559_v38 = vrot.slane %v10274_v31, %v17665_v57  ;;  %v17668_v14 = vld [vmem:[#allocation331_spill] sm:$0xff] }
 0x854   :  { %v10535_v58 = vsel %vm10445_vm9, %v10534_v25, %v10530_v4  ;;  %v10162_v37 = vcombine.low %v10140_v56, %v10147_v7 }
 0x855   :  { %v10540_v29 = vsel %vm10452_vm10, %v10539_v34, %v10535_v58  ;;  %v10265_v35 = vpop.permute.xlu1 %10264  ;;  %v10163_v17 = vcombine.low %v10154_v53, %v10161_v28  ;;  %v17670_v28 = vld [vmem:[#allocation203_spill] sm:$0xff] }
 0x856   :  { %v10544_v16 = vrot.slane %v10265_v35, %v17662_v19  ;;  %v10170_v27 = vrot.slane %v10162_v37, %v14596_v43  ;;  %v10280_v2 = vpop.permute.xlu0 %10279  ;;  %v17671_v37 = vld [vmem:[#allocation288_spill] sm:$0xff] }
 0x857   :  { %v10177_v48 = vrot.slane %v10163_v17, %v14596_v43 }
 0x858   :  { %v10545_v41 = vsel %vm10459_vm11, %v10544_v16, %v10540_v29  ;;  %v10568_v16 = vrot.slane %v10280_v2, %v17669_v20 }
 0x859   :  { %v10550_v15 = vsel %vm10466_vm12, %v10549_v62, %v10545_v41  ;;  %v10271_v51 = vpop.permute.xlu1 %10270  ;;  %v10178_v22 = vcombine.low %v10170_v27, %v10177_v48  ;;  %v17672_v41 = vld [vmem:[#allocation286_spill] sm:$0xff] }
 0x85a   :  { %v10554_v6 = vrot.slane %v10271_v51, %v17664_v44  ;;  %v10286_v49 = vpop.permute.xlu0 %10285 }
 0x85b   :  { %10369 = vperm.xlu0 %11023, %v10178_v22  }
 0x85c   :  { %v10555_v46 = vsel %vm10473_vm13, %v10554_v6, %v10550_v15 }
 0x85d   :  { %v16450_v5 = vsel %vm10480_vm14, %v10559_v38, %v10555_v46  ;;  %v10277_v54 = vpop.permute.xlu1 %10276  ;;  %v10578_v46 = vrot.slane %v10286_v49, %v17671_v37 }
 0x85e   :  { %v10719_v12 = vcombine.low %v17666_v59, %v16450_v5  ;;  %v10292_v45 = vpop.permute.xlu0 %10291  ;;  %v10564_v35 = vrot.slane %v10277_v54, %v17667_v47 }
 0x860   :  { %v10569_v51 = vsel %vm10382_vm0, %v10568_v16, %v10564_v35 }
 0x861   :  { %v10283_v8 = vpop.permute.xlu1 %10282 }
 0x862   :  { %v10298_v52 = vpop.permute.xlu0 %10297  ;;  %v10573_v17 = vrot.slane %v10283_v8, %v17668_v14 }
 0x864   :  { %v10574_v6 = vsel %vm10389_vm1, %v10573_v17, %v10569_v51 }
 0x865   :  { %v10289_v61 = vpop.permute.xlu1 %10288 }
 0x866   :  { %v16458_v36 = vpop.permute.xlu0 %10303  ;;  %v10583_v38 = vrot.slane %v10289_v61, %v17670_v28 }
 0x869   :  { %v10295_v4 = vpop.permute.xlu1 %10294 }
 0x86a   :  { %v10328_v40 = vpop.permute.xlu0 %10327 }
 0x86b   :  { %v10647_v25 = vrot.slane %v10328_v40, %v17669_v20 }
 0x86d   :  { %v10301_v50 = vpop.permute.xlu1 %10300 }
 0x86e   :  { %v10334_v32 = vpop.permute.xlu0 %10333 }
 0x86f   :  { %v10657_v29 = vrot.slane %v10334_v32, %v17671_v37  ;;  %v10579_v32 = vsel %vm10396_vm2, %v10578_v46, %v10574_v6 }
 0x871   :  { %v16454_v24 = vpop.permute.xlu1 %10306 }
 0x872   :  { %v10340_v13 = vpop.permute.xlu0 %10339 }
 0x873   :  { %v10667_v15 = vrot.slane %v10340_v13, %v17672_v41  ;;  %v10584_v13 = vsel %vm10403_vm3, %v10583_v38, %v10579_v32 }
 0x875   :  { %v16456_v21 = vpop.permute.xlu1 %10309 }
 0x876   :  { %v10346_v0 = vpop.permute.xlu0 %10345 }
 0x877   :  { %v10677_v40 = vrot.slane %v10346_v0, %v17647_v1 }
 0x879   :  { %v16460_v55 = vpop.permute.xlu1 %10312 }
 0x87a   :  { %v10352_v33 = vpop.permute.xlu0 %10351 }
 0x87d   :  { %v16462_v18 = vpop.permute.xlu1 %10315 }
 0x87e   :  { %v10355_v56 = vpop.permute.xlu0 %10354 }
 0x881   :  { %v10325_v39 = vpop.permute.xlu1 %10324 }
 0x882   :  { %v10643_v60 = vrot.slane %v10325_v39, %v17667_v47  ;;  %v10358_v27 = vpop.permute.xlu0 %10357  ;;  %v10687_v47 = vrot.slane %v10352_v33, %v17659_v9  ;;  %v10613_v33 = vrot.slane %v16454_v24, %v17660_v3 }
 0x884   :  { %v10648_v7 = vsel %vm10382_vm0, %v10647_v25, %v10643_v60  ;;  %v10598_v25 = vrot.slane %v10298_v52, %v17647_v1  ;;  %v10618_v1 = vrot.slane %v16456_v21, %v17661_v11  ;;  %v10623_v52 = vrot.slane %v16460_v55, %v17662_v19 }
 0x885   :  { %v10331_v10 = vpop.permute.xlu1 %10330 }
 0x886   :  { %v10652_v63 = vrot.slane %v10331_v10, %v17668_v14  ;;  %v10361_v39 = vpop.permute.xlu0 %10360  ;;  %v10593_v10 = vrot.slane %v10295_v4, %v17646_v26  ;;  %v10692_v4 = vrot.slane %v10355_v56, %v17660_v3  ;;  %v10628_v3 = vrot.slane %v16462_v18, %v17663_v30 }
 0x888   :  { %v10653_v53 = vsel %vm10389_vm1, %v10652_v63, %v10648_v7  ;;  %v10603_v63 = vrot.slane %v10301_v50, %v17658_v42 }
 0x889   :  { %v10337_v23 = vpop.permute.xlu1 %10336  ;;  %v10658_v62 = vsel %vm10396_vm2, %v10657_v29, %v10653_v53  ;;  %v10608_v53 = vrot.slane %v16458_v36, %v17659_v9  ;;  %v10702_v9 = vrot.slane %v10361_v39, %v17662_v19 }
 0x88a   :  { %v10662_v58 = vrot.slane %v10337_v23, %v17670_v28  ;;  %v10588_v23 = vrot.slane %v10292_v45, %v17672_v41  ;;  %v10727_v41 = vrot.slane %v10719_v12, %v14596_v43 }
 0x88c   :  { %v10663_v48 = vsel %vm10403_vm3, %v10662_v58, %v10658_v62  ;;  %v10589_v60 = vsel %vm10410_vm4, %v10588_v23, %v10584_v13 }
 0x88d   :  { %v10343_v34 = vpop.permute.xlu1 %10342  ;;  %v10668_v54 = vsel %vm10410_vm4, %v10667_v15, %v10663_v48  ;;  %v10594_v0 = vsel %vm10417_vm5, %v10593_v10, %v10589_v60 }
 0x88e   :  { %v10672_v31 = vrot.slane %v10343_v34, %v17646_v26  ;;  %v10599_v45 = vsel %vm10424_vm6, %v10598_v25, %v10594_v0 }
 0x88f   :  { %v10604_v7 = vsel %vm10431_vm7, %v10603_v63, %v10599_v45 }
 0x890   :  { %v10673_v8 = vsel %vm10417_vm5, %v10672_v31, %v10668_v54  ;;  %v10609_v28 = vsel %vm10438_vm8, %v10608_v53, %v10604_v7 }
 0x891   :  { %v10349_v22 = vpop.permute.xlu1 %10348  ;;  %v10678_v61 = vsel %vm10424_vm6, %v10677_v40, %v10673_v8  ;;  %v10614_v36 = vsel %vm10445_vm9, %v10613_v33, %v10609_v28 }
 0x892   :  { %v10682_v2 = vrot.slane %v10349_v22, %v17658_v42  ;;  %v10697_v42 = vrot.slane %v10358_v27, %v17661_v11  ;;  %v10619_v55 = vsel %vm10452_vm10, %v10618_v1, %v10614_v36 }
 0x893   :  { %v10624_v29 = vsel %vm10459_vm11, %v10623_v52, %v10619_v55 }
 0x894   :  { %v10683_v49 = vsel %vm10431_vm7, %v10682_v2, %v10678_v61  ;;  %v10629_v17 = vsel %vm10466_vm12, %v10628_v3, %v10624_v29 }
 0x895   :  { %v10319_v20 = vpop.permute.xlu1 %10318  ;;  %v10688_v26 = vsel %vm10438_vm8, %v10687_v47, %v10683_v49 }
 0x896   :  { %v10693_v34 = vsel %vm10445_vm9, %v10692_v4, %v10688_v26  ;;  %v10633_v11 = vrot.slane %v10319_v20, %v17664_v44 }
 0x897   :  { %v10698_v24 = vsel %vm10452_vm10, %v10697_v42, %v10693_v34 }
 0x898   :  { %v10703_v18 = vsel %vm10459_vm11, %v10702_v9, %v10698_v24  ;;  %v10634_v16 = vsel %vm10473_vm13, %v10633_v11, %v10629_v17 }
 0x899   :  { %v10322_v56 = vpop.permute.xlu1 %10321 }
 0x89a   :  { %v10638_v37 = vrot.slane %v10322_v56, %v17665_v57 }
 0x8a1   :  { %v10364_v14 = vpop.permute.xlu0 %10363 }
 0x8a2   :  { %v10707_v58 = vrot.slane %v10364_v14, %v17663_v30 }
 0x8a4   :  { %v10708_v30 = vsel %vm10466_vm12, %v10707_v58, %v10703_v18 }
 0x8a5   :  { %v10367_v50 = vpop.permute.xlu0 %10366 }
 0x8a6   :  { %v10712_v21 = vrot.slane %v10367_v50, %v17664_v44  ;;  %v10639_v44 = vsel %vm10480_vm14, %v10638_v37, %v10634_v16 }
 0x8a8   :  { %v10713_v27 = vsel %vm10473_vm13, %v10712_v21, %v10708_v30 }
 0x8d6   :  { %v10370_v35 = vpop.permute.xlu0 %10369 }
 0x8d7   :  { %v10717_v19 = vrot.slane %v10370_v35, %v17665_v57  ;;  %v17673_v57 = vlaneseq }
 0x8d9   :  { %v10718_v62 = vsel %vm10480_vm14, %v10717_v19, %v10713_v27  ;;  %vm10746_vm15 = vcmp.lt.s32.totalorder %v17673_v57, 512 }
 0x8da   :  { %v10720_v48 = vcombine.low %v10639_v44, %v10718_v62 }
 0x8dc   :  { %v10734_v31 = vrot.slane %v10720_v48, %v14596_v43 }
 0x8de   :  { %v10735_v15 = vcombine.low %v10727_v41, %v10734_v31 }
 0x8e0   :  { %v10742_v51 = vrot.slane %v10735_v15, %v14596_v43 }
 0x8e2   :  { %10748 = vst.msk [vmem:[#allocation13] sm:$0xf] %vm10746_vm15, %v10742_v51 }
 0x8e3   :  { %11284 = shalt.err (!%p11281_p6)
}
 0x8e4   :  { %10758 = dma.vmem_to_hbm [thread:$0]  %s10756_s5, 64, %s16547_s6, [#allocation4]  }
 0x8e5   :  { %11301 = dma.done.wait [#allocation4], 64  }
 0x8e6   :  { %11302 = vsyncadd [#allocation4], 4294967232 }
 0x8e7   :  { %10762 = vsyncpa [#allocation3], 1 }
 0x8e8   :  { %10763 = vsyncpa [#allocation6], 1 }
 0x8e9   :  { %10764 = vsyncpa [#allocation9], 1 }
 0x8ea   :  { %10765 = vsyncpa [#allocation12], 1 }
 0x8eb   :  { %10766 = vsyncpa [#allocation4], 1 }

</bundles_post_ra>
